<compile_context>
chip_gen: v5e
topology: v5e:2x2
jax: 0.10.0
libtpu: 0.0.40
codegen_flags: <defaults>
</compile_context>

<pallas_src>
import numpy as np
import jax
import jax.numpy as jnp
from jax.experimental import pallas as pl
from jax.experimental.pallas import tpu as pltpu


# ---------------------------------------------------------------------------
# Interpolation matrices (exact PyTorch semantics, built on host in float64)
# ---------------------------------------------------------------------------
def bilinear_matrix(s_out, s_in):
    """F.interpolate(mode='bilinear', align_corners=False) as (s_out, s_in)."""
    W = np.zeros((s_out, s_in), np.float64)
    scale = s_in / s_out
    for i in range(s_out):
        src = (i + 0.5) * scale - 0.5
        if src < 0.0:            # PyTorch clamps negative source coords (non-cubic)
            src = 0.0
        i0 = min(int(np.floor(src)), s_in - 1)
        i1 = min(i0 + 1, s_in - 1)
        l1 = src - i0
        W[i, i0] += 1.0 - l1
        W[i, i1] += l1
    return W


def bicubic_matrix(s_out, s_in, A=-0.75):
    """F.interpolate(mode='bicubic', align_corners=False, antialias=False)."""
    def cc1(x):  # |x| in [0,1]
        return ((A + 2.0) * x - (A + 3.0)) * x * x + 1.0

    def cc2(x):  # |x| in [1,2]
        return ((A * x - 5.0 * A) * x + 8.0 * A) * x - 4.0 * A

    W = np.zeros((s_out, s_in), np.float64)
    scale = s_in / s_out
    for i in range(s_out):
        src = (i + 0.5) * scale - 0.5          # cubic path: no clamp of src
        i0 = int(np.floor(src))
        t = src - i0
        coeffs = [cc2(t + 1.0), cc1(t), cc1(1.0 - t), cc2(2.0 - t)]
        for k in range(4):
            j = min(max(i0 - 1 + k, 0), s_in - 1)   # clamped reads at borders
            W[i, j] += coeffs[k]
    return W


def _resample_operators(spats):
    """Per block: K_k^T = (M_k (x) M_k)^T with shape (S_k^2, 49), float64."""
    Wc = bicubic_matrix(7, 56)
    ops = []
    for i, s in enumerate(spats):
        if i == 0:
            assert s == 56, "x_2 must already be 56x56 (as in the PyTorch module)"
            M = Wc                               # x_2: bicubic only
        else:
            M = Wc @ bilinear_matrix(56, s)      # bilinear up to 56, bicubic down to 7
        ops.append(np.ascontiguousarray(np.kron(M, M).T))
    return ops


# ---------------------------------------------------------------------------
# Fused Pallas kernel: resample (Kronecker-folded) + 1x1 conv + bias + residual
# ---------------------------------------------------------------------------
def _make_rfd_kernel(compute_dtype, chan_ranges):
    def kernel(x2_ref, x3_ref, x4_ref, x5_ref,
               k2_ref, k3_ref, k4_ref, k5_ref,
               w_ref, b_ref, id_ref, age_ref,
               o_ref, cat_ref):
        # 1) Folded bilinear-up + bicubic-down per block, written into the
        #    (960, 49) bf16 VMEM concat scratch at static sublane offsets.
        for (x_ref, k_ref), (lo, hi) in zip(
                ((x2_ref, k2_ref), (x3_ref, k3_ref),
                 (x4_ref, k4_ref), (x5_ref, k5_ref)),
                chan_ranges):
            # in-kernel VPU cast f32 -> bf16 (activations arrive as f32 from HBM)
            t = jnp.dot(x_ref[0].astype(compute_dtype), k_ref[...],
                        preferred_element_type=jnp.float32)
            cat_ref[lo:hi, :] = t.astype(compute_dtype)

        # 2) Single fused 1x1-conv matmul: (512, 960) @ (960, 49) -> (512, 49) f32.
        out = jnp.dot(w_ref[...], cat_ref[...],
                      preferred_element_type=jnp.float32)

        # 3) Epilogue (short accumulator live range): + bias - (x_id + x_age).
        o_ref[0] = (out + b_ref[...] - (id_ref[0] + age_ref[0])).astype(o_ref.dtype)
    return kernel


def _rfd_pallas(x2, x3, x4, x5, x_id, x_age, w, b2, kops, compute_dtype):
    xs_in = (x2, x3, x4, x5)
    B = x2.shape[0]
    chans = tuple(int(x.shape[1]) for x in xs_in)          # (64, 128, 256, 512)
    spats = tuple(int(x.shape[2]) for x in xs_in)          # (56, 28, 14, 7)
    cout, cin = int(w.shape[0]), int(w.shape[1])
    P = 49                                                  # 7 * 7 output pixels
    assert sum(chans) == cin

    offs = np.concatenate(([0], np.cumsum(chans)))
    chan_ranges = tuple((int(offs[k]), int(offs[k + 1])) for k in range(4))

    # NCHW-native flattening: (B, C, S, S) -> (B, C, S*S) is a free reshape; stays f32.
    xs = [x.reshape(B, c, s * s) for x, c, s in zip(xs_in, chans, spats)]
    idf = x_id.reshape(B, cout, P)
    agef = x_age.reshape(B, cout, P)

    # Advisory cost for XLA scheduling around this tiny custom call.
    flops = 2 * B * (sum(c * s * s * P for c, s in zip(chans, spats)) + cout * cin * P)
    bytes_accessed = (4 * B * sum(c * s * s for c, s in zip(chans, spats))   # acts f32
                      + 2 * sum(s * s * P for s in spats)                    # K ops bf16
                      + 2 * cout * cin + 4 * cout                            # weight+bias
                      + 4 * B * cout * P * 3)                                # id, age, out
    cost = pl.CostEstimate(flops=flops, transcendentals=0,
                           bytes_accessed=bytes_accessed)

    in_specs = (
        # per-batch activation blocks (pipelined over the grid), f32
        [pl.BlockSpec((1, c, s * s), lambda b: (b, 0, 0))
         for c, s in zip(chans, spats)]
        # Kronecker resampling operators: resident across the whole grid
        + [pl.BlockSpec((s * s, P), lambda b: (0, 0)) for s in spats]
        + [pl.BlockSpec((cout, cin), lambda b: (0, 0)),        # full conv weight
           pl.BlockSpec((cout, 1), lambda b: (0, 0)),          # bias (resident)
           pl.BlockSpec((1, cout, P), lambda b: (b, 0, 0)),    # x_id
           pl.BlockSpec((1, cout, P), lambda b: (b, 0, 0))]    # x_age
    )

    out = pl.pallas_call(
        _make_rfd_kernel(compute_dtype, chan_ranges),
        out_shape=jax.ShapeDtypeStruct((B, cout, P), jnp.float32),
        grid=(B,),
        in_specs=in_specs,
        out_specs=pl.BlockSpec((1, cout, P), lambda b: (b, 0, 0)),
        scratch_shapes=[pltpu.VMEM((cin, P), compute_dtype)],   # (960, 49) concat buf
        compiler_params=pltpu.CompilerParams(
            dimension_semantics=("parallel",),          # shard batch over v7x's 2 TCs
            vmem_limit_bytes=32 * 1024 * 1024),
        cost_estimate=cost,
    )(*xs, *kops, w, b2, idf, agef)

    return out.reshape(B, cout, 7, 7)                   # NCHW, free reshape


def make_rfd(weight, bias, spats=(56, 28, 14, 7), compute_dtype=jnp.bfloat16):
    """Prepare constants ONCE (weight reshape+cast, bias, Kronecker operators) and
    return a jitted forward that only launches the fused pallas_call per step."""
    cout = int(weight.shape[0])
    cin = int(weight.shape[1])
    w_prep = jnp.asarray(weight).reshape(cout, cin).astype(compute_dtype)
    b_prep = jnp.asarray(bias).reshape(cout, 1).astype(jnp.float32)
    kops = tuple(jnp.asarray(K, compute_dtype) for K in _resample_operators(spats))

    @jax.jit
    def forward(x2, x3, x4, x5, x_id, x_age):
        return _rfd_pallas(x2, x3, x4, x5, x_id, x_age,
                           w_prep, b_prep, kops, compute_dtype)

    return forward


# ---------------------------------------------------------------------------
# Pure-XLA f32 reference of the same folded-operator math (for a sanity check)
# ---------------------------------------------------------------------------
def _reference_forward(x2, x3, x4, x5, x_id, x_age, weight, bias):
    xs_in = (x2, x3, x4, x5)
    B = x2.shape[0]
    spats = tuple(int(x.shape[2]) for x in xs_in)
    kops = _resample_operators(spats)
    feats = []
    for x, K in zip(xs_in, kops):
        _, C, S, _ = x.shape
        feats.append(jnp.einsum('bcs,sp->bcp',
                                x.reshape(B, C, S * S).astype(jnp.float32),
                                jnp.asarray(K, jnp.float32)))
    cat = jnp.concatenate(feats, axis=1)                          # (B, 960, 49)
    w = weight.reshape(weight.shape[0], -1).astype(jnp.float32)
    out = jnp.einsum('oc,bcp->bop', w, cat) + bias[None, :, None]
    out = out - (x_id.reshape(out.shape) + x_age.reshape(out.shape))
    return out.reshape(B, -1, 7, 7)


# ---------------------------------------------------------------------------
if __name__ == "__main__":
    key = jax.random.PRNGKey(0)
    ks = jax.random.split(key, 8)
    B = 2

    # Shapes implied by the module (spatial sizes hard-coded in forward).
    x2 = jax.random.normal(ks[0], (B, 64, 56, 56), jnp.float32)
    x3 = jax.random.normal(ks[1], (B, 128, 28, 28), jnp.float32)
    x4 = jax.random.normal(ks[2], (B, 256, 14, 14), jnp.float32)
    x5 = jax.random.normal(ks[3], (B, 512, 7, 7), jnp.float32)
    x_id = jax.random.normal(ks[4], (B, 512, 7, 7), jnp.float32)
    x_age = jax.random.normal(ks[5], (B, 512, 7, 7), jnp.float32)

    # Deterministic Conv2d(960, 512, 1) parameters (PyTorch-style uniform bound).
    bound = 1.0 / np.sqrt(960.0)
    weight = jax.random.uniform(ks[6], (512, 960, 1, 1), jnp.float32, -bound, bound)
    bias = jax.random.uniform(ks[7], (512,), jnp.float32, -bound, bound)

    rfd = make_rfd(weight, bias)                      # param prep hoisted (one time)
    out = jax.block_until_ready(rfd(x2, x3, x4, x5, x_id, x_age))

    assert out.shape == (B, 512, 7, 7) and out.dtype == jnp.float32
    assert bool(jnp.all(jnp.isfinite(out)))

    # Sanity check against the pure-XLA f32 reference (bf16 MXU operands, f32 acc).
    ref = _reference_forward(x2, x3, x4, x5, x_id, x_age, weight, bias)
    max_err = float(jnp.max(jnp.abs(out - ref)))
    assert max_err < 5e-2, f"max abs error vs reference: {max_err}"

    print("KERNEL_OK")
</pallas_src>

<mosaic_0001>
module attributes {stable_mosaic.version = 11 : i64} {
  func.func @kernel(%arg0: i32, %arg1: memref<1x64x3136xf32, #tpu.memory_space<vmem>>, %arg2: memref<1x128x784xf32, #tpu.memory_space<vmem>>, %arg3: memref<1x256x196xf32, #tpu.memory_space<vmem>>, %arg4: memref<1x512x49xf32, #tpu.memory_space<vmem>>, %arg5: memref<3136x49xbf16, #tpu.memory_space<vmem>>, %arg6: memref<784x49xbf16, #tpu.memory_space<vmem>>, %arg7: memref<196x49xbf16, #tpu.memory_space<vmem>>, %arg8: memref<49x49xbf16, #tpu.memory_space<vmem>>, %arg9: memref<512x960xbf16, #tpu.memory_space<vmem>>, %arg10: memref<512x1xf32, #tpu.memory_space<vmem>>, %arg11: memref<1x512x49xf32, #tpu.memory_space<vmem>>, %arg12: memref<1x512x49xf32, #tpu.memory_space<vmem>>, %arg13: memref<1x512x49xf32, #tpu.memory_space<vmem>>, %arg14: memref<960x49xbf16, #tpu.memory_space<vmem>>) attributes {dimension_semantics = [#tpu.dimension_semantics<parallel>], iteration_bounds = array<i64: 2>, scalar_prefetch = 0 : i64, scratch_operands = 1 : i64, tpu.core_type = #tpu.core_type<tc>, window_params = [{transform_indices = @transform_0, window_bounds = array<i64: 1, 64, 3136>}, {transform_indices = @transform_1, window_bounds = array<i64: 1, 128, 784>}, {transform_indices = @transform_2, window_bounds = array<i64: 1, 256, 196>}, {transform_indices = @transform_3, window_bounds = array<i64: 1, 512, 49>}, {pipeline_mode = #tpu.pipeline_mode<synchronous>, transform_indices = @transform_4, window_bounds = array<i64: 3136, 49>}, {pipeline_mode = #tpu.pipeline_mode<synchronous>, transform_indices = @transform_5, window_bounds = array<i64: 784, 49>}, {pipeline_mode = #tpu.pipeline_mode<synchronous>, transform_indices = @transform_6, window_bounds = array<i64: 196, 49>}, {pipeline_mode = #tpu.pipeline_mode<synchronous>, transform_indices = @transform_7, window_bounds = array<i64: 49, 49>}, {pipeline_mode = #tpu.pipeline_mode<synchronous>, transform_indices = @transform_8, window_bounds = array<i64: 512, 960>}, {pipeline_mode = #tpu.pipeline_mode<synchronous>, transform_indices = @transform_9, window_bounds = array<i64: 512, 1>}, {transform_indices = @transform_10, window_bounds = array<i64: 1, 512, 49>}, {transform_indices = @transform_11, window_bounds = array<i64: 1, 512, 49>}, {transform_indices = @transform_12, window_bounds = array<i64: 1, 512, 49>}]} {
    %c0 = arith.constant 0 : index
    %c0_0 = arith.constant 0 : index
    %c0_1 = arith.constant 0 : index
    %0 = vector.load %arg1[%c0, %c0_0, %c0_1] : memref<1x64x3136xf32, #tpu.memory_space<vmem>>, vector<1x64x3136xf32>
    %1 = vector.shape_cast %0 : vector<1x64x3136xf32> to vector<64x3136xf32>
    %2 = arith.truncf %1 : vector<64x3136xf32> to vector<64x3136xbf16>
    %c0_2 = arith.constant 0 : index
    %c0_3 = arith.constant 0 : index
    %3 = vector.load %arg5[%c0_2, %c0_3] : memref<3136x49xbf16, #tpu.memory_space<vmem>>, vector<3136x49xbf16>
    %cst = arith.constant dense<0.000000e+00> : vector<64x49xf32>
    %4 = tpu.matmul %2, %3, %cst {dimension_numbers = #tpu.dot_dimension_numbers<[1], [0], [0], [1], [0, 0, 1, 1], [], []>} : vector<64x3136xbf16>, vector<3136x49xbf16>, vector<64x49xf32> -> vector<64x49xf32>
    %5 = arith.truncf %4 : vector<64x49xf32> to vector<64x49xbf16>
    %c0_4 = arith.constant 0 : index
    %c0_5 = arith.constant 0 : index
    %6 = vector.load %arg14[%c0_4, %c0_5] : memref<960x49xbf16, #tpu.memory_space<vmem>>, vector<64x49xbf16>
    tpu.vector_store %arg14[%c0_4, %c0_5], %5 {strides = array<i32>} : memref<960x49xbf16, #tpu.memory_space<vmem>>, vector<64x49xbf16>,
    %c0_6 = arith.constant 0 : index
    %c0_7 = arith.constant 0 : index
    %c0_8 = arith.constant 0 : index
    %7 = vector.load %arg2[%c0_6, %c0_7, %c0_8] : memref<1x128x784xf32, #tpu.memory_space<vmem>>, vector<1x128x784xf32>
    %8 = vector.shape_cast %7 : vector<1x128x784xf32> to vector<128x784xf32>
    %9 = arith.truncf %8 : vector<128x784xf32> to vector<128x784xbf16>
    %c0_9 = arith.constant 0 : index
    %c0_10 = arith.constant 0 : index
    %10 = vector.load %arg6[%c0_9, %c0_10] : memref<784x49xbf16, #tpu.memory_space<vmem>>, vector<784x49xbf16>
    %cst_11 = arith.constant dense<0.000000e+00> : vector<128x49xf32>
    %11 = tpu.matmul %9, %10, %cst_11 {dimension_numbers = #tpu.dot_dimension_numbers<[1], [0], [0], [1], [0, 0, 1, 1], [], []>} : vector<128x784xbf16>, vector<784x49xbf16>, vector<128x49xf32> -> vector<128x49xf32>
    %12 = arith.truncf %11 : vector<128x49xf32> to vector<128x49xbf16>
    %c64 = arith.constant 64 : index
    %c0_12 = arith.constant 0 : index
    %13 = vector.load %arg14[%c64, %c0_12] : memref<960x49xbf16, #tpu.memory_space<vmem>>, vector<128x49xbf16>
    tpu.vector_store %arg14[%c64, %c0_12], %12 {strides = array<i32>} : memref<960x49xbf16, #tpu.memory_space<vmem>>, vector<128x49xbf16>,
    %c0_13 = arith.constant 0 : index
    %c0_14 = arith.constant 0 : index
    %c0_15 = arith.constant 0 : index
    %14 = vector.load %arg3[%c0_13, %c0_14, %c0_15] : memref<1x256x196xf32, #tpu.memory_space<vmem>>, vector<1x256x196xf32>
    %15 = vector.shape_cast %14 : vector<1x256x196xf32> to vector<256x196xf32>
    %16 = arith.truncf %15 : vector<256x196xf32> to vector<256x196xbf16>
    %c0_16 = arith.constant 0 : index
    %c0_17 = arith.constant 0 : index
    %17 = vector.load %arg7[%c0_16, %c0_17] : memref<196x49xbf16, #tpu.memory_space<vmem>>, vector<196x49xbf16>
    %cst_18 = arith.constant dense<0.000000e+00> : vector<256x49xf32>
    %18 = tpu.matmul %16, %17, %cst_18 {dimension_numbers = #tpu.dot_dimension_numbers<[1], [0], [0], [1], [0, 0, 1, 1], [], []>} : vector<256x196xbf16>, vector<196x49xbf16>, vector<256x49xf32> -> vector<256x49xf32>
    %19 = arith.truncf %18 : vector<256x49xf32> to vector<256x49xbf16>
    %c192 = arith.constant 192 : index
    %c0_19 = arith.constant 0 : index
    %20 = vector.load %arg14[%c192, %c0_19] : memref<960x49xbf16, #tpu.memory_space<vmem>>, vector<256x49xbf16>
    tpu.vector_store %arg14[%c192, %c0_19], %19 {strides = array<i32>} : memref<960x49xbf16, #tpu.memory_space<vmem>>, vector<256x49xbf16>,
    %c0_20 = arith.constant 0 : index
    %c0_21 = arith.constant 0 : index
    %c0_22 = arith.constant 0 : index
    %21 = vector.load %arg4[%c0_20, %c0_21, %c0_22] : memref<1x512x49xf32, #tpu.memory_space<vmem>>, vector<1x512x49xf32>
    %22 = vector.shape_cast %21 : vector<1x512x49xf32> to vector<512x49xf32>
    %23 = arith.truncf %22 : vector<512x49xf32> to vector<512x49xbf16>
    %c0_23 = arith.constant 0 : index
    %c0_24 = arith.constant 0 : index
    %24 = vector.load %arg8[%c0_23, %c0_24] : memref<49x49xbf16, #tpu.memory_space<vmem>>, vector<49x49xbf16>
    %cst_25 = arith.constant dense<0.000000e+00> : vector<512x49xf32>
    %25 = tpu.matmul %23, %24, %cst_25 {dimension_numbers = #tpu.dot_dimension_numbers<[1], [0], [0], [1], [0, 0, 1, 1], [], []>} : vector<512x49xbf16>, vector<49x49xbf16>, vector<512x49xf32> -> vector<512x49xf32>
    %26 = arith.truncf %25 : vector<512x49xf32> to vector<512x49xbf16>
    %c448 = arith.constant 448 : index
    %c0_26 = arith.constant 0 : index
    %27 = vector.load %arg14[%c448, %c0_26] : memref<960x49xbf16, #tpu.memory_space<vmem>>, vector<512x49xbf16>
    tpu.vector_store %arg14[%c448, %c0_26], %26 {strides = array<i32>} : memref<960x49xbf16, #tpu.memory_space<vmem>>, vector<512x49xbf16>,
    %c0_27 = arith.constant 0 : index
    %c0_28 = arith.constant 0 : index
    %28 = vector.load %arg9[%c0_27, %c0_28] : memref<512x960xbf16, #tpu.memory_space<vmem>>, vector<512x960xbf16>
    %c0_29 = arith.constant 0 : index
    %c0_30 = arith.constant 0 : index
    %29 = vector.load %arg14[%c0_29, %c0_30] : memref<960x49xbf16, #tpu.memory_space<vmem>>, vector<960x49xbf16>
    %cst_31 = arith.constant dense<0.000000e+00> : vector<512x49xf32>
    %30 = tpu.matmul %28, %29, %cst_31 {dimension_numbers = #tpu.dot_dimension_numbers<[1], [0], [0], [1], [0, 0, 1, 1], [], []>} : vector<512x960xbf16>, vector<960x49xbf16>, vector<512x49xf32> -> vector<512x49xf32>
    %c0_32 = arith.constant 0 : index
    %c0_33 = arith.constant 0 : index
    %31 = vector.load %arg10[%c0_32, %c0_33] : memref<512x1xf32, #tpu.memory_space<vmem>>, vector<512x1xf32>
    %32 = vector.broadcast %31 : vector<512x1xf32> to vector<512x49xf32>
    %33 = arith.addf %30, %32 : vector<512x49xf32>
    %c0_34 = arith.constant 0 : index
    %c0_35 = arith.constant 0 : index
    %c0_36 = arith.constant 0 : index
    %34 = vector.load %arg11[%c0_34, %c0_35, %c0_36] : memref<1x512x49xf32, #tpu.memory_space<vmem>>, vector<1x512x49xf32>
    %35 = vector.shape_cast %34 : vector<1x512x49xf32> to vector<512x49xf32>
    %c0_37 = arith.constant 0 : index
    %c0_38 = arith.constant 0 : index
    %c0_39 = arith.constant 0 : index
    %36 = vector.load %arg12[%c0_37, %c0_38, %c0_39] : memref<1x512x49xf32, #tpu.memory_space<vmem>>, vector<1x512x49xf32>
    %37 = vector.shape_cast %36 : vector<1x512x49xf32> to vector<512x49xf32>
    %38 = arith.addf %35, %37 : vector<512x49xf32>
    %39 = arith.subf %33, %38 : vector<512x49xf32>
    %c0_40 = arith.constant 0 : index
    %c0_41 = arith.constant 0 : index
    %c0_42 = arith.constant 0 : index
    %40 = vector.load %arg13[%c0_40, %c0_41, %c0_42] : memref<1x512x49xf32, #tpu.memory_space<vmem>>, vector<1x512x49xf32>
    %41 = vector.shape_cast %40 : vector<1x512x49xf32> to vector<512x49xf32>
    %42 = vector.shape_cast %39 : vector<512x49xf32> to vector<1x512x49xf32>
    tpu.vector_store %arg13[%c0_40, %c0_41, %c0_42], %42 {strides = array<i32>} : memref<1x512x49xf32, #tpu.memory_space<vmem>>, vector<1x512x49xf32>,
    return
  }
  func.func @transform_0(%arg0: i32) -> (i32, i32, i32) {
    %c0_i32 = arith.constant 0 : i32
    %c0_i32_0 = arith.constant 0 : i32
    %c0_i32_1 = arith.constant 0 : i32
    return %arg0, %c0_i32, %c0_i32_0 : i32, i32, i32
  }
  func.func @transform_1(%arg0: i32) -> (i32, i32, i32) {
    %c0_i32 = arith.constant 0 : i32
    %c0_i32_0 = arith.constant 0 : i32
    %c0_i32_1 = arith.constant 0 : i32
    return %arg0, %c0_i32, %c0_i32_0 : i32, i32, i32
  }
  func.func @transform_2(%arg0: i32) -> (i32, i32, i32) {
    %c0_i32 = arith.constant 0 : i32
    %c0_i32_0 = arith.constant 0 : i32
    %c0_i32_1 = arith.constant 0 : i32
    return %arg0, %c0_i32, %c0_i32_0 : i32, i32, i32
  }
  func.func @transform_3(%arg0: i32) -> (i32, i32, i32) {
    %c0_i32 = arith.constant 0 : i32
    %c0_i32_0 = arith.constant 0 : i32
    %c0_i32_1 = arith.constant 0 : i32
    return %arg0, %c0_i32, %c0_i32_0 : i32, i32, i32
  }
  func.func @transform_4(%arg0: i32) -> (i32, i32) {
    %c0_i32 = arith.constant 0 : i32
    %c0_i32_0 = arith.constant 0 : i32
    %c0_i32_1 = arith.constant 0 : i32
    return %c0_i32, %c0_i32_0 : i32, i32
  }
  func.func @transform_5(%arg0: i32) -> (i32, i32) {
    %c0_i32 = arith.constant 0 : i32
    %c0_i32_0 = arith.constant 0 : i32
    %c0_i32_1 = arith.constant 0 : i32
    return %c0_i32, %c0_i32_0 : i32, i32
  }
  func.func @transform_6(%arg0: i32) -> (i32, i32) {
    %c0_i32 = arith.constant 0 : i32
    %c0_i32_0 = arith.constant 0 : i32
    %c0_i32_1 = arith.constant 0 : i32
    return %c0_i32, %c0_i32_0 : i32, i32
  }
  func.func @transform_7(%arg0: i32) -> (i32, i32) {
    %c0_i32 = arith.constant 0 : i32
    %c0_i32_0 = arith.constant 0 : i32
    %c0_i32_1 = arith.constant 0 : i32
    return %c0_i32, %c0_i32_0 : i32, i32
  }
  func.func @transform_8(%arg0: i32) -> (i32, i32) {
    %c0_i32 = arith.constant 0 : i32
    %c0_i32_0 = arith.constant 0 : i32
    %c0_i32_1 = arith.constant 0 : i32
    return %c0_i32, %c0_i32_0 : i32, i32
  }
  func.func @transform_9(%arg0: i32) -> (i32, i32) {
    %c0_i32 = arith.constant 0 : i32
    %c0_i32_0 = arith.constant 0 : i32
    %c0_i32_1 = arith.constant 0 : i32
    return %c0_i32, %c0_i32_0 : i32, i32
  }
  func.func @transform_10(%arg0: i32) -> (i32, i32, i32) {
    %c0_i32 = arith.constant 0 : i32
    %c0_i32_0 = arith.constant 0 : i32
    %c0_i32_1 = arith.constant 0 : i32
    return %arg0, %c0_i32, %c0_i32_0 : i32, i32, i32
  }
  func.func @transform_11(%arg0: i32) -> (i32, i32, i32) {
    %c0_i32 = arith.constant 0 : i32
    %c0_i32_0 = arith.constant 0 : i32
    %c0_i32_1 = arith.constant 0 : i32
    return %arg0, %c0_i32, %c0_i32_0 : i32, i32, i32
  }
  func.func @transform_12(%arg0: i32) -> (i32, i32, i32) {
    %c0_i32 = arith.constant 0 : i32
    %c0_i32_0 = arith.constant 0 : i32
    %c0_i32_1 = arith.constant 0 : i32
    return %arg0, %c0_i32, %c0_i32_0 : i32, i32, i32
  }
}

</mosaic_0001>

<bundles_post_ra>
// kernel: forward.1
= control target key start
LH: loop header
LB: loop body
LE: loop exit
PB: predicated region body
PF: predicated region fallthrough
CT: control target
= control target key end

     0   :  { %s12468_s21 = smov 0   ;;  %s17828_s0 = inlined_call_operand.vmem [shape: f32[2,64,3136], index: 0, kind: input, shape index: {}]   ;;  %s17829_s1 = inlined_call_operand.vmem [shape: f32[2,128,784], index: 1, kind: input, shape index: {}]   ;;  %s17830_s2 = inlined_call_operand.vmem [shape: f32[2,256,196], index: 2, kind: input, shape index: {}]   ;;  %s17831_s3 = inlined_call_operand.vmem [shape: f32[2,512,49], index: 3, kind: input, shape index: {}]   ;;  %s17832_s4 = inlined_call_operand.vmem [shape: bf16[3136,49], index: 4, kind: input, shape index: {}]   ;;  %s17833_s5 = inlined_call_operand.vmem [shape: bf16[784,49], index: 5, kind: input, shape index: {}]   ;;  %s17834_s6 = inlined_call_operand.vmem [shape: bf16[196,49], index: 6, kind: input, shape index: {}]   ;;  %s17835_s7 = inlined_call_operand.vmem [shape: bf16[49,49], index: 7, kind: input, shape index: {}]   ;;  %s17836_s8 = inlined_call_operand.vmem [shape: bf16[512,960], index: 8, kind: input, shape index: {}]   ;;  %s17837_s9 = inlined_call_operand.vmem [shape: f32[512,1], index: 9, kind: input, shape index: {}]   ;;  %s17838_s10 = inlined_call_operand.vmem [shape: f32[2,512,49], index: 10, kind: input, shape index: {}]   ;;  %s17839_s11 = inlined_call_operand.vmem [shape: f32[2,512,49], index: 11, kind: input, shape index: {}]   ;;  %s17840_s12 = inlined_call_operand.vmem [shape: f32[2,512,49], index: 12, kind: output, shape index: {}]  }
   0x1 LB: > { %s9364_s22 = sadd.s32 4294967295, %s12400_s21   ;;  %p9368_p0 = scmp.ge.s32.totalorder %s12400_s21, 1  ;;  %s12400_s21 = sphi %s12468_s21, %s22_s21  }
   0x2   : > { %p412_p1 = scmp.lt.s32.totalorder %s12400_s21, 3 }
   0x4   : > { %p413_p2 = pnand %p9368_p0, %p412_p1 }
   0x6   : > { %416 = sbr.rel (%p413_p2) target bundleno = 2222 (0x8ae), region = 68 }
   0xb   : > { %v11791_v0 = vld [vmem:[%s17832_s4 + $0x38] sm:$0xff]  ;;  %v11790_v4 = vld [vmem:[%s17832_s4 + $0x30] sm:$0xff]  ;;  %v11789_v8 = vld [vmem:[%s17832_s4 + $0x28] sm:$0xff]  ;;  %p479_p3 = scmp.lt.s32.totalorder %s9364_s22, 1  ;;  %vm2383_vm0 = vcmask 523264   ;;  %vm3698_vm1 = vcmask 130048  }
   0xc   : > { %v11799_v1 = vld [vmem:[%s17832_s4 + $0x78] sm:$0xff]  ;;  %2396 = vmatpush.bf16.msra.mxu0 %v11791_v0  ;;  %v11798_v5 = vld [vmem:[%s17832_s4 + $0x70] sm:$0xff]  ;;  %v11797_v9 = vld [vmem:[%s17832_s4 + $0x68] sm:$0xff]  ;;  %vm4810_vm2 = vcmask 1040384   ;;  %vm3129_vm3 = vcmask 396288   ;;  %vm4343_vm4 = vcmask 1041408  }
   0xd   : > { %v11807_v2 = vld [vmem:[%s17832_s4 + $0xb8] sm:$0xff]  ;;  %2425 = vmatpush.bf16.msra.mxu1 %v11799_v1  ;;  %v11806_v6 = vld [vmem:[%s17832_s4 + $0xb0] sm:$0xff]  ;;  %v11805_v10 = vld [vmem:[%s17832_s4 + $0xa8] sm:$0xff]  ;;  %s17942_s22 = smov (!%p479_p3, %s9364_s22), 1  ;;  %vm4713_vm5 = vcmask 400384   ;;  %vm4294_vm6 = vcmask 556032  }
   0xe   : > { %v12488_v3 = vld [vmem:[%s17832_s4 + $0xf8] sm:$0xff]  ;;  %2454 = vmatpush.bf16.msra.mxu2 %v11807_v2  ;;  %v12503_v7 = vld [vmem:[%s17832_s4 + $0xf0] sm:$0xff]  ;;  %v12518_v11 = vld [vmem:[%s17832_s4 + $0xe8] sm:$0xff]  ;;  %s12380_s17 = smul.u32 1600, %s17942_s22 }
   0xf   : > { %12360 = vmatpush.bf16.msra.mxu3 %v12488_v3  ;;  %v11788_v12 = vld [vmem:[%s17832_s4 + $0x20] sm:$0xff]  ;;  %v11787_v16 = vld [vmem:[%s17832_s4 + $0x18] sm:$0xff]  ;;  %v11786_v20 = vld [vmem:[%s17832_s4 + $0x10] sm:$0xff]  ;;  %s12381_s29 = smul.u32 896, %s17942_s22 }
  0x10   : > { %2397 = vmatpush.bf16.msra.mxu0 %v11790_v4  ;;  %v11796_v13 = vld [vmem:[%s17832_s4 + $0x60] sm:$0xff]  ;;  %v11795_v17 = vld [vmem:[%s17832_s4 + $0x58] sm:$0xff]  ;;  %v11794_v21 = vld [vmem:[%s17832_s4 + $0x50] sm:$0xff]  ;;  %s12581_s30 = scalar_lea.vmem %s17828_s0, %s12380_s17 }
  0x11   : > { %2426 = vmatpush.bf16.msra.mxu1 %v11798_v5  ;;  %v11804_v14 = vld [vmem:[%s17832_s4 + $0xa0] sm:$0xff]  ;;  %v11803_v18 = vld [vmem:[%s17832_s4 + $0x98] sm:$0xff]  ;;  %v11802_v22 = vld [vmem:[%s17832_s4 + $0x90] sm:$0xff]  ;;  %s13627_s17 = scalar_lea.vmem %s17829_s1, %s12381_s29  ;;  %s14255_s29 = sshll.u32 %s17942_s22, 9 }
  0x12   : > { %2455 = vmatpush.bf16.msra.mxu2 %v11806_v6  ;;  %v12535_v15 = vld [vmem:[%s17832_s4 + $0xe0] sm:$0xff]  ;;  %v12554_v19 = vld [vmem:[%s17832_s4 + $0xd8] sm:$0xff]  ;;  %v12570_v23 = vld [vmem:[%s17832_s4 + $0xd0] sm:$0xff]  ;;  %s14263_s15 = scalar_lea.vmem %s17831_s3, %s14255_s29  ;;  %s14292_s18 = scalar_lea.vmem %s17830_s2, %s14255_s29 }
  0x13   : > { %12361 = vmatpush.bf16.msra.mxu3 %v12503_v7  ;;  %v11785_v24 = vld [vmem:[%s17832_s4 + $0x8] sm:$0xff]  ;;  %v11784_v28 = vld [vmem:[%s17832_s4] sm:$0xff]  ;;  %v541_v35 = vld [vmem:[%s12581_s30 + $0xd0] sm:$0xff]  ;;  %s16797_s26 = scalar_lea.vmem %s17838_s10, %s14255_s29  ;;  %s16803_s13 = scalar_lea.vmem %s17839_s11, %s14255_s29 }
  0x14   : > { %2398 = vmatpush.bf16.msra.mxu0 %v11789_v8  ;;  %v11793_v25 = vld [vmem:[%s17832_s4 + $0x48] sm:$0xff]  ;;  %v11792_v29 = vld [vmem:[%s17832_s4 + $0x40] sm:$0xff]  ;;  %v517_v36 = vld [vmem:[%s12581_s30 + $0x10] sm:$0xff]  ;;  %s16823_s16 = scalar_lea.vmem %s17840_s12, %s14255_s29 }
  0x15   : > { %2427 = vmatpush.bf16.msra.mxu1 %v11797_v9  ;;  %v11801_v26 = vld [vmem:[%s17832_s4 + $0x88] sm:$0xff]  ;;  %v11800_v30 = vld [vmem:[%s17832_s4 + $0x80] sm:$0xff]  ;;  %v542_v37 = vld [vmem:[%s12581_s30 + $0xd8] sm:$0xff] }
  0x16   : > { %2456 = vmatpush.bf16.msra.mxu2 %v11805_v10  ;;  %v12590_v27 = vld [vmem:[%s17832_s4 + $0xc8] sm:$0xff]  ;;  %v12604_v31 = vld [vmem:[%s17832_s4 + $0xc0] sm:$0xff]  ;;  %v618_v38 = vld [vmem:[%s12581_s30 + $0x338] sm:$0xff]  ;;  %v717_v43 = vpack.c.bf16 %v542_v37, %v517_v36 }
  0x17   : > { %12362 = vmatpush.bf16.msra.mxu3 %v12518_v11  ;;  %v515_v32 = vld [vmem:[%s12581_s30] sm:$0xff]  ;;  %v540_v33 = vld [vmem:[%s12581_s30 + $0xc8] sm:$0xff]  ;;  %v11847_v40 = vld [vmem:[%s17832_s4 + $0x1f8] sm:$0xff] }
  0x18   : > { %2399 = vmatpush.bf16.msra.mxu0 %v11788_v12  ;;  %v516_v34 = vld [vmem:[%s12581_s30 + $0x8] sm:$0xff]  ;;  %v643_v39 = vld [vmem:[%s12581_s30 + $0x400] sm:$0xff]  ;;  %v715_v41 = vpack.c.bf16 %v540_v33, %v515_v32  ;;  %v11846_v45 = vld [vmem:[%s17832_s4 + $0x1f0] sm:$0xff] }
  0x19   : > { %2428 = vmatpush.bf16.msra.mxu1 %v11796_v13  ;;  %v716_v42 = vpack.c.bf16 %v541_v35, %v516_v34  ;;  %v768_v44 = vpack.c.bf16 %v643_v39, %v618_v38  ;;  %v11831_v46 = vld [vmem:[%s17832_s4 + $0x178] sm:$0xff]  ;;  %v11830_v48 = vld [vmem:[%s17832_s4 + $0x170] sm:$0xff]  ;;  %v11845_v50 = vld [vmem:[%s17832_s4 + $0x1e8] sm:$0xff] }
  0x1a   : > { %2457 = vmatpush.bf16.msra.mxu2 %v11804_v14  ;;  %v11839_v47 = vld [vmem:[%s17832_s4 + $0x1b8] sm:$0xff]  ;;  %v11838_v49 = vld [vmem:[%s17832_s4 + $0x1b0] sm:$0xff]  ;;  %v11829_v51 = vld [vmem:[%s17832_s4 + $0x168] sm:$0xff] }
  0x1b   : > { %12363 = vmatpush.bf16.msra.mxu3 %v12535_v15  ;;  %v11837_v52 = vld [vmem:[%s17832_s4 + $0x1a8] sm:$0xff]  ;;  %v11844_v53 = vld [vmem:[%s17832_s4 + $0x1e0] sm:$0xff]  ;;  %v565_v54 = vld [vmem:[%s12581_s30 + $0x190] sm:$0xff] }
  0x1c   : > { %2400 = vmatpush.bf16.msra.mxu0 %v11787_v16  ;;  %v590_v55 = vld [vmem:[%s12581_s30 + $0x258] sm:$0xff]  ;;  %v591_v57 = vld [vmem:[%s12581_s30 + $0x260] sm:$0xff]  ;;  %v592_v59 = vld [vmem:[%s12581_s30 + $0x268] sm:$0xff] }
  0x1d   : > { %2429 = vmatpush.bf16.msra.mxu1 %v11795_v17  ;;  %v566_v56 = vld [vmem:[%s12581_s30 + $0x198] sm:$0xff]  ;;  %v567_v58 = vld [vmem:[%s12581_s30 + $0x1a0] sm:$0xff]  ;;  %v668_v60 = vld [vmem:[%s12581_s30 + $0x4c8] sm:$0xff]  ;;  %v740_v1 = vpack.c.bf16 %v590_v55, %v565_v54 }
  0x1e   : > { %2458 = vmatpush.bf16.msra.mxu2 %v11803_v18  ;;  %v693_v61 = vld [vmem:[%s12581_s30 + $0x590] sm:$0xff]  ;;  %v11828_v62 = vld [vmem:[%s17832_s4 + $0x160] sm:$0xff]  ;;  %v11843_v0 = vld [vmem:[%s17832_s4 + $0x1d8] sm:$0xff]  ;;  %v741_v2 = vpack.c.bf16 %v591_v57, %v566_v56 }
  0x1f   : > { %12364 = vmatpush.bf16.msra.mxu3 %v12554_v19  ;;  %v11836_v63 = vld [vmem:[%s17832_s4 + $0x1a0] sm:$0xff]  ;;  %v793_v4 = vpack.c.bf16 %v693_v61, %v668_v60  ;;  %v11842_v5 = vld [vmem:[%s17832_s4 + $0x1d0] sm:$0xff]  ;;  %v11827_v6 = vld [vmem:[%s17832_s4 + $0x158] sm:$0xff] }
  0x20   : > { %2401 = vmatpush.bf16.msra.mxu0 %v11786_v20  ;;  %v11826_v8 = vld [vmem:[%s17832_s4 + $0x150] sm:$0xff]  ;;  %v11841_v10 = vld [vmem:[%s17832_s4 + $0x1c8] sm:$0xff]  ;;  %v11840_v13 = vld [vmem:[%s17832_s4 + $0x1c0] sm:$0xff] }
  0x21   : > { %2430 = vmatpush.bf16.msra.mxu1 %v11794_v21  ;;  %v11834_v9 = vld [vmem:[%s17832_s4 + $0x190] sm:$0xff]  ;;  %v11833_v12 = vld [vmem:[%s17832_s4 + $0x188] sm:$0xff]  ;;  %v615_v14 = vld [vmem:[%s12581_s30 + $0x320] sm:$0xff] }
  0x22   : > { %2459 = vmatpush.bf16.msra.mxu2 %v11802_v22  ;;  %v616_v16 = vld [vmem:[%s12581_s30 + $0x328] sm:$0xff]  ;;  %v641_v17 = vld [vmem:[%s12581_s30 + $0x3f0] sm:$0xff]  ;;  %v522_v20 = vld [vmem:[%s12581_s30 + $0x38] sm:$0xff] }
  0x23   : > { %12365 = vmatpush.bf16.msra.mxu3 %v12570_v23  ;;  %v617_v18 = vld [vmem:[%s12581_s30 + $0x330] sm:$0xff]  ;;  %v547_v21 = vld [vmem:[%s12581_s30 + $0x100] sm:$0xff]  ;;  %v11821_v32 = vld [vmem:[%s17832_s4 + $0x128] sm:$0xff] }
  0x24   : > { %2402 = vmatpush.bf16.msra.mxu0 %v11785_v24  ;;  %v11824_v22 = vld [vmem:[%s17832_s4 + $0x140] sm:$0xff]  ;;  %v11877_v33 = vld [vmem:[%s17832_s4 + $0x2e8] sm:$0xff]  ;;  %v665_v34 = vld [vmem:[%s12581_s30 + $0x4b0] sm:$0xff] }
  0x25   : > { %2431 = vmatpush.bf16.msra.mxu1 %v11793_v25  ;;  %v766_v25 = vpack.c.bf16 %v641_v17, %v616_v16  ;;  %v690_v35 = vld [vmem:[%s12581_s30 + $0x578] sm:$0xff]  ;;  %v691_v37 = vld [vmem:[%s12581_s30 + $0x580] sm:$0xff]  ;;  %v692_v39 = vld [vmem:[%s12581_s30 + $0x588] sm:$0xff] }
  0x26   : > { %2460 = vmatpush.bf16.msra.mxu2 %v11801_v26  ;;  %v666_v36 = vld [vmem:[%s12581_s30 + $0x4b8] sm:$0xff]  ;;  %v667_v38 = vld [vmem:[%s12581_s30 + $0x4c0] sm:$0xff]  ;;  %v520_v56 = vld [vmem:[%s12581_s30 + $0x28] sm:$0xff] }
  0x27   : > { %12366 = vmatpush.bf16.msra.mxu3 %v12590_v27  ;;  %v518_v54 = vld [vmem:[%s12581_s30 + $0x18] sm:$0xff]  ;;  %v543_v55 = vld [vmem:[%s12581_s30 + $0xe0] sm:$0xff]  ;;  %v545_v57 = vld [vmem:[%s12581_s30 + $0xf0] sm:$0xff] }
  0x28   : > { %2403 = vmatpush.bf16.msra.mxu0 %v11784_v28  ;;  %v11823_v28 = vld [vmem:[%s17832_s4 + $0x138] sm:$0xff]  ;;  %v647_v61 = vld [vmem:[%s12581_s30 + $0x420] sm:$0xff]  ;;  %v672_v16 = vld [vmem:[%s12581_s30 + $0x4e8] sm:$0xff] }
  0x29   : > { %2432 = vmatpush.bf16.msra.mxu1 %v11792_v29  ;;  %v11879_v29 = vld [vmem:[%s17832_s4 + $0x2f8] sm:$0xff]  ;;  %v697_v17 = vld [vmem:[%s12581_s30 + $0x5b0] sm:$0xff] }
  0x2a   : > { %2461 = vmatpush.bf16.msra.mxu2 %v11800_v30  ;;  %v11822_v30 = vld [vmem:[%s17832_s4 + $0x130] sm:$0xff]  ;;  %v622_v60 = vld [vmem:[%s12581_s30 + $0x358] sm:$0xff] }
  0x2b   : > { %12367 = vmatpush.bf16.msra.mxu3 %v12604_v31  ;;  %2404 = vmatmul.bf16.vlgmr.msra.gmra.mxu0 %v715_v41  ;;  %v597_v41 = vld [vmem:[%s12581_s30 + $0x290] sm:$0xff] }
  0x2c   : > { %2483 = vmatpush.bf16.msrb.mxu0 %v12488_v3  ;;  %2433 = vmatmul.bf16.vlgmr.msra.gmra.mxu1 %v716_v42  ;;  %v742_v3 = vpack.c.bf16 %v592_v59, %v567_v58  ;;  %v11820_v42 = vld [vmem:[%s17832_s4 + $0x120] sm:$0xff]  ;;  %v521_v58 = vld [vmem:[%s12581_s30 + $0x30] sm:$0xff]  ;;  %v546_v59 = vld [vmem:[%s12581_s30 + $0xf8] sm:$0xff] }
  0x2d   : > { %2462 = vmatmul.bf16.vlgmr.msra.gmra.mxu2 %v717_v43  ;;  %2541 = vmatpush.bf16.msrb.mxu1 %v11831_v46  ;;  %v11876_v43 = vld [vmem:[%s17832_s4 + $0x2e0] sm:$0xff]  ;;  %v792_v46 = vpack.c.bf16 %v692_v39, %v667_v38 }
  0x2e   : > { %2501 = vmatmul.bf16.vlgmr.msra.gmra.mxu3 %v768_v44  ;;  %2570 = vmatpush.bf16.msrb.mxu2 %v11839_v47  ;;  %v790_v44 = vpack.c.bf16 %v690_v35, %v665_v34  ;;  %v621_v34 = vld [vmem:[%s12581_s30 + $0x350] sm:$0xff]  ;;  %v646_v35 = vld [vmem:[%s12581_s30 + $0x418] sm:$0xff] }
  0x2f   : > { %2599 = vmatpush.bf16.msrb.mxu3 %v11847_v40  ;;  %v572_v40 = vld [vmem:[%s12581_s30 + $0x1c8] sm:$0xff] }
  0x30   : > { %2484 = vmatpush.bf16.msrb.mxu0 %v12503_v7  ;;  %v11835_v7 = vld [vmem:[%s17832_s4 + $0x198] sm:$0xff]  ;;  %v747_v47 = vpack.c.bf16 %v597_v41, %v572_v40  ;;  %v11856_v40 = vld [vmem:[%s17832_s4 + $0x240] sm:$0xff] }
  0x31   : > { %2542 = vmatpush.bf16.msrb.mxu1 %v11830_v48  ;;  %v11819_v48 = vld [vmem:[%s17832_s4 + $0x118] sm:$0xff]  ;;  %v11864_v41 = vld [vmem:[%s17832_s4 + $0x280] sm:$0xff] }
  0x32   : > { %2571 = vmatpush.bf16.msrb.mxu2 %v11838_v49  ;;  %v11875_v49 = vld [vmem:[%s17832_s4 + $0x2d8] sm:$0xff] }
  0x33   : > { %2600 = vmatpush.bf16.msrb.mxu3 %v11846_v45  ;;  %v791_v45 = vpack.c.bf16 %v691_v37, %v666_v36  ;;  %v526_v36 = vld [vmem:[%s12581_s30 + $0x58] sm:$0xff]  ;;  %v551_v37 = vld [vmem:[%s12581_s30 + $0x120] sm:$0xff] }
  0x34   : > { %2485 = vmatpush.bf16.msrb.mxu0 %v12518_v11  ;;  %v11825_v11 = vld [vmem:[%s17832_s4 + $0x148] sm:$0xff] }
  0x35   : > { %2543 = vmatpush.bf16.msrb.mxu1 %v11829_v51  ;;  %v11874_v51 = vld [vmem:[%s17832_s4 + $0x2d0] sm:$0xff] }
  0x36   : > { %2572 = vmatpush.bf16.msrb.mxu2 %v11837_v52  ;;  %v11817_v52 = vld [vmem:[%s17832_s4 + $0x108] sm:$0xff] }
  0x37   : > { %2601 = vmatpush.bf16.msrb.mxu3 %v11845_v50  ;;  %v11818_v50 = vld [vmem:[%s17832_s4 + $0x110] sm:$0xff] }
  0x38   : > { %2486 = vmatpush.bf16.msrb.mxu0 %v12535_v15  ;;  %v640_v15 = vld [vmem:[%s12581_s30 + $0x3e8] sm:$0xff] }
  0x39   : > { %2544 = vmatpush.bf16.msrb.mxu1 %v11828_v62  ;;  %v765_v24 = vpack.c.bf16 %v640_v15, %v615_v14  ;;  %v11816_v62 = vld [vmem:[%s17832_s4 + $0x100] sm:$0xff]  ;;  %v596_v15 = vld [vmem:[%s12581_s30 + $0x288] sm:$0xff] }
  0x3a   : > { %2573 = vmatpush.bf16.msrb.mxu2 %v11836_v63  ;;  %v11872_v63 = vld [vmem:[%s17832_s4 + $0x2c0] sm:$0xff] }
  0x3b   : > { %2602 = vmatpush.bf16.msrb.mxu3 %v11844_v53  ;;  %2409 = vmatmul.bf16.gmra.mxu0 %v740_v1  ;;  %v11873_v53 = vld [vmem:[%s17832_s4 + $0x2c8] sm:$0xff]  ;;  %v720_v1 = vpack.c.bf16 %v545_v57, %v520_v56  ;;  %v571_v14 = vld [vmem:[%s12581_s30 + $0x1c0] sm:$0xff]  ;;  %v601_v57 = vld [vmem:[%s12581_s30 + $0x2b0] sm:$0xff] }
  0x3c   : > { %2487 = vmatpush.bf16.msrb.mxu0 %v12554_v19  ;;  %2438 = vmatmul.bf16.gmra.mxu1 %v741_v2  ;;  %v642_v19 = vld [vmem:[%s12581_s30 + $0x3f8] sm:$0xff]  ;;  %v721_v2 = vpack.c.bf16 %v546_v59, %v521_v58  ;;  %v576_v56 = vld [vmem:[%s12581_s30 + $0x1e8] sm:$0xff] }
  0x3d   : > { %2467 = vmatmul.bf16.gmra.mxu2 %v742_v3  ;;  %2545 = vmatpush.bf16.msrb.mxu1 %v11827_v6  ;;  %v767_v26 = vpack.c.bf16 %v642_v19, %v617_v18  ;;  %v772_v3 = vpack.c.bf16 %v647_v61, %v622_v60  ;;  %v11862_v6 = vld [vmem:[%s17832_s4 + $0x270] sm:$0xff]  ;;  %v11860_v18 = vld [vmem:[%s17832_s4 + $0x260] sm:$0xff] }
  0x3e   : > { %2506 = vmatmul.bf16.gmra.mxu3 %v793_v4  ;;  %2574 = vmatpush.bf16.msrb.mxu2 %v11835_v7  ;;  %v11863_v4 = vld [vmem:[%s17832_s4 + $0x278] sm:$0xff]  ;;  %v11870_v7 = vld [vmem:[%s17832_s4 + $0x2b0] sm:$0xff]  ;;  %v11868_v19 = vld [vmem:[%s17832_s4 + $0x2a0] sm:$0xff] }
  0x3f   : > { %2603 = vmatpush.bf16.msrb.mxu3 %v11843_v0  ;;  %v718_v0 = vpack.c.bf16 %v543_v55, %v518_v54  ;;  %v671_v54 = vld [vmem:[%s12581_s30 + $0x4e0] sm:$0xff]  ;;  %v696_v55 = vld [vmem:[%s12581_s30 + $0x5a8] sm:$0xff] }
  0x40   : > { %2488 = vmatpush.bf16.msrb.mxu0 %v12570_v23  ;;  %v11832_v23 = vld [vmem:[%s17832_s4 + $0x180] sm:$0xff] }
  0x41   : > { %2546 = vmatpush.bf16.msrb.mxu1 %v11826_v8  ;;  %v11861_v8 = vld [vmem:[%s17832_s4 + $0x268] sm:$0xff]  ;;  %v11852_v60 = vld [vmem:[%s17832_s4 + $0x220] sm:$0xff] }
  0x42   : > { %2575 = vmatpush.bf16.msrb.mxu2 %v11834_v9  ;;  %v11869_v9 = vld [vmem:[%s17832_s4 + $0x2a8] sm:$0xff]  ;;  %v11908_v61 = vld [vmem:[%s17832_s4 + $0x3e0] sm:$0xff] }
  0x43   : > { %2604 = vmatpush.bf16.msrb.mxu3 %v11842_v5  ;;  %v11871_v5 = vld [vmem:[%s17832_s4 + $0x2b8] sm:$0xff] }
  0x44   : > { %2489 = vmatpush.bf16.msrb.mxu0 %v12590_v27  ;;  %v722_v27 = vpack.c.bf16 %v547_v21, %v522_v20 }
  0x45   : > { %2547 = vmatpush.bf16.msrb.mxu1 %v11825_v11  ;;  %v593_v11 = vld [vmem:[%s12581_s30 + $0x270] sm:$0xff] }
  0x46   : > { %2576 = vmatpush.bf16.msrb.mxu2 %v11833_v12  ;;  %v570_v12 = vld [vmem:[%s12581_s30 + $0x1b8] sm:$0xff] }
  0x47   : > { %2605 = vmatpush.bf16.msrb.mxu3 %v11841_v10  ;;  %v568_v10 = vld [vmem:[%s12581_s30 + $0x1a8] sm:$0xff] }
  0x48   : > { %2490 = vmatpush.bf16.msrb.mxu0 %v12604_v31  ;;  %v11878_v31 = vld [vmem:[%s17832_s4 + $0x2f0] sm:$0xff]  ;;  %v743_v20 = vpack.c.bf16 %v593_v11, %v568_v10  ;;  %v550_v11 = vld [vmem:[%s12581_s30 + $0x118] sm:$0xff] }
  0x49   : > { %2548 = vmatpush.bf16.msrb.mxu1 %v11824_v22  ;;  %v746_v22 = vpack.c.bf16 %v596_v15, %v571_v14  ;;  %v525_v10 = vld [vmem:[%s12581_s30 + $0x50] sm:$0xff] }
  0x4a   : > { %2577 = vmatpush.bf16.msrb.mxu2 %v11832_v23  ;;  %v797_v23 = vpack.c.bf16 %v697_v17, %v672_v16  ;;  %v11848_v16 = vld [vmem:[%s17832_s4 + $0x200] sm:$0xff] }
  0x4b   : > { %2606 = vmatpush.bf16.msrb.mxu3 %v11840_v13  ;;  %2414 = vmatmul.bf16.gmra.mxu0 %v765_v24  ;;  %v595_v13 = vld [vmem:[%s12581_s30 + $0x280] sm:$0xff]  ;;  %v11859_v24 = vld [vmem:[%s17832_s4 + $0x258] sm:$0xff] }
  0x4c   : > { %2443 = vmatmul.bf16.gmra.mxu1 %v766_v25  ;;  %2512 = vmatpush.bf16.msra.mxu0 %v11823_v28  ;;  %v745_v21 = vpack.c.bf16 %v595_v13, %v570_v12  ;;  %v11867_v25 = vld [vmem:[%s17832_s4 + $0x298] sm:$0xff]  ;;  %v11857_v28 = vld [vmem:[%s17832_s4 + $0x248] sm:$0xff]  ;;  %v651_v13 = vld [vmem:[%s12581_s30 + $0x440] sm:$0xff] }
  0x4d   : > { %2472 = vmatmul.bf16.gmra.mxu2 %v767_v26  ;;  %2657 = vmatpush.bf16.msra.mxu1 %v11863_v4  ;;  %v11858_v26 = vld [vmem:[%s17832_s4 + $0x250] sm:$0xff]  ;;  %v11849_v4 = vld [vmem:[%s17832_s4 + $0x208] sm:$0xff]  ;;  %v626_v12 = vld [vmem:[%s12581_s30 + $0x378] sm:$0xff] }
  0x4e   : > { %2607 = vmatmul.bf16.vlgmr.msrb.gmra.mxu3 %v722_v27  ;;  %2686 = vmatpush.bf16.msra.mxu2 %v11871_v5  ;;  %v11866_v27 = vld [vmem:[%s17832_s4 + $0x290] sm:$0xff]  ;;  %v11905_v5 = vld [vmem:[%s17832_s4 + $0x3c8] sm:$0xff]  ;;  %v11904_v17 = vld [vmem:[%s17832_s4 + $0x3c0] sm:$0xff] }
  0x4f   : > { %2715 = vmatpush.bf16.msra.mxu3 %v11879_v29  ;;  %v11865_v29 = vld [vmem:[%s17832_s4 + $0x288] sm:$0xff] }
  0x50   : > { %2513 = vmatpush.bf16.msra.mxu0 %v11822_v30  ;;  %v519_v30 = vld [vmem:[%s12581_s30 + $0x20] sm:$0xff] }
  0x51   : > { %2658 = vmatpush.bf16.msra.mxu1 %v11862_v6  ;;  %v619_v6 = vld [vmem:[%s12581_s30 + $0x340] sm:$0xff] }
  0x52   : > { %2687 = vmatpush.bf16.msra.mxu2 %v11870_v7  ;;  %v644_v7 = vld [vmem:[%s12581_s30 + $0x408] sm:$0xff] }
  0x53   : > { %2716 = vmatpush.bf16.msra.mxu3 %v11878_v31  ;;  %v544_v31 = vld [vmem:[%s12581_s30 + $0xe8] sm:$0xff]  ;;  %v769_v14 = vpack.c.bf16 %v644_v7, %v619_v6  ;;  %v649_v6 = vld [vmem:[%s12581_s30 + $0x430] sm:$0xff] }
  0x54   : > { %2514 = vmatpush.bf16.msra.mxu0 %v11821_v32  ;;  %v620_v32 = vld [vmem:[%s12581_s30 + $0x348] sm:$0xff]  ;;  %v719_v38 = vpack.c.bf16 %v544_v31, %v519_v30  ;;  %v625_v7 = vld [vmem:[%s12581_s30 + $0x370] sm:$0xff] }
  0x55   : > { %2659 = vmatpush.bf16.msra.mxu1 %v11861_v8  ;;  %v524_v8 = vld [vmem:[%s12581_s30 + $0x48] sm:$0xff] }
  0x56   : > { %2688 = vmatpush.bf16.msra.mxu2 %v11869_v9  ;;  %v549_v9 = vld [vmem:[%s12581_s30 + $0x110] sm:$0xff] }
  0x57   : > { %2717 = vmatpush.bf16.msra.mxu3 %v11877_v33  ;;  %v645_v33 = vld [vmem:[%s12581_s30 + $0x410] sm:$0xff]  ;;  %v724_v15 = vpack.c.bf16 %v549_v9, %v524_v8  ;;  %v650_v8 = vld [vmem:[%s12581_s30 + $0x438] sm:$0xff] }
  0x58   : > { %2515 = vmatpush.bf16.msra.mxu0 %v11820_v42  ;;  %v770_v39 = vpack.c.bf16 %v645_v33, %v620_v32  ;;  %v771_v42 = vpack.c.bf16 %v646_v35, %v621_v34  ;;  %v11893_v33 = vld [vmem:[%s17832_s4 + $0x368] sm:$0xff]  ;;  %v669_v35 = vld [vmem:[%s12581_s30 + $0x4d0] sm:$0xff]  ;;  %v530_v9 = vld [vmem:[%s12581_s30 + $0x78] sm:$0xff] }
  0x59   : > { %2660 = vmatpush.bf16.msra.mxu1 %v11860_v18  ;;  %v11901_v34 = vld [vmem:[%s17832_s4 + $0x3a8] sm:$0xff] }
  0x5a   : > { %2689 = vmatpush.bf16.msra.mxu2 %v11868_v19 }
  0x5b   : > { %2718 = vmatpush.bf16.msra.mxu3 %v11876_v43  ;;  %2419 = vmatmul.bf16.gmra.mxu0 %v790_v44  ;;  %v726_v43 = vpack.c.bf16 %v551_v37, %v526_v36  ;;  %v11855_v44 = vld [vmem:[%s17832_s4 + $0x238] sm:$0xff] }
  0x5c   : > { %2448 = vmatmul.bf16.gmra.mxu1 %v791_v45  ;;  %2516 = vmatpush.bf16.msra.mxu0 %v11819_v48  ;;  %v11911_v45 = vld [vmem:[%s17832_s4 + $0x3f8] sm:$0xff]  ;;  %v11853_v48 = vld [vmem:[%s17832_s4 + $0x228] sm:$0xff] }
  0x5d   : > { %2477 = vmatmul.bf16.gmra.mxu2 %v792_v46  ;;  %2661 = vmatpush.bf16.msra.mxu1 %v11859_v24  ;;  %v11854_v46 = vld [vmem:[%s17832_s4 + $0x230] sm:$0xff]  ;;  %v11903_v24 = vld [vmem:[%s17832_s4 + $0x3b8] sm:$0xff] }
  0x5e   : > { %2612 = vmatmul.bf16.gmra.mxu3 %v747_v47  ;;  %2690 = vmatpush.bf16.msra.mxu2 %v11867_v25  ;;  %v11910_v47 = vld [vmem:[%s17832_s4 + $0x3f0] sm:$0xff]  ;;  %v694_v36 = vld [vmem:[%s12581_s30 + $0x598] sm:$0xff] }
  0x5f   : > { %2719 = vmatpush.bf16.msra.mxu3 %v11875_v49  ;;  %v11909_v49 = vld [vmem:[%s17832_s4 + $0x3e8] sm:$0xff]  ;;  %v574_v37 = vld [vmem:[%s12581_s30 + $0x1d8] sm:$0xff] }
  0x60   : > { %2517 = vmatpush.bf16.msra.mxu0 %v11818_v50  ;;  %v569_v50 = vld [vmem:[%s12581_s30 + $0x1b0] sm:$0xff] }
  0x61   : > { %2662 = vmatpush.bf16.msra.mxu1 %v11858_v26 }
  0x62   : > { %2691 = vmatpush.bf16.msra.mxu2 %v11866_v27  ;;  %v11894_v27 = vld [vmem:[%s17832_s4 + $0x370] sm:$0xff] }
  0x63   : > { %2720 = vmatpush.bf16.msra.mxu3 %v11874_v51  ;;  %v594_v51 = vld [vmem:[%s12581_s30 + $0x278] sm:$0xff] }
  0x64   : > { %2518 = vmatpush.bf16.msra.mxu0 %v11817_v52  ;;  %v670_v52 = vld [vmem:[%s12581_s30 + $0x4d8] sm:$0xff]  ;;  %v744_v58 = vpack.c.bf16 %v594_v51, %v569_v50 }
  0x65   : > { %2663 = vmatpush.bf16.msra.mxu1 %v11857_v28  ;;  %v11902_v28 = vld [vmem:[%s17832_s4 + $0x3b0] sm:$0xff] }
  0x66   : > { %2692 = vmatpush.bf16.msra.mxu2 %v11865_v29 }
  0x67   : > { %2721 = vmatpush.bf16.msra.mxu3 %v11873_v53  ;;  %v695_v53 = vld [vmem:[%s12581_s30 + $0x5a0] sm:$0xff] }
  0x68   : > { %2519 = vmatpush.bf16.msra.mxu0 %v11816_v62  ;;  %v795_v59 = vpack.c.bf16 %v695_v53, %v670_v52  ;;  %v796_v62 = vpack.c.bf16 %v696_v55, %v671_v54  ;;  %v11891_v55 = vld [vmem:[%s17832_s4 + $0x358] sm:$0xff] }
  0x69   : > { %2664 = vmatpush.bf16.msra.mxu1 %v11856_v40  ;;  %v600_v40 = vld [vmem:[%s12581_s30 + $0x2a8] sm:$0xff] }
  0x6a   : > { %2693 = vmatpush.bf16.msra.mxu2 %v11864_v41  ;;  %v676_v41 = vld [vmem:[%s12581_s30 + $0x508] sm:$0xff] }
  0x6b   : > { %2722 = vmatpush.bf16.msra.mxu3 %v11872_v63  ;;  %2491 = vmatmul.bf16.vlgmr.msrb.gmra.mxu0 %v718_v0  ;;  %v751_v63 = vpack.c.bf16 %v601_v57, %v576_v56  ;;  %v11851_v0 = vld [vmem:[%s17832_s4 + $0x218] sm:$0xff] }
  0x6c   : > { %2549 = vmatmul.bf16.vlgmr.msrb.gmra.mxu1 %v720_v1  ;;  %2628 = vmatpush.bf16.msrb.mxu0 %v11855_v44  ;;  %v11907_v1 = vld [vmem:[%s17832_s4 + $0x3d8] sm:$0xff] }
  0x6d   : > { %2578 = vmatmul.bf16.vlgmr.msrb.gmra.mxu2 %v721_v2  ;;  %v11850_v2 = vld [vmem:[%s17832_s4 + $0x210] sm:$0xff]  ;;  %v11899_v56 = vld [vmem:[%s17832_s4 + $0x398] sm:$0xff] }
  0x6e   : > { %2617 = vmatmul.bf16.gmra.mxu3 %v772_v3  ;;  %v11906_v3 = vld [vmem:[%s17832_s4 + $0x3d0] sm:$0xff]  ;;  %2802 = vmatpush.bf16.msrb.mxu2 %v11903_v24  ;;  %v11943_v24 = vld [vmem:[%s17832_s4 + $0x4f8] sm:$0xff] }
  0x6f   : > { %2831 = vmatpush.bf16.msrb.mxu3 %v11911_v45  ;;  %v794_v45 = vpack.c.bf16 %v694_v36, %v669_v35  ;;  %v11885_v35 = vld [vmem:[%s17832_s4 + $0x328] sm:$0xff] }
  0x70   : > { %2629 = vmatpush.bf16.msrb.mxu0 %v11854_v46  ;;  %v11941_v36 = vld [vmem:[%s17832_s4 + $0x4e8] sm:$0xff] }
  0x72   : > { %2803 = vmatpush.bf16.msrb.mxu2 %v11902_v28  ;;  %v11886_v28 = vld [vmem:[%s17832_s4 + $0x330] sm:$0xff] }
  0x73   : > { %2832 = vmatpush.bf16.msrb.mxu3 %v11910_v47  ;;  %v11892_v47 = vld [vmem:[%s17832_s4 + $0x360] sm:$0xff] }
  0x74   : > { %2630 = vmatpush.bf16.msrb.mxu0 %v11853_v48  ;;  %v11900_v48 = vld [vmem:[%s17832_s4 + $0x3a0] sm:$0xff] }
  0x76   : > { %2804 = vmatpush.bf16.msrb.mxu2 %v11901_v34 }
  0x77   : > { %2833 = vmatpush.bf16.msrb.mxu3 %v11909_v49 }
  0x78   : > { %2631 = vmatpush.bf16.msrb.mxu0 %v11852_v60  ;;  %v11898_v60 = vld [vmem:[%s17832_s4 + $0x390] sm:$0xff] }
  0x7a   : > { %2805 = vmatpush.bf16.msrb.mxu2 %v11900_v48 }
  0x7b   : > { %2496 = vmatmul.bf16.gmra.mxu0 %v743_v20  ;;  %2834 = vmatpush.bf16.msrb.mxu3 %v11908_v61  ;;  %v725_v20 = vpack.c.bf16 %v550_v11, %v525_v10  ;;  %v555_v10 = vld [vmem:[%s12581_s30 + $0x140] sm:$0xff] }
  0x7c   : > { %2554 = vmatmul.bf16.gmra.mxu1 %v745_v21  ;;  %2632 = vmatpush.bf16.msrb.mxu0 %v11851_v0  ;;  %v776_v21 = vpack.c.bf16 %v651_v13, %v626_v12 }
  0x7d   : > { %2583 = vmatmul.bf16.gmra.mxu2 %v746_v22 }
  0x7e   : > { %2622 = vmatmul.bf16.gmra.mxu3 %v797_v23  ;;  %v11895_v23 = vld [vmem:[%s17832_s4 + $0x378] sm:$0xff]  ;;  %2806 = vmatpush.bf16.msrb.mxu2 %v11899_v56 }
  0x7f   : > { %2835 = vmatpush.bf16.msrb.mxu3 %v11907_v1  ;;  %2773 = vmatpush.bf16.msrb.mxu1 %v11895_v23  ;;  %v11889_v1 = vld [vmem:[%s17832_s4 + $0x348] sm:$0xff]  ;;  %v11887_v23 = vld [vmem:[%s17832_s4 + $0x338] sm:$0xff] }
  0x80   : > { %2633 = vmatpush.bf16.msrb.mxu0 %v11850_v2  ;;  %v11897_v2 = vld [vmem:[%s17832_s4 + $0x388] sm:$0xff] }
  0x82   : > { %2807 = vmatpush.bf16.msrb.mxu2 %v11898_v60 }
  0x83   : > { %2836 = vmatpush.bf16.msrb.mxu3 %v11906_v3  ;;  %2774 = vmatpush.bf16.msrb.mxu1 %v11894_v27  ;;  %v523_v3 = vld [vmem:[%s12581_s30 + $0x40] sm:$0xff] }
  0x84   : > { %2634 = vmatpush.bf16.msrb.mxu0 %v11849_v4  ;;  %v548_v4 = vld [vmem:[%s12581_s30 + $0x108] sm:$0xff] }
  0x85   : > { %v723_v13 = vpack.c.bf16 %v548_v4, %v523_v3 }
  0x86   : > { %2808 = vmatpush.bf16.msrb.mxu2 %v11897_v2  ;;  %v11938_v2 = vld [vmem:[%s17832_s4 + $0x4d0] sm:$0xff] }
  0x87   : > { %2837 = vmatpush.bf16.msrb.mxu3 %v11905_v5  ;;  %2775 = vmatpush.bf16.msrb.mxu1 %v11893_v33  ;;  %v624_v5 = vld [vmem:[%s12581_s30 + $0x368] sm:$0xff] }
  0x88   : > { %2635 = vmatpush.bf16.msrb.mxu0 %v11848_v16  ;;  %v11896_v16 = vld [vmem:[%s17832_s4 + $0x380] sm:$0xff] }
  0x8a   : > { %2809 = vmatpush.bf16.msrb.mxu2 %v11896_v16  ;;  %v554_v16 = vld [vmem:[%s12581_s30 + $0x138] sm:$0xff] }
  0x8b   : > { %2520 = vmatmul.bf16.vlgmr.msra.gmra.mxu0 %v719_v38  ;;  %2838 = vmatpush.bf16.msrb.mxu3 %v11904_v17  ;;  %v599_v38 = vld [vmem:[%s12581_s30 + $0x2a0] sm:$0xff] }
  0x8c   : > { %2559 = vmatmul.bf16.gmra.mxu1 %v770_v39  ;;  %v575_v39 = vld [vmem:[%s12581_s30 + $0x1e0] sm:$0xff]  ;;  %v749_v46 = vpack.c.bf16 %v599_v38, %v574_v37  ;;  %2744 = vmatpush.bf16.msra.mxu0 %v11887_v23  ;;  %v573_v38 = vld [vmem:[%s12581_s30 + $0x1d0] sm:$0xff] }
  0x8d   : > { %2588 = vmatmul.bf16.gmra.mxu2 %v771_v42  ;;  %v701_v42 = vld [vmem:[%s12581_s30 + $0x5d0] sm:$0xff]  ;;  %v750_v52 = vpack.c.bf16 %v600_v40, %v575_v39  ;;  %2776 = vmatpush.bf16.msrb.mxu1 %v11892_v47  ;;  %v598_v39 = vld [vmem:[%s12581_s30 + $0x298] sm:$0xff] }
  0x8e   : > { %2723 = vmatmul.bf16.vlgmr.msra.gmra.mxu3 %v726_v43  ;;  %v801_v53 = vpack.c.bf16 %v701_v42, %v676_v41  ;;  %v674_v40 = vld [vmem:[%s12581_s30 + $0x4f8] sm:$0xff]  ;;  %v699_v41 = vld [vmem:[%s12581_s30 + $0x5c0] sm:$0xff] }
  0x8f   : > { %2947 = vmatpush.bf16.msra.mxu3 %v11943_v24  ;;  %v675_v42 = vld [vmem:[%s12581_s30 + $0x500] sm:$0xff] }
  0x90   : > { %2745 = vmatpush.bf16.msra.mxu0 %v11886_v28  ;;  %v11936_v24 = vld [vmem:[%s17832_s4 + $0x4c0] sm:$0xff] }
  0x91   : > { %2777 = vmatpush.bf16.msrb.mxu1 %v11891_v55 }
  0x94   : > { %2746 = vmatpush.bf16.msra.mxu0 %v11885_v35  ;;  %v11927_v35 = vld [vmem:[%s17832_s4 + $0x478] sm:$0xff] }
  0x9b   : > { %2525 = vmatmul.bf16.gmra.mxu0 %v744_v58 }
  0x9c   : > { %2564 = vmatmul.bf16.gmra.mxu1 %v795_v59  ;;  %v11890_v59 = vld [vmem:[%s17832_s4 + $0x350] sm:$0xff] }
  0x9d   : > { %2593 = vmatmul.bf16.gmra.mxu2 %v796_v62  ;;  %2778 = vmatpush.bf16.msrb.mxu1 %v11890_v59 }
  0x9e   : > { %2728 = vmatmul.bf16.gmra.mxu3 %v751_v63 }
  0xa1   : > { %2779 = vmatpush.bf16.msrb.mxu1 %v11889_v1  ;;  %v11882_v1 = vld [vmem:[%s17832_s4 + $0x310] sm:$0xff] }
  0xa8   : > { %v2405_v18 = vpop.f32.mrf.mxu0 }
  0xa9   : > { %v2434_v19 = vpop.f32.mrf.mxu1 }
  0xaa   : > { %v2435_v22 = vadd.f32 %v2434_v19, %v2405_v18 }
  0xab   : > { %2530 = vmatmul.bf16.gmra.mxu0 %v769_v14  ;;  %v774_v14 = vpack.c.bf16 %v649_v6, %v624_v5 }
  0xac   : > { %2665 = vmatmul.bf16.vlgmr.msra.gmra.mxu1 %v724_v15  ;;  %v11888_v15 = vld [vmem:[%s17832_s4 + $0x340] sm:$0xff] }
  0xad   : > { %2694 = vmatmul.bf16.vlgmr.msra.gmra.mxu2 %v725_v20  ;;  %v775_v20 = vpack.c.bf16 %v650_v8, %v625_v7  ;;  %2780 = vmatpush.bf16.msrb.mxu1 %v11888_v15  ;;  %v11881_v7 = vld [vmem:[%s17832_s4 + $0x308] sm:$0xff]  ;;  %v529_v15 = vld [vmem:[%s12581_s30 + $0x70] sm:$0xff] }
  0xae   : > { %2733 = vmatmul.bf16.gmra.mxu3 %v776_v21  ;;  %v730_v21 = vpack.c.bf16 %v555_v10, %v530_v9  ;;  %v11937_v8 = vld [vmem:[%s17832_s4 + $0x4c8] sm:$0xff]  ;;  %v623_v10 = vld [vmem:[%s12581_s30 + $0x360] sm:$0xff] }
  0xb0   : > { %v2463_v25 = vpop.f32.mrf.mxu2  ;;  %v2407_v30 = vpop.f32.mrf.mxu0 }
  0xb1   : > { %v12910_v26 = vpop.f32.mrf.mxu3  ;;  %v12918_v29 = vadd.f32 %v2463_v25, %v2435_v22  ;;  %v2436_v31 = vpop.f32.mrf.mxu1  ;;  %2889 = vmatpush.bf16.msra.mxu1 %v11927_v35  ;;  %v11928_v35 = vld [vmem:[%s17832_s4 + $0x480] sm:$0xff] }
  0xb2   : > { %v2437_v32 = vadd.f32 %v2436_v31, %v2407_v30  ;;  %v11942_v30 = vld [vmem:[%s17832_s4 + $0x4f0] sm:$0xff] }
  0xb3   : > { %2948 = vmatpush.bf16.msra.mxu3 %v11942_v30 }
  0xb7   : > { %2949 = vmatpush.bf16.msra.mxu3 %v11941_v36 }
  0xb8   : > { %v2465_v43 = vpop.f32.mrf.mxu2  ;;  %v2410_v50 = vpop.f32.mrf.mxu0 }
  0xb9   : > { %v12934_v44 = vpop.f32.mrf.mxu3  ;;  %v12942_v49 = vadd.f32 %v2465_v43, %v2437_v32  ;;  %v2439_v51 = vpop.f32.mrf.mxu1  ;;  %v700_v43 = vld [vmem:[%s12581_s30 + $0x5c8] sm:$0xff] }
  0xba   : > { %v2440_v54 = vadd.f32 %v2439_v51, %v2410_v50  ;;  %v748_v50 = vpack.c.bf16 %v598_v39, %v573_v38  ;;  %v799_v51 = vpack.c.bf16 %v699_v41, %v674_v40  ;;  %v800_v56 = vpack.c.bf16 %v700_v43, %v675_v42  ;;  %v11926_v38 = vld [vmem:[%s17832_s4 + $0x470] sm:$0xff] }
  0xbb   : > { %2535 = vmatmul.bf16.gmra.mxu0 %v794_v45  ;;  %v580_v45 = vld [vmem:[%s12581_s30 + $0x208] sm:$0xff]  ;;  %v11934_v39 = vld [vmem:[%s17832_s4 + $0x4b0] sm:$0xff]  ;;  %2890 = vmatpush.bf16.msra.mxu1 %v11926_v38 }
  0xbc   : > { %2670 = vmatmul.bf16.gmra.mxu1 %v749_v46  ;;  %v605_v46 = vld [vmem:[%s12581_s30 + $0x2d0] sm:$0xff] }
  0xbd   : > { %2699 = vmatmul.bf16.gmra.mxu2 %v750_v52  ;;  %v11940_v52 = vld [vmem:[%s17832_s4 + $0x4e0] sm:$0xff]  ;;  %v673_v43 = vld [vmem:[%s12581_s30 + $0x4f0] sm:$0xff] }
  0xbe   : > { %2738 = vmatmul.bf16.gmra.mxu3 %v801_v53 }
  0xbf   : > { %2950 = vmatpush.bf16.msra.mxu3 %v11940_v52  ;;  %v604_v52 = vld [vmem:[%s12581_s30 + $0x2c8] sm:$0xff] }
  0xc0   : > { %v2468_v57 = vpop.f32.mrf.mxu2  ;;  %v2412_v62 = vpop.f32.mrf.mxu0 }
  0xc1   : > { %v12950_v58 = vpop.f32.mrf.mxu3  ;;  %v12958_v61 = vadd.f32 %v2468_v57, %v2440_v54  ;;  %v2441_v63 = vpop.f32.mrf.mxu1  ;;  %v755_v57 = vpack.c.bf16 %v605_v46, %v580_v45  ;;  %v698_v45 = vld [vmem:[%s12581_s30 + $0x5b8] sm:$0xff]  ;;  %v11925_v46 = vld [vmem:[%s17832_s4 + $0x468] sm:$0xff] }
  0xc2   : > { %v2442_v0 = vadd.f32 %v2441_v63, %v2412_v62  ;;  %v11883_v62 = vld [vmem:[%s17832_s4 + $0x318] sm:$0xff]  ;;  %2891 = vmatpush.bf16.msra.mxu1 %v11925_v46 }
  0xc3   : > { %v11939_v63 = vld [vmem:[%s17832_s4 + $0x4d8] sm:$0xff] }
  0xc4   : > { %2951 = vmatpush.bf16.msra.mxu3 %v11939_v63  ;;  %v11919_v46 = vld [vmem:[%s17832_s4 + $0x438] sm:$0xff] }
  0xc8   : > { %v2470_v11 = vpop.f32.mrf.mxu2  ;;  %v2415_v18 = vpop.f32.mrf.mxu0  ;;  %2952 = vmatpush.bf16.msra.mxu3 %v11938_v2 }
  0xc9   : > { %v12974_v12 = vpop.f32.mrf.mxu3  ;;  %v12982_v17 = vadd.f32 %v2470_v11, %v2442_v0  ;;  %v2444_v19 = vpop.f32.mrf.mxu1  ;;  %v648_v11 = vld [vmem:[%s12581_s30 + $0x428] sm:$0xff] }
  0xca   : > { %v2445_v22 = vadd.f32 %v2444_v19, %v2415_v18  ;;  %v630_v18 = vld [vmem:[%s12581_s30 + $0x398] sm:$0xff]  ;;  %v655_v19 = vld [vmem:[%s12581_s30 + $0x460] sm:$0xff] }
  0xcb   : > { %2636 = vmatmul.bf16.vlgmr.msrb.gmra.mxu0 %v723_v13  ;;  %v528_v13 = vld [vmem:[%s12581_s30 + $0x68] sm:$0xff] }
  0xcc   : > { %2675 = vmatmul.bf16.gmra.mxu1 %v774_v14  ;;  %v553_v14 = vld [vmem:[%s12581_s30 + $0x130] sm:$0xff]  ;;  %2953 = vmatpush.bf16.msra.mxu3 %v11937_v8 }
  0xcd   : > { %2704 = vmatmul.bf16.gmra.mxu2 %v775_v20  ;;  %v728_v23 = vpack.c.bf16 %v553_v14, %v528_v13  ;;  %v11930_v8 = vld [vmem:[%s17832_s4 + $0x490] sm:$0xff]  ;;  %v527_v14 = vld [vmem:[%s12581_s30 + $0x60] sm:$0xff] }
  0xce   : > { %2839 = vmatmul.bf16.vlgmr.msrb.gmra.mxu3 %v730_v21 }
  0xd0   : > { %v2473_v25 = vpop.f32.mrf.mxu2  ;;  %v2417_v32 = vpop.f32.mrf.mxu0  ;;  %2954 = vmatpush.bf16.msra.mxu3 %v11936_v24  ;;  %v559_v24 = vld [vmem:[%s12581_s30 + $0x160] sm:$0xff] }
  0xd1   : > { %v12990_v27 = vpop.f32.mrf.mxu3  ;;  %v2474_v31 = vadd.f32 %v2473_v25, %v2445_v22  ;;  %v2446_v33 = vpop.f32.mrf.mxu1  ;;  %v773_v22 = vpack.c.bf16 %v648_v11, %v623_v10 }
  0xd2   : > { %v2447_v34 = vadd.f32 %v2446_v33, %v2417_v32  ;;  %v780_v32 = vpack.c.bf16 %v655_v19, %v630_v18  ;;  %v11929_v18 = vld [vmem:[%s17832_s4 + $0x488] sm:$0xff] }
  0xd3   : > { %v13005_v37 = vadd.f32 %v12910_v26, %v2474_v31  ;;  %v11884_v26 = vld [vmem:[%s17832_s4 + $0x320] sm:$0xff]  ;;  %v729_v31 = vpack.c.bf16 %v554_v16, %v529_v15  ;;  %v552_v15 = vld [vmem:[%s12581_s30 + $0x128] sm:$0xff] }
  0xd4   : > { %2747 = vmatpush.bf16.msra.mxu0 %v11884_v26  ;;  %v579_v26 = vld [vmem:[%s12581_s30 + $0x200] sm:$0xff]  ;;  %v11921_v16 = vld [vmem:[%s17832_s4 + $0x448] sm:$0xff] }
  0xd5   : > { %v628_v19 = vld [vmem:[%s12581_s30 + $0x388] sm:$0xff] }
  0xd8   : > { %v2475_v47 = vpop.f32.mrf.mxu2  ;;  %v2420_v54 = vpop.f32.mrf.mxu0  ;;  %2748 = vmatpush.bf16.msra.mxu0 %v11883_v62  ;;  %v11932_v62 = vld [vmem:[%s17832_s4 + $0x4a0] sm:$0xff] }
  0xd9   : > { %v13015_v48 = vpop.f32.mrf.mxu3  ;;  %v2476_v53 = vadd.f32 %v2475_v47, %v2447_v34  ;;  %v2449_v55 = vpop.f32.mrf.mxu1  ;;  %v11933_v47 = vld [vmem:[%s17832_s4 + $0x4a8] sm:$0xff] }
  0xda   : > { %v2450_v59 = vadd.f32 %v2449_v55, %v2420_v54  ;;  %v705_v54 = vld [vmem:[%s12581_s30 + $0x5f0] sm:$0xff] }
  0xdb   : > { %v13024_v60 = vadd.f32 %v12934_v44, %v2476_v53  ;;  %2641 = vmatmul.bf16.gmra.mxu0 %v748_v50  ;;  %v578_v50 = vld [vmem:[%s12581_s30 + $0x1f8] sm:$0xff]  ;;  %v680_v53 = vld [vmem:[%s12581_s30 + $0x528] sm:$0xff] }
  0xdc   : > { %2680 = vmatmul.bf16.gmra.mxu1 %v799_v51  ;;  %2749 = vmatpush.bf16.msra.mxu0 %v11882_v1  ;;  %v603_v51 = vld [vmem:[%s12581_s30 + $0x2c0] sm:$0xff]  ;;  %v754_v1 = vpack.c.bf16 %v604_v52, %v579_v26  ;;  %v805_v2 = vpack.c.bf16 %v705_v54, %v680_v53  ;;  %v11974_v26 = vld [vmem:[%s17832_s4 + $0x5f0] sm:$0xff] }
  0xdd   : > { %2709 = vmatmul.bf16.gmra.mxu2 %v800_v56  ;;  %v798_v56 = vpack.c.bf16 %v698_v45, %v673_v43 }
  0xde   : > { %2844 = vmatmul.bf16.gmra.mxu3 %v755_v57  ;;  %v753_v57 = vpack.c.bf16 %v603_v51, %v578_v50  ;;  %v11918_v51 = vld [vmem:[%s17832_s4 + $0x430] sm:$0xff] }
  0xe0   : > { %v2478_v0 = vpop.f32.mrf.mxu2  ;;  %v2422_v4 = vpop.f32.mrf.mxu0  ;;  %2750 = vmatpush.bf16.msra.mxu0 %v11881_v7  ;;  %v11922_v7 = vld [vmem:[%s17832_s4 + $0x450] sm:$0xff] }
  0xe1   : > { %v13032_v44 = vpop.f32.mrf.mxu3  ;;  %v2479_v3 = vadd.f32 %v2478_v0, %v2450_v59  ;;  %v2451_v5 = vpop.f32.mrf.mxu1  ;;  %v11924_v59 = vld [vmem:[%s17832_s4 + $0x460] sm:$0xff] }
  0xe2   : > { %v2452_v6 = vadd.f32 %v2451_v5, %v2422_v4  ;;  %2892 = vmatpush.bf16.msra.mxu1 %v11924_v59  ;;  %v11923_v4 = vld [vmem:[%s17832_s4 + $0x458] sm:$0xff] }
  0xe3   : > { %v13047_v9 = vadd.f32 %v12950_v58, %v2479_v3  ;;  %v11880_v58 = vld [vmem:[%s17832_s4 + $0x300] sm:$0xff]  ;;  %v11931_v5 = vld [vmem:[%s17832_s4 + $0x498] sm:$0xff] }
  0xe4   : > { %2751 = vmatpush.bf16.msra.mxu0 %v11880_v58  ;;  %v534_v58 = vld [vmem:[%s12581_s30 + $0x98] sm:$0xff] }
  0xe5   : > { %v602_v59 = vld [vmem:[%s12581_s30 + $0x2b8] sm:$0xff] }
  0xe6   : > { %2893 = vmatpush.bf16.msra.mxu1 %v11923_v4  ;;  %v704_v4 = vld [vmem:[%s12581_s30 + $0x5e8] sm:$0xff] }
  0xe8   : > { %v2480_v20 = vpop.f32.mrf.mxu2  ;;  %v2492_v28 = vpop.f32.mrf.mxu0  ;;  %2860 = vmatpush.bf16.msrb.mxu0 %v11919_v46  ;;  %v11913_v46 = vld [vmem:[%s17832_s4 + $0x408] sm:$0xff] }
  0xe9   : > { %v13057_v21 = vpop.f32.mrf.mxu3  ;;  %v2481_v25 = vadd.f32 %v2480_v20, %v2452_v6  ;;  %v13065_v30 = vpop.f32.mrf.mxu1  ;;  %v13068_v33 = vadd.f32 %v2492_v28, %v12918_v29  ;;  %v11935_v29 = vld [vmem:[%s17832_s4 + $0x4b8] sm:$0xff]  ;;  %v653_v20 = vld [vmem:[%s12581_s30 + $0x450] sm:$0xff]  ;;  %v727_v28 = vpack.c.bf16 %v552_v15, %v527_v14  ;;  %v11916_v15 = vld [vmem:[%s17832_s4 + $0x420] sm:$0xff] }
  0xea   : > { %2918 = vmatpush.bf16.msra.mxu2 %v11935_v29  ;;  %2894 = vmatpush.bf16.msra.mxu1 %v11922_v7 }
  0xeb   : > { %v13071_v34 = vadd.f32 %v12974_v12, %v2481_v25  ;;  %2646 = vmatmul.bf16.gmra.mxu0 %v773_v22  ;;  %v629_v22 = vld [vmem:[%s12581_s30 + $0x390] sm:$0xff] }
  0xec   : > { %2781 = vmatmul.bf16.vlgmr.msrb.gmra.mxu1 %v728_v23  ;;  %v654_v23 = vld [vmem:[%s12581_s30 + $0x458] sm:$0xff]  ;;  %2861 = vmatpush.bf16.msrb.mxu0 %v11918_v51  ;;  %v533_v51 = vld [vmem:[%s12581_s30 + $0x90] sm:$0xff] }
  0xed   : > { %2810 = vmatmul.bf16.vlgmr.msrb.gmra.mxu2 %v729_v31  ;;  %v778_v31 = vpack.c.bf16 %v653_v20, %v628_v19 }
  0xee   : > { %2849 = vmatmul.bf16.gmra.mxu3 %v780_v32  ;;  %2919 = vmatpush.bf16.msra.mxu2 %v11934_v39  ;;  %v11920_v32 = vld [vmem:[%s17832_s4 + $0x440] sm:$0xff]  ;;  %v779_v39 = vpack.c.bf16 %v654_v23, %v629_v22 }
  0xef   : > { %2895 = vmatpush.bf16.msra.mxu1 %v11921_v16  ;;  %v11972_v16 = vld [vmem:[%s17832_s4 + $0x5e0] sm:$0xff] }
  0xf0   : > { %v13079_v12 = vpop.f32.mrf.mxu2  ;;  %v2494_v40 = vpop.f32.mrf.mxu0 }
  0xf1   : > { %v13081_v36 = vpop.f32.mrf.mxu3  ;;  %v13089_v41 = vpop.f32.mrf.mxu1  ;;  %v13092_v42 = vadd.f32 %v2494_v40, %v12942_v49  ;;  %v734_v40 = vpack.c.bf16 %v559_v24, %v534_v58  ;;  %v11915_v24 = vld [vmem:[%s17832_s4 + $0x418] sm:$0xff] }
  0xf2   : > { %2920 = vmatpush.bf16.msra.mxu2 %v11933_v47  ;;  %v11975_v47 = vld [vmem:[%s17832_s4 + $0x5f8] sm:$0xff] }
  0xf3   : > { %2896 = vmatpush.bf16.msra.mxu1 %v11920_v32  ;;  %3063 = vmatpush.bf16.msrb.mxu3 %v11975_v47  ;;  %v11970_v32 = vld [vmem:[%s17832_s4 + $0x5d0] sm:$0xff]  ;;  %v532_v47 = vld [vmem:[%s12581_s30 + $0x88] sm:$0xff] }
  0xf6   : > { %2921 = vmatpush.bf16.msra.mxu2 %v11932_v62  ;;  %v11917_v62 = vld [vmem:[%s17832_s4 + $0x428] sm:$0xff] }
  0xf7   : > { %3064 = vmatpush.bf16.msrb.mxu3 %v11974_v26  ;;  %2862 = vmatpush.bf16.msrb.mxu0 %v11917_v62  ;;  %v558_v26 = vld [vmem:[%s12581_s30 + $0x158] sm:$0xff]  ;;  %v11912_v62 = vld [vmem:[%s17832_s4 + $0x400] sm:$0xff] }
  0xf8   : > { %v13108_v49 = vpop.f32.mrf.mxu2  ;;  %v2497_v63 = vpop.f32.mrf.mxu0 }
  0xf9   : > { %v13110_v55 = vpop.f32.mrf.mxu3  ;;  %v13118_v0 = vpop.f32.mrf.mxu1  ;;  %v13121_v3 = vadd.f32 %v2497_v63, %v12958_v61  ;;  %v678_v63 = vld [vmem:[%s12581_s30 + $0x518] sm:$0xff] }
  0xfa   : > { %2922 = vmatpush.bf16.msra.mxu2 %v11931_v5  ;;  %v584_v5 = vld [vmem:[%s12581_s30 + $0x228] sm:$0xff] }
  0xfb   : > { %2651 = vmatmul.bf16.gmra.mxu0 %v798_v56  ;;  %v577_v56 = vld [vmem:[%s12581_s30 + $0x1f0] sm:$0xff] }
  0xfc   : > { %2786 = vmatmul.bf16.gmra.mxu1 %v753_v57  ;;  %2863 = vmatpush.bf16.msrb.mxu0 %v11916_v15  ;;  %v11966_v15 = vld [vmem:[%s17832_s4 + $0x5b0] sm:$0xff] }
  0xfd   : > { %2815 = vmatmul.bf16.gmra.mxu2 %v754_v1  ;;  %v703_v1 = vld [vmem:[%s12581_s30 + $0x5e0] sm:$0xff] }
  0xfe   : > { %2854 = vmatmul.bf16.gmra.mxu3 %v805_v2  ;;  %2923 = vmatpush.bf16.msra.mxu2 %v11930_v8  ;;  %v679_v2 = vld [vmem:[%s12581_s30 + $0x520] sm:$0xff]  ;;  %v803_v14 = vpack.c.bf16 %v703_v1, %v678_v63 }
  0xff   : > { %v804_v20 = vpack.c.bf16 %v704_v4, %v679_v2  ;;  %v733_v2 = vpack.c.bf16 %v558_v26, %v533_v51 }
 0x100   : > { %v13129_v61 = vpop.f32.mrf.mxu2  ;;  %v2499_v10 = vpop.f32.mrf.mxu0  ;;  %2864 = vmatpush.bf16.msrb.mxu0 %v11915_v24  ;;  %v13319_v24 = vld [vmem:[%s17832_s4 + $0x568] sm:$0xff] }
 0x101   : > { %v13131_v6 = vpop.f32.mrf.mxu3  ;;  %v13139_v11 = vpop.f32.mrf.mxu1  ;;  %v13142_v13 = vadd.f32 %v2499_v10, %v12982_v17  ;;  %v752_v10 = vpack.c.bf16 %v602_v59, %v577_v56 }
 0x102   : > { %2924 = vmatpush.bf16.msra.mxu2 %v11929_v18 }
 0x106   : > { %2925 = vmatpush.bf16.msra.mxu2 %v11928_v35 }
 0x108   : > { %v13158_v17 = vpop.f32.mrf.mxu2  ;;  %v2521_v29 = vpop.f32.mrf.mxu0 }
 0x109   : > { %v13160_v25 = vpop.f32.mrf.mxu3  ;;  %v13168_v38 = vpop.f32.mrf.mxu1  ;;  %v2522_v43 = vadd.f32 %v2521_v29, %v13068_v33 }
 0x10b   : > { %v2551_v45 = vadd.f32 %v13065_v30, %v2522_v43  ;;  %2752 = vmatmul.bf16.vlgmr.msra.gmra.mxu0 %v727_v28 }
 0x10c   : > { %2791 = vmatmul.bf16.gmra.mxu1 %v778_v31  ;;  %v11914_v31 = vld [vmem:[%s17832_s4 + $0x410] sm:$0xff] }
 0x10d   : > { %2820 = vmatmul.bf16.gmra.mxu2 %v779_v39  ;;  %v2580_v33 = vadd.f32 %v13079_v12, %v2551_v45  ;;  %2865 = vmatpush.bf16.msrb.mxu0 %v11914_v31  ;;  %v652_v45 = vld [vmem:[%s12581_s30 + $0x448] sm:$0xff]  ;;  %v583_v31 = vld [vmem:[%s12581_s30 + $0x220] sm:$0xff] }
 0x10e   : > { %2955 = vmatmul.bf16.vlgmr.msra.gmra.mxu3 %v734_v40  ;;  %v627_v40 = vld [vmem:[%s12581_s30 + $0x380] sm:$0xff] }
 0x10f   : > { %v13190_v12 = vadd.f32 %v12990_v27, %v2580_v33  ;;  %v11973_v27 = vld [vmem:[%s17832_s4 + $0x5e8] sm:$0xff]  ;;  %v557_v33 = vld [vmem:[%s12581_s30 + $0x150] sm:$0xff] }
 0x110   : > { %v13179_v30 = vpop.f32.mrf.mxu2  ;;  %v2523_v52 = vpop.f32.mrf.mxu0  ;;  %3065 = vmatpush.bf16.msrb.mxu3 %v11973_v27  ;;  %v732_v59 = vpack.c.bf16 %v557_v33, %v532_v47  ;;  %v11968_v27 = vld [vmem:[%s17832_s4 + $0x5c0] sm:$0xff] }
 0x111   : > { %v13181_v50 = vpop.f32.mrf.mxu3  ;;  %v13192_v53 = vpop.f32.mrf.mxu1  ;;  %v2524_v54 = vadd.f32 %v2523_v52, %v13092_v42  ;;  %v609_v42 = vld [vmem:[%s12581_s30 + $0x2f0] sm:$0xff]  ;;  %v634_v52 = vld [vmem:[%s12581_s30 + $0x3b8] sm:$0xff]  ;;  %2866 = vmatpush.bf16.msrb.mxu0 %v11913_v46  ;;  %v13339_v46 = vld [vmem:[%s17832_s4 + $0x560] sm:$0xff] }
 0x112   : > { %v759_v22 = vpack.c.bf16 %v609_v42, %v584_v5 }
 0x113   : > { %v2553_v57 = vadd.f32 %v13089_v41, %v2524_v54 }
 0x114   : > { %3066 = vmatpush.bf16.msrb.mxu3 %v11972_v16 }
 0x115   : > { %v2582_v7 = vadd.f32 %v13108_v49, %v2553_v57  ;;  %v777_v57 = vpack.c.bf16 %v652_v45, %v627_v40  ;;  %2867 = vmatpush.bf16.msrb.mxu0 %v11912_v62  ;;  %v11962_v62 = vld [vmem:[%s17832_s4 + $0x590] sm:$0xff] }
 0x117   : > { %v13222_v18 = vadd.f32 %v13015_v48, %v2582_v7  ;;  %v11971_v48 = vld [vmem:[%s17832_s4 + $0x5d8] sm:$0xff] }
 0x118   : > { %v13211_v41 = vpop.f32.mrf.mxu2  ;;  %v2526_v19 = vpop.f32.mrf.mxu0  ;;  %3067 = vmatpush.bf16.msrb.mxu3 %v11971_v48  ;;  %v13287_v7 = vld [vmem:[%s17832_s4 + $0x578] sm:$0xff] }
 0x119   : > { %v13213_v8 = vpop.f32.mrf.mxu3  ;;  %v13224_v49 = vpop.f32.mrf.mxu1  ;;  %v2527_v23 = vadd.f32 %v2526_v19, %v13121_v3  ;;  %12368 = vmatpush.bf16.msrb.mxu1 %v13287_v7  ;;  %v582_v48 = vld [vmem:[%s12581_s30 + $0x218] sm:$0xff] }
 0x11b   : > { %v2556_v58 = vadd.f32 %v13118_v0, %v2527_v23  ;;  %2757 = vmatmul.bf16.gmra.mxu0 %v752_v10 }
 0x11c   : > { %2796 = vmatmul.bf16.gmra.mxu1 %v803_v14  ;;  %3068 = vmatpush.bf16.msrb.mxu3 %v11970_v32  ;;  %v13301_v14 = vld [vmem:[%s17832_s4 + $0x570] sm:$0xff]  ;;  %v684_v32 = vld [vmem:[%s12581_s30 + $0x548] sm:$0xff] }
 0x11d   : > { %2825 = vmatmul.bf16.gmra.mxu2 %v804_v20  ;;  %v2585_v3 = vadd.f32 %v13129_v61, %v2556_v58  ;;  %12369 = vmatpush.bf16.msrb.mxu1 %v13301_v14  ;;  %v702_v58 = vld [vmem:[%s12581_s30 + $0x5d8] sm:$0xff] }
 0x11e   : > { %2960 = vmatmul.bf16.gmra.mxu3 %v759_v22  ;;  %v677_v22 = vld [vmem:[%s12581_s30 + $0x510] sm:$0xff] }
 0x11f   : > { %v13246_v61 = vadd.f32 %v13032_v44, %v2585_v3  ;;  %v11969_v44 = vld [vmem:[%s17832_s4 + $0x5c8] sm:$0xff]  ;;  %v607_v3 = vld [vmem:[%s12581_s30 + $0x2e0] sm:$0xff] }
 0x120   : > { %v13235_v0 = vpop.f32.mrf.mxu2  ;;  %v2528_v35 = vpop.f32.mrf.mxu0  ;;  %3069 = vmatpush.bf16.msrb.mxu3 %v11969_v44  ;;  %v757_v45 = vpack.c.bf16 %v607_v3, %v582_v48  ;;  %v11964_v44 = vld [vmem:[%s17832_s4 + $0x5a0] sm:$0xff] }
 0x121   : > { %v13237_v28 = vpop.f32.mrf.mxu3  ;;  %v13248_v29 = vpop.f32.mrf.mxu1  ;;  %v2529_v39 = vadd.f32 %v2528_v35, %v13142_v13  ;;  %v659_v13 = vld [vmem:[%s12581_s30 + $0x480] sm:$0xff]  ;;  %v709_v35 = vld [vmem:[%s12581_s30 + $0x610] sm:$0xff]  ;;  %12370 = vmatpush.bf16.msrb.mxu1 %v13319_v24 }
 0x122   : > { %v784_v4 = vpack.c.bf16 %v659_v13, %v634_v52  ;;  %v809_v26 = vpack.c.bf16 %v709_v35, %v684_v32  ;;  %v13407_v3 = vld [vmem:[%s17832_s4 + $0x540] sm:$0xff] }
 0x123   : > { %v2558_v43 = vadd.f32 %v13139_v11, %v2529_v39 }
 0x124   : > { %3070 = vmatpush.bf16.msrb.mxu3 %v11968_v27 }
 0x125   : > { %v2587_v54 = vadd.f32 %v13158_v17, %v2558_v43  ;;  %v802_v43 = vpack.c.bf16 %v702_v58, %v677_v22  ;;  %12371 = vmatpush.bf16.msrb.mxu1 %v13339_v46  ;;  %v563_v22 = vld [vmem:[%s12581_s30 + $0x180] sm:$0xff] }
 0x127   : > { %v13278_v63 = vadd.f32 %v13057_v21, %v2587_v54  ;;  %v11967_v21 = vld [vmem:[%s17832_s4 + $0x5b8] sm:$0xff] }
 0x128   : > { %v13267_v11 = vpop.f32.mrf.mxu2  ;;  %v2531_v1 = vpop.f32.mrf.mxu0  ;;  %3034 = vmatpush.bf16.msrb.mxu2 %v11967_v21  ;;  %v13355_v54 = vld [vmem:[%s17832_s4 + $0x558] sm:$0xff]  ;;  %v13387_v21 = vld [vmem:[%s17832_s4 + $0x548] sm:$0xff] }
 0x129   : > { %v13269_v56 = vpop.f32.mrf.mxu3  ;;  %v13280_v17 = vpop.f32.mrf.mxu1  ;;  %v2532_v5 = vadd.f32 %v2531_v1, %v13005_v37  ;;  %12372 = vmatpush.bf16.msrb.mxu1 %v13355_v54 }
 0x12b   : > { %v2561_v42 = vadd.f32 %v13168_v38, %v2532_v5  ;;  %2762 = vmatmul.bf16.gmra.mxu0 %v777_v57 }
 0x12c   : > { %2897 = vmatmul.bf16.vlgmr.msra.gmra.mxu1 %v732_v59  ;;  %3035 = vmatpush.bf16.msrb.mxu2 %v11966_v15  ;;  %v13369_v59 = vld [vmem:[%s17832_s4 + $0x550] sm:$0xff] }
 0x12d   : > { %2926 = vmatmul.bf16.vlgmr.msra.gmra.mxu2 %v733_v2  ;;  %v2590_v37 = vadd.f32 %v13179_v30, %v2561_v42  ;;  %12373 = vmatpush.bf16.msrb.mxu1 %v13369_v59  ;;  %v556_v42 = vld [vmem:[%s12581_s30 + $0x148] sm:$0xff]  ;;  %v657_v15 = vld [vmem:[%s12581_s30 + $0x470] sm:$0xff] }
 0x12e   : > { %2965 = vmatmul.bf16.gmra.mxu3 %v784_v4  ;;  %v531_v4 = vld [vmem:[%s12581_s30 + $0x80] sm:$0xff] }
 0x12f   : > { %v13307_v30 = vadd.f32 %v13081_v36, %v2590_v37  ;;  %v11965_v36 = vld [vmem:[%s17832_s4 + $0x5a8] sm:$0xff] }
 0x130   : > { %v13294_v38 = vpop.f32.mrf.mxu2  ;;  %v2533_v16 = vpop.f32.mrf.mxu0  ;;  %3036 = vmatpush.bf16.msrb.mxu2 %v11965_v36  ;;  %v632_v37 = vld [vmem:[%s12581_s30 + $0x3a8] sm:$0xff]  ;;  %v731_v36 = vpack.c.bf16 %v556_v42, %v531_v4  ;;  %v682_v4 = vld [vmem:[%s12581_s30 + $0x538] sm:$0xff]  ;;  %v683_v42 = vld [vmem:[%s12581_s30 + $0x540] sm:$0xff] }
 0x131   : > { %v13296_v10 = vpop.f32.mrf.mxu3  ;;  %v13309_v19 = vpop.f32.mrf.mxu1  ;;  %v2534_v20 = vadd.f32 %v2533_v16, %v13024_v60  ;;  %v608_v60 = vld [vmem:[%s12581_s30 + $0x2e8] sm:$0xff]  ;;  %v633_v16 = vld [vmem:[%s12581_s30 + $0x3b0] sm:$0xff]  ;;  %12374 = vmatpush.bf16.msrb.mxu1 %v13387_v21  ;;  %v782_v48 = vpack.c.bf16 %v657_v15, %v632_v37 }
 0x132   : > { %v758_v51 = vpack.c.bf16 %v608_v60, %v583_v31  ;;  %v11960_v31 = vld [vmem:[%s17832_s4 + $0x580] sm:$0xff]  ;;  %v588_v37 = vld [vmem:[%s12581_s30 + $0x248] sm:$0xff] }
 0x133   : > { %v2563_v23 = vadd.f32 %v13192_v53, %v2534_v20  ;;  %v538_v20 = vld [vmem:[%s12581_s30 + $0xb8] sm:$0xff] }
 0x134   : > { %3037 = vmatpush.bf16.msrb.mxu2 %v11964_v44  ;;  %v11951_v44 = vld [vmem:[%s17832_s4 + $0x538] sm:$0xff] }
 0x135   : > { %v2592_v53 = vadd.f32 %v13211_v41, %v2563_v23  ;;  %12375 = vmatpush.bf16.msrb.mxu1 %v13407_v3  ;;  %2976 = vmatpush.bf16.msra.mxu0 %v11951_v44 }
 0x137   : > { %v13345_v47 = vadd.f32 %v13110_v55, %v2592_v53  ;;  %v11963_v55 = vld [vmem:[%s17832_s4 + $0x598] sm:$0xff]  ;;  %v738_v53 = vpack.c.bf16 %v563_v22, %v538_v20  ;;  %v11948_v22 = vld [vmem:[%s17832_s4 + $0x520] sm:$0xff] }
 0x138   : > { %v13332_v39 = vpop.f32.mrf.mxu2  ;;  %v2536_v41 = vpop.f32.mrf.mxu0  ;;  %3038 = vmatpush.bf16.msrb.mxu2 %v11963_v55 }
 0x139   : > { %v13334_v40 = vpop.f32.mrf.mxu3  ;;  %v13347_v33 = vpop.f32.mrf.mxu1  ;;  %v2537_v52 = vadd.f32 %v2536_v41, %v13047_v9 }
 0x13b   : > { %v2566_v13 = vadd.f32 %v13224_v49, %v2537_v52  ;;  %2767 = vmatmul.bf16.gmra.mxu0 %v802_v43 }
 0x13c   : > { %2902 = vmatmul.bf16.gmra.mxu1 %v757_v45  ;;  %3039 = vmatpush.bf16.msrb.mxu2 %v11962_v62 }
 0x13d   : > { %2931 = vmatmul.bf16.gmra.mxu2 %v758_v51  ;;  %v2595_v9 = vadd.f32 %v13235_v0, %v2566_v13  ;;  %v11950_v51 = vld [vmem:[%s17832_s4 + $0x530] sm:$0xff] }
 0x13e   : > { %2970 = vmatmul.bf16.gmra.mxu3 %v809_v26  ;;  %v12002_v26 = vld [vmem:[%s17833_s5 + $0xb0] sm:$0xff]  ;;  %2977 = vmatpush.bf16.msra.mxu0 %v11950_v51 }
 0x13f   : > { %v13375_v0 = vadd.f32 %v13131_v6, %v2595_v9  ;;  %v11961_v6 = vld [vmem:[%s17832_s4 + $0x588] sm:$0xff]  ;;  %v581_v9 = vld [vmem:[%s12581_s30 + $0x210] sm:$0xff] }
 0x140   : > { %v13362_v49 = vpop.f32.mrf.mxu2  ;;  %v2538_v27 = vpop.f32.mrf.mxu0  ;;  %3040 = vmatpush.bf16.msrb.mxu2 %v11961_v6  ;;  %v708_v6 = vld [vmem:[%s12581_s30 + $0x608] sm:$0xff] }
 0x141   : > { %v13364_v57 = vpop.f32.mrf.mxu3  ;;  %v13377_v1 = vpop.f32.mrf.mxu1  ;;  %v2539_v2 = vadd.f32 %v2538_v27, %v13071_v34  ;;  %v658_v34 = vld [vmem:[%s12581_s30 + $0x478] sm:$0xff] }
 0x142   : > { %v783_v35 = vpack.c.bf16 %v658_v34, %v633_v16  ;;  %v606_v27 = vld [vmem:[%s12581_s30 + $0x2d8] sm:$0xff] }
 0x143   : > { %v2568_v5 = vadd.f32 %v13248_v29, %v2539_v2  ;;  %v11949_v2 = vld [vmem:[%s17832_s4 + $0x528] sm:$0xff]  ;;  %v756_v34 = vpack.c.bf16 %v606_v27, %v581_v9  ;;  %v631_v9 = vld [vmem:[%s12581_s30 + $0x3a0] sm:$0xff] }
 0x144   : > { %3041 = vmatpush.bf16.msrb.mxu2 %v11960_v31  ;;  %2978 = vmatpush.bf16.msra.mxu0 %v11949_v2  ;;  %v808_v31 = vpack.c.bf16 %v708_v6, %v683_v42  ;;  %v11985_v2 = vld [vmem:[%s17833_s5 + $0x28] sm:$0xff]  ;;  %v562_v42 = vld [vmem:[%s12581_s30 + $0x178] sm:$0xff] }
 0x145   : > { %v2597_v29 = vadd.f32 %v13267_v11, %v2568_v5  ;;  %v707_v5 = vld [vmem:[%s12581_s30 + $0x600] sm:$0xff]  ;;  %v638_v6 = vld [vmem:[%s12581_s30 + $0x3d8] sm:$0xff] }
 0x146   : > { %v807_v20 = vpack.c.bf16 %v707_v5, %v682_v4  ;;  %v611_v4 = vld [vmem:[%s12581_s30 + $0x300] sm:$0xff]  ;;  %v537_v5 = vld [vmem:[%s12581_s30 + $0xb0] sm:$0xff] }
 0x147   : > { %v13413_v60 = vadd.f32 %v13160_v25, %v2597_v29  ;;  %v12003_v25 = vld [vmem:[%s17833_s5 + $0xb8] sm:$0xff]  ;;  %v12000_v29 = vld [vmem:[%s17833_s5 + $0xa0] sm:$0xff] }
 0x148   : > { %v13400_v23 = vpop.f32.mrf.mxu2  ;;  %v2637_v11 = vpop.f32.mrf.mxu0  ;;  %3821 = vmatpush.bf16.msra.mxu3 %v12003_v25  ;;  %2979 = vmatpush.bf16.msra.mxu0 %v11948_v22  ;;  %v11946_v25 = vld [vmem:[%s17832_s4 + $0x510] sm:$0xff]  ;;  %v11944_v22 = vld [vmem:[%s17832_s4 + $0x500] sm:$0xff] }
 0x149   : > { %v13402_v58 = vpop.f32.mrf.mxu3  ;;  %v13415_v32 = vpop.f32.mrf.mxu1  ;;  %v2638_v43 = vadd.f32 %v2637_v11, %v13190_v12 }
 0x14b   : > { %v2667_v45 = vadd.f32 %v13280_v17, %v2638_v43  ;;  %2868 = vmatmul.bf16.vlgmr.msrb.gmra.mxu0 %v731_v36  ;;  %v11947_v43 = vld [vmem:[%s17832_s4 + $0x518] sm:$0xff] }
 0x14c   : > { %2907 = vmatmul.bf16.gmra.mxu1 %v782_v48  ;;  %3822 = vmatpush.bf16.msra.mxu3 %v12002_v26 }
 0x14d   : > { %2936 = vmatmul.bf16.gmra.mxu2 %v783_v35  ;;  %v2696_v12 = vadd.f32 %v13294_v38, %v2667_v45  ;;  %2980 = vmatpush.bf16.msra.mxu0 %v11947_v43 }
 0x14e   : > { %3071 = vmatmul.bf16.vlgmr.msrb.gmra.mxu3 %v738_v53 }
 0x14f   : > { %v13438_v38 = vadd.f32 %v13181_v50, %v2696_v12  ;;  %v12001_v50 = vld [vmem:[%s17833_s5 + $0xa8] sm:$0xff]  ;;  %v11986_v12 = vld [vmem:[%s17833_s5 + $0x30] sm:$0xff] }
 0x150   : > { %v13427_v17 = vpop.f32.mrf.mxu2  ;;  %v2639_v52 = vpop.f32.mrf.mxu0  ;;  %3823 = vmatpush.bf16.msra.mxu3 %v12001_v50  ;;  %v11997_v50 = vld [vmem:[%s17833_s5 + $0x88] sm:$0xff] }
 0x151   : > { %v13429_v41 = vpop.f32.mrf.mxu3  ;;  %v13440_v13 = vpop.f32.mrf.mxu1  ;;  %v2640_v55 = vadd.f32 %v2639_v52, %v13222_v18  ;;  %v613_v18 = vld [vmem:[%s12581_s30 + $0x310] sm:$0xff]  ;;  %2981 = vmatpush.bf16.msra.mxu0 %v11946_v25 }
 0x152   : > { %v763_v11 = vpack.c.bf16 %v613_v18, %v588_v37  ;;  %v663_v37 = vld [vmem:[%s12581_s30 + $0x4a0] sm:$0xff]  ;;  %v11982_v25 = vld [vmem:[%s17833_s5 + $0x10] sm:$0xff] }
 0x153   : > { %v2669_v62 = vadd.f32 %v13309_v19, %v2640_v55 }
 0x154   : > { %3824 = vmatpush.bf16.msra.mxu3 %v12000_v29  ;;  %v11984_v29 = vld [vmem:[%s17833_s5 + $0x20] sm:$0xff] }
 0x155   : > { %v2698_v15 = vadd.f32 %v13332_v39, %v2669_v62  ;;  %v656_v62 = vld [vmem:[%s12581_s30 + $0x468] sm:$0xff] }
 0x157   : > { %v13470_v36 = vadd.f32 %v13213_v8, %v2698_v15  ;;  %v11987_v8 = vld [vmem:[%s17833_s5 + $0x38] sm:$0xff] }
 0x158   : > { %v13459_v19 = vpop.f32.mrf.mxu2  ;;  %v2642_v48 = vpop.f32.mrf.mxu0  ;;  %3723 = vmatpush.bf16.msra.mxu1 %v11987_v8 }
 0x159   : > { %v13461_v16 = vpop.f32.mrf.mxu3  ;;  %v13472_v39 = vpop.f32.mrf.mxu1  ;;  %v2643_v35 = vadd.f32 %v2642_v48, %v13246_v61  ;;  %v11999_v61 = vld [vmem:[%s17833_s5 + $0x98] sm:$0xff] }
 0x15a   : > { %3825 = vmatpush.bf16.msra.mxu3 %v11999_v61  ;;  %v11983_v61 = vld [vmem:[%s17833_s5 + $0x18] sm:$0xff] }
 0x15b   : > { %v2672_v53 = vadd.f32 %v13347_v33, %v2643_v35  ;;  %2873 = vmatmul.bf16.gmra.mxu0 %v756_v34  ;;  %v781_v34 = vpack.c.bf16 %v656_v62, %v631_v9  ;;  %v737_v35 = vpack.c.bf16 %v562_v42, %v537_v5  ;;  %v706_v62 = vld [vmem:[%s12581_s30 + $0x5f8] sm:$0xff] }
 0x15c   : > { %2912 = vmatmul.bf16.gmra.mxu1 %v807_v20 }
 0x15d   : > { %2941 = vmatmul.bf16.gmra.mxu2 %v808_v31  ;;  %v2701_v33 = vadd.f32 %v13362_v49, %v2672_v53  ;;  %v11998_v49 = vld [vmem:[%s17833_s5 + $0x90] sm:$0xff]  ;;  %3724 = vmatpush.bf16.msra.mxu1 %v11986_v12  ;;  %v788_v53 = vpack.c.bf16 %v663_v37, %v638_v6  ;;  %v11980_v37 = vld [vmem:[%s17833_s5] sm:$0xff] }
 0x15e   : > { %3076 = vmatmul.bf16.gmra.mxu3 %v763_v11 }
 0x15f   : > { %v13500_v51 = vadd.f32 %v13237_v28, %v2701_v33  ;;  %3826 = vmatpush.bf16.msra.mxu3 %v11998_v49  ;;  %v11945_v28 = vld [vmem:[%s17832_s4 + $0x508] sm:$0xff] }
 0x160   : > { %v13486_v45 = vpop.f32.mrf.mxu2  ;;  %v2644_v26 = vpop.f32.mrf.mxu0  ;;  %2982 = vmatpush.bf16.msra.mxu0 %v11945_v28  ;;  %v636_v28 = vld [vmem:[%s12581_s30 + $0x3c8] sm:$0xff] }
 0x161   : > { %v13488_v44 = vpop.f32.mrf.mxu3  ;;  %v13502_v52 = vpop.f32.mrf.mxu1  ;;  %v2645_v55 = vadd.f32 %v2644_v26, %v13278_v63  ;;  %v586_v63 = vld [vmem:[%s12581_s30 + $0x238] sm:$0xff]  ;;  %3725 = vmatpush.bf16.msra.mxu1 %v11985_v2  ;;  %v661_v2 = vld [vmem:[%s12581_s30 + $0x490] sm:$0xff] }
 0x162   : > { %v761_v20 = vpack.c.bf16 %v611_v4, %v586_v63  ;;  %v688_v63 = vld [vmem:[%s12581_s30 + $0x568] sm:$0xff]  ;;  %v786_v6 = vpack.c.bf16 %v661_v2, %v636_v28 }
 0x163   : > { %v2674_v27 = vadd.f32 %v13377_v1, %v2645_v55  ;;  %3827 = vmatpush.bf16.msra.mxu3 %v11997_v50  ;;  %v681_v55 = vld [vmem:[%s12581_s30 + $0x530] sm:$0xff]  ;;  %v587_v50 = vld [vmem:[%s12581_s30 + $0x240] sm:$0xff] }
 0x164   : > { %2983 = vmatpush.bf16.msra.mxu0 %v11944_v22  ;;  %v806_v42 = vpack.c.bf16 %v706_v62, %v681_v55  ;;  %v11988_v62 = vld [vmem:[%s17833_s5 + $0x40] sm:$0xff] }
 0x165   : > { %v2703_v1 = vadd.f32 %v13400_v23, %v2674_v27  ;;  %v11996_v23 = vld [vmem:[%s17833_s5 + $0x80] sm:$0xff]  ;;  %3726 = vmatpush.bf16.msra.mxu1 %v11984_v29  ;;  %v11993_v27 = vld [vmem:[%s17833_s5 + $0x68] sm:$0xff] }
 0x167   : > { %v13538_v48 = vadd.f32 %v13269_v56, %v2703_v1  ;;  %3828 = vmatpush.bf16.msra.mxu3 %v11996_v23  ;;  %v11995_v56 = vld [vmem:[%s17833_s5 + $0x78] sm:$0xff]  ;;  %v11992_v1 = vld [vmem:[%s17833_s5 + $0x60] sm:$0xff] }
 0x168   : > { %v13524_v18 = vpop.f32.mrf.mxu2  ;;  %v2647_v31 = vpop.f32.mrf.mxu0  ;;  %3005 = vmatpush.bf16.msrb.mxu0 %v13287_v7  ;;  %3772 = vmatpush.bf16.msra.mxu2 %v11995_v56  ;;  %v686_v56 = vld [vmem:[%s12581_s30 + $0x558] sm:$0xff] }
 0x169   : > { %v13526_v15 = vpop.f32.mrf.mxu3  ;;  %v13540_v11 = vpop.f32.mrf.mxu1  ;;  %v2648_v43 = vadd.f32 %v2647_v31, %v13307_v30  ;;  %3727 = vmatpush.bf16.msra.mxu1 %v11983_v61  ;;  %v11989_v61 = vld [vmem:[%s17833_s5 + $0x48] sm:$0xff] }
 0x16b   : > { %v2677_v8 = vadd.f32 %v13415_v32, %v2648_v43  ;;  %2878 = vmatmul.bf16.gmra.mxu0 %v781_v34 }
 0x16c   : > { %3018 = vmatmul.bf16.vlgmr.msrb.gmra.mxu1 %v761_v20  ;;  %3006 = vmatpush.bf16.msrb.mxu0 %v13301_v14  ;;  %v713_v14 = vld [vmem:[%s12581_s30 + $0x630] sm:$0xff] }
 0x16d   : > { %3042 = vmatmul.bf16.vlgmr.msrb.gmra.mxu2 %v737_v35  ;;  %v2706_v30 = vadd.f32 %v13427_v17, %v2677_v8  ;;  %v11994_v17 = vld [vmem:[%s17833_s5 + $0x70] sm:$0xff]  ;;  %3728 = vmatpush.bf16.msra.mxu1 %v11982_v25  ;;  %v813_v22 = vpack.c.bf16 %v713_v14, %v688_v63  ;;  %v535_v8 = vld [vmem:[%s12581_s30 + $0xa0] sm:$0xff] }
 0x16e   : > { %3081 = vmatmul.bf16.gmra.mxu3 %v788_v53  ;;  %3773 = vmatpush.bf16.msra.mxu2 %v11994_v17  ;;  %v3140_v25 = vld [vmem:[%s13627_s17 + $0x10] sm:$0xff]  ;;  %v3147_v17 = vld [vmem:[%s13627_s17 + $0x48] sm:$0xff] }
 0x16f   : > { %v13563_v7 = vadd.f32 %v13296_v10, %v2706_v30  ;;  %v11981_v10 = vld [vmem:[%s17833_s5 + $0x8] sm:$0xff]  ;;  %v637_v30 = vld [vmem:[%s12581_s30 + $0x3d0] sm:$0xff]  ;;  %v3252_v2 = vpack.c.bf16 %v3147_v17, %v3140_v25 }
 0x170   : > { %v13552_v32 = vpop.f32.mrf.mxu2  ;;  %v2649_v12 = vpop.f32.mrf.mxu0  ;;  %3007 = vmatpush.bf16.msrb.mxu0 %v13319_v24  ;;  %v3152_v25 = vld [vmem:[%s13627_s17 + $0x70] sm:$0xff]  ;;  %v3159_v17 = vld [vmem:[%s13627_s17 + $0xa8] sm:$0xff] }
 0x171   : > { %v13554_v33 = vpop.f32.mrf.mxu3  ;;  %v13565_v49 = vpop.f32.mrf.mxu1  ;;  %v2650_v26 = vadd.f32 %v2649_v12, %v13345_v47  ;;  %v612_v47 = vld [vmem:[%s12581_s30 + $0x308] sm:$0xff]  ;;  %3729 = vmatpush.bf16.msra.mxu1 %v11981_v10 }
 0x172   : > { %3774 = vmatpush.bf16.msra.mxu2 %v11993_v27  ;;  %v762_v20 = vpack.c.bf16 %v612_v47, %v587_v50 }
 0x173   : > { %v2679_v9 = vadd.f32 %v13440_v13, %v2650_v26 }
 0x174   : > { %3008 = vmatpush.bf16.msrb.mxu0 %v13339_v46 }
 0x175   : > { %v2708_v4 = vadd.f32 %v13459_v19, %v2679_v9  ;;  %3730 = vmatpush.bf16.msra.mxu1 %v11980_v37  ;;  %v687_v37 = vld [vmem:[%s12581_s30 + $0x560] sm:$0xff] }
 0x176   : > { %3775 = vmatpush.bf16.msra.mxu2 %v11992_v1  ;;  %v3138_v1 = vld [vmem:[%s13627_s17] sm:$0xff] }
 0x177   : > { %v13597_v19 = vadd.f32 %v13334_v40, %v2708_v4  ;;  %v11991_v40 = vld [vmem:[%s17833_s5 + $0x58] sm:$0xff] }
 0x178   : > { %v13586_v13 = vpop.f32.mrf.mxu2  ;;  %v2652_v24 = vpop.f32.mrf.mxu0  ;;  %3009 = vmatpush.bf16.msrb.mxu0 %v13355_v54 }
 0x179   : > { %v13588_v5 = vpop.f32.mrf.mxu3  ;;  %v13599_v34 = vpop.f32.mrf.mxu1  ;;  %v2653_v29 = vadd.f32 %v2652_v24, %v13375_v0  ;;  %v3145_v24 = vld [vmem:[%s13627_s17 + $0x38] sm:$0xff] }
 0x17a   : > { %3776 = vmatpush.bf16.msra.mxu2 %v11991_v40 }
 0x17b   : > { %v2682_v23 = vadd.f32 %v13472_v39, %v2653_v29  ;;  %2883 = vmatmul.bf16.gmra.mxu0 %v806_v42  ;;  %v11990_v39 = vld [vmem:[%s17833_s5 + $0x50] sm:$0xff] }
 0x17c   : > { %3023 = vmatmul.bf16.gmra.mxu1 %v786_v6  ;;  %3010 = vmatpush.bf16.msrb.mxu0 %v13369_v59  ;;  %v662_v59 = vld [vmem:[%s12581_s30 + $0x498] sm:$0xff]  ;;  %v585_v42 = vld [vmem:[%s12581_s30 + $0x230] sm:$0xff] }
 0x17d   : > { %3047 = vmatmul.bf16.gmra.mxu2 %v762_v20  ;;  %v2711_v31 = vadd.f32 %v13486_v45, %v2682_v23  ;;  %v610_v6 = vld [vmem:[%s12581_s30 + $0x2f8] sm:$0xff]  ;;  %v3154_v20 = vld [vmem:[%s13627_s17 + $0x80] sm:$0xff] }
 0x17e   : > { %3086 = vmatmul.bf16.gmra.mxu3 %v813_v22  ;;  %3777 = vmatpush.bf16.msra.mxu2 %v11990_v39  ;;  %v3161_v22 = vld [vmem:[%s13627_s17 + $0xb8] sm:$0xff]  ;;  %v760_v40 = vpack.c.bf16 %v610_v6, %v585_v42 }
 0x17f   : > { %v13618_v35 = vadd.f32 %v13364_v57, %v2711_v31  ;;  %v560_v57 = vld [vmem:[%s12581_s30 + $0x168] sm:$0xff]  ;;  %v3250_v31 = vpack.c.bf16 %v3145_v24, %v3138_v1  ;;  %v685_v24 = vld [vmem:[%s12581_s30 + $0x550] sm:$0xff] }
 0x180   : > { %v13610_v46 = vpop.f32.mrf.mxu2  ;;  %v2654_v45 = vpop.f32.mrf.mxu0  ;;  %3011 = vmatpush.bf16.msrb.mxu0 %v13387_v21  ;;  %v735_v55 = vpack.c.bf16 %v560_v57, %v535_v8 }
 0x181   : > { %v13612_v0 = vpop.f32.mrf.mxu3  ;;  %v13620_v53 = vpop.f32.mrf.mxu1  ;;  %v2655_v54 = vadd.f32 %v2654_v45, %v13413_v60  ;;  %v711_v60 = vld [vmem:[%s12581_s30 + $0x620] sm:$0xff] }
 0x182   : > { %3778 = vmatpush.bf16.msra.mxu2 %v11989_v61  ;;  %v811_v9 = vpack.c.bf16 %v711_v60, %v686_v56 }
 0x183   : > { %v2684_v43 = vadd.f32 %v13502_v52, %v2655_v54  ;;  %v3259_v54 = vpack.c.bf16 %v3161_v22, %v3154_v20  ;;  %v11977_v20 = vld [vmem:[%s17832_s4 + $0x608] sm:$0xff]  ;;  %v3166_v22 = vld [vmem:[%s13627_s17 + $0xe0] sm:$0xff] }
 0x184   : > { %3012 = vmatpush.bf16.msrb.mxu0 %v13407_v3 }
 0x185   : > { %v2713_v12 = vadd.f32 %v13524_v18, %v2684_v43  ;;  %v787_v18 = vpack.c.bf16 %v662_v59, %v637_v30  ;;  %v635_v30 = vld [vmem:[%s12581_s30 + $0x3c0] sm:$0xff]  ;;  %v660_v59 = vld [vmem:[%s12581_s30 + $0x488] sm:$0xff] }
 0x186   : > { %3779 = vmatpush.bf16.msra.mxu2 %v11988_v62 }
 0x187   : > { %v13651_v10 = vadd.f32 %v13402_v58, %v2713_v12  ;;  %v3139_v12 = vld [vmem:[%s13627_s17 + $0x8] sm:$0xff] }
 0x188   : > { %v13643_v26 = vpop.f32.mrf.mxu2  ;;  %v2753_v27 = vpop.f32.mrf.mxu0 }
 0x189   : > { %v13645_v52 = vpop.f32.mrf.mxu3  ;;  %v13653_v28 = vpop.f32.mrf.mxu1  ;;  %v2754_v21 = vadd.f32 %v2753_v27, %v13438_v38 }
 0x18b   : > { %v2783_v50 = vadd.f32 %v13540_v11, %v2754_v21  ;;  %2984 = vmatmul.bf16.vlgmr.msra.gmra.mxu0 %v735_v55  ;;  %v3168_v55 = vld [vmem:[%s13627_s17 + $0xf0] sm:$0xff] }
 0x18c   : > { %3028 = vmatmul.bf16.gmra.mxu1 %v811_v9  ;;  %v3175_v9 = vld [vmem:[%s13627_s17 + $0x128] sm:$0xff] }
 0x18d   : > { %3052 = vmatmul.bf16.gmra.mxu2 %v787_v18  ;;  %v2812_v58 = vadd.f32 %v13552_v32, %v2783_v50  ;;  %v712_v32 = vld [vmem:[%s12581_s30 + $0x628] sm:$0xff]  ;;  %v785_v18 = vpack.c.bf16 %v660_v59, %v635_v30 }
 0x18e   : > { %3829 = vmatmul.bf16.vlgmr.msra.gmra.mxu3 %v3252_v2  ;;  %v812_v45 = vpack.c.bf16 %v712_v32, %v687_v37  ;;  %v3257_v2 = vpack.c.bf16 %v3159_v17, %v3152_v25  ;;  %v710_v32 = vld [vmem:[%s12581_s30 + $0x618] sm:$0xff] }
 0x18f   : > { %v13664_v3 = vadd.f32 %v13429_v41, %v2812_v58  ;;  %v3266_v58 = vpack.c.bf16 %v3175_v9, %v3168_v55  ;;  %v536_v9 = vld [vmem:[%s12581_s30 + $0xa8] sm:$0xff] }
 0x190   : > { %v13659_v38 = vpop.f32.mrf.mxu2  ;;  %v2755_v63 = vpop.f32.mrf.mxu0 }
 0x191   : > { %v13661_v47 = vpop.f32.mrf.mxu3  ;;  %v13666_v11 = vpop.f32.mrf.mxu1  ;;  %v2756_v14 = vadd.f32 %v2755_v63, %v13470_v36 }
 0x193   : > { %v2785_v4 = vadd.f32 %v13565_v49, %v2756_v14 }
 0x195   : > { %v2814_v29 = vadd.f32 %v13586_v13, %v2785_v4  ;;  %v11978_v4 = vld [vmem:[%s17832_s4 + $0x610] sm:$0xff] }
 0x197   : > { %v13684_v36 = vadd.f32 %v13461_v16, %v2814_v29  ;;  %v3173_v29 = vld [vmem:[%s13627_s17 + $0x118] sm:$0xff] }
 0x198   : > { %v13679_v23 = vpop.f32.mrf.mxu2  ;;  %v2758_v49 = vpop.f32.mrf.mxu0 }
 0x199   : > { %v13681_v41 = vpop.f32.mrf.mxu3  ;;  %v13686_v39 = vpop.f32.mrf.mxu1  ;;  %v2759_v43 = vadd.f32 %v2758_v49, %v13500_v51  ;;  %v3189_v49 = vld [vmem:[%s13627_s17 + $0x198] sm:$0xff] }
 0x19b   : > { %v2788_v13 = vadd.f32 %v13599_v34, %v2759_v43  ;;  %2989 = vmatmul.bf16.gmra.mxu0 %v760_v40  ;;  %v3153_v40 = vld [vmem:[%s13627_s17 + $0x78] sm:$0xff]  ;;  %v3264_v43 = vpack.c.bf16 %v3173_v29, %v3166_v22 }
 0x19c   : > { %3731 = vmatmul.bf16.vlgmr.msra.gmra.mxu1 %v3250_v31  ;;  %v3160_v31 = vld [vmem:[%s13627_s17 + $0xb0] sm:$0xff] }
 0x19d   : > { %3057 = vmatmul.bf16.gmra.mxu2 %v812_v45  ;;  %v2817_v16 = vadd.f32 %v13610_v46, %v2788_v13  ;;  %v3146_v46 = vld [vmem:[%s13627_s17 + $0x40] sm:$0xff] }
 0x19e   : > { %3834 = vmatmul.bf16.gmra.mxu3 %v3259_v54  ;;  %v3251_v50 = vpack.c.bf16 %v3146_v46, %v3139_v12  ;;  %v11976_v13 = vld [vmem:[%s17832_s4 + $0x600] sm:$0xff] }
 0x19f   : > { %v13696_v51 = vadd.f32 %v13488_v44, %v2817_v16 }
 0x1a0   : > { %v13691_v8 = vpop.f32.mrf.mxu2  ;;  %v2760_v61 = vpop.f32.mrf.mxu0 }
 0x1a1   : > { %v13693_v57 = vpop.f32.mrf.mxu3  ;;  %v13698_v34 = vpop.f32.mrf.mxu1  ;;  %v2761_v56 = vadd.f32 %v2760_v61, %v13538_v48 }
 0x1a3   : > { %v2790_v60 = vadd.f32 %v13620_v53, %v2761_v56 }
 0x1a5   : > { %v2819_v62 = vadd.f32 %v13643_v26, %v2790_v60  ;;  %v11979_v26 = vld [vmem:[%s17832_s4 + $0x618] sm:$0xff]  ;;  %v3258_v60 = vpack.c.bf16 %v3160_v31, %v3153_v40  ;;  %v539_v40 = vld [vmem:[%s12581_s30 + $0xc0] sm:$0xff]  ;;  %v564_v31 = vld [vmem:[%s12581_s30 + $0x188] sm:$0xff] }
 0x1a6   : > { %3096 = vmatpush.bf16.msra.mxu0 %v11979_v26 }
 0x1a7   : > { %v13716_v48 = vadd.f32 %v13526_v15, %v2819_v62  ;;  %v561_v62 = vld [vmem:[%s12581_s30 + $0x170] sm:$0xff] }
 0x1a8   : > { %v13711_v27 = vpop.f32.mrf.mxu2  ;;  %v2763_v53 = vpop.f32.mrf.mxu0  ;;  %v736_v26 = vpack.c.bf16 %v561_v62, %v536_v9  ;;  %v12010_v9 = vld [vmem:[%s17833_s5 + $0xf0] sm:$0xff] }
 0x1a9   : > { %v13713_v44 = vpop.f32.mrf.mxu3  ;;  %v13718_v21 = vpop.f32.mrf.mxu1  ;;  %v2764_v63 = vadd.f32 %v2763_v53, %v13563_v7  ;;  %v3167_v53 = vld [vmem:[%s13627_s17 + $0xe8] sm:$0xff]  ;;  %v12018_v62 = vld [vmem:[%s17833_s5 + $0x130] sm:$0xff] }
 0x1aa   : > { %3097 = vmatpush.bf16.msra.mxu0 %v11978_v4 }
 0x1ab   : > { %v2793_v14 = vadd.f32 %v13653_v28, %v2764_v63  ;;  %2994 = vmatmul.bf16.gmra.mxu0 %v785_v18  ;;  %v3180_v18 = vld [vmem:[%s13627_s17 + $0x150] sm:$0xff] }
 0x1ac   : > { %3736 = vmatmul.bf16.gmra.mxu1 %v3257_v2  ;;  %v3187_v2 = vld [vmem:[%s13627_s17 + $0x188] sm:$0xff] }
 0x1ad   : > { %3780 = vmatmul.bf16.vlgmr.msra.gmra.mxu2 %v3251_v50  ;;  %v2822_v15 = vadd.f32 %v13659_v38, %v2793_v14  ;;  %v3196_v50 = vld [vmem:[%s13627_s17 + $0x1d0] sm:$0xff] }
 0x1ae   : > { %3839 = vmatmul.bf16.gmra.mxu3 %v3266_v58  ;;  %3098 = vmatpush.bf16.msra.mxu0 %v11977_v20  ;;  %v3203_v58 = vld [vmem:[%s13627_s17 + $0x208] sm:$0xff] }
 0x1af   : > { %v13734_v42 = vadd.f32 %v13554_v33, %v2822_v15  ;;  %v3182_v33 = vld [vmem:[%s13627_s17 + $0x160] sm:$0xff]  ;;  %v3271_v15 = vpack.c.bf16 %v3187_v2, %v3180_v18 }
 0x1b0   : > { %v13726_v7 = vpop.f32.mrf.mxu2  ;;  %v2765_v6 = vpop.f32.mrf.mxu0  ;;  %v3273_v30 = vpack.c.bf16 %v3189_v49, %v3182_v33  ;;  %v3194_v33 = vld [vmem:[%s13627_s17 + $0x1c0] sm:$0xff]  ;;  %v3201_v49 = vld [vmem:[%s13627_s17 + $0x1f8] sm:$0xff] }
 0x1b1   : > { %v13728_v28 = vpop.f32.mrf.mxu3  ;;  %v13736_v37 = vpop.f32.mrf.mxu1  ;;  %v2766_v1 = vadd.f32 %v2765_v6, %v13597_v19 }
 0x1b2   : > { %3099 = vmatpush.bf16.msra.mxu0 %v11976_v13 }
 0x1b3   : > { %v2795_v38 = vadd.f32 %v13666_v11, %v2766_v1  ;;  %v810_v11 = vpack.c.bf16 %v710_v32, %v685_v24  ;;  %v3280_v1 = vpack.c.bf16 %v3203_v58, %v3196_v50  ;;  %v614_v58 = vld [vmem:[%s12581_s30 + $0x318] sm:$0xff] }
 0x1b5   : > { %v2824_v45 = vadd.f32 %v13679_v23, %v2795_v38 }
 0x1b7   : > { %v13760_v16 = vadd.f32 %v13588_v5, %v2824_v45  ;;  %v3181_v45 = vld [vmem:[%s13627_s17 + $0x158] sm:$0xff] }
 0x1b8   : > { %v13752_v54 = vpop.f32.mrf.mxu2  ;;  %v2768_v61 = vpop.f32.mrf.mxu0 }
 0x1b9   : > { %v13754_v19 = vpop.f32.mrf.mxu3  ;;  %v13762_v56 = vpop.f32.mrf.mxu1  ;;  %v2769_v23 = vadd.f32 %v2768_v61, %v13618_v35 }
 0x1bb   : > { %v2798_v59 = vadd.f32 %v13686_v39, %v2769_v23  ;;  %2999 = vmatmul.bf16.gmra.mxu0 %v810_v11  ;;  %v3210_v11 = vld [vmem:[%s13627_s17 + $0x240] sm:$0xff] }
 0x1bc   : > { %3741 = vmatmul.bf16.gmra.mxu1 %v3264_v43  ;;  %v3217_v43 = vld [vmem:[%s13627_s17 + $0x278] sm:$0xff] }
 0x1bd   : > { %3785 = vmatmul.bf16.gmra.mxu2 %v3258_v60  ;;  %v2827_v5 = vadd.f32 %v13691_v8, %v2798_v59  ;;  %v3174_v8 = vld [vmem:[%s13627_s17 + $0x120] sm:$0xff]  ;;  %v739_v60 = vpack.c.bf16 %v564_v31, %v539_v40 }
 0x1be   : > { %3844 = vmatmul.bf16.gmra.mxu3 %v3273_v30  ;;  %v3265_v6 = vpack.c.bf16 %v3174_v8, %v3167_v53  ;;  %v3278_v30 = vpack.c.bf16 %v3201_v49, %v3194_v33  ;;  %v589_v8 = vld [vmem:[%s12581_s30 + $0x250] sm:$0xff]  ;;  %v12028_v40 = vld [vmem:[%s17833_s5 + $0x180] sm:$0xff] }
 0x1bf   : > { %v13772_v35 = vadd.f32 %v13612_v0, %v2827_v5  ;;  %v3287_v5 = vpack.c.bf16 %v3217_v43, %v3210_v11  ;;  %4024 = vmatpush.bf16.msrb.mxu3 %v12028_v40  ;;  %v12015_v43 = vld [vmem:[%s17833_s5 + $0x118] sm:$0xff] }
 0x1c0   : > { %v13767_v25 = vpop.f32.mrf.mxu2  ;;  %v2770_v12 = vpop.f32.mrf.mxu0 }
 0x1c1   : > { %v13769_v17 = vpop.f32.mrf.mxu3  ;;  %v13774_v39 = vpop.f32.mrf.mxu1  ;;  %v2771_v46 = vadd.f32 %v2770_v12, %v13651_v10 }
 0x1c3   : > { %v2800_v55 = vadd.f32 %v13698_v34, %v2771_v46 }
 0x1c5   : > { %v2829_v63 = vadd.f32 %v13711_v27, %v2800_v55 }
 0x1c7   : > { %v13792_v10 = vadd.f32 %v13645_v52, %v2829_v63  ;;  %v12009_v63 = vld [vmem:[%s17833_s5 + $0xe8] sm:$0xff] }
 0x1c8   : > { %v13787_v14 = vpop.f32.mrf.mxu2  ;;  %v2869_v34 = vpop.f32.mrf.mxu0 }
 0x1c9   : > { %v13789_v0 = vpop.f32.mrf.mxu3  ;;  %v13794_v4 = vpop.f32.mrf.mxu1  ;;  %v2870_v38 = vadd.f32 %v2869_v34, %v13664_v3  ;;  %v3195_v34 = vld [vmem:[%s13627_s17 + $0x1c8] sm:$0xff] }
 0x1cb   : > { %v2899_v27 = vadd.f32 %v13718_v21, %v2870_v38  ;;  %3013 = vmatmul.bf16.vlgmr.msrb.gmra.mxu0 %v736_v26  ;;  %v3208_v26 = vld [vmem:[%s13627_s17 + $0x230] sm:$0xff] }
 0x1cc   : > { %3746 = vmatmul.bf16.gmra.mxu1 %v3271_v15  ;;  %v3215_v15 = vld [vmem:[%s13627_s17 + $0x268] sm:$0xff] }
 0x1cd   : > { %3790 = vmatmul.bf16.gmra.mxu2 %v3265_v6  ;;  %v2928_v52 = vadd.f32 %v13726_v7, %v2899_v27  ;;  %v3188_v7 = vld [vmem:[%s13627_s17 + $0x190] sm:$0xff]  ;;  %v3202_v6 = vld [vmem:[%s13627_s17 + $0x200] sm:$0xff] }
 0x1ce   : > { %3849 = vmatmul.bf16.gmra.mxu3 %v3280_v1  ;;  %v3272_v59 = vpack.c.bf16 %v3188_v7, %v3181_v45  ;;  %v3224_v1 = vld [vmem:[%s13627_s17 + $0x2b0] sm:$0xff]  ;;  %v3279_v49 = vpack.c.bf16 %v3202_v6, %v3195_v34  ;;  %v12012_v6 = vld [vmem:[%s17833_s5 + $0x100] sm:$0xff] }
 0x1cf   : > { %v13804_v3 = vadd.f32 %v13661_v47, %v2928_v52  ;;  %v764_v52 = vpack.c.bf16 %v614_v58, %v589_v8  ;;  %v3216_v8 = vld [vmem:[%s13627_s17 + $0x270] sm:$0xff]  ;;  %v3245_v58 = vld [vmem:[%s13627_s17 + $0x358] sm:$0xff] }
 0x1d0   : > { %v13799_v24 = vpop.f32.mrf.mxu2  ;;  %v2871_v20 = vpop.f32.mrf.mxu0 }
 0x1d1   : > { %v13801_v32 = vpop.f32.mrf.mxu3  ;;  %v13806_v21 = vpop.f32.mrf.mxu1  ;;  %v2872_v22 = vadd.f32 %v2871_v20, %v13684_v36  ;;  %v3285_v20 = vpack.c.bf16 %v3215_v15, %v3208_v26 }
 0x1d3   : > { %v2901_v29 = vadd.f32 %v13736_v37, %v2872_v22  ;;  %v12008_v22 = vld [vmem:[%s17833_s5 + $0xe0] sm:$0xff] }
 0x1d5   : > { %v2930_v13 = vadd.f32 %v13752_v54, %v2901_v29  ;;  %v12011_v54 = vld [vmem:[%s17833_s5 + $0xf8] sm:$0xff]  ;;  %v12016_v29 = vld [vmem:[%s17833_s5 + $0x120] sm:$0xff] }
 0x1d6   : > { %3870 = vmatpush.bf16.msrb.mxu0 %v12011_v54  ;;  %v12005_v54 = vld [vmem:[%s17833_s5 + $0xc8] sm:$0xff] }
 0x1d7   : > { %v13824_v36 = vadd.f32 %v13681_v41, %v2930_v13  ;;  %v12019_v41 = vld [vmem:[%s17833_s5 + $0x138] sm:$0xff] }
 0x1d8   : > { %v13819_v61 = vpop.f32.mrf.mxu2  ;;  %v2874_v37 = vpop.f32.mrf.mxu0  ;;  %3919 = vmatpush.bf16.msrb.mxu1 %v12019_v41  ;;  %v12025_v41 = vld [vmem:[%s17833_s5 + $0x168] sm:$0xff] }
 0x1d9   : > { %v13821_v47 = vpop.f32.mrf.mxu3  ;;  %v13826_v23 = vpop.f32.mrf.mxu1  ;;  %v2875_v12 = vadd.f32 %v2874_v37, %v13696_v51  ;;  %v12014_v37 = vld [vmem:[%s17833_s5 + $0x110] sm:$0xff] }
 0x1da   : > { %3871 = vmatpush.bf16.msrb.mxu0 %v12010_v9  ;;  %v639_v9 = vld [vmem:[%s12581_s30 + $0x3e0] sm:$0xff] }
 0x1db   : > { %v2904_v46 = vadd.f32 %v13762_v56, %v2875_v12  ;;  %10165 = vmatmul.msk.bf16.vlgmr.msra.gmra.mxu0 %vm2383_vm0, %v739_v60 }
 0x1dc   : > { %3751 = vmatmul.bf16.gmra.mxu1 %v3278_v30  ;;  %v12006_v30 = vld [vmem:[%s17833_s5 + $0xd0] sm:$0xff] }
 0x1dd   : > { %3795 = vmatmul.bf16.gmra.mxu2 %v3272_v59  ;;  %v2933_v51 = vadd.f32 %v13767_v25, %v2904_v46  ;;  %3920 = vmatpush.bf16.msrb.mxu1 %v12018_v62  ;;  %v664_v62 = vld [vmem:[%s12581_s30 + $0x4a8] sm:$0xff] }
 0x1de   : > { %3854 = vmatmul.bf16.gmra.mxu3 %v3287_v5  ;;  %3872 = vmatpush.bf16.msrb.mxu0 %v12009_v63  ;;  %v789_v15 = vpack.c.bf16 %v664_v62, %v639_v9 }
 0x1df   : > { %v13849_v25 = vadd.f32 %v13693_v57, %v2933_v51  ;;  %v12017_v57 = vld [vmem:[%s17833_s5 + $0x128] sm:$0xff] }
 0x1e0   : > { %v13838_v56 = vpop.f32.mrf.mxu2  ;;  %v2876_v18 = vpop.f32.mrf.mxu0 }
 0x1e1   : > { %v13840_v55 = vpop.f32.mrf.mxu3  ;;  %v13851_v2 = vpop.f32.mrf.mxu1  ;;  %v2877_v53 = vadd.f32 %v2876_v18, %v13716_v48  ;;  %v3231_v48 = vld [vmem:[%s13627_s17 + $0x2e8] sm:$0xff]  ;;  %3921 = vmatpush.bf16.msrb.mxu1 %v12017_v57  ;;  %v3229_v18 = vld [vmem:[%s13627_s17 + $0x2d8] sm:$0xff] }
 0x1e2   : > { %v3294_v45 = vpack.c.bf16 %v3231_v48, %v3224_v1  ;;  %3873 = vmatpush.bf16.msrb.mxu0 %v12008_v22 }
 0x1e3   : > { %v2906_v50 = vadd.f32 %v13774_v39, %v2877_v53  ;;  %v3209_v53 = vld [vmem:[%s13627_s17 + $0x238] sm:$0xff] }
 0x1e5   : > { %v2935_v38 = vadd.f32 %v13787_v14, %v2906_v50  ;;  %3922 = vmatpush.bf16.msrb.mxu1 %v12016_v29  ;;  %v3238_v50 = vld [vmem:[%s13627_s17 + $0x320] sm:$0xff] }
 0x1e7   : > { %v13884_v14 = vadd.f32 %v13713_v44, %v2935_v38  ;;  %v12007_v44 = vld [vmem:[%s17833_s5 + $0xd8] sm:$0xff] }
 0x1e8   : > { %v13870_v39 = vpop.f32.mrf.mxu2  ;;  %v2879_v31 = vpop.f32.mrf.mxu0  ;;  %3874 = vmatpush.bf16.msrb.mxu0 %v12007_v44  ;;  %v689_v44 = vld [vmem:[%s12581_s30 + $0x570] sm:$0xff] }
 0x1e9   : > { %v13872_v27 = vpop.f32.mrf.mxu3  ;;  %v13886_v33 = vpop.f32.mrf.mxu1  ;;  %v2880_v7 = vadd.f32 %v2879_v31, %v13734_v42  ;;  %v12027_v42 = vld [vmem:[%s17833_s5 + $0x178] sm:$0xff]  ;;  %3923 = vmatpush.bf16.msrb.mxu1 %v12015_v43  ;;  %v12022_v31 = vld [vmem:[%s17833_s5 + $0x150] sm:$0xff] }
 0x1ea   : > { %3968 = vmatpush.bf16.msrb.mxu2 %v12027_v42  ;;  %v714_v43 = vld [vmem:[%s12581_s30 + $0x638] sm:$0xff]  ;;  %v12021_v42 = vld [vmem:[%s17833_s5 + $0x148] sm:$0xff] }
 0x1eb   : > { %v2909_v11 = vadd.f32 %v13794_v4, %v2880_v7  ;;  %10166 = vmatmul.msk.bf16.gmra.mxu0 %vm2383_vm0, %v764_v52  ;;  %v3286_v52 = vpack.c.bf16 %v3216_v8, %v3209_v53 }
 0x1ec   : > { %3756 = vmatmul.bf16.gmra.mxu1 %v3285_v20  ;;  %3875 = vmatpush.bf16.msrb.mxu0 %v12006_v30  ;;  %v3301_v20 = vpack.c.bf16 %v3245_v58, %v3238_v50  ;;  %v3243_v30 = vld [vmem:[%s13627_s17 + $0x348] sm:$0xff]  ;;  %v3237_v58 = vld [vmem:[%s13627_s17 + $0x318] sm:$0xff] }
 0x1ed   : > { %3800 = vmatmul.bf16.gmra.mxu2 %v3279_v49  ;;  %v2938_v4 = vadd.f32 %v13799_v24, %v2909_v11  ;;  %v12026_v24 = vld [vmem:[%s17833_s5 + $0x170] sm:$0xff]  ;;  %3924 = vmatpush.bf16.msrb.mxu1 %v12014_v37  ;;  %v3223_v37 = vld [vmem:[%s13627_s17 + $0x2a8] sm:$0xff] }
 0x1ee   : > { %3859 = vmatmul.bf16.gmra.mxu3 %v3294_v45  ;;  %3969 = vmatpush.bf16.msrb.mxu2 %v12026_v24  ;;  %v3230_v24 = vld [vmem:[%s13627_s17 + $0x2e0] sm:$0xff] }
 0x1ef   : > { %v13915_v59 = vadd.f32 %v13728_v28, %v2938_v4  ;;  %v12013_v28 = vld [vmem:[%s17833_s5 + $0x108] sm:$0xff]  ;;  %v3236_v4 = vld [vmem:[%s13627_s17 + $0x310] sm:$0xff] }
 0x1f0   : > { %v13901_v13 = vpop.f32.mrf.mxu2  ;;  %v2881_v5 = vpop.f32.mrf.mxu0  ;;  %3876 = vmatpush.bf16.msrb.mxu0 %v12005_v54 }
 0x1f1   : > { %v13903_v60 = vpop.f32.mrf.mxu3  ;;  %v13917_v12 = vpop.f32.mrf.mxu1  ;;  %v2882_v46 = vadd.f32 %v2881_v5, %v13760_v16  ;;  %v3222_v16 = vld [vmem:[%s13627_s17 + $0x2a0] sm:$0xff]  ;;  %3925 = vmatpush.bf16.msrb.mxu1 %v12013_v28  ;;  %v3151_v5 = vld [vmem:[%s13627_s17 + $0x68] sm:$0xff]  ;;  %v814_v28 = vpack.c.bf16 %v714_v43, %v689_v44 }
 0x1f2   : > { %3970 = vmatpush.bf16.msrb.mxu2 %v12025_v41  ;;  %v3292_v34 = vpack.c.bf16 %v3229_v18, %v3222_v16  ;;  %v12020_v41 = vld [vmem:[%s17833_s5 + $0x140] sm:$0xff]  ;;  %v3293_v16 = vpack.c.bf16 %v3230_v24, %v3223_v37  ;;  %v3155_v37 = vld [vmem:[%s13627_s17 + $0x88] sm:$0xff] }
 0x1f3   : > { %v2911_v51 = vadd.f32 %v13806_v21, %v2882_v46  ;;  %v12004_v21 = vld [vmem:[%s17833_s5 + $0xc0] sm:$0xff] }
 0x1f4   : > { %3877 = vmatpush.bf16.msrb.mxu0 %v12004_v21  ;;  %v3149_v21 = vld [vmem:[%s13627_s17 + $0x58] sm:$0xff]  ;;  %v3162_v24 = vld [vmem:[%s13627_s17 + $0xc0] sm:$0xff] }
 0x1f5   : > { %v2940_v63 = vadd.f32 %v13819_v61, %v2911_v51  ;;  %v12024_v61 = vld [vmem:[%s17833_s5 + $0x160] sm:$0xff]  ;;  %3926 = vmatpush.bf16.msrb.mxu1 %v12012_v6  ;;  %v3244_v6 = vld [vmem:[%s13627_s17 + $0x350] sm:$0xff] }
 0x1f6   : > { %3971 = vmatpush.bf16.msrb.mxu2 %v12024_v61  ;;  %v3158_v61 = vld [vmem:[%s13627_s17 + $0xa0] sm:$0xff] }
 0x1f7   : > { %v13953_v1 = vadd.f32 %v13754_v19, %v2940_v63  ;;  %v12023_v19 = vld [vmem:[%s17833_s5 + $0x158] sm:$0xff] }
 0x1f8   : > { %v13939_v57 = vpop.f32.mrf.mxu2  ;;  %v2884_v48 = vpop.f32.mrf.mxu0  ;;  %v3141_v63 = vld [vmem:[%s13627_s17 + $0x18] sm:$0xff] }
 0x1f9   : > { %v13941_v26 = vpop.f32.mrf.mxu3  ;;  %v13955_v38 = vpop.f32.mrf.mxu1  ;;  %v2885_v22 = vadd.f32 %v2884_v48, %v13772_v35  ;;  %v3165_v48 = vld [vmem:[%s13627_s17 + $0xd8] sm:$0xff] }
 0x1fa   : > { %3972 = vmatpush.bf16.msrb.mxu2 %v12023_v19 }
 0x1fb   : > { %v2914_v29 = vadd.f32 %v13826_v23, %v2885_v22  ;;  %10167 = vmatmul.msk.bf16.gmra.mxu0 %vm2383_vm0, %v789_v15  ;;  %v3148_v15 = vld [vmem:[%s13627_s17 + $0x50] sm:$0xff] }
 0x1fc   : > { %3761 = vmatmul.bf16.gmra.mxu1 %v3292_v34  ;;  %v3142_v34 = vld [vmem:[%s13627_s17 + $0x20] sm:$0xff]  ;;  %v3253_v22 = vpack.c.bf16 %v3148_v15, %v3141_v63 }
 0x1fd   : > { %3805 = vmatmul.bf16.gmra.mxu2 %v3286_v52  ;;  %v2943_v35 = vadd.f32 %v13838_v56, %v2914_v29  ;;  %v3254_v29 = vpack.c.bf16 %v3149_v21, %v3142_v34 }
 0x1fe   : > { %3864 = vmatmul.bf16.gmra.mxu3 %v3301_v20  ;;  %3973 = vmatpush.bf16.msrb.mxu2 %v12022_v31  ;;  %v3300_v31 = vpack.c.bf16 %v3244_v6, %v3237_v58 }
 0x1ff   : > { %v13972_v49 = vadd.f32 %v13769_v17, %v2943_v35  ;;  %v3144_v17 = vld [vmem:[%s13627_s17 + $0x30] sm:$0xff] }
 0x200   : > { %v13964_v40 = vpop.f32.mrf.mxu2  ;;  %v2886_v45 = vpop.f32.mrf.mxu0 }
 0x201   : > { %v13966_v23 = vpop.f32.mrf.mxu3  ;;  %v13974_v7 = vpop.f32.mrf.mxu1  ;;  %v2887_v56 = vadd.f32 %v2886_v45, %v13792_v10 }
 0x202   : > { %3974 = vmatpush.bf16.msrb.mxu2 %v12021_v42 }
 0x203   : > { %v2916_v11 = vadd.f32 %v13851_v2, %v2887_v56  ;;  %v3299_v2 = vpack.c.bf16 %v3243_v30, %v3236_v4 }
 0x205   : > { %v2945_v46 = vadd.f32 %v13870_v39, %v2916_v11  ;;  %v3256_v39 = vpack.c.bf16 %v3151_v5, %v3144_v17  ;;  %v3156_v17 = vld [vmem:[%s13627_s17 + $0x90] sm:$0xff]  ;;  %v3163_v5 = vld [vmem:[%s13627_s17 + $0xc8] sm:$0xff] }
 0x206   : > { %3975 = vmatpush.bf16.msrb.mxu2 %v12020_v41 }
 0x207   : > { %v13996_v51 = vadd.f32 %v13789_v0, %v2945_v46  ;;  %v3143_v46 = vld [vmem:[%s13627_s17 + $0x28] sm:$0xff] }
 0x208   : > { %v3050_v54 = vpop.f32.mrf.mxu2  ;;  %v2985_v9 = vpop.f32.mrf.mxu0 }
 0x209   : > { %v13990_v10 = vpop.f32.mrf.mxu3  ;;  %v13998_v62 = vpop.f32.mrf.mxu1  ;;  %v14001_v18 = vadd.f32 %v2985_v9, %v13804_v3 }
 0x20b   : > { %10168 = vmatmul.msk.bf16.gmra.mxu0 %vm2383_vm0, %v814_v28  ;;  %v3150_v28 = vld [vmem:[%s13627_s17 + $0x60] sm:$0xff] }
 0x20c   : > { %3766 = vmatmul.bf16.gmra.mxu1 %v3299_v2  ;;  %v3179_v2 = vld [vmem:[%s13627_s17 + $0x148] sm:$0xff]  ;;  %v3255_v58 = vpack.c.bf16 %v3150_v28, %v3143_v46 }
 0x20d   : > { %3810 = vmatmul.bf16.gmra.mxu2 %v3293_v16 }
 0x20e   : > { %10365 = vmatmul.msk.bf16.vlgmr.msrb.gmra.mxu3 %vm3698_vm1, %v3256_v39  ;;  %v3261_v39 = vpack.c.bf16 %v3163_v5, %v3156_v17 }
 0x210   : > { %v3053_v0 = vpop.f32.mrf.mxu2  ;;  %v2987_v8 = vpop.f32.mrf.mxu0 }
 0x211   : > { %v14005_v53 = vpop.f32.mrf.mxu3  ;;  %v14007_v50 = vpop.f32.mrf.mxu1  ;;  %v14010_v3 = vadd.f32 %v2987_v8, %v13824_v36  ;;  %v3263_v36 = vpack.c.bf16 %v3165_v48, %v3158_v61 }
 0x218   : > { %v14020_v52 = vpop.f32.mrf.mxu2  ;;  %v2990_v19 = vpop.f32.mrf.mxu0 }
 0x219   : > { %v14022_v20 = vpop.f32.mrf.mxu3  ;;  %v3732_v35 = vpop.f32.mrf.mxu1  ;;  %v2991_v45 = vadd.f32 %v2990_v19, %v13849_v25  ;;  %v3169_v19 = vld [vmem:[%s13627_s17 + $0xf8] sm:$0xff] }
 0x21b   : > { %v3020_v56 = vadd.f32 %v13886_v33, %v2991_v45  ;;  %3878 = vmatmul.bf16.vlgmr.msrb.gmra.mxu0 %v3253_v22  ;;  %v3157_v45 = vld [vmem:[%s13627_s17 + $0x98] sm:$0xff] }
 0x21c   : > { %3927 = vmatmul.bf16.vlgmr.msrb.gmra.mxu1 %v3254_v29 }
 0x21d   : > { %3815 = vmatmul.bf16.gmra.mxu2 %v3300_v31  ;;  %v3049_v11 = vadd.f32 %v13964_v40, %v3020_v56  ;;  %v3172_v40 = vld [vmem:[%s13627_s17 + $0x110] sm:$0xff]  ;;  %v3170_v31 = vld [vmem:[%s13627_s17 + $0x100] sm:$0xff] }
 0x21e   : > { %10366 = vmatmul.msk.bf16.gmra.mxu3 %vm3698_vm1, %v3263_v36  ;;  %v3270_v63 = vpack.c.bf16 %v3179_v2, %v3172_v40  ;;  %v3177_v36 = vld [vmem:[%s13627_s17 + $0x138] sm:$0xff]  ;;  %v3164_v56 = vld [vmem:[%s13627_s17 + $0xd0] sm:$0xff] }
 0x21f   : > { %v14033_v25 = vadd.f32 %v13840_v55, %v3049_v11  ;;  %v3260_v55 = vpack.c.bf16 %v3162_v24, %v3155_v37  ;;  %v3186_v11 = vld [vmem:[%s13627_s17 + $0x180] sm:$0xff]  ;;  %v3262_v17 = vpack.c.bf16 %v3164_v56, %v3157_v45 }
 0x220   : > { %v14028_v44 = vpop.f32.mrf.mxu2  ;;  %v2992_v33 = vpop.f32.mrf.mxu0 }
 0x221   : > { %v14030_v43 = vpop.f32.mrf.mxu3  ;;  %v3734_v42 = vpop.f32.mrf.mxu1  ;;  %v2993_v4 = vadd.f32 %v2992_v33, %v13884_v14  ;;  %v3193_v33 = vld [vmem:[%s13627_s17 + $0x1b8] sm:$0xff] }
 0x222   : > { %v3277_v5 = vpack.c.bf16 %v3193_v33, %v3186_v11  ;;  %v3197_v33 = vld [vmem:[%s13627_s17 + $0x1d8] sm:$0xff] }
 0x223   : > { %v3022_v30 = vadd.f32 %v13917_v12, %v2993_v4 }
 0x225   : > { %v3051_v41 = vadd.f32 %v3050_v54, %v3022_v30 }
 0x227   : > { %v14050_v8 = vadd.f32 %v13872_v27, %v3051_v41 }
 0x228   : > { %v14045_v9 = vpop.f32.mrf.mxu2  ;;  %v2995_v14 = vpop.f32.mrf.mxu0 }
 0x229   : > { %v14047_v16 = vpop.f32.mrf.mxu3  ;;  %v3737_v12 = vpop.f32.mrf.mxu1  ;;  %v2996_v15 = vadd.f32 %v2995_v14, %v13915_v59  ;;  %v3183_v14 = vld [vmem:[%s13627_s17 + $0x168] sm:$0xff] }
 0x22b   : > { %v3025_v34 = vadd.f32 %v13955_v38, %v2996_v15  ;;  %3883 = vmatmul.bf16.gmra.mxu0 %v3260_v55  ;;  %v3171_v15 = vld [vmem:[%s13627_s17 + $0x108] sm:$0xff] }
 0x22c   : > { %3932 = vmatmul.bf16.gmra.mxu1 %v3261_v39 }
 0x22d   : > { %3976 = vmatmul.bf16.vlgmr.msrb.gmra.mxu2 %v3255_v58  ;;  %v3054_v27 = vadd.f32 %v3053_v0, %v3025_v34  ;;  %v3176_v0 = vld [vmem:[%s13627_s17 + $0x130] sm:$0xff]  ;;  %v3178_v34 = vld [vmem:[%s13627_s17 + $0x140] sm:$0xff] }
 0x22e   : > { %10367 = vmatmul.msk.bf16.gmra.mxu3 %vm3698_vm1, %v3270_v63  ;;  %v3267_v30 = vpack.c.bf16 %v3176_v0, %v3169_v19  ;;  %v3184_v58 = vld [vmem:[%s13627_s17 + $0x170] sm:$0xff]  ;;  %v3191_v63 = vld [vmem:[%s13627_s17 + $0x1a8] sm:$0xff]  ;;  %v3269_v19 = vpack.c.bf16 %v3178_v34, %v3171_v15 }
 0x22f   : > { %v14058_v59 = vadd.f32 %v13903_v60, %v3054_v27  ;;  %v3200_v27 = vld [vmem:[%s13627_s17 + $0x1f0] sm:$0xff] }
 0x230   : > { %v3781_v54 = vpop.f32.mrf.mxu2  ;;  %v2997_v6 = vpop.f32.mrf.mxu0 }
 0x231   : > { %v14055_v21 = vpop.f32.mrf.mxu3  ;;  %v3782_v38 = vadd.f32 %v3781_v54, %v3732_v35  ;;  %v3739_v61 = vpop.f32.mrf.mxu1  ;;  %v2998_v48 = vadd.f32 %v2997_v6, %v13953_v1  ;;  %v3268_v1 = vpack.c.bf16 %v3177_v36, %v3170_v31  ;;  %v3207_v54 = vld [vmem:[%s13627_s17 + $0x228] sm:$0xff] }
 0x232   : > { %v3284_v0 = vpack.c.bf16 %v3207_v54, %v3200_v27  ;;  %v12035_v54 = vld [vmem:[%s17834_s6 + $0x30] sm:$0xff] }
 0x233   : > { %v14062_v22 = vadd.f32 %v14005_v53, %v3782_v38  ;;  %v3027_v29 = vadd.f32 %v13974_v7, %v2998_v48 }
 0x235   : > { %v3056_v60 = vadd.f32 %v14020_v52, %v3027_v29 }
 0x237   : > { %v14077_v53 = vadd.f32 %v13941_v26, %v3056_v60  ;;  %v3204_v60 = vld [vmem:[%s13627_s17 + $0x210] sm:$0xff] }
 0x238   : > { %v3783_v35 = vpop.f32.mrf.mxu2  ;;  %v3000_v7 = vpop.f32.mrf.mxu0 }
 0x239   : > { %v14074_v4 = vpop.f32.mrf.mxu3  ;;  %v3784_v37 = vadd.f32 %v3783_v35, %v3734_v42  ;;  %v3742_v24 = vpop.f32.mrf.mxu1  ;;  %v3001_v46 = vadd.f32 %v3000_v7, %v13972_v49  ;;  %v3198_v35 = vld [vmem:[%s13627_s17 + $0x1e0] sm:$0xff] }
 0x23a   : > { %v3214_v7 = vld [vmem:[%s13627_s17 + $0x260] sm:$0xff] }
 0x23b   : > { %v14081_v28 = vadd.f32 %v14022_v20, %v3784_v37  ;;  %v3030_v52 = vadd.f32 %v13998_v62, %v3001_v46  ;;  %3888 = vmatmul.bf16.gmra.mxu0 %v3267_v30  ;;  %v3205_v30 = vld [vmem:[%s13627_s17 + $0x218] sm:$0xff]  ;;  %v3192_v37 = vld [vmem:[%s13627_s17 + $0x1b0] sm:$0xff] }
 0x23c   : > { %3937 = vmatmul.bf16.gmra.mxu1 %v3268_v1  ;;  %v3185_v1 = vld [vmem:[%s13627_s17 + $0x178] sm:$0xff] }
 0x23d   : > { %3981 = vmatmul.bf16.gmra.mxu2 %v3262_v17  ;;  %v3059_v26 = vadd.f32 %v14028_v44, %v3030_v52  ;;  %v3190_v44 = vld [vmem:[%s13627_s17 + $0x1a0] sm:$0xff]  ;;  %v3281_v17 = vpack.c.bf16 %v3204_v60, %v3197_v33  ;;  %v3282_v52 = vpack.c.bf16 %v3205_v30, %v3198_v35  ;;  %v3228_v60 = vld [vmem:[%s13627_s17 + $0x2d0] sm:$0xff]  ;;  %v3235_v35 = vld [vmem:[%s13627_s17 + $0x308] sm:$0xff] }
 0x23e   : > { %10368 = vmatmul.msk.bf16.gmra.mxu3 %vm3698_vm1, %v3277_v5  ;;  %v3274_v6 = vpack.c.bf16 %v3190_v44, %v3183_v14 }
 0x23f   : > { %v14089_v42 = vadd.f32 %v13966_v23, %v3059_v26 }
 0x240   : > { %v3786_v49 = vpop.f32.mrf.mxu2  ;;  %v3002_v40 = vpop.f32.mrf.mxu0 }
 0x241   : > { %v14086_v20 = vpop.f32.mrf.mxu3  ;;  %v3787_v62 = vadd.f32 %v3786_v49, %v3737_v12  ;;  %v3744_v2 = vpop.f32.mrf.mxu1  ;;  %v3003_v41 = vadd.f32 %v3002_v40, %v13996_v51  ;;  %v3275_v51 = vpack.c.bf16 %v3191_v63, %v3184_v58  ;;  %v12402_v58 = vmov 0  }
 0x242   : > { %v4812_v63 = vsel %vm4810_vm2, 65535, %v12402_v58  ;;  %12391 = vset.pattern.permute.xlu0 %v12402_v58  ;;  %12392 = vset.pattern.permute.xlu1 %v12402_v58 }
 0x243   : > { %v14093_v55 = vadd.f32 %v14030_v43, %v3787_v62  ;;  %v3032_v39 = vadd.f32 %v14007_v50, %v3003_v41  ;;  %v3276_v41 = vpack.c.bf16 %v3192_v37, %v3185_v1  ;;  %12393 = vset.pattern.permute.xlu2 %v12402_v58  ;;  %v12039_v58 = vld [vmem:[%s17834_s6 + $0x50] sm:$0xff] }
 0x245   : > { %v3061_v23 = vadd.f32 %v14045_v9, %v3032_v39 }
 0x247   : > { %v14108_v43 = vadd.f32 %v13990_v10, %v3061_v23  ;;  %v12043_v23 = vld [vmem:[%s17835_s7 + $0x10] sm:$0xff] }
 0x248   : > { %v3788_v12 = vpop.f32.mrf.mxu2  ;;  %v3014_v50 = vpop.f32.mrf.mxu0 }
 0x249   : > { %v14105_v38 = vpop.f32.mrf.mxu3  ;;  %v3789_v48 = vadd.f32 %v3788_v12, %v3739_v61  ;;  %v14110_v29 = vpop.f32.mrf.mxu1  ;;  %v3015_v10 = vadd.f32 %v3014_v50, %v14001_v18  ;;  %v3221_v18 = vld [vmem:[%s13627_s17 + $0x298] sm:$0xff]  ;;  %v3218_v50 = vld [vmem:[%s13627_s17 + $0x280] sm:$0xff] }
 0x24a   : > { %v3291_v39 = vpack.c.bf16 %v3221_v18, %v3214_v7 }
 0x24b   : > { %v14113_v31 = vadd.f32 %v14047_v16, %v3789_v48  ;;  %3893 = vmatmul.bf16.gmra.mxu0 %v3274_v6  ;;  %v3044_v11 = vadd.f32 %v13901_v13, %v3015_v10  ;;  %v12042_v10 = vld [vmem:[%s17835_s7 + $0x8] sm:$0xff] }
 0x24c   : > { %3942 = vmatmul.bf16.gmra.mxu1 %v3275_v51 }
 0x24d   : > { %3986 = vmatmul.bf16.gmra.mxu2 %v3269_v19  ;;  %v3073_v13 = vadd.f32 %v13801_v32, %v3044_v11  ;;  %v3199_v11 = vld [vmem:[%s13627_s17 + $0x1e8] sm:$0xff] }
 0x24e   : > { %10369 = vmatmul.msk.bf16.gmra.mxu3 %vm3698_vm1, %v3284_v0 }
 0x250   : > { %v3791_v9 = vpop.f32.mrf.mxu2  ;;  %v3016_v45 = vpop.f32.mrf.mxu0 }
 0x251   : > { %v14117_v61 = vpop.f32.mrf.mxu3  ;;  %v3792_v36 = vadd.f32 %v3791_v9, %v3742_v24  ;;  %v14119_v56 = vpop.f32.mrf.mxu1  ;;  %v4691_v24 = vld [vmem:[%s17835_s7 + $0x18] sm:$0x1]  ;;  %v3017_v5 = vadd.f32 %v3016_v45, %v14010_v3  ;;  %v4218_v9 = vld [vmem:[%s17834_s6 + $0x60] sm:$0x3]  ;;  %v3219_v45 = vld [vmem:[%s13627_s17 + $0x288] sm:$0xff] }
 0x252   : > { %v4705_v26 = vunpack.c.l.b16 %v4691_v24  ;;  %v4268_v33 = vunpack.c.l.b16 %v4218_v9  ;;  %v12041_v24 = vld [vmem:[%s17835_s7] sm:$0xff] }
 0x253   : > { %v14122_v16 = vadd.f32 %v14055_v21, %v3792_v36  ;;  %v3046_v32 = vadd.f32 %v13939_v57, %v3017_v5  ;;  %v3212_v36 = vld [vmem:[%s13627_s17 + $0x250] sm:$0xff]  ;;  %v12029_v9 = vld [vmem:[%s17834_s6] sm:$0xff] }
 0x254   : > { %v4709_v44 = vpack.c.b16 %v4705_v26, %v4705_v26  ;;  %v4281_v30 = vpack.c.b16 %v4268_v33, %v4268_v33  ;;  %v3289_v18 = vpack.c.bf16 %v3219_v45, %v3212_v36  ;;  %v3298_v26 = vpack.c.bf16 %v3235_v35, %v3228_v60  ;;  %v12037_v36 = vld [vmem:[%s17834_s6 + $0x40] sm:$0xff] }
 0x255   : > { %v3075_v27 = vadd.f32 %v13821_v47, %v3046_v32  ;;  %v3211_v47 = vld [vmem:[%s13627_s17 + $0x248] sm:$0xff] }
 0x256   : > { %v4814_v34 = vand.u32 %v4812_v63, %v4709_v44  ;;  %v3288_v7 = vpack.c.bf16 %v3218_v50, %v3211_v47  ;;  %v12031_v44 = vld [vmem:[%s17834_s6 + $0x10] sm:$0xff]  ;;  %v3242_v47 = vld [vmem:[%s13627_s17 + $0x340] sm:$0xff]  ;;  %v3249_v50 = vld [vmem:[%s13627_s17 + $0x378] sm:$0xff] }
 0x257   : > { %v3305_v60 = vpack.c.bf16 %v3249_v50, %v3242_v47  ;;  %v4098_v47 = vld [vmem:[%s14292_s18] sm:$0xff]  ;;  %v4100_v50 = vld [vmem:[%s14292_s18 + $0x10] sm:$0xff] }
 0x258   : > { %v3793_v46 = vpop.f32.mrf.mxu2  ;;  %v3101_v62 = vpop.f32.mrf.mxu0  ;;  %12376 = vmatpush.bf16.msra.mxu3 %v4814_v34  ;;  %4820 = vmatpush.bf16.msra.mxu2 %v4814_v34  ;;  %v3225_v34 = vld [vmem:[%s13627_s17 + $0x2b8] sm:$0xff] }
 0x259   : > { %v14137_v21 = vpop.f32.mrf.mxu3  ;;  %v3794_v49 = vadd.f32 %v3793_v46, %v3744_v2  ;;  %v14140_v40 = vpop.f32.mrf.mxu1  ;;  %v3102_v14 = vadd.f32 %v3101_v62, %v3073_v13  ;;  %v12036_v2 = vld [vmem:[%s17834_s6 + $0x38] sm:$0xff] }
 0x25a   : > { %4347 = vmatpush.bf16.msra.mxu0 %v12036_v2 }
 0x25b   : > { %v14143_v3 = vadd.f32 %v14074_v4, %v3794_v49  ;;  %v3121_v15 = vpack.c.bf16 %v3102_v14, %v3102_v14  ;;  %3898 = vmatmul.bf16.gmra.mxu0 %v3281_v17  ;;  %v12033_v17 = vld [vmem:[%s17834_s6 + $0x20] sm:$0xff]  ;;  %v4345_v49 = vsel %vm4343_vm4, %v4281_v30, 0 }
 0x25c   : > { %3947 = vmatmul.bf16.gmra.mxu1 %v3282_v52  ;;  %12377 = vmatpush.bf16.msra.mxu3 %v12043_v23 }
 0x25d   : > { %3991 = vmatmul.bf16.gmra.mxu2 %v3276_v41  ;;  %3130 = vst.msk [vmem:[#allocation2] sm:$0xf] %vm3129_vm3, %v3121_v15  ;;  %4439 = vmatpush.bf16.msra.mxu1 %v4345_v49  ;;  %v3247_v49 = vld [vmem:[%s13627_s17 + $0x368] sm:$0xff] }
 0x25e   : > { %10370 = vmatmul.msk.bf16.gmra.mxu3 %vm3698_vm1, %v3291_v39  ;;  %4348 = vmatpush.bf16.msra.mxu0 %v12035_v54  ;;  %v3232_v54 = vld [vmem:[%s13627_s17 + $0x2f0] sm:$0xff] }
 0x25f   : > { %4821 = vmatpush.bf16.msra.mxu2 %v12043_v23  ;;  %v12038_v23 = vld [vmem:[%s17834_s6 + $0x48] sm:$0xff] }
 0x260   : > { %v3796_v57 = vpop.f32.mrf.mxu2  ;;  %v3103_v6 = vpop.f32.mrf.mxu0  ;;  %12378 = vmatpush.bf16.msra.mxu3 %v12042_v10 }
 0x261   : > { %v14151_v4 = vpop.f32.mrf.mxu3  ;;  %v3797_v12 = vadd.f32 %v3796_v57, %v14110_v29  ;;  %v14161_v51 = vpop.f32.mrf.mxu1  ;;  %v3104_v48 = vadd.f32 %v3103_v6, %v3075_v27  ;;  %v12034_v29 = vld [vmem:[%s17834_s6 + $0x28] sm:$0xff]  ;;  %v3233_v6 = vld [vmem:[%s13627_s17 + $0x2f8] sm:$0xff] }
 0x262   : > { %4349 = vmatpush.bf16.msra.mxu0 %v12034_v29  ;;  %v3295_v29 = vpack.c.bf16 %v3232_v54, %v3225_v34 }
 0x263   : > { %v14166_v19 = vadd.f32 %v14086_v20, %v3797_v12  ;;  %v3122_v0 = vpack.c.bf16 %v3104_v48, %v3104_v48  ;;  %v3206_v20 = vld [vmem:[%s13627_s17 + $0x220] sm:$0xff]  ;;  %4822 = vmatpush.bf16.msra.mxu2 %v12042_v10  ;;  %v3213_v48 = vld [vmem:[%s13627_s17 + $0x258] sm:$0xff] }
 0x264   : > { %v3283_v52 = vpack.c.bf16 %v3206_v20, %v3199_v11  ;;  %12379 = vmatpush.bf16.msra.mxu3 %v12041_v24  ;;  %v3226_v12 = vld [vmem:[%s13627_s17 + $0x2c0] sm:$0xff] }
 0x265   : > { %3131 = vst.msk [vmem:[#allocation2 + $0x4] sm:$0xf] %vm3129_vm3, %v3122_v0  ;;  %v3296_v10 = vpack.c.bf16 %v3233_v6, %v3226_v12 }
 0x266   : > { %4350 = vmatpush.bf16.msra.mxu0 %v12033_v17 }
 0x267   : > { %4823 = vmatpush.bf16.msra.mxu2 %v12041_v24 }
 0x268   : > { %v3798_v1 = vpop.f32.mrf.mxu2  ;;  %v3106_v46 = vpop.f32.mrf.mxu0 }
 0x269   : > { %v14184_v37 = vpop.f32.mrf.mxu3  ;;  %v3799_v5 = vadd.f32 %v3798_v1, %v14119_v56  ;;  %v14193_v13 = vpop.f32.mrf.mxu1  ;;  %v3107_v62 = vadd.f32 %v3106_v46, %v14033_v25  ;;  %v12032_v56 = vld [vmem:[%s17834_s6 + $0x18] sm:$0xff]  ;;  %v3239_v46 = vld [vmem:[%s13627_s17 + $0x328] sm:$0xff] }
 0x26a   : > { %v12040_v25 = vld [vmem:[%s17834_s6 + $0x58] sm:$0xff]  ;;  %4351 = vmatpush.bf16.msra.mxu0 %v12032_v56 }
 0x26b   : > { %v14197_v41 = vadd.f32 %v14105_v38, %v3799_v5  ;;  %v3123_v39 = vpack.c.bf16 %v3107_v62, %v3107_v62  ;;  %3903 = vmatmul.bf16.gmra.mxu0 %v3288_v7  ;;  %4440 = vmatpush.bf16.msra.mxu1 %v12040_v25  ;;  %v3234_v62 = vld [vmem:[%s13627_s17 + $0x300] sm:$0xff] }
 0x26c   : > { %3952 = vmatmul.bf16.gmra.mxu1 %v3289_v18 }
 0x26d   : > { %3996 = vmatmul.bf16.gmra.mxu2 %v3283_v52  ;;  %3132 = vst.msk [vmem:[#allocation2 + $0x8] sm:$0xf] %vm3129_vm3, %v3123_v39  ;;  %v3246_v52 = vld [vmem:[%s13627_s17 + $0x360] sm:$0xff]  ;;  %v4620_v39 = vld [vmem:[%s14263_s15 + $0xf8] sm:$0xff] }
 0x26e   : > { %10371 = vmatmul.msk.bf16.gmra.mxu3 %vm3698_vm1, %v3298_v26  ;;  %4352 = vmatpush.bf16.msra.mxu0 %v12031_v44  ;;  %v3240_v26 = vld [vmem:[%s13627_s17 + $0x330] sm:$0xff] }
 0x26f   : > { %4441 = vmatpush.bf16.msra.mxu1 %v12039_v58  ;;  %v3303_v44 = vpack.c.bf16 %v3247_v49, %v3240_v26  ;;  %v4103_v26 = vld [vmem:[%s14292_s18 + $0x28] sm:$0xff]  ;;  %v4105_v49 = vld [vmem:[%s14292_s18 + $0x38] sm:$0xff] }
 0x270   : > { %v3801_v38 = vpop.f32.mrf.mxu2  ;;  %v3108_v32 = vpop.f32.mrf.mxu0 }
 0x271   : > { %v14207_v14 = vpop.f32.mrf.mxu3  ;;  %v3802_v63 = vadd.f32 %v3801_v38, %v14140_v40  ;;  %v14216_v15 = vpop.f32.mrf.mxu1  ;;  %v3109_v2 = vadd.f32 %v3108_v32, %v14050_v8  ;;  %v12030_v40 = vld [vmem:[%s17834_s6 + $0x8] sm:$0xff]  ;;  %v3220_v8 = vld [vmem:[%s13627_s17 + $0x290] sm:$0xff]  ;;  %v3302_v38 = vpack.c.bf16 %v3246_v52, %v3239_v46 }
 0x272   : > { %4353 = vmatpush.bf16.msra.mxu0 %v12030_v40  ;;  %v3290_v20 = vpack.c.bf16 %v3220_v8, %v3213_v48  ;;  %v3241_v8 = vld [vmem:[%s13627_s17 + $0x338] sm:$0xff]  ;;  %v4104_v52 = vld [vmem:[%s14292_s18 + $0x30] sm:$0xff] }
 0x273   : > { %v14221_v57 = vadd.f32 %v14117_v61, %v3802_v63  ;;  %v3124_v27 = vpack.c.bf16 %v3109_v2, %v3109_v2  ;;  %4442 = vmatpush.bf16.msra.mxu1 %v12038_v23 }
 0x275   : > { %3133 = vst.msk [vmem:[#allocation2 + $0xc] sm:$0xf] %vm3129_vm3, %v3124_v27 }
 0x276   : > { %4354 = vmatpush.bf16.msra.mxu0 %v12029_v9  ;;  %v4621_v9 = vld [vmem:[%s14263_s15 + $0x100] sm:$0xff] }
 0x277   : > { %4443 = vmatpush.bf16.msra.mxu1 %v12037_v36  ;;  %v4622_v36 = vld [vmem:[%s14263_s15 + $0x108] sm:$0xff] }
 0x278   : > { %v3803_v61 = vpop.f32.mrf.mxu2  ;;  %v3111_v11 = vpop.f32.mrf.mxu0 }
 0x279   : > { %v14237_v0 = vpop.f32.mrf.mxu3  ;;  %v3804_v45 = vadd.f32 %v3803_v61, %v14161_v51  ;;  %v3762_v33 = vpop.f32.mrf.mxu1  ;;  %v3112_v35 = vadd.f32 %v3111_v11, %v14058_v59  ;;  %v4099_v61 = vld [vmem:[%s14292_s18 + $0x8] sm:$0xff] }
 0x27b   : > { %v14248_v30 = vadd.f32 %v14137_v21, %v3804_v45  ;;  %v3125_v1 = vpack.c.bf16 %v3112_v35, %v3112_v35  ;;  %3908 = vmatmul.bf16.gmra.mxu0 %v3295_v29  ;;  %v4101_v29 = vld [vmem:[%s14292_s18 + $0x18] sm:$0xff] }
 0x27c   : > { %3957 = vmatmul.bf16.gmra.mxu1 %v3296_v10  ;;  %v3248_v10 = vld [vmem:[%s13627_s17 + $0x370] sm:$0xff] }
 0x27d   : > { %4001 = vmatmul.bf16.gmra.mxu2 %v3290_v20  ;;  %3134 = vst.msk [vmem:[#allocation2 + $0x10] sm:$0xf] %vm3129_vm3, %v3125_v1  ;;  %v4163_v20 = vpack.c.bf16 %v4101_v29, %v4099_v61  ;;  %v3304_v35 = vpack.c.bf16 %v3248_v10, %v3241_v8  ;;  %v4669_v1 = vpack.c.bf16 %v4622_v36, %v4621_v9  ;;  %v4106_v8 = vld [vmem:[%s14292_s18 + $0x40] sm:$0xff]  ;;  %v4107_v61 = vld [vmem:[%s14292_s18 + $0x48] sm:$0xff]  ;;  %v4109_v29 = vld [vmem:[%s14292_s18 + $0x58] sm:$0xff] }
 0x27e   : > { %10372 = vmatmul.msk.bf16.gmra.mxu3 %vm3698_vm1, %v3305_v60  ;;  %v4625_v10 = vld [vmem:[%s14263_s15 + $0x120] sm:$0xff]  ;;  %v4626_v9 = vld [vmem:[%s14263_s15 + $0x128] sm:$0xff]  ;;  %v4591_v36 = vld [vmem:[%s14263_s15 + $0x10] sm:$0xff] }
 0x280   : > { %v3806_v51 = vpop.f32.mrf.mxu2  ;;  %v3113_v7 = vpop.f32.mrf.mxu0 }
 0x281   : > { %v14252_v59 = vpop.f32.mrf.mxu3  ;;  %v3807_v21 = vadd.f32 %v3806_v51, %v14193_v13  ;;  %v3764_v18 = vpop.f32.mrf.mxu1  ;;  %v3114_v17 = vadd.f32 %v3113_v7, %v14077_v53  ;;  %v3227_v13 = vld [vmem:[%s13627_s17 + $0x2c8] sm:$0xff]  ;;  %v4619_v53 = vld [vmem:[%s14263_s15 + $0xf0] sm:$0xff] }
 0x282   : > { %v3297_v32 = vpack.c.bf16 %v3234_v62, %v3227_v13  ;;  %v4668_v2 = vpack.c.bf16 %v4620_v39, %v4619_v53  ;;  %v4623_v13 = vld [vmem:[%s14263_s15 + $0x110] sm:$0xff]  ;;  %v4624_v62 = vld [vmem:[%s14263_s15 + $0x118] sm:$0xff]  ;;  %v4589_v53 = vld [vmem:[%s14263_s15] sm:$0xff] }
 0x283   : > { %v14266_v24 = vadd.f32 %v14151_v4, %v3807_v21  ;;  %v3126_v5 = vpack.c.bf16 %v3114_v17, %v3114_v17  ;;  %v4590_v39 = vld [vmem:[%s14263_s15 + $0x8] sm:$0xff] }
 0x285   : > { %3135 = vst.msk [vmem:[#allocation2 + $0x14] sm:$0xf] %vm3129_vm3, %v3126_v5 }
 0x288   : > { %v3808_v56 = vpop.f32.mrf.mxu2  ;;  %v3116_v4 = vpop.f32.mrf.mxu0 }
 0x289   : > { %v14277_v25 = vpop.f32.mrf.mxu3  ;;  %v3809_v58 = vadd.f32 %v3808_v56, %v14216_v15  ;;  %v3767_v63 = vpop.f32.mrf.mxu1  ;;  %v3117_v34 = vadd.f32 %v3116_v4, %v14089_v42 }
 0x28b   : > { %v14282_v27 = vadd.f32 %v14184_v37, %v3809_v58  ;;  %v3127_v54 = vpack.c.bf16 %v3117_v34, %v3117_v34  ;;  %3913 = vmatmul.bf16.gmra.mxu0 %v3302_v38  ;;  %v4165_v58 = vpack.c.bf16 %v4105_v49, %v4103_v26 }
 0x28c   : > { %3962 = vmatmul.bf16.gmra.mxu1 %v3303_v44 }
 0x28d   : > { %4006 = vmatmul.bf16.gmra.mxu2 %v3297_v32  ;;  %3136 = vst.msk [vmem:[#allocation2 + $0x18] sm:$0xf] %vm3129_vm3, %v3127_v54 }
 0x28e   : > { %10464 = vmatmul.msk.bf16.vlgmr.msra.gmra.mxu3 %vm4713_vm5, %v4668_v2  ;;  %v4670_v2 = vpack.c.bf16 %v4624_v62, %v4623_v13 }
 0x290   : > { %v3811_v15 = vpop.f32.mrf.mxu2  ;;  %v3118_v23 = vpop.f32.mrf.mxu0 }
 0x291   : > { %v14286_v40 = vpop.f32.mrf.mxu3  ;;  %v3812_v42 = vadd.f32 %v3811_v15, %v3762_v33  ;;  %v3769_v12 = vpop.f32.mrf.mxu1  ;;  %v3119_v37 = vadd.f32 %v3118_v23, %v14108_v43  ;;  %v4162_v33 = vpack.c.bf16 %v4100_v50, %v4098_v47  ;;  %v4108_v47 = vld [vmem:[%s14292_s18 + $0x50] sm:$0xff] }
 0x293   : > { %v14296_v6 = vadd.f32 %v14207_v14, %v3812_v42  ;;  %v3128_v48 = vpack.c.bf16 %v3119_v37, %v3119_v37 }
 0x295   : > { %3137 = vst.msk [vmem:[#allocation2 + $0x1c] sm:$0xf] %vm3129_vm3, %v3128_v48 }
 0x298   : > { %v3813_v45 = vpop.f32.mrf.mxu2  ;;  %v3879_v60 = vpop.f32.mrf.mxu0 }
 0x299   : > { %v14307_v11 = vpop.f32.mrf.mxu3  ;;  %v3814_v43 = vadd.f32 %v3813_v45, %v3764_v18  ;;  %v3928_v14 = vpop.f32.mrf.mxu1  ;;  %v3880_v34 = vadd.f32 %v3879_v60, %v14062_v22  ;;  %v4592_v45 = vld [vmem:[%s14263_s15 + $0x18] sm:$0xff]  ;;  %v4166_v60 = vpack.c.bf16 %v4108_v47, %v4106_v8 }
 0x29b   : > { %v14310_v51 = vadd.f32 %v14237_v0, %v3814_v43  ;;  %4355 = vmatmul.bf16.vlgmr.msra.gmra.mxu0 %v4162_v33  ;;  %v4102_v0 = vld [vmem:[%s14292_s18 + $0x20] sm:$0xff]  ;;  %v3929_v15 = vadd.f32 %v3928_v14, %v3880_v34  ;;  %v4167_v14 = vpack.c.bf16 %v4109_v29, %v4107_v61 }
 0x29c   : > { %10421 = vmatmul.msk.bf16.vlgmr.msra.gmra.mxu1 %vm4294_vm6, %v4163_v20  ;;  %v4164_v44 = vpack.c.bf16 %v4104_v52, %v4102_v0 }
 0x29d   : > { %4011 = vmatmul.bf16.gmra.mxu2 %v3304_v35 }
 0x29e   : > { %10465 = vmatmul.msk.bf16.gmra.mxu3 %vm4713_vm5, %v4669_v1  ;;  %v4671_v1 = vpack.c.bf16 %v4626_v9, %v4625_v10 }
 0x2a0   : > { %v3816_v21 = vpop.f32.mrf.mxu2  ;;  %v3881_v17 = vpop.f32.mrf.mxu0 }
 0x2a1   : > { %v14314_v7 = vpop.f32.mrf.mxu3  ;;  %v3817_v18 = vadd.f32 %v3816_v21, %v3767_v63  ;;  %v3930_v5 = vpop.f32.mrf.mxu1  ;;  %v3882_v37 = vadd.f32 %v3881_v17, %v14081_v28  ;;  %v4654_v21 = vpack.c.bf16 %v4592_v45, %v4591_v36  ;;  %v4114_v45 = vld [vmem:[%s14292_s18 + $0x80] sm:$0xff] }
 0x2a3   : > { %v14317_v46 = vadd.f32 %v14252_v59, %v3817_v18  ;;  %v4653_v59 = vpack.c.bf16 %v4590_v39, %v4589_v53  ;;  %v3931_v33 = vadd.f32 %v3930_v5, %v3882_v37  ;;  %v4110_v53 = vld [vmem:[%s14292_s18 + $0x60] sm:$0xff]  ;;  %v4112_v39 = vld [vmem:[%s14292_s18 + $0x70] sm:$0xff] }
 0x2a8   : > { %v3818_v56 = vpop.f32.mrf.mxu2  ;;  %v3884_v63 = vpop.f32.mrf.mxu0 }
 0x2a9   : > { %v14327_v38 = vpop.f32.mrf.mxu3  ;;  %v3819_v4 = vadd.f32 %v3818_v56, %v3769_v12  ;;  %v3933_v32 = vpop.f32.mrf.mxu1  ;;  %v3885_v18 = vadd.f32 %v3884_v63, %v14093_v55  ;;  %v4628_v63 = vld [vmem:[%s14263_s15 + $0x138] sm:$0xff] }
 0x2ab   : > { %v14331_v54 = vadd.f32 %v14277_v25, %v3819_v4  ;;  %4360 = vmatmul.bf16.gmra.mxu0 %v4164_v44  ;;  %v3934_v0 = vadd.f32 %v3933_v32, %v3885_v18  ;;  %v4111_v44 = vld [vmem:[%s14292_s18 + $0x68] sm:$0xff]  ;;  %v4627_v4 = vld [vmem:[%s14263_s15 + $0x130] sm:$0xff]  ;;  %v4593_v32 = vld [vmem:[%s14263_s15 + $0x20] sm:$0xff] }
 0x2ac   : > { %10422 = vmatmul.msk.bf16.gmra.mxu1 %vm4294_vm6, %v4165_v58  ;;  %v4113_v58 = vld [vmem:[%s14292_s18 + $0x78] sm:$0xff]  ;;  %v4672_v37 = vpack.c.bf16 %v4628_v63, %v4627_v4  ;;  %v4118_v63 = vld [vmem:[%s14292_s18 + $0xa0] sm:$0xff] }
 0x2ad   : > { %10449 = vmatmul.msk.bf16.vlgmr.msra.gmra.mxu2 %vm4713_vm5, %v4653_v59 }
 0x2ae   : > { %10466 = vmatmul.msk.bf16.gmra.mxu3 %vm4713_vm5, %v4670_v2  ;;  %v4594_v2 = vld [vmem:[%s14263_s15 + $0x28] sm:$0xff] }
 0x2b0   : > { %v3977_v42 = vpop.f32.mrf.mxu2  ;;  %v3886_v25 = vpop.f32.mrf.mxu0 }
 0x2b1   : > { %v14336_v23 = vpop.f32.mrf.mxu3  ;;  %v3978_v22 = vadd.f32 %v3977_v42, %v3929_v15  ;;  %v3935_v12 = vpop.f32.mrf.mxu1  ;;  %v3887_v13 = vadd.f32 %v3886_v25, %v14113_v31  ;;  %v4168_v42 = vpack.c.bf16 %v4112_v39, %v4110_v53 }
 0x2b3   : > { %v4027_v48 = vadd.f32 %v14286_v40, %v3978_v22  ;;  %v3936_v59 = vadd.f32 %v3935_v12, %v3887_v13  ;;  %v4169_v22 = vpack.c.bf16 %v4113_v58, %v4111_v44 }
 0x2b5   : > { %v4066_v50 = vpack.c.bf16 %v4027_v48, %v4027_v48  ;;  %v4655_v48 = vpack.c.bf16 %v4594_v2, %v4593_v32  ;;  %v4120_v32 = vld [vmem:[%s14292_s18 + $0xb0] sm:$0xff] }
 0x2b7   : > { %4082 = vst.msk [vmem:[#allocation2 + $0x20] sm:$0xf] %vm3129_vm3, %v4066_v50 }
 0x2b8   : > { %v3979_v20 = vpop.f32.mrf.mxu2  ;;  %v3889_v35 = vpop.f32.mrf.mxu0 }
 0x2b9   : > { %v14349_v43 = vpop.f32.mrf.mxu3  ;;  %v3980_v28 = vadd.f32 %v3979_v20, %v3931_v33  ;;  %v3938_v40 = vpop.f32.mrf.mxu1  ;;  %v3890_v8 = vadd.f32 %v3889_v35, %v14122_v16  ;;  %v4116_v33 = vld [vmem:[%s14292_s18 + $0x90] sm:$0xff]  ;;  %v4630_v35 = vld [vmem:[%s14263_s15 + $0x148] sm:$0xff] }
 0x2bb   : > { %v4029_v17 = vadd.f32 %v14307_v11, %v3980_v28  ;;  %4365 = vmatmul.bf16.gmra.mxu0 %v4166_v60  ;;  %v3939_v50 = vadd.f32 %v3938_v40, %v3890_v8  ;;  %v4115_v60 = vld [vmem:[%s14292_s18 + $0x88] sm:$0xff]  ;;  %v4629_v28 = vld [vmem:[%s14263_s15 + $0x140] sm:$0xff]  ;;  %v4595_v40 = vld [vmem:[%s14263_s15 + $0x30] sm:$0xff]  ;;  %v4172_v8 = vpack.c.bf16 %v4120_v32, %v4118_v63 }
 0x2bc   : > { %10423 = vmatmul.msk.bf16.gmra.mxu1 %vm4294_vm6, %v4167_v14  ;;  %v4117_v14 = vld [vmem:[%s14292_s18 + $0x98] sm:$0xff] }
 0x2bd   : > { %v4067_v5 = vpack.c.bf16 %v4029_v17, %v4029_v17  ;;  %10450 = vmatmul.msk.bf16.gmra.mxu2 %vm4713_vm5, %v4654_v21 }
 0x2be   : > { %10467 = vmatmul.msk.bf16.gmra.mxu3 %vm4713_vm5, %v4671_v1  ;;  %v4596_v1 = vld [vmem:[%s14263_s15 + $0x38] sm:$0xff] }
 0x2bf   : > { %4083 = vst.msk [vmem:[#allocation2 + $0x24] sm:$0xf] %vm3129_vm3, %v4067_v5  ;;  %v4170_v5 = vpack.c.bf16 %v4116_v33, %v4114_v45 }
 0x2c0   : > { %v3982_v55 = vpop.f32.mrf.mxu2  ;;  %v3891_v26 = vpop.f32.mrf.mxu0 }
 0x2c1   : > { %v14357_v11 = vpop.f32.mrf.mxu3  ;;  %v3983_v52 = vadd.f32 %v3982_v55, %v3934_v0  ;;  %v3940_v49 = vpop.f32.mrf.mxu1  ;;  %v3892_v9 = vadd.f32 %v3891_v26, %v14143_v3  ;;  %v4171_v0 = vpack.c.bf16 %v4117_v14, %v4115_v60  ;;  %v4656_v26 = vpack.c.bf16 %v4596_v1, %v4595_v40  ;;  %v4122_v14 = vld [vmem:[%s14292_s18 + $0xc0] sm:$0xff]  ;;  %v4125_v1 = vld [vmem:[%s14292_s18 + $0xd8] sm:$0xff] }
 0x2c3   : > { %v4032_v62 = vadd.f32 %v14314_v7, %v3983_v52  ;;  %v3941_v21 = vadd.f32 %v3940_v49, %v3892_v9  ;;  %v4673_v52 = vpack.c.bf16 %v4630_v35, %v4629_v28  ;;  %v4124_v28 = vld [vmem:[%s14292_s18 + $0xd0] sm:$0xff]  ;;  %v4123_v35 = vld [vmem:[%s14292_s18 + $0xc8] sm:$0xff] }
 0x2c5   : > { %v4068_v56 = vpack.c.bf16 %v4032_v62, %v4032_v62 }
 0x2c7   : > { %4084 = vst.msk [vmem:[#allocation2 + $0x28] sm:$0xf] %vm3129_vm3, %v4068_v56 }
 0x2c8   : > { %v3984_v34 = vpop.f32.mrf.mxu2  ;;  %v3894_v25 = vpop.f32.mrf.mxu0 }
 0x2c9   : > { %v14370_v15 = vpop.f32.mrf.mxu3  ;;  %v3985_v31 = vadd.f32 %v3984_v34, %v3936_v59  ;;  %v3943_v7 = vpop.f32.mrf.mxu1  ;;  %v3895_v13 = vadd.f32 %v3894_v25, %v14166_v19  ;;  %v4119_v59 = vld [vmem:[%s14292_s18 + $0xa8] sm:$0xff]  ;;  %v4121_v34 = vld [vmem:[%s14292_s18 + $0xb8] sm:$0xff] }
 0x2ca   : > { %v4598_v25 = vld [vmem:[%s14263_s15 + $0x48] sm:$0xff] }
 0x2cb   : > { %v4034_v47 = vadd.f32 %v14327_v38, %v3985_v31  ;;  %4370 = vmatmul.bf16.gmra.mxu0 %v4168_v42  ;;  %v3944_v53 = vadd.f32 %v3943_v7, %v3895_v13  ;;  %v4631_v42 = vld [vmem:[%s14263_s15 + $0x150] sm:$0xff]  ;;  %v4597_v31 = vld [vmem:[%s14263_s15 + $0x40] sm:$0xff] }
 0x2cc   : > { %10424 = vmatmul.msk.bf16.gmra.mxu1 %vm4294_vm6, %v4169_v22  ;;  %v4632_v22 = vld [vmem:[%s14263_s15 + $0x158] sm:$0xff] }
 0x2cd   : > { %v4069_v12 = vpack.c.bf16 %v4034_v47, %v4034_v47  ;;  %10451 = vmatmul.msk.bf16.gmra.mxu2 %vm4713_vm5, %v4655_v48  ;;  %v4173_v47 = vpack.c.bf16 %v4121_v34, %v4119_v59 }
 0x2ce   : > { %10468 = vmatmul.msk.bf16.gmra.mxu3 %vm4713_vm5, %v4672_v37 }
 0x2cf   : > { %4085 = vst.msk [vmem:[#allocation2 + $0x2c] sm:$0xf] %vm3129_vm3, %v4069_v12 }
 0x2d0   : > { %v3987_v16 = vpop.f32.mrf.mxu2  ;;  %v3896_v29 = vpop.f32.mrf.mxu0 }
 0x2d1   : > { %v14378_v38 = vpop.f32.mrf.mxu3  ;;  %v3988_v61 = vadd.f32 %v3987_v16, %v3939_v50  ;;  %v3945_v10 = vpop.f32.mrf.mxu1  ;;  %v3897_v58 = vadd.f32 %v3896_v29, %v14197_v41  ;;  %v4674_v50 = vpack.c.bf16 %v4632_v22, %v4631_v42  ;;  %v4657_v16 = vpack.c.bf16 %v4598_v25, %v4597_v31  ;;  %v12304_v42 = vld [vmem:[#allocation2 + $0x20] sm:$0xff]  ;;  %v4128_v31 = vld [vmem:[%s14292_s18 + $0xf0] sm:$0xff] }
 0x2d2   : > { %v4126_v22 = vld [vmem:[%s14292_s18 + $0xe0] sm:$0xff] }
 0x2d3   : > { %v4037_v36 = vadd.f32 %v14336_v23, %v3988_v61  ;;  %v3946_v7 = vadd.f32 %v3945_v10, %v3897_v58 }
 0x2d5   : > { %v4070_v20 = vpack.c.bf16 %v4037_v36, %v4037_v36 }
 0x2d7   : > { %4086 = vst.msk [vmem:[#allocation2 + $0x30] sm:$0xf] %vm3129_vm3, %v4070_v20 }
 0x2d8   : > { %v3989_v18 = vpop.f32.mrf.mxu2  ;;  %v3899_v55 = vpop.f32.mrf.mxu0 }
 0x2d9   : > { %v14391_v17 = vpop.f32.mrf.mxu3  ;;  %v3990_v3 = vadd.f32 %v3989_v18, %v3941_v21  ;;  %v3948_v23 = vpop.f32.mrf.mxu1  ;;  %v3900_v61 = vadd.f32 %v3899_v55, %v14221_v57  ;;  %v4633_v21 = vld [vmem:[%s14263_s15 + $0x160] sm:$0xff]  ;;  %v4634_v18 = vld [vmem:[%s14263_s15 + $0x168] sm:$0xff] }
 0x2db   : > { %v4039_v62 = vadd.f32 %v14349_v43, %v3990_v3  ;;  %4375 = vmatmul.bf16.gmra.mxu0 %v4170_v5  ;;  %v3949_v9 = vadd.f32 %v3948_v23, %v3900_v61  ;;  %v4600_v3 = vld [vmem:[%s14263_s15 + $0x58] sm:$0xff]  ;;  %v4176_v61 = vpack.c.bf16 %v4128_v31, %v4126_v22 }
 0x2dc   : > { %10425 = vmatmul.msk.bf16.gmra.mxu1 %vm4294_vm6, %v4171_v0  ;;  %v4599_v0 = vld [vmem:[%s14263_s15 + $0x50] sm:$0xff] }
 0x2dd   : > { %v4071_v49 = vpack.c.bf16 %v4039_v62, %v4039_v62  ;;  %10452 = vmatmul.msk.bf16.gmra.mxu2 %vm4713_vm5, %v4656_v26  ;;  %v4175_v26 = vpack.c.bf16 %v4125_v1, %v4123_v35 }
 0x2de   : > { %10469 = vmatmul.msk.bf16.gmra.mxu3 %vm4713_vm5, %v4673_v52 }
 0x2df   : > { %4087 = vst.msk [vmem:[#allocation2 + $0x34] sm:$0xf] %vm3129_vm3, %v4071_v49  ;;  %v4675_v49 = vpack.c.bf16 %v4634_v18, %v4633_v21 }
 0x2e0   : > { %v3992_v19 = vpop.f32.mrf.mxu2  ;;  %v3901_v56 = vpop.f32.mrf.mxu0 }
 0x2e1   : > { %v14399_v43 = vpop.f32.mrf.mxu3  ;;  %v3993_v39 = vadd.f32 %v3992_v19, %v3944_v53  ;;  %v3950_v44 = vpop.f32.mrf.mxu1  ;;  %v3902_v20 = vadd.f32 %v3901_v56, %v14248_v30  ;;  %v4174_v30 = vpack.c.bf16 %v4124_v28, %v4122_v14  ;;  %v4658_v53 = vpack.c.bf16 %v4600_v3, %v4599_v0  ;;  %v12300_v0 = vld [vmem:[#allocation2] sm:$0xff] }
 0x2e2   : > { %v4130_v3 = vld [vmem:[%s14292_s18 + $0x100] sm:$0xff] }
 0x2e3   : > { %v4042_v4 = vadd.f32 %v14357_v11, %v3993_v39  ;;  %v3951_v55 = vadd.f32 %v3950_v44, %v3902_v20 }
 0x2e5   : > { %v4072_v2 = vpack.c.bf16 %v4042_v4, %v4042_v4  ;;  %v12305_v4 = vld [vmem:[#allocation2 + $0x28] sm:$0xff] }
 0x2e6   : > { %v12306_v56 = vld [vmem:[#allocation2 + $0x30] sm:$0xff] }
 0x2e7   : > { %4088 = vst.msk [vmem:[#allocation2 + $0x38] sm:$0xf] %vm3129_vm3, %v4072_v2 }
 0x2e8   : > { %v3994_v37 = vpop.f32.mrf.mxu2  ;;  %v3904_v12 = vpop.f32.mrf.mxu0 }
 0x2e9   : > { %v14412_v48 = vpop.f32.mrf.mxu3  ;;  %v3995_v41 = vadd.f32 %v3994_v37, %v3946_v7  ;;  %v3953_v11 = vpop.f32.mrf.mxu1  ;;  %v3905_v19 = vadd.f32 %v3904_v12, %v14266_v24  ;;  %v4127_v7 = vld [vmem:[%s14292_s18 + $0xe8] sm:$0xff]  ;;  %v4129_v37 = vld [vmem:[%s14292_s18 + $0xf8] sm:$0xff] }
 0x2ea   : > { %v4602_v12 = vld [vmem:[%s14263_s15 + $0x68] sm:$0xff] }
 0x2eb   : > { %v4044_v29 = vadd.f32 %v14370_v15, %v3995_v41  ;;  %4380 = vmatmul.bf16.gmra.mxu0 %v4172_v8  ;;  %v3954_v58 = vadd.f32 %v3953_v11, %v3905_v19  ;;  %v4635_v8 = vld [vmem:[%s14263_s15 + $0x170] sm:$0xff]  ;;  %v4601_v41 = vld [vmem:[%s14263_s15 + $0x60] sm:$0xff] }
 0x2ec   : > { %10426 = vmatmul.msk.bf16.gmra.mxu1 %vm4294_vm6, %v4173_v47  ;;  %v4636_v47 = vld [vmem:[%s14263_s15 + $0x178] sm:$0xff] }
 0x2ed   : > { %v4073_v10 = vpack.c.bf16 %v4044_v29, %v4044_v29  ;;  %10453 = vmatmul.msk.bf16.gmra.mxu2 %vm4713_vm5, %v4657_v16 }
 0x2ee   : > { %10470 = vmatmul.msk.bf16.gmra.mxu3 %vm4713_vm5, %v4674_v50 }
 0x2ef   : > { %4089 = vst.msk [vmem:[#allocation2 + $0x3c] sm:$0xf] %vm3129_vm3, %v4073_v10 }
 0x2f0   : > { %v3997_v57 = vpop.f32.mrf.mxu2  ;;  %v3906_v45 = vpop.f32.mrf.mxu0 }
 0x2f1   : > { %v14420_v15 = vpop.f32.mrf.mxu3  ;;  %v3998_v36 = vadd.f32 %v3997_v57, %v3949_v9  ;;  %v3955_v33 = vpop.f32.mrf.mxu1  ;;  %v3907_v59 = vadd.f32 %v3906_v45, %v14282_v27  ;;  %v12303_v27 = vld [vmem:[#allocation2 + $0x18] sm:$0xff]  ;;  %v4676_v57 = vpack.c.bf16 %v4636_v47, %v4635_v8 }
 0x2f3   : > { %v4047_v60 = vadd.f32 %v14378_v38, %v3998_v36  ;;  %v3956_v11 = vadd.f32 %v3955_v33, %v3907_v59  ;;  %v4659_v36 = vpack.c.bf16 %v4602_v12, %v4601_v41  ;;  %v12302_v33 = vld [vmem:[#allocation2 + $0x10] sm:$0xff] }
 0x2f5   : > { %v4074_v40 = vpack.c.bf16 %v4047_v60, %v4047_v60 }
 0x2f6   : > { %v12307_v5 = vld [vmem:[#allocation2 + $0x38] sm:$0xff] }
 0x2f7   : > { %4090 = vst.msk [vmem:[#allocation2 + $0x40] sm:$0xf] %vm3129_vm3, %v4074_v40  ;;  %7577 = vmatpush.bf16.msrb.mxu3 %v12307_v5 }
 0x2f8   : > { %v3999_v23 = vpop.f32.mrf.mxu2  ;;  %v3909_v13 = vpop.f32.mrf.mxu0 }
 0x2f9   : > { %v14433_v52 = vpop.f32.mrf.mxu3  ;;  %v4000_v38 = vadd.f32 %v3999_v23, %v3951_v55  ;;  %v3958_v62 = vpop.f32.mrf.mxu1  ;;  %v3910_v45 = vadd.f32 %v3909_v13, %v14296_v6  ;;  %v4132_v55 = vld [vmem:[%s14292_s18 + $0x110] sm:$0xff]  ;;  %v4638_v13 = vld [vmem:[%s14263_s15 + $0x188] sm:$0xff] }
 0x2fb   : > { %v4049_v39 = vadd.f32 %v14391_v17, %v4000_v38  ;;  %4385 = vmatmul.bf16.gmra.mxu0 %v4174_v30  ;;  %7578 = vmatpush.bf16.msrb.mxu3 %v12306_v56  ;;  %v3959_v14 = vadd.f32 %v3958_v62, %v3910_v45  ;;  %v4131_v30 = vld [vmem:[%s14292_s18 + $0x108] sm:$0xff]  ;;  %v4637_v38 = vld [vmem:[%s14263_s15 + $0x180] sm:$0xff]  ;;  %v4603_v62 = vld [vmem:[%s14263_s15 + $0x70] sm:$0xff] }
 0x2fc   : > { %10427 = vmatmul.msk.bf16.gmra.mxu1 %vm4294_vm6, %v4175_v26  ;;  %v4133_v26 = vld [vmem:[%s14292_s18 + $0x118] sm:$0xff] }
 0x2fd   : > { %v4075_v44 = vpack.c.bf16 %v4049_v39, %v4049_v39  ;;  %10454 = vmatmul.msk.bf16.gmra.mxu2 %vm4713_vm5, %v4658_v53  ;;  %v4178_v39 = vpack.c.bf16 %v4132_v55, %v4130_v3 }
 0x2fe   : > { %10471 = vmatmul.msk.bf16.gmra.mxu3 %vm4713_vm5, %v4675_v49  ;;  %v4604_v49 = vld [vmem:[%s14263_s15 + $0x78] sm:$0xff] }
 0x2ff   : > { %4091 = vst.msk [vmem:[#allocation2 + $0x44] sm:$0xf] %vm3129_vm3, %v4075_v44  ;;  %7579 = vmatpush.bf16.msrb.mxu3 %v12305_v4  ;;  %v4677_v4 = vpack.c.bf16 %v4638_v13, %v4637_v38  ;;  %v4139_v38 = vld [vmem:[%s14292_s18 + $0x148] sm:$0xff]  ;;  %v4141_v13 = vld [vmem:[%s14292_s18 + $0x158] sm:$0xff] }
 0x300   : > { %v4002_v24 = vpop.f32.mrf.mxu2  ;;  %v3911_v32 = vpop.f32.mrf.mxu0 }
 0x301   : > { %v14441_v17 = vpop.f32.mrf.mxu3  ;;  %v4003_v63 = vadd.f32 %v4002_v24, %v3954_v58  ;;  %v3960_v2 = vpop.f32.mrf.mxu1  ;;  %v3912_v18 = vadd.f32 %v3911_v32, %v14310_v51 }
 0x303   : > { %v4052_v34 = vadd.f32 %v14399_v43, %v4003_v63  ;;  %7580 = vmatpush.bf16.msrb.mxu3 %v12304_v42  ;;  %v4177_v43 = vpack.c.bf16 %v4129_v37, %v4127_v7  ;;  %v3961_v53 = vadd.f32 %v3960_v2, %v3912_v18  ;;  %v4660_v63 = vpack.c.bf16 %v4604_v49, %v4603_v62  ;;  %v4641_v62 = vld [vmem:[%s14263_s15 + $0x1a0] sm:$0xff]  ;;  %v4642_v49 = vld [vmem:[%s14263_s15 + $0x1a8] sm:$0xff] }
 0x305   : > { %v4076_v25 = vpack.c.bf16 %v4052_v34, %v4052_v34 }
 0x307   : > { %4092 = vst.msk [vmem:[#allocation2 + $0x48] sm:$0xf] %vm3129_vm3, %v4076_v25  ;;  %7581 = vmatpush.bf16.msrb.mxu3 %v12303_v27 }
 0x308   : > { %v4004_v50 = vpop.f32.mrf.mxu2  ;;  %v3914_v10 = vpop.f32.mrf.mxu0 }
 0x309   : > { %v14454_v16 = vpop.f32.mrf.mxu3  ;;  %v4005_v29 = vadd.f32 %v4004_v50, %v3956_v11  ;;  %v3963_v9 = vpop.f32.mrf.mxu1  ;;  %v3915_v59 = vadd.f32 %v3914_v10, %v14317_v46  ;;  %v4134_v11 = vld [vmem:[%s14292_s18 + $0x120] sm:$0xff]  ;;  %v4136_v50 = vld [vmem:[%s14292_s18 + $0x130] sm:$0xff]  ;;  %v4640_v10 = vld [vmem:[%s14263_s15 + $0x198] sm:$0xff] }
 0x30b   : > { %v4054_v20 = vadd.f32 %v14412_v48, %v4005_v29  ;;  %4390 = vmatmul.bf16.gmra.mxu0 %v4176_v61  ;;  %7582 = vmatpush.bf16.msrb.mxu3 %v12302_v33  ;;  %v12301_v48 = vld [vmem:[#allocation2 + $0x8] sm:$0xff]  ;;  %v3964_v22 = vadd.f32 %v3963_v9, %v3915_v59  ;;  %v4639_v29 = vld [vmem:[%s14263_s15 + $0x190] sm:$0xff]  ;;  %v4605_v9 = vld [vmem:[%s14263_s15 + $0x80] sm:$0xff] }
 0x30c   : > { %10428 = vmatmul.msk.bf16.gmra.mxu1 %vm4294_vm6, %v4177_v43  ;;  %v4135_v61 = vld [vmem:[%s14292_s18 + $0x128] sm:$0xff]  ;;  %v4137_v43 = vld [vmem:[%s14292_s18 + $0x138] sm:$0xff] }
 0x30d   : > { %v4077_v60 = vpack.c.bf16 %v4054_v20, %v4054_v20  ;;  %10455 = vmatmul.msk.bf16.gmra.mxu2 %vm4713_vm5, %v4659_v36  ;;  %v4181_v20 = vpack.c.bf16 %v4137_v43, %v4135_v61 }
 0x30e   : > { %10472 = vmatmul.msk.bf16.gmra.mxu3 %vm4713_vm5, %v4676_v57  ;;  %v4606_v57 = vld [vmem:[%s14263_s15 + $0x88] sm:$0xff] }
 0x30f   : > { %4093 = vst.msk [vmem:[#allocation2 + $0x4c] sm:$0xf] %vm3129_vm3, %v4077_v60  ;;  %7583 = vmatpush.bf16.msrb.mxu3 %v12301_v48  ;;  %v4661_v48 = vpack.c.bf16 %v4606_v57, %v4605_v9 }
 0x310   : > { %v4007_v28 = vpop.f32.mrf.mxu2  ;;  %v3916_v1 = vpop.f32.mrf.mxu0 }
 0x311   : > { %v4900_v6 = vpop.f32.mrf.mxu3  ;;  %v4008_v35 = vadd.f32 %v4007_v28, %v3959_v14  ;;  %v3965_v21 = vpop.f32.mrf.mxu1  ;;  %v3917_v47 = vadd.f32 %v3916_v1, %v14331_v54 }
 0x312   : > { %v5015_v40 = vpack.c.bf16 %v4900_v6, %v4900_v6  ;;  %v4678_v6 = vpack.c.bf16 %v4640_v10, %v4639_v29 }
 0x313   : > { %v4057_v5 = vadd.f32 %v14420_v15, %v4008_v35  ;;  %7584 = vmatpush.bf16.msrb.mxu3 %v12300_v0  ;;  %v4179_v15 = vpack.c.bf16 %v4133_v26, %v4131_v30  ;;  %v3966_v36 = vadd.f32 %v3965_v21, %v3917_v47  ;;  %v4138_v30 = vld [vmem:[%s14292_s18 + $0x140] sm:$0xff]  ;;  %v4140_v26 = vld [vmem:[%s14292_s18 + $0x150] sm:$0xff] }
 0x314   : > { %5079 = vst.msk [vmem:[#allocation2 + $0x158] sm:$0xf] %vm3129_vm3, %v5015_v40  ;;  %v4643_v47 = vld [vmem:[%s14263_s15 + $0x1b0] sm:$0xff] }
 0x315   : > { %v4078_v23 = vpack.c.bf16 %v4057_v5, %v4057_v5 }
 0x317   : > { %4094 = vst.msk [vmem:[#allocation2 + $0x50] sm:$0xf] %vm3129_vm3, %v4078_v23 }
 0x318   : > { %v4009_v19 = vpop.f32.mrf.mxu2  ;;  %v4356_v58 = vpop.f32.mrf.mxu0 }
 0x319   : > { %v4902_v51 = vpop.f32.mrf.mxu3  ;;  %v4010_v56 = vadd.f32 %v4009_v19, %v3961_v53  ;;  %v4445_v24 = vpop.f32.mrf.mxu1  ;;  %v4607_v53 = vld [vmem:[%s14263_s15 + $0x90] sm:$0xff]  ;;  %v4608_v19 = vld [vmem:[%s14263_s15 + $0x98] sm:$0xff] }
 0x31a   : > { %v5016_v44 = vpack.c.bf16 %v4902_v51, %v4902_v51  ;;  %v4446_v32 = vadd.f32 %v4445_v24, %v4356_v58 }
 0x31b   : > { %v4059_v34 = vadd.f32 %v14433_v52, %v4010_v56  ;;  %4395 = vmatmul.bf16.gmra.mxu0 %v4178_v39  ;;  %v4182_v39 = vpack.c.bf16 %v4140_v26, %v4138_v30 }
 0x31c   : > { %5080 = vst.msk [vmem:[#allocation2 + $0x15c] sm:$0xf] %vm3129_vm3, %v5016_v44  ;;  %v4525_v2 = vpack.c.bf16 %v4446_v32, %v4446_v32  ;;  %10429 = vmatmul.msk.bf16.gmra.mxu1 %vm4294_vm6, %v4179_v15  ;;  %v4183_v15 = vpack.c.bf16 %v4141_v13, %v4139_v38 }
 0x31d   : > { %v4079_v42 = vpack.c.bf16 %v4059_v34, %v4059_v34  ;;  %10456 = vmatmul.msk.bf16.gmra.mxu2 %vm4713_vm5, %v4660_v63  ;;  %v4662_v63 = vpack.c.bf16 %v4608_v19, %v4607_v53 }
 0x31e   : > { %10473 = vmatmul.msk.bf16.gmra.mxu3 %vm4713_vm5, %v4677_v4  ;;  %4557 = vst.msk [vmem:[#allocation2 + $0x60] sm:$0xf] %vm3129_vm3, %v4525_v2  ;;  %v4679_v4 = vpack.c.bf16 %v4642_v49, %v4641_v62 }
 0x31f   : > { %4095 = vst.msk [vmem:[#allocation2 + $0x54] sm:$0xf] %vm3129_vm3, %v4079_v42 }
 0x320   : > { %v4012_v46 = vpop.f32.mrf.mxu2  ;;  %v4358_v7 = vpop.f32.mrf.mxu0 }
 0x321   : > { %v4905_v52 = vpop.f32.mrf.mxu3  ;;  %v4013_v31 = vadd.f32 %v4012_v46, %v3964_v22  ;;  %v4447_v37 = vpop.f32.mrf.mxu1 }
 0x322   : > { %v5017_v25 = vpack.c.bf16 %v4905_v52, %v4905_v52  ;;  %v4448_v8 = vadd.f32 %v4447_v37, %v4358_v7  ;;  %v4144_v7 = vld [vmem:[%s14292_s18 + $0x170] sm:$0xff]  ;;  %v4143_v37 = vld [vmem:[%s14292_s18 + $0x168] sm:$0xff] }
 0x323   : > { %v4062_v41 = vadd.f32 %v14441_v17, %v4013_v31  ;;  %v4180_v17 = vpack.c.bf16 %v4136_v50, %v4134_v11  ;;  %v4609_v11 = vld [vmem:[%s14263_s15 + $0xa0] sm:$0xff]  ;;  %v4610_v50 = vld [vmem:[%s14263_s15 + $0xa8] sm:$0xff] }
 0x324   : > { %5081 = vst.msk [vmem:[#allocation2 + $0x160] sm:$0xf] %vm3129_vm3, %v5017_v25  ;;  %v4526_v12 = vpack.c.bf16 %v4448_v8, %v4448_v8  ;;  %v4142_v25 = vld [vmem:[%s14292_s18 + $0x160] sm:$0xff]  ;;  %v4145_v8 = vld [vmem:[%s14292_s18 + $0x178] sm:$0xff] }
 0x325   : > { %v4080_v27 = vpack.c.bf16 %v4062_v41, %v4062_v41  ;;  %v4644_v41 = vld [vmem:[%s14263_s15 + $0x1b8] sm:$0xff]  ;;  %v4184_v61 = vpack.c.bf16 %v4144_v7, %v4142_v25  ;;  %v4185_v43 = vpack.c.bf16 %v4145_v8, %v4143_v37 }
 0x326   : > { %4558 = vst.msk [vmem:[#allocation2 + $0x64] sm:$0xf] %vm3129_vm3, %v4526_v12  ;;  %v4648_v25 = vld [vmem:[%s14263_s15 + $0x1d8] sm:$0xff] }
 0x327   : > { %4096 = vst.msk [vmem:[#allocation2 + $0x58] sm:$0xf] %vm3129_vm3, %v4080_v27 }
 0x328   : > { %v4014_v54 = vpop.f32.mrf.mxu2  ;;  %v4361_v14 = vpop.f32.mrf.mxu0 }
 0x329   : > { %v4907_v45 = vpop.f32.mrf.mxu3  ;;  %v4015_v33 = vadd.f32 %v4014_v54, %v3966_v36  ;;  %v4450_v28 = vpop.f32.mrf.mxu1  ;;  %v4680_v36 = vpack.c.bf16 %v4644_v41, %v4643_v47  ;;  %v4663_v54 = vpack.c.bf16 %v4610_v50, %v4609_v11 }
 0x32a   : > { %v5018_v60 = vpack.c.bf16 %v4907_v45, %v4907_v45  ;;  %v4451_v35 = vadd.f32 %v4450_v28, %v4361_v14 }
 0x32b   : > { %v4064_v40 = vadd.f32 %v14454_v16, %v4015_v33  ;;  %4400 = vmatmul.bf16.gmra.mxu0 %v4180_v17 }
 0x32c   : > { %5082 = vst.msk [vmem:[#allocation2 + $0x164] sm:$0xf] %vm3129_vm3, %v5018_v60  ;;  %v4527_v1 = vpack.c.bf16 %v4451_v35, %v4451_v35  ;;  %10430 = vmatmul.msk.bf16.gmra.mxu1 %vm4294_vm6, %v4181_v20 }
 0x32d   : > { %v4081_v21 = vpack.c.bf16 %v4064_v40, %v4064_v40  ;;  %10457 = vmatmul.msk.bf16.gmra.mxu2 %vm4713_vm5, %v4661_v48  ;;  %v4146_v40 = vld [vmem:[%s14292_s18 + $0x180] sm:$0xff] }
 0x32e   : > { %10474 = vmatmul.msk.bf16.gmra.mxu3 %vm4713_vm5, %v4678_v6  ;;  %4559 = vst.msk [vmem:[#allocation2 + $0x68] sm:$0xf] %vm3129_vm3, %v4527_v1  ;;  %v4148_v1 = vld [vmem:[%s14292_s18 + $0x190] sm:$0xff] }
 0x32f   : > { %4097 = vst.msk [vmem:[#allocation2 + $0x5c] sm:$0xf] %vm3129_vm3, %v4081_v21  ;;  %v4147_v21 = vld [vmem:[%s14292_s18 + $0x188] sm:$0xff]  ;;  %v4186_v30 = vpack.c.bf16 %v4148_v1, %v4146_v40  ;;  %v4649_v40 = vld [vmem:[%s14263_s15 + $0x1e0] sm:$0xff] }
 0x330   : > { %v4825_v18 = vpop.f32.mrf.mxu2  ;;  %v4363_v0 = vpop.f32.mrf.mxu0  ;;  %v4650_v1 = vld [vmem:[%s14263_s15 + $0x1e8] sm:$0xff] }
 0x331   : > { %v4910_v16 = vpop.f32.mrf.mxu3  ;;  %v4452_v3 = vpop.f32.mrf.mxu1  ;;  %v4985_v12 = vpack.c.bf16 %v4825_v18, %v4825_v18  ;;  %v4645_v18 = vld [vmem:[%s14263_s15 + $0x1c0] sm:$0xff] }
 0x332   : > { %v5019_v5 = vpack.c.bf16 %v4910_v16, %v4910_v16  ;;  %v4453_v55 = vadd.f32 %v4452_v3, %v4363_v0  ;;  %v4149_v16 = vld [vmem:[%s14292_s18 + $0x198] sm:$0xff]  ;;  %v4611_v3 = vld [vmem:[%s14263_s15 + $0xb0] sm:$0xff] }
 0x333   : > { %5049 = vst.msk [vmem:[#allocation2 + $0xe0] sm:$0xf] %vm3129_vm3, %v4985_v12  ;;  %v4187_v26 = vpack.c.bf16 %v4149_v16, %v4147_v21 }
 0x334   : > { %5083 = vst.msk [vmem:[#allocation2 + $0x168] sm:$0xf] %vm3129_vm3, %v5019_v5  ;;  %v4528_v23 = vpack.c.bf16 %v4453_v55, %v4453_v55  ;;  %v4646_v5 = vld [vmem:[%s14263_s15 + $0x1c8] sm:$0xff]  ;;  %v4612_v55 = vld [vmem:[%s14263_s15 + $0xb8] sm:$0xff] }
 0x335   : > { %v4681_v53 = vpack.c.bf16 %v4646_v5, %v4645_v18  ;;  %v4664_v19 = vpack.c.bf16 %v4612_v55, %v4611_v3 }
 0x336   : > { %4560 = vst.msk [vmem:[#allocation2 + $0x6c] sm:$0xf] %vm3129_vm3, %v4528_v23 }
 0x338   : > { %v4827_v56 = vpop.f32.mrf.mxu2  ;;  %v4366_v58 = vpop.f32.mrf.mxu0 }
 0x339   : > { %v4912_v51 = vpop.f32.mrf.mxu3  ;;  %v4455_v24 = vpop.f32.mrf.mxu1  ;;  %v4986_v20 = vpack.c.bf16 %v4827_v56, %v4827_v56 }
 0x33a   : > { %v5020_v44 = vpack.c.bf16 %v4912_v51, %v4912_v51  ;;  %v4456_v32 = vadd.f32 %v4455_v24, %v4366_v58 }
 0x33b   : > { %4405 = vmatmul.bf16.gmra.mxu0 %v4182_v39  ;;  %5050 = vst.msk [vmem:[#allocation2 + $0xe4] sm:$0xf] %vm3129_vm3, %v4986_v20  ;;  %v12310_v20 = vld [vmem:[#allocation2 + $0x50] sm:$0xff] }
 0x33c   : > { %5084 = vst.msk [vmem:[#allocation2 + $0x16c] sm:$0xf] %vm3129_vm3, %v5020_v44  ;;  %v4529_v59 = vpack.c.bf16 %v4456_v32, %v4456_v32  ;;  %10431 = vmatmul.msk.bf16.gmra.mxu1 %vm4294_vm6, %v4183_v15 }
 0x33d   : > { %10458 = vmatmul.msk.bf16.gmra.mxu2 %vm4713_vm5, %v4662_v63 }
 0x33e   : > { %10475 = vmatmul.msk.bf16.gmra.mxu3 %vm4713_vm5, %v4679_v4  ;;  %4561 = vst.msk [vmem:[#allocation2 + $0x70] sm:$0xf] %vm3129_vm3, %v4529_v59 }
 0x340   : > { %v4830_v2 = vpop.f32.mrf.mxu2  ;;  %v4368_v22 = vpop.f32.mrf.mxu0 }
 0x341   : > { %v4915_v34 = vpop.f32.mrf.mxu3  ;;  %v4457_v46 = vpop.f32.mrf.mxu1  ;;  %v4987_v0 = vpack.c.bf16 %v4830_v2, %v4830_v2  ;;  %v12313_v2 = vld [vmem:[#allocation2 + $0x68] sm:$0xff] }
 0x342   : > { %v5021_v42 = vpack.c.bf16 %v4915_v34, %v4915_v34  ;;  %v4458_v52 = vadd.f32 %v4457_v46, %v4368_v22  ;;  %v4152_v22 = vld [vmem:[%s14292_s18 + $0x1b0] sm:$0xff]  ;;  %v4151_v46 = vld [vmem:[%s14292_s18 + $0x1a8] sm:$0xff] }
 0x343   : > { %5051 = vst.msk [vmem:[#allocation2 + $0xe8] sm:$0xf] %vm3129_vm3, %v4987_v0 }
 0x344   : > { %5085 = vst.msk [vmem:[#allocation2 + $0x170] sm:$0xf] %vm3129_vm3, %v5021_v42  ;;  %v4530_v31 = vpack.c.bf16 %v4458_v52, %v4458_v52  ;;  %v4150_v42 = vld [vmem:[%s14292_s18 + $0x1a0] sm:$0xff]  ;;  %v4153_v52 = vld [vmem:[%s14292_s18 + $0x1b8] sm:$0xff] }
 0x345   : > { %v4188_v8 = vpack.c.bf16 %v4152_v22, %v4150_v42  ;;  %v4189_v47 = vpack.c.bf16 %v4153_v52, %v4151_v46  ;;  %v4652_v42 = vld [vmem:[%s14263_s15 + $0x1f8] sm:$0xff] }
 0x346   : > { %4562 = vst.msk [vmem:[#allocation2 + $0x74] sm:$0xf] %vm3129_vm3, %v4530_v31  ;;  %v4647_v31 = vld [vmem:[%s14263_s15 + $0x1d0] sm:$0xff] }
 0x348   : > { %v4832_v29 = vpop.f32.mrf.mxu2  ;;  %v4371_v9 = vpop.f32.mrf.mxu0 }
 0x349   : > { %v4917_v27 = vpop.f32.mrf.mxu3  ;;  %v4460_v57 = vpop.f32.mrf.mxu1  ;;  %v4988_v56 = vpack.c.bf16 %v4832_v29, %v4832_v29 }
 0x34a   : > { %v5022_v10 = vpack.c.bf16 %v4917_v27, %v4917_v27  ;;  %v4461_v45 = vadd.f32 %v4460_v57, %v4371_v9  ;;  %v4682_v27 = vpack.c.bf16 %v4648_v25, %v4647_v31 }
 0x34b   : > { %4410 = vmatmul.bf16.gmra.mxu0 %v4184_v61  ;;  %5052 = vst.msk [vmem:[#allocation2 + $0xec] sm:$0xf] %vm3129_vm3, %v4988_v56  ;;  %v12312_v61 = vld [vmem:[#allocation2 + $0x60] sm:$0xff] }
 0x34c   : > { %5086 = vst.msk [vmem:[#allocation2 + $0x174] sm:$0xf] %vm3129_vm3, %v5022_v10  ;;  %v4531_v17 = vpack.c.bf16 %v4461_v45, %v4461_v45  ;;  %10432 = vmatmul.msk.bf16.gmra.mxu1 %vm4294_vm6, %v4185_v43  ;;  %v12311_v10 = vld [vmem:[#allocation2 + $0x58] sm:$0xff] }
 0x34d   : > { %10459 = vmatmul.msk.bf16.gmra.mxu2 %vm4713_vm5, %v4663_v54  ;;  %v12314_v32 = vld [vmem:[#allocation2 + $0x70] sm:$0xff] }
 0x34e   : > { %10476 = vmatmul.msk.bf16.gmra.mxu3 %vm4713_vm5, %v4680_v36  ;;  %4563 = vst.msk [vmem:[#allocation2 + $0x78] sm:$0xf] %vm3129_vm3, %v4531_v17 }
 0x350   : > { %v14534_v60 = vpop.f32.mrf.mxu2  ;;  %v4373_v28 = vpop.f32.mrf.mxu0 }
 0x351   : > { %v4920_v33 = vpop.f32.mrf.mxu3  ;;  %v4462_v6 = vpop.f32.mrf.mxu1  ;;  %v4989_v7 = vpack.c.bf16 %v14534_v60, %v14534_v60 }
 0x352   : > { %v5023_v14 = vpack.c.bf16 %v4920_v33, %v4920_v33  ;;  %v4463_v48 = vadd.f32 %v4462_v6, %v4373_v28  ;;  %v4154_v28 = vld [vmem:[%s14292_s18 + $0x1c0] sm:$0xff]  ;;  %v4156_v6 = vld [vmem:[%s14292_s18 + $0x1d0] sm:$0xff] }
 0x353   : > { %5053 = vst.msk [vmem:[#allocation2 + $0xf0] sm:$0xf] %vm3129_vm3, %v4989_v7  ;;  %v4190_v18 = vpack.c.bf16 %v4156_v6, %v4154_v28 }
 0x354   : > { %5087 = vst.msk [vmem:[#allocation2 + $0x178] sm:$0xf] %vm3129_vm3, %v5023_v14  ;;  %v4532_v35 = vpack.c.bf16 %v4463_v48, %v4463_v48  ;;  %v12309_v14 = vld [vmem:[#allocation2 + $0x48] sm:$0xff] }
 0x355   : > { %v4155_v48 = vld [vmem:[%s14292_s18 + $0x1c8] sm:$0xff] }
 0x356   : > { %4564 = vst.msk [vmem:[#allocation2 + $0x7c] sm:$0xf] %vm3129_vm3, %v4532_v35  ;;  %v4157_v35 = vld [vmem:[%s14292_s18 + $0x1d8] sm:$0xff] }
 0x357   : > { %v4191_v5 = vpack.c.bf16 %v4157_v35, %v4155_v48 }
 0x358   : > { %v4837_v38 = vpop.f32.mrf.mxu2  ;;  %v4376_v62 = vpop.f32.mrf.mxu0 }
 0x359   : > { %v4922_v23 = vpop.f32.mrf.mxu3  ;;  %v4465_v49 = vpop.f32.mrf.mxu1  ;;  %v4990_v9 = vpack.c.bf16 %v4837_v38, %v4837_v38 }
 0x35a   : > { %v5024_v13 = vpack.c.bf16 %v4922_v23, %v4922_v23  ;;  %v4466_v51 = vadd.f32 %v4465_v49, %v4376_v62  ;;  %v12346_v49 = vld [vmem:[#allocation2 + $0x170] sm:$0xff] }
 0x35b   : > { %4415 = vmatmul.bf16.gmra.mxu0 %v4186_v30  ;;  %5054 = vst.msk [vmem:[#allocation2 + $0xf4] sm:$0xf] %vm3129_vm3, %v4990_v9  ;;  %v4683_v30 = vpack.c.bf16 %v4650_v1, %v4649_v40 }
 0x35c   : > { %5088 = vst.msk [vmem:[#allocation2 + $0x17c] sm:$0xf] %vm3129_vm3, %v5024_v13  ;;  %v4533_v39 = vpack.c.bf16 %v4466_v51, %v4466_v51  ;;  %10433 = vmatmul.msk.bf16.gmra.mxu1 %vm4294_vm6, %v4187_v26  ;;  %v12308_v26 = vld [vmem:[#allocation2 + $0x40] sm:$0xff] }
 0x35d   : > { %v12315_v15 = vld [vmem:[#allocation2 + $0x78] sm:$0xff]  ;;  %10460 = vmatmul.msk.bf16.gmra.mxu2 %vm4713_vm5, %v4664_v19 }
 0x35e   : > { %10477 = vmatmul.msk.bf16.gmra.mxu3 %vm4713_vm5, %v4681_v53  ;;  %4565 = vst.msk [vmem:[#allocation2 + $0x80] sm:$0xf] %vm3129_vm3, %v4533_v39  ;;  %7746 = vmatpush.bf16.msrb.mxu0 %v12315_v15 }
 0x360   : > { %v14553_v58 = vpop.f32.mrf.mxu2  ;;  %v4378_v4 = vpop.f32.mrf.mxu0 }
 0x361   : > { %v4925_v44 = vpop.f32.mrf.mxu3  ;;  %v4467_v63 = vpop.f32.mrf.mxu1  ;;  %v4991_v21 = vpack.c.bf16 %v14553_v58, %v14553_v58 }
 0x362   : > { %v5025_v24 = vpack.c.bf16 %v4925_v44, %v4925_v44  ;;  %v4468_v59 = vadd.f32 %v4467_v63, %v4378_v4  ;;  %7747 = vmatpush.bf16.msrb.mxu0 %v12314_v32  ;;  %v12345_v44 = vld [vmem:[#allocation2 + $0x168] sm:$0xff]  ;;  %v4158_v4 = vld [vmem:[%s14292_s18 + $0x1e0] sm:$0xff]  ;;  %v4160_v63 = vld [vmem:[%s14292_s18 + $0x1f0] sm:$0xff] }
 0x363   : > { %5055 = vst.msk [vmem:[#allocation2 + $0xf8] sm:$0xf] %vm3129_vm3, %v4991_v21  ;;  %v12347_v38 = vld [vmem:[#allocation2 + $0x178] sm:$0xff]  ;;  %v4159_v32 = vld [vmem:[%s14292_s18 + $0x1e8] sm:$0xff]  ;;  %v4192_v46 = vpack.c.bf16 %v4160_v63, %v4158_v4 }
 0x364   : > { %5089 = vst.msk [vmem:[#allocation2 + $0x180] sm:$0xf] %vm3129_vm3, %v5025_v24  ;;  %v4534_v34 = vpack.c.bf16 %v4468_v59, %v4468_v59  ;;  %v4161_v59 = vld [vmem:[%s14292_s18 + $0x1f8] sm:$0xff] }
 0x365   : > { %v4193_v52 = vpack.c.bf16 %v4161_v59, %v4159_v32  ;;  %v4613_v32 = vld [vmem:[%s14263_s15 + $0xc0] sm:$0xff]  ;;  %v4614_v59 = vld [vmem:[%s14263_s15 + $0xc8] sm:$0xff] }
 0x366   : > { %4566 = vst.msk [vmem:[#allocation2 + $0x84] sm:$0xf] %vm3129_vm3, %v4534_v34  ;;  %7748 = vmatpush.bf16.msrb.mxu0 %v12313_v2  ;;  %v12344_v34 = vld [vmem:[#allocation2 + $0x160] sm:$0xff]  ;;  %v4651_v2 = vld [vmem:[%s14263_s15 + $0x1f0] sm:$0xff] }
 0x368   : > { %v4842_v41 = vpop.f32.mrf.mxu2  ;;  %v4381_v11 = vpop.f32.mrf.mxu0 }
 0x369   : > { %v4927_v37 = vpop.f32.mrf.mxu3  ;;  %v4470_v50 = vpop.f32.mrf.mxu1  ;;  %v4992_v53 = vpack.c.bf16 %v4842_v41, %v4842_v41  ;;  %v12343_v41 = vld [vmem:[#allocation2 + $0x158] sm:$0xff] }
 0x36a   : > { %v5026_v12 = vpack.c.bf16 %v4927_v37, %v4927_v37  ;;  %v4471_v43 = vadd.f32 %v4470_v50, %v4381_v11  ;;  %7749 = vmatpush.bf16.msrb.mxu0 %v12312_v61  ;;  %v12330_v50 = vld [vmem:[#allocation2 + $0xf0] sm:$0xff] }
 0x36b   : > { %4420 = vmatmul.bf16.gmra.mxu0 %v4188_v8  ;;  %5056 = vst.msk [vmem:[#allocation2 + $0xfc] sm:$0xf] %vm3129_vm3, %v4992_v53  ;;  %v4684_v8 = vpack.c.bf16 %v4652_v42, %v4651_v2 }
 0x36c   : > { %5090 = vst.msk [vmem:[#allocation2 + $0x184] sm:$0xf] %vm3129_vm3, %v5026_v12  ;;  %v4535_v29 = vpack.c.bf16 %v4471_v43, %v4471_v43  ;;  %10434 = vmatmul.msk.bf16.gmra.mxu1 %vm4294_vm6, %v4189_v47 }
 0x36e   : > { %10478 = vmatmul.msk.bf16.gmra.mxu3 %vm4713_vm5, %v4682_v27  ;;  %4567 = vst.msk [vmem:[#allocation2 + $0x88] sm:$0xf] %vm3129_vm3, %v4535_v29  ;;  %7750 = vmatpush.bf16.msrb.mxu0 %v12311_v10 }
 0x370   : > { %v14571_v36 = vpop.f32.mrf.mxu2  ;;  %v4383_v45 = vpop.f32.mrf.mxu0 }
 0x371   : > { %v4930_v57 = vpop.f32.mrf.mxu3  ;;  %v4472_v17 = vpop.f32.mrf.mxu1 }
 0x372   : > { %v5027_v54 = vpack.c.bf16 %v4930_v57, %v4930_v57  ;;  %v4473_v33 = vadd.f32 %v4472_v17, %v4383_v45  ;;  %7751 = vmatpush.bf16.msrb.mxu0 %v12310_v20  ;;  %v12331_v12 = vld [vmem:[#allocation2 + $0xf8] sm:$0xff]  ;;  %v12329_v57 = vld [vmem:[#allocation2 + $0xe8] sm:$0xff]  ;;  %v10483_v45 = vld [vmem:[%s17836_s8] sm:$0xf] }
 0x373   : > { %8084 = vmatpush.bf16.msrb.mxu2 %v12331_v12  ;;  %v12044_v17 = vld [vmem:[%s17836_s8 + $0x4] sm:$0xf] }
 0x374   : > { %5091 = vst.msk [vmem:[#allocation2 + $0x188] sm:$0xf] %vm3129_vm3, %v5027_v54  ;;  %v4536_v60 = vpack.c.bf16 %v4473_v33, %v4473_v33  ;;  %v10485_v20 = vld [vmem:[%s17836_s8 + $0x20] sm:$0xf0]  ;;  %v12048_v33 = vld [vmem:[%s17836_s8 + $0x1c] sm:$0xf0] }
 0x375   : > { %v10488_v28 = vor.u32 %v12044_v17, %v10485_v20  ;;  %v10484_v1 = vor.u32 %v12048_v33, %v10483_v45  ;;  %v4616_v45 = vld [vmem:[%s14263_s15 + $0xd8] sm:$0xff] }
 0x376   : > { %4568 = vst.msk [vmem:[#allocation2 + $0x8c] sm:$0xf] %vm3129_vm3, %v4536_v60  ;;  %7752 = vmatpush.bf16.msrb.mxu0 %v12309_v14  ;;  %v12328_v60 = vld [vmem:[#allocation2 + $0xe0] sm:$0xff] }
 0x377   : > { %8085 = vmatpush.bf16.msrb.mxu2 %v12330_v50 }
 0x378   : > { %v14584_v0 = vpop.f32.mrf.mxu2  ;;  %v4386_v55 = vpop.f32.mrf.mxu0 }
 0x379   : > { %v4932_v16 = vpop.f32.mrf.mxu3  ;;  %v4475_v23 = vpop.f32.mrf.mxu1  ;;  %v4994_v53 = vpack.c.bf16 %v14584_v0, %v14584_v0 }
 0x37a   : > { %v5028_v3 = vpack.c.bf16 %v4932_v16, %v4932_v16  ;;  %v4476_v13 = vadd.f32 %v4475_v23, %v4386_v55  ;;  %7753 = vmatpush.bf16.msrb.mxu0 %v12308_v26 }
 0x37b   : > { %4425 = vmatmul.bf16.gmra.mxu0 %v4190_v18  ;;  %8086 = vmatpush.bf16.msrb.mxu2 %v12329_v57  ;;  %v4993_v18 = vpack.c.bf16 %v14571_v36, %v14571_v36  ;;  %v10517_v36 = vld [vmem:[%s17836_s8 + $0x60] sm:$0xf0]  ;;  %5058 = vst.msk [vmem:[#allocation2 + $0x104] sm:$0xf] %vm3129_vm3, %v4994_v53 }
 0x37c   : > { %5092 = vst.msk [vmem:[#allocation2 + $0x18c] sm:$0xf] %vm3129_vm3, %v5028_v3  ;;  %v4537_v62 = vpack.c.bf16 %v4476_v13, %v4476_v13  ;;  %10435 = vmatmul.msk.bf16.gmra.mxu1 %vm4294_vm6, %v4191_v5  ;;  %v12052_v13 = vld [vmem:[%s17836_s8 + $0x44] sm:$0xf] }
 0x37d   : > { %5057 = vst.msk [vmem:[#allocation2 + $0x100] sm:$0xf] %vm3129_vm3, %v4993_v18 }
 0x37e   : > { %10479 = vmatmul.msk.bf16.gmra.mxu3 %vm4713_vm5, %v4683_v30  ;;  %8422 = vmatpush.bf16.msra.mxu0 %v12347_v38  ;;  %4569 = vst.msk [vmem:[#allocation2 + $0x90] sm:$0xf] %vm3129_vm3, %v4537_v62  ;;  %v10515_v62 = vld [vmem:[%s17836_s8 + $0x40] sm:$0xf] }
 0x37f   : > { %8087 = vmatpush.bf16.msrb.mxu2 %v12328_v60 }
 0x380   : > { %v14591_v51 = vpop.f32.mrf.mxu2  ;;  %v4388_v15 = vpop.f32.mrf.mxu0 }
 0x381   : > { %v4935_v19 = vpop.f32.mrf.mxu3  ;;  %v4477_v56 = vpop.f32.mrf.mxu1  ;;  %v4995_v0 = vpack.c.bf16 %v14591_v51, %v14591_v51  ;;  %v12060_v51 = vld [vmem:[%s17836_s8 + $0x84] sm:$0xf] }
 0x382   : > { %v5029_v39 = vpack.c.bf16 %v4935_v19, %v4935_v19  ;;  %8423 = vmatpush.bf16.msra.mxu0 %v12346_v49  ;;  %v4478_v58 = vadd.f32 %v4477_v56, %v4388_v15  ;;  %v12056_v49 = vld [vmem:[%s17836_s8 + $0x5c] sm:$0xf0] }
 0x383   : > { %5059 = vst.msk [vmem:[#allocation2 + $0x108] sm:$0xf] %vm3129_vm3, %v4995_v0 }
 0x384   : > { %5093 = vst.msk [vmem:[#allocation2 + $0x190] sm:$0xf] %vm3129_vm3, %v5029_v39  ;;  %v4538_v24 = vpack.c.bf16 %v4478_v58, %v4478_v58  ;;  %v10520_v39 = vor.u32 %v12052_v13, %v10517_v36 }
 0x386   : > { %8424 = vmatpush.bf16.msra.mxu0 %v12345_v44  ;;  %4570 = vst.msk [vmem:[#allocation2 + $0x94] sm:$0xf] %vm3129_vm3, %v4538_v24  ;;  %v10516_v24 = vor.u32 %v12056_v49, %v10515_v62  ;;  %v4617_v62 = vld [vmem:[%s14263_s15 + $0xe0] sm:$0xff]  ;;  %v4618_v49 = vld [vmem:[%s14263_s15 + $0xe8] sm:$0xff] }
 0x387   : > { %v4667_v53 = vpack.c.bf16 %v4618_v49, %v4617_v62  ;;  %v12317_v49 = vld [vmem:[#allocation2 + $0x88] sm:$0xff] }
 0x388   : > { %v14601_v31 = vpop.f32.mrf.mxu2  ;;  %v4391_v7 = vpop.f32.mrf.mxu0 }
 0x389   : > { %v4937_v22 = vpop.f32.mrf.mxu3  ;;  %v4480_v37 = vpop.f32.mrf.mxu1 }
 0x38a   : > { %v5030_v25 = vpack.c.bf16 %v4937_v22, %v4937_v22  ;;  %8425 = vmatpush.bf16.msra.mxu0 %v12344_v34  ;;  %v4481_v47 = vadd.f32 %v4480_v37, %v4391_v7  ;;  %v4665_v34 = vpack.c.bf16 %v4614_v59, %v4613_v32  ;;  %v10549_v37 = vld [vmem:[%s17836_s8 + $0xa0] sm:$0xf0] }
 0x38b   : > { %4430 = vmatmul.bf16.gmra.mxu0 %v4192_v46  ;;  %v10613_v59 = vld [vmem:[%s17836_s8 + $0x120] sm:$0xf0] }
 0x38c   : > { %5094 = vst.msk [vmem:[#allocation2 + $0x194] sm:$0xf] %vm3129_vm3, %v5030_v25  ;;  %v4539_v11 = vpack.c.bf16 %v4481_v47, %v4481_v47  ;;  %10436 = vmatmul.msk.bf16.gmra.mxu1 %vm4294_vm6, %v4193_v52  ;;  %10461 = vmatmul.msk.bf16.gmra.mxu2 %vm4713_vm5, %v4665_v34  ;;  %v12064_v47 = vld [vmem:[%s17836_s8 + $0x9c] sm:$0xf0] }
 0x38d   : > { %v10611_v34 = vld [vmem:[%s17836_s8 + $0x100] sm:$0xf] }
 0x38e   : > { %10480 = vmatmul.msk.bf16.gmra.mxu3 %vm4713_vm5, %v4684_v8  ;;  %4571 = vst.msk [vmem:[#allocation2 + $0x98] sm:$0xf] %vm3129_vm3, %v4539_v11  ;;  %8426 = vmatpush.bf16.msra.mxu0 %v12343_v41  ;;  %v10547_v8 = vld [vmem:[%s17836_s8 + $0x80] sm:$0xf]  ;;  %v4996_v41 = vpack.c.bf16 %v14601_v31, %v14601_v31  ;;  %v10552_v11 = vor.u32 %v12060_v51, %v10549_v37 }
 0x390   : > { %v14607_v61 = vpop.f32.mrf.mxu2  ;;  %v4393_v29 = vpop.f32.mrf.mxu0  ;;  %5060 = vst.msk [vmem:[#allocation2 + $0x10c] sm:$0xf] %vm3129_vm3, %v4996_v41 }
 0x391   : > { %v4940_v27 = vpop.f32.mrf.mxu3  ;;  %v4482_v10 = vpop.f32.mrf.mxu1  ;;  %v4997_v31 = vpack.c.bf16 %v14607_v61, %v14607_v61  ;;  %v12068_v61 = vld [vmem:[%s17836_s8 + $0xc4] sm:$0xf] }
 0x392   : > { %v5031_v43 = vpack.c.bf16 %v4940_v27, %v4940_v27  ;;  %v4483_v9 = vadd.f32 %v4482_v10, %v4393_v29  ;;  %v10548_v10 = vor.u32 %v12064_v47, %v10547_v8 }
 0x393   : > { %5061 = vst.msk [vmem:[#allocation2 + $0x110] sm:$0xf] %vm3129_vm3, %v4997_v31 }
 0x394   : > { %5095 = vst.msk [vmem:[#allocation2 + $0x198] sm:$0xf] %vm3129_vm3, %v5031_v43  ;;  %v4540_v54 = vpack.c.bf16 %v4483_v9, %v4483_v9 }
 0x396   : > { %4572 = vst.msk [vmem:[#allocation2 + $0x9c] sm:$0xf] %vm3129_vm3, %v4540_v54  ;;  %v4615_v54 = vld [vmem:[%s14263_s15 + $0xd0] sm:$0xff] }
 0x397   : > { %v4666_v17 = vpack.c.bf16 %v4616_v45, %v4615_v54 }
 0x398   : > { %v14623_v6 = vpop.f32.mrf.mxu2  ;;  %v4396_v35 = vpop.f32.mrf.mxu0 }
 0x399   : > { %v4942_v14 = vpop.f32.mrf.mxu3  ;;  %v4485_v40 = vpop.f32.mrf.mxu1 }
 0x39a   : > { %v5032_v48 = vpack.c.bf16 %v4942_v14, %v4942_v14  ;;  %v4486_v21 = vadd.f32 %v4485_v40, %v4396_v35  ;;  %v10581_v40 = vld [vmem:[%s17836_s8 + $0xe0] sm:$0xf0] }
 0x39b   : > { %7754 = vmatmul.bf16.vlgmr.msrb.gmra.mxu0 %v10488_v28 }
 0x39c   : > { %5096 = vst.msk [vmem:[#allocation2 + $0x19c] sm:$0xf] %vm3129_vm3, %v5032_v48  ;;  %v4541_v16 = vpack.c.bf16 %v4486_v21, %v4486_v21  ;;  %10462 = vmatmul.msk.bf16.gmra.mxu2 %vm4713_vm5, %v4666_v17  ;;  %v12072_v21 = vld [vmem:[%s17836_s8 + $0xdc] sm:$0xf0]  ;;  %v12084_v17 = vld [vmem:[%s17836_s8 + $0x144] sm:$0xf] }
 0x39e   : > { %7585 = vmatmul.bf16.vlgmr.msrb.gmra.mxu3 %v10484_v1  ;;  %4573 = vst.msk [vmem:[#allocation2 + $0xa0] sm:$0xf] %vm3129_vm3, %v4541_v16  ;;  %v10579_v1 = vld [vmem:[%s17836_s8 + $0xc0] sm:$0xf]  ;;  %v4998_v16 = vpack.c.bf16 %v14623_v6, %v14623_v6 }
 0x3a0   : > { %v14630_v3 = vpop.f32.mrf.mxu2  ;;  %v4398_v23 = vpop.f32.mrf.mxu0  ;;  %5062 = vst.msk [vmem:[#allocation2 + $0x114] sm:$0xf] %vm3129_vm3, %v4998_v16 }
 0x3a1   : > { %v4945_v5 = vpop.f32.mrf.mxu3  ;;  %v4487_v30 = vpop.f32.mrf.mxu1  ;;  %v4999_v6 = vpack.c.bf16 %v14630_v3, %v14630_v3  ;;  %v12076_v3 = vld [vmem:[%s17836_s8 + $0x104] sm:$0xf] }
 0x3a2   : > { %v5033_v55 = vpack.c.bf16 %v4945_v5, %v4945_v5  ;;  %v4488_v26 = vadd.f32 %v4487_v30, %v4398_v23  ;;  %v10584_v5 = vor.u32 %v12068_v61, %v10581_v40 }
 0x3a3   : > { %5063 = vst.msk [vmem:[#allocation2 + $0x118] sm:$0xf] %vm3129_vm3, %v4999_v6 }
 0x3a4   : > { %5097 = vst.msk [vmem:[#allocation2 + $0x1a0] sm:$0xf] %vm3129_vm3, %v5033_v55  ;;  %v4542_v38 = vpack.c.bf16 %v4488_v26, %v4488_v26 }
 0x3a6   : > { %4574 = vst.msk [vmem:[#allocation2 + $0xa4] sm:$0xf] %vm3129_vm3, %v4542_v38  ;;  %v10580_v38 = vor.u32 %v12072_v21, %v10579_v1 }
 0x3a8   : > { %v14649_v15 = vpop.f32.mrf.mxu2  ;;  %v4401_v44 = vpop.f32.mrf.mxu0 }
 0x3a9   : > { %v4947_v19 = vpop.f32.mrf.mxu3  ;;  %v4490_v58 = vpop.f32.mrf.mxu1 }
 0x3aa   : > { %v5034_v56 = vpack.c.bf16 %v4947_v19, %v4947_v19  ;;  %v4491_v4 = vadd.f32 %v4490_v58, %v4401_v44 }
 0x3ab   : > { %7759 = vmatmul.bf16.gmra.mxu0 %v10520_v39 }
 0x3ac   : > { %5098 = vst.msk [vmem:[#allocation2 + $0x1a4] sm:$0xf] %vm3129_vm3, %v5034_v56  ;;  %v4543_v63 = vpack.c.bf16 %v4491_v4, %v4491_v4  ;;  %10463 = vmatmul.msk.bf16.gmra.mxu2 %vm4713_vm5, %v4667_v53  ;;  %v12092_v53 = vld [vmem:[%s17836_s8 + $0x184] sm:$0xf] }
 0x3ad   : > { %v12320_v21 = vld [vmem:[#allocation2 + $0xa0] sm:$0xff] }
 0x3ae   : > { %7590 = vmatmul.bf16.gmra.mxu3 %v10516_v24  ;;  %4575 = vst.msk [vmem:[#allocation2 + $0xa8] sm:$0xf] %vm3129_vm3, %v4543_v63 }
 0x3b0   : > { %v14658_v42 = vpop.f32.mrf.mxu2  ;;  %v4403_v46 = vpop.f32.mrf.mxu0 }
 0x3b1   : > { %v4950_v2 = vpop.f32.mrf.mxu3  ;;  %v4492_v52 = vpop.f32.mrf.mxu1 }
 0x3b2   : > { %v5035_v22 = vpack.c.bf16 %v4950_v2, %v4950_v2  ;;  %v4493_v25 = vadd.f32 %v4492_v52, %v4403_v46  ;;  %v12080_v2 = vld [vmem:[%s17836_s8 + $0x11c] sm:$0xf0]  ;;  %v5001_v46 = vpack.c.bf16 %v14658_v42, %v14658_v42 }
 0x3b3   : > { %v10612_v41 = vor.u32 %v12080_v2, %v10611_v34  ;;  %v12316_v2 = vld [vmem:[#allocation2 + $0x80] sm:$0xff] }
 0x3b4   : > { %5099 = vst.msk [vmem:[#allocation2 + $0x1a8] sm:$0xf] %vm3129_vm3, %v5035_v22  ;;  %v4544_v7 = vpack.c.bf16 %v4493_v25, %v4493_v25  ;;  %v5000_v22 = vpack.c.bf16 %v14649_v15, %v14649_v15 }
 0x3b5   : > { %5065 = vst.msk [vmem:[#allocation2 + $0x120] sm:$0xf] %vm3129_vm3, %v5001_v46 }
 0x3b6   : > { %4576 = vst.msk [vmem:[#allocation2 + $0xac] sm:$0xf] %vm3129_vm3, %v4544_v7  ;;  %v10616_v7 = vor.u32 %v12076_v3, %v10613_v59 }
 0x3b7   : > { %5064 = vst.msk [vmem:[#allocation2 + $0x11c] sm:$0xf] %vm3129_vm3, %v5000_v22 }
 0x3b8   : > { %v14678_v50 = vpop.f32.mrf.mxu2  ;;  %v4406_v43 = vpop.f32.mrf.mxu0 }
 0x3b9   : > { %v4952_v12 = vpop.f32.mrf.mxu3  ;;  %v4495_v29 = vpop.f32.mrf.mxu1  ;;  %v5002_v52 = vpack.c.bf16 %v14678_v50, %v14678_v50 }
 0x3ba   : > { %v5036_v27 = vpack.c.bf16 %v4952_v12, %v4952_v12  ;;  %v4496_v9 = vadd.f32 %v4495_v29, %v4406_v43 }
 0x3bb   : > { %7764 = vmatmul.bf16.gmra.mxu0 %v10552_v11  ;;  %5066 = vst.msk [vmem:[#allocation2 + $0x124] sm:$0xf] %vm3129_vm3, %v5002_v52 }
 0x3bc   : > { %5100 = vst.msk [vmem:[#allocation2 + $0x1ac] sm:$0xf] %vm3129_vm3, %v5036_v27  ;;  %v4545_v57 = vpack.c.bf16 %v4496_v9, %v4496_v9 }
 0x3bd   : > { %v12321_v45 = vld [vmem:[#allocation2 + $0xa8] sm:$0xff] }
 0x3be   : > { %7595 = vmatmul.bf16.gmra.mxu3 %v10548_v10  ;;  %4577 = vst.msk [vmem:[#allocation2 + $0xb0] sm:$0xf] %vm3129_vm3, %v4545_v57 }
 0x3c0   : > { %v4870_v33 = vpop.f32.mrf.mxu2  ;;  %v4408_v14 = vpop.f32.mrf.mxu0 }
 0x3c1   : > { %v4955_v20 = vpop.f32.mrf.mxu3  ;;  %v4497_v28 = vpop.f32.mrf.mxu1  ;;  %v5003_v63 = vpack.c.bf16 %v4870_v33, %v4870_v33  ;;  %v10643_v33 = vld [vmem:[%s17836_s8 + $0x140] sm:$0xf] }
 0x3c2   : > { %v5037_v60 = vpack.c.bf16 %v4955_v20, %v4955_v20  ;;  %v4498_v48 = vadd.f32 %v4497_v28, %v4408_v14  ;;  %v10645_v20 = vld [vmem:[%s17836_s8 + $0x160] sm:$0xf0] }
 0x3c3   : > { %5067 = vst.msk [vmem:[#allocation2 + $0x128] sm:$0xf] %vm3129_vm3, %v5003_v63  ;;  %v10648_v28 = vor.u32 %v12084_v17, %v10645_v20  ;;  %v12351_v17 = vld [vmem:[#allocation2 + $0x198] sm:$0xff] }
 0x3c4   : > { %5101 = vst.msk [vmem:[#allocation2 + $0x1b0] sm:$0xf] %vm3129_vm3, %v5037_v60  ;;  %v4546_v35 = vpack.c.bf16 %v4498_v48, %v4498_v48  ;;  %v12088_v60 = vld [vmem:[%s17836_s8 + $0x15c] sm:$0xf0] }
 0x3c5   : > { %v10644_v1 = vor.u32 %v12088_v60, %v10643_v33 }
 0x3c6   : > { %4578 = vst.msk [vmem:[#allocation2 + $0xb4] sm:$0xf] %vm3129_vm3, %v4546_v35 }
 0x3c8   : > { %v4872_v55 = vpop.f32.mrf.mxu2  ;;  %v4411_v30 = vpop.f32.mrf.mxu0 }
 0x3c9   : > { %v4957_v18 = vpop.f32.mrf.mxu3  ;;  %v4500_v26 = vpop.f32.mrf.mxu1  ;;  %v5004_v0 = vpack.c.bf16 %v4872_v55, %v4872_v55  ;;  %v12319_v55 = vld [vmem:[#allocation2 + $0x98] sm:$0xff] }
 0x3ca   : > { %v5038_v23 = vpack.c.bf16 %v4957_v18, %v4957_v18  ;;  %v4501_v13 = vadd.f32 %v4500_v26, %v4411_v30 }
 0x3cb   : > { %7769 = vmatmul.bf16.gmra.mxu0 %v10584_v5  ;;  %5068 = vst.msk [vmem:[#allocation2 + $0x12c] sm:$0xf] %vm3129_vm3, %v5004_v0 }
 0x3cc   : > { %5102 = vst.msk [vmem:[#allocation2 + $0x1b4] sm:$0xf] %vm3129_vm3, %v5038_v23  ;;  %v4547_v36 = vpack.c.bf16 %v4501_v13, %v4501_v13  ;;  %v12318_v13 = vld [vmem:[#allocation2 + $0x90] sm:$0xff] }
 0x3cd   : > { %v12322_v9 = vld [vmem:[#allocation2 + $0xb0] sm:$0xff] }
 0x3ce   : > { %7600 = vmatmul.bf16.gmra.mxu3 %v10580_v38  ;;  %4579 = vst.msk [vmem:[#allocation2 + $0xb8] sm:$0xf] %vm3129_vm3, %v4547_v36 }
 0x3d0   : > { %v4875_v39 = vpop.f32.mrf.mxu2  ;;  %v4413_v44 = vpop.f32.mrf.mxu0 }
 0x3d1   : > { %v4960_v19 = vpop.f32.mrf.mxu3  ;;  %v4502_v58 = vpop.f32.mrf.mxu1  ;;  %v5005_v24 = vpack.c.bf16 %v4875_v39, %v4875_v39 }
 0x3d2   : > { %v5039_v56 = vpack.c.bf16 %v4960_v19, %v4960_v19  ;;  %v4503_v4 = vadd.f32 %v4502_v58, %v4413_v44  ;;  %v10677_v19 = vld [vmem:[%s17836_s8 + $0x1a0] sm:$0xf0]  ;;  %v12096_v44 = vld [vmem:[%s17836_s8 + $0x19c] sm:$0xf0]  ;;  %v10491_v58 = vld [vmem:[%s17836_s8 + $0x8] sm:$0xf] }
 0x3d3   : > { %5069 = vst.msk [vmem:[#allocation2 + $0x130] sm:$0xf] %vm3129_vm3, %v5005_v24  ;;  %v12049_v24 = vld [vmem:[%s17836_s8 + $0x24] sm:$0xf0]  ;;  %v10680_v63 = vor.u32 %v12092_v53, %v10677_v19 }
 0x3d4   : > { %5103 = vst.msk [vmem:[#allocation2 + $0x1b8] sm:$0xf] %vm3129_vm3, %v5039_v56  ;;  %v4548_v32 = vpack.c.bf16 %v4503_v4, %v4503_v4  ;;  %v10675_v56 = vld [vmem:[%s17836_s8 + $0x180] sm:$0xf]  ;;  %v10492_v46 = vor.u32 %v12049_v24, %v10491_v58  ;;  %v12337_v52 = vld [vmem:[#allocation2 + $0x128] sm:$0xff] }
 0x3d5   : > { %v10676_v34 = vor.u32 %v12096_v44, %v10675_v56  ;;  %v12065_v53 = vld [vmem:[%s17836_s8 + $0xa4] sm:$0xf0] }
 0x3d6   : > { %4580 = vst.msk [vmem:[#allocation2 + $0xbc] sm:$0xf] %vm3129_vm3, %v4548_v32 }
 0x3d8   : > { %v4877_v51 = vpop.f32.mrf.mxu2  ;;  %v4416_v8 = vpop.f32.mrf.mxu0 }
 0x3d9   : > { %v4962_v25 = vpop.f32.mrf.mxu3  ;;  %v4505_v47 = vpop.f32.mrf.mxu1  ;;  %v5006_v15 = vpack.c.bf16 %v4877_v51, %v4877_v51  ;;  %v12336_v51 = vld [vmem:[#allocation2 + $0x120] sm:$0xff] }
 0x3da   : > { %v5040_v37 = vpack.c.bf16 %v4962_v25, %v4962_v25  ;;  %v4506_v12 = vadd.f32 %v4505_v47, %v4416_v8  ;;  %v12353_v8 = vld [vmem:[#allocation2 + $0x1a8] sm:$0xff] }
 0x3db   : > { %7774 = vmatmul.bf16.gmra.mxu0 %v10616_v7  ;;  %5070 = vst.msk [vmem:[#allocation2 + $0x134] sm:$0xf] %vm3129_vm3, %v5006_v15  ;;  %v12354_v7 = vld [vmem:[#allocation2 + $0x1b0] sm:$0xff] }
 0x3dc   : > { %5104 = vst.msk [vmem:[#allocation2 + $0x1bc] sm:$0xf] %vm3129_vm3, %v5040_v37  ;;  %v4549_v42 = vpack.c.bf16 %v4506_v12, %v4506_v12 }
 0x3dd   : > { %v12323_v11 = vld [vmem:[#allocation2 + $0xb8] sm:$0xff] }
 0x3de   : > { %7605 = vmatmul.bf16.gmra.mxu3 %v10612_v41  ;;  %4581 = vst.msk [vmem:[#allocation2 + $0xc0] sm:$0xf] %vm3129_vm3, %v4549_v42  ;;  %7915 = vmatpush.bf16.msrb.mxu1 %v12323_v11  ;;  %v12335_v42 = vld [vmem:[#allocation2 + $0x118] sm:$0xff] }
 0x3e0   : > { %v4880_v27 = vpop.f32.mrf.mxu2  ;;  %v4418_v29 = vpop.f32.mrf.mxu0 }
 0x3e1   : > { %v4965_v50 = vpop.f32.mrf.mxu3  ;;  %v4507_v10 = vpop.f32.mrf.mxu1  ;;  %v5007_v57 = vpack.c.bf16 %v4880_v27, %v4880_v27  ;;  %v12100_v27 = vld [vmem:[%s17836_s8 + $0x1c4] sm:$0xf] }
 0x3e2   : > { %v5041_v43 = vpack.c.bf16 %v4965_v50, %v4965_v50  ;;  %v4508_v31 = vadd.f32 %v4507_v10, %v4418_v29  ;;  %7916 = vmatpush.bf16.msrb.mxu1 %v12322_v9  ;;  %v12338_v39 = vld [vmem:[#allocation2 + $0x130] sm:$0xff]  ;;  %v12352_v50 = vld [vmem:[#allocation2 + $0x1a0] sm:$0xff] }
 0x3e3   : > { %5071 = vst.msk [vmem:[#allocation2 + $0x138] sm:$0xf] %vm3129_vm3, %v5007_v57  ;;  %v12355_v0 = vld [vmem:[#allocation2 + $0x1b8] sm:$0xff]  ;;  %v12334_v29 = vld [vmem:[#allocation2 + $0x110] sm:$0xff]  ;;  %v10707_v10 = vld [vmem:[%s17836_s8 + $0x1c0] sm:$0xf] }
 0x3e4   : > { %5105 = vst.msk [vmem:[#allocation2 + $0x1c0] sm:$0xf] %vm3129_vm3, %v5041_v43  ;;  %v4550_v54 = vpack.c.bf16 %v4508_v31, %v4508_v31  ;;  %v10709_v43 = vld [vmem:[%s17836_s8 + $0x1e0] sm:$0xf0]  ;;  %v12104_v9 = vld [vmem:[%s17836_s8 + $0x1dc] sm:$0xf0] }
 0x3e5   : > { %v10523_v57 = vld [vmem:[%s17836_s8 + $0x48] sm:$0xf] }
 0x3e6   : > { %4582 = vst.msk [vmem:[#allocation2 + $0xc4] sm:$0xf] %vm3129_vm3, %v4550_v54  ;;  %7917 = vmatpush.bf16.msrb.mxu1 %v12321_v45  ;;  %v12057_v31 = vld [vmem:[%s17836_s8 + $0x64] sm:$0xf0]  ;;  %v10712_v45 = vor.u32 %v12100_v27, %v10709_v43 }
 0x3e8   : > { %v4882_v48 = vpop.f32.mrf.mxu2  ;;  %v4421_v61 = vpop.f32.mrf.mxu0 }
 0x3e9   : > { %v4967_v14 = vpop.f32.mrf.mxu3  ;;  %v4510_v40 = vpop.f32.mrf.mxu1  ;;  %v5008_v16 = vpack.c.bf16 %v4882_v48, %v4882_v48  ;;  %v10524_v48 = vor.u32 %v12057_v31, %v10523_v57  ;;  %v10803_v57 = vld [vmem:[%s17836_s8 + $0x280] sm:$0xf] }
 0x3ea   : > { %v5042_v35 = vpack.c.bf16 %v4967_v14, %v4967_v14  ;;  %v4511_v18 = vadd.f32 %v4510_v40, %v4421_v61  ;;  %7918 = vmatpush.bf16.msrb.mxu1 %v12320_v21  ;;  %v10708_v14 = vor.u32 %v12104_v9, %v10707_v10  ;;  %v12350_v40 = vld [vmem:[#allocation2 + $0x190] sm:$0xff]  ;;  %v12332_v21 = vld [vmem:[#allocation2 + $0x100] sm:$0xff] }
 0x3eb   : > { %7779 = vmatmul.bf16.gmra.mxu0 %v10648_v28  ;;  %5072 = vst.msk [vmem:[#allocation2 + $0x13c] sm:$0xf] %vm3129_vm3, %v5008_v16  ;;  %v12124_v10 = vld [vmem:[%s17836_s8 + $0x284] sm:$0xf]  ;;  %v12128_v31 = vld [vmem:[%s17836_s8 + $0x29c] sm:$0xf0] }
 0x3ec   : > { %5106 = vst.msk [vmem:[#allocation2 + $0x1c4] sm:$0xf] %vm3129_vm3, %v5042_v35  ;;  %v4551_v5 = vpack.c.bf16 %v4511_v18, %v4511_v18  ;;  %v12333_v35 = vld [vmem:[#allocation2 + $0x108] sm:$0xff]  ;;  %v10805_v9 = vld [vmem:[%s17836_s8 + $0x2a0] sm:$0xf0] }
 0x3ee   : > { %7610 = vmatmul.bf16.gmra.mxu3 %v10644_v1  ;;  %4583 = vst.msk [vmem:[#allocation2 + $0xc8] sm:$0xf] %vm3129_vm3, %v4551_v5  ;;  %7919 = vmatpush.bf16.msrb.mxu1 %v12319_v55 }
 0x3f0   : > { %v4423_v26 = vpop.f32.mrf.mxu0 }
 0x3f1   : > { %v4970_v23 = vpop.f32.mrf.mxu3  ;;  %v4512_v38 = vpop.f32.mrf.mxu1 }
 0x3f2   : > { %v5043_v30 = vpack.c.bf16 %v4970_v23, %v4970_v23  ;;  %v4513_v36 = vadd.f32 %v4512_v38, %v4423_v26  ;;  %7920 = vmatpush.bf16.msrb.mxu1 %v12318_v13  ;;  %v12339_v6 = vld [vmem:[#allocation2 + $0x138] sm:$0xff]  ;;  %v12349_v23 = vld [vmem:[#allocation2 + $0x188] sm:$0xff]  ;;  %v12108_v38 = vld [vmem:[%s17836_s8 + $0x204] sm:$0xf] }
 0x3f3   : > { %8253 = vmatpush.bf16.msra.mxu3 %v12339_v6  ;;  %v10741_v13 = vld [vmem:[%s17836_s8 + $0x220] sm:$0xf0]  ;;  %v10739_v6 = vld [vmem:[%s17836_s8 + $0x200] sm:$0xf] }
 0x3f4   : > { %5107 = vst.msk [vmem:[#allocation2 + $0x1c8] sm:$0xf] %vm3129_vm3, %v5043_v30  ;;  %v4552_v62 = vpack.c.bf16 %v4513_v36, %v4513_v36  ;;  %v5489_v30 = vld [vmem:[%s17837_s9] sm:$0xff] }
 0x3f5   : > { %5555 = vperm.xlu0 %12391, %v5489_v30   ;;  %v12348_v36 = vld [vmem:[#allocation2 + $0x180] sm:$0xff]  ;;  %v12089_v30 = vld [vmem:[%s17836_s8 + $0x164] sm:$0xf0] }
 0x3f6   : > { %4584 = vst.msk [vmem:[#allocation2 + $0xcc] sm:$0xf] %vm3129_vm3, %v4552_v62  ;;  %7921 = vmatpush.bf16.msrb.mxu1 %v12317_v49  ;;  %v12112_v62 = vld [vmem:[%s17836_s8 + $0x21c] sm:$0xf0]  ;;  %v10555_v49 = vld [vmem:[%s17836_s8 + $0x88] sm:$0xf] }
 0x3f7   : > { %8254 = vmatpush.bf16.msra.mxu3 %v12338_v39  ;;  %v10744_v39 = vor.u32 %v12108_v38, %v10741_v13  ;;  %v10740_v44 = vor.u32 %v12112_v62, %v10739_v6  ;;  %v10556_v24 = vor.u32 %v12065_v53, %v10555_v49  ;;  %v10557_v38 = vld [vmem:[%s17836_s8 + $0xa8] sm:$0xf0] }
 0x3f8   : > { %v4426_v3 = vpop.f32.mrf.mxu0 }
 0x3f9   : > { %v4972_v4 = vpop.f32.mrf.mxu3  ;;  %v4515_v59 = vpop.f32.mrf.mxu1 }
 0x3fa   : > { %v5044_v32 = vpack.c.bf16 %v4972_v4, %v4972_v4  ;;  %v4516_v22 = vadd.f32 %v4515_v59, %v4426_v3  ;;  %7922 = vmatpush.bf16.msrb.mxu1 %v12316_v2  ;;  %v5490_v4 = vld [vmem:[%s17837_s9 + $0x8] sm:$0xff]  ;;  %v5491_v59 = vld [vmem:[%s17837_s9 + $0x10] sm:$0xff]  ;;  %v12116_v2 = vld [vmem:[%s17836_s8 + $0x244] sm:$0xf] }
 0x3fb   : > { %7784 = vmatmul.bf16.gmra.mxu0 %v10680_v63  ;;  %8255 = vmatpush.bf16.msra.mxu3 %v12337_v52  ;;  %v12120_v52 = vld [vmem:[%s17836_s8 + $0x25c] sm:$0xf0] }
 0x3fc   : > { %5108 = vst.msk [vmem:[#allocation2 + $0x1cc] sm:$0xf] %vm3129_vm3, %v5044_v32  ;;  %v4553_v25 = vpack.c.bf16 %v4516_v22, %v4516_v22  ;;  %5565 = vperm.xlu1 %12392, %v5491_v59   ;;  %v10773_v22 = vld [vmem:[%s17836_s8 + $0x260] sm:$0xf0]  ;;  %v5494_v59 = vld [vmem:[%s17837_s9 + $0x28] sm:$0xff] }
 0x3fd   : > { %7923 = vmatmul.bf16.vlgmr.msrb.gmra.mxu1 %v10492_v46  ;;  %5560 = vperm.xlu0 %12391, %v5490_v4   ;;  %v10771_v46 = vld [vmem:[%s17836_s8 + $0x240] sm:$0xf] }
 0x3fe   : > { %8591 = vmatpush.bf16.msra.mxu1 %v12355_v0  ;;  %7615 = vmatmul.bf16.gmra.mxu3 %v10676_v34  ;;  %4585 = vst.msk [vmem:[#allocation2 + $0xd0] sm:$0xf] %vm3129_vm3, %v4553_v25  ;;  %v12325_v34 = vld [vmem:[#allocation2 + $0xc8] sm:$0xff] }
 0x3ff   : > { %8256 = vmatpush.bf16.msra.mxu3 %v12336_v51  ;;  %v10587_v25 = vld [vmem:[%s17836_s8 + $0xc8] sm:$0xf]  ;;  %v12045_v51 = vld [vmem:[%s17836_s8 + $0xc] sm:$0xf] }
 0x400   : > { %v4428_v41 = vpop.f32.mrf.mxu0 }
 0x401   : > { %v4975_v37 = vpop.f32.mrf.mxu3  ;;  %v4517_v15 = vpop.f32.mrf.mxu1 }
 0x402   : > { %8592 = vmatpush.bf16.msra.mxu1 %v12354_v7  ;;  %v5045_v47 = vpack.c.bf16 %v4975_v37, %v4975_v37  ;;  %v4518_v12 = vadd.f32 %v4517_v15, %v4428_v41  ;;  %v12073_v7 = vld [vmem:[%s17836_s8 + $0xe4] sm:$0xf0]  ;;  %v10493_v37 = vld [vmem:[%s17836_s8 + $0x28] sm:$0xf0]  ;;  %v10772_v41 = vor.u32 %v12120_v52, %v10771_v46  ;;  %v12324_v15 = vld [vmem:[#allocation2 + $0xc0] sm:$0xff] }
 0x403   : > { %8257 = vmatpush.bf16.msra.mxu3 %v12335_v42  ;;  %v10588_v42 = vor.u32 %v12073_v7, %v10587_v25  ;;  %v10869_v46 = vld [vmem:[%s17836_s8 + $0x320] sm:$0xf0]  ;;  %v10867_v52 = vld [vmem:[%s17836_s8 + $0x300] sm:$0xf]  ;;  %v10683_v7 = vld [vmem:[%s17836_s8 + $0x188] sm:$0xf] }
 0x404   : > { %5109 = vst.msk [vmem:[#allocation2 + $0x1d0] sm:$0xf] %vm3129_vm3, %v5045_v47  ;;  %v4554_v11 = vpack.c.bf16 %v4518_v12, %v4518_v12  ;;  %v10776_v47 = vor.u32 %v12116_v2, %v10773_v22  ;;  %v12140_v22 = vld [vmem:[%s17836_s8 + $0x304] sm:$0xf]  ;;  %v12144_v25 = vld [vmem:[%s17836_s8 + $0x31c] sm:$0xf0] }
 0x406   : > { %8593 = vmatpush.bf16.msra.mxu1 %v12353_v8  ;;  %4586 = vst.msk [vmem:[#allocation2 + $0xd4] sm:$0xf] %vm3129_vm3, %v4554_v11  ;;  %v10496_v11 = vor.u32 %v12045_v51, %v10493_v37  ;;  %v12097_v51 = vld [vmem:[%s17836_s8 + $0x1a4] sm:$0xf0]  ;;  %v12069_v37 = vld [vmem:[%s17836_s8 + $0xcc] sm:$0xf] }
 0x407   : > { %8258 = vmatpush.bf16.msra.mxu3 %v12334_v29 }
 0x408   : > { %v4431_v33 = vpop.f32.mrf.mxu0 }
 0x409   : > { %v4977_v54 = vpop.f32.mrf.mxu3  ;;  %v4520_v60 = vpop.f32.mrf.mxu1 }
 0x40a   : > { %8594 = vmatpush.bf16.msra.mxu1 %v12352_v50  ;;  %v5046_v20 = vpack.c.bf16 %v4977_v54, %v4977_v54  ;;  %v4521_v28 = vadd.f32 %v4520_v60, %v4431_v33  ;;  %v5492_v50 = vld [vmem:[%s17837_s9 + $0x18] sm:$0xff]  ;;  %v10619_v54 = vld [vmem:[%s17836_s8 + $0x108] sm:$0xf]  ;;  %v10808_v60 = vor.u32 %v12124_v10, %v10805_v9  ;;  %v10684_v10 = vor.u32 %v12097_v51, %v10683_v7  ;;  %v10653_v7 = vld [vmem:[%s17836_s8 + $0x168] sm:$0xf0] }
 0x40b   : > { %7789 = vmatmul.bf16.gmra.mxu0 %v10712_v45  ;;  %8259 = vmatpush.bf16.msra.mxu3 %v12333_v35  ;;  %v12081_v45 = vld [vmem:[%s17836_s8 + $0x124] sm:$0xf0] }
 0x40c   : > { %5110 = vst.msk [vmem:[#allocation2 + $0x1d4] sm:$0xf] %vm3129_vm3, %v5046_v20  ;;  %v4555_v61 = vpack.c.bf16 %v4521_v28, %v4521_v28  ;;  %5570 = vperm.xlu1 %12392, %v5492_v50   ;;  %v10525_v20 = vld [vmem:[%s17836_s8 + $0x68] sm:$0xf0] }
 0x40d   : > { %7928 = vmatmul.bf16.gmra.mxu1 %v10524_v48  ;;  %v12326_v32 = vld [vmem:[#allocation2 + $0xd0] sm:$0xff]  ;;  %v10620_v48 = vor.u32 %v12081_v45, %v10619_v54 }
 0x40e   : > { %8595 = vmatpush.bf16.msra.mxu1 %v12351_v17  ;;  %7620 = vmatmul.bf16.gmra.mxu3 %v10708_v14  ;;  %4587 = vst.msk [vmem:[#allocation2 + $0xd8] sm:$0xf] %vm3129_vm3, %v4555_v61  ;;  %v12053_v17 = vld [vmem:[%s17836_s8 + $0x4c] sm:$0xf]  ;;  %v10804_v14 = vor.u32 %v12128_v31, %v10803_v57 }
 0x40f   : > { %8260 = vmatpush.bf16.msra.mxu3 %v12332_v21  ;;  %v14875_v29 = vpop.f32.mrf.mxu2  ;;  %v10528_v35 = vor.u32 %v12053_v17, %v10525_v20  ;;  %v5498_v57 = vld [vmem:[%s17837_s9 + $0x48] sm:$0xff] }
 0x410   : > { %v4433_v18 = vpop.f32.mrf.mxu0  ;;  %v5009_v20 = vpack.c.bf16 %v14875_v29, %v14875_v29  ;;  %v12152_v29 = vld [vmem:[%s17836_s8 + $0x35c] sm:$0xf0] }
 0x411   : > { %v4980_v1 = vpop.f32.mrf.mxu3  ;;  %v4522_v5 = vpop.f32.mrf.mxu1 }
 0x412   : > { %8596 = vmatpush.bf16.msra.mxu1 %v12350_v40  ;;  %v5047_v16 = vpack.c.bf16 %v4980_v1, %v4980_v1  ;;  %v4523_v55 = vadd.f32 %v4522_v5, %v4433_v18  ;;  %v10837_v18 = vld [vmem:[%s17836_s8 + $0x2e0] sm:$0xf0]  ;;  %v10835_v5 = vld [vmem:[%s17836_s8 + $0x2c0] sm:$0xf]  ;;  %5073 = vst.msk [vmem:[#allocation2 + $0x140] sm:$0xf] %vm3129_vm3, %v5009_v20 }
 0x413   : > { %v5500_v20 = vld [vmem:[%s17837_s9 + $0x58] sm:$0xff] }
 0x414   : > { %5111 = vst.msk [vmem:[#allocation2 + $0x1d8] sm:$0xf] %vm3129_vm3, %v5047_v16  ;;  %v4556_v26 = vpack.c.bf16 %v4523_v55, %v4523_v55  ;;  %v12132_v16 = vld [vmem:[%s17836_s8 + $0x2c4] sm:$0xf]  ;;  %v12136_v55 = vld [vmem:[%s17836_s8 + $0x2dc] sm:$0xf0] }
 0x415   : > { %v10836_v6 = vor.u32 %v12136_v55, %v10835_v5  ;;  %v10715_v5 = vld [vmem:[%s17836_s8 + $0x1c8] sm:$0xf] }
 0x416   : > { %8597 = vmatpush.bf16.msra.mxu1 %v12349_v23  ;;  %4588 = vst.msk [vmem:[#allocation2 + $0xdc] sm:$0xf] %vm3129_vm3, %v4556_v26  ;;  %v10651_v23 = vld [vmem:[%s17836_s8 + $0x148] sm:$0xf]  ;;  %v12061_v26 = vld [vmem:[%s17836_s8 + $0x8c] sm:$0xf] }
 0x417   : > { %v14905_v61 = vpop.f32.mrf.mxu2  ;;  %v10652_v49 = vor.u32 %v12089_v30, %v10651_v23  ;;  %v10560_v53 = vor.u32 %v12061_v26, %v10557_v38  ;;  %v12105_v55 = vld [vmem:[%s17836_s8 + $0x1e4] sm:$0xf0]  ;;  %v12077_v23 = vld [vmem:[%s17836_s8 + $0x10c] sm:$0xf] }
 0x418   : > { %v14827_v58 = vpop.f32.mrf.mxu0  ;;  %v10621_v30 = vld [vmem:[%s17836_s8 + $0x128] sm:$0xf0] }
 0x419   : > { %v4982_v19 = vpop.f32.mrf.mxu3 }
 0x41a   : > { %8598 = vmatpush.bf16.msra.mxu1 %v12348_v36  ;;  %v5048_v56 = vpack.c.bf16 %v4982_v19, %v4982_v19  ;;  %v10840_v36 = vor.u32 %v12132_v16, %v10837_v18  ;;  %v5493_v19 = vld [vmem:[%s17837_s9 + $0x20] sm:$0xff]  ;;  %v5010_v18 = vpack.c.bf16 %v14905_v61, %v14905_v61 }
 0x41b   : > { %7794 = vmatmul.bf16.gmra.mxu0 %v10744_v39  ;;  %v5496_v39 = vld [vmem:[%s17837_s9 + $0x38] sm:$0xff]  ;;  %5575 = vperm.xlu2 %12393, %v5493_v19   ;;  %v12148_v16 = vld [vmem:[%s17836_s8 + $0x344] sm:$0xf]  ;;  %v5499_v19 = vld [vmem:[%s17837_s9 + $0x50] sm:$0xff] }
 0x41c   : > { %5112 = vst.msk [vmem:[#allocation2 + $0x1dc] sm:$0xf] %vm3129_vm3, %v5048_v56  ;;  %5590 = vperm.xlu1 %12392, %v5496_v39  }
 0x41d   : > { %v12327_v63 = vld [vmem:[#allocation2 + $0xd8] sm:$0xff]  ;;  %7933 = vmatmul.bf16.gmra.mxu1 %v10556_v24  ;;  %v5495_v24 = vld [vmem:[%s17837_s9 + $0x30] sm:$0xff]  ;;  %5074 = vst.msk [vmem:[#allocation2 + $0x144] sm:$0xf] %vm3129_vm3, %v5010_v18  ;;  %v12093_v18 = vld [vmem:[%s17836_s8 + $0x18c] sm:$0xf] }
 0x41e   : > { %7625 = vmatmul.bf16.gmra.mxu3 %v10740_v44  ;;  %8088 = vmatpush.bf16.msrb.mxu2 %v12327_v63  ;;  %v12358_v63 = vld [vmem:[#allocation2 + $0x1d0] sm:$0xff] }
 0x41f   : > { %v14911_v21 = vpop.f32.mrf.mxu2  ;;  %5585 = vperm.xlu0 %12391, %v5495_v24  }
 0x420   : > { %v14835_v3 = vpop.f32.mrf.mxu0 }
 0x421   : > { %v14833_v0 = vpop.f32.mrf.mxu3 }
 0x422   : > { %8089 = vmatpush.bf16.msrb.mxu2 %v12326_v32 }
 0x423   : > { %v12359_v56 = vld [vmem:[#allocation2 + $0x1d8] sm:$0xff]  ;;  %5580 = vperm.xlu2 %12393, %v5494_v59   ;;  %v12156_v59 = vld [vmem:[%s17836_s8 + $0x384] sm:$0xf] }
 0x424   : > { %5605 = vperm.xlu1 %12392, %v5499_v19  }
 0x426   : > { %8090 = vmatpush.bf16.msrb.mxu2 %v12325_v34  ;;  %v12357_v34 = vld [vmem:[#allocation2 + $0x1c8] sm:$0xff] }
 0x427   : > { %v4892_v44 = vpop.f32.mrf.mxu2  ;;  %5600 = vperm.xlu0 %12391, %v5498_v57   ;;  %v5501_v57 = vld [vmem:[%s17837_s9 + $0x60] sm:$0xff] }
 0x428   : > { %v14866_v12 = vpop.f32.mrf.mxu0 }
 0x429   : > { %v14864_v8 = vpop.f32.mrf.mxu3 }
 0x42a   : > { %8091 = vmatpush.bf16.msrb.mxu2 %v12324_v15  ;;  %v10872_v15 = vor.u32 %v12140_v22, %v10869_v46  ;;  %v12160_v22 = vld [vmem:[%s17836_s8 + $0x39c] sm:$0xf0]  ;;  %v10747_v46 = vld [vmem:[%s17836_s8 + $0x208] sm:$0xf] }
 0x42b   : > { %7799 = vmatmul.bf16.gmra.mxu0 %v10776_v47  ;;  %v10589_v47 = vld [vmem:[%s17836_s8 + $0xe8] sm:$0xf0] }
 0x42c   : > { %v10592_v9 = vor.u32 %v12069_v37, %v10589_v47 }
 0x42d   : > { %7938 = vmatmul.bf16.gmra.mxu1 %v10588_v42  ;;  %8092 = vmatmul.bf16.vlgmr.msrb.gmra.mxu2 %v10496_v11  ;;  %v12356_v42 = vld [vmem:[#allocation2 + $0x1c0] sm:$0xff]  ;;  %v10868_v11 = vor.u32 %v12144_v25, %v10867_v52  ;;  %v12113_v52 = vld [vmem:[%s17836_s8 + $0x224] sm:$0xf0]  ;;  %v12085_v25 = vld [vmem:[%s17836_s8 + $0x14c] sm:$0xf] }
 0x42e   : > { %7630 = vmatmul.bf16.gmra.mxu3 %v10772_v41  ;;  %8764 = vmatpush.bf16.msra.mxu2 %v12359_v56  ;;  %v12340_v56 = vld [vmem:[#allocation2 + $0x140] sm:$0xff] }
 0x42f   : > { %v4895_v2 = vpop.f32.mrf.mxu2  ;;  %5615 = vperm.xlu0 %12391, %v5501_v57  }
 0x430   : > { %v14873_v43 = vpop.f32.mrf.mxu0  ;;  %v5013_v54 = vpack.c.bf16 %v4895_v2, %v4895_v2  ;;  %v10931_v2 = vld [vmem:[%s17836_s8 + $0x380] sm:$0xf] }
 0x431   : > { %v14871_v27 = vpop.f32.mrf.mxu3  ;;  %v10932_v47 = vor.u32 %v12160_v22, %v10931_v2  ;;  %v12176_v2 = vld [vmem:[%s17836_s8 + $0x41c] sm:$0xf0]  ;;  %v10811_v22 = vld [vmem:[%s17836_s8 + $0x288] sm:$0xf] }
 0x432   : > { %8765 = vmatpush.bf16.msra.mxu2 %v12358_v63  ;;  %5077 = vst.msk [vmem:[#allocation2 + $0x150] sm:$0xf] %vm3129_vm3, %v5013_v54  ;;  %v5497_v63 = vld [vmem:[%s17837_s9 + $0x40] sm:$0xff] }
 0x433   : > { %5595 = vperm.xlu2 %12393, %v5497_v63   ;;  %v12172_v63 = vld [vmem:[%s17836_s8 + $0x404] sm:$0xf] }
 0x436   : > { %8766 = vmatpush.bf16.msra.mxu2 %v12357_v34  ;;  %v10933_v34 = vld [vmem:[%s17836_s8 + $0x3a0] sm:$0xf0] }
 0x437   : > { %v4897_v31 = vpop.f32.mrf.mxu2  ;;  %v10936_v37 = vor.u32 %v12156_v59, %v10933_v34  ;;  %v10997_v59 = vld [vmem:[%s17836_s8 + $0x420] sm:$0xf0]  ;;  %v10995_v34 = vld [vmem:[%s17836_s8 + $0x400] sm:$0xf] }
 0x438   : > { %v14903_v28 = vpop.f32.mrf.mxu0  ;;  %v5014_v45 = vpack.c.bf16 %v4897_v31, %v4897_v31 }
 0x439   : > { %v14901_v33 = vpop.f32.mrf.mxu3 }
 0x43a   : > { %8767 = vmatpush.bf16.msra.mxu2 %v12356_v42  ;;  %5078 = vst.msk [vmem:[#allocation2 + $0x154] sm:$0xf] %vm3129_vm3, %v5014_v45  ;;  %v10748_v42 = vor.u32 %v12113_v52, %v10747_v46  ;;  %v12129_v46 = vld [vmem:[%s17836_s8 + $0x2a4] sm:$0xf0]  ;;  %v12101_v52 = vld [vmem:[%s17836_s8 + $0x1cc] sm:$0xf] }
 0x43b   : > { %7804 = vmatmul.bf16.gmra.mxu0 %v10808_v60  ;;  %5610 = vperm.xlu2 %12393, %v5500_v20   ;;  %v5505_v20 = vld [vmem:[%s17837_s9 + $0x80] sm:$0xff] }
 0x43d   : > { %7943 = vmatmul.bf16.gmra.mxu1 %v10620_v48  ;;  %8097 = vmatmul.bf16.gmra.mxu2 %v10528_v35  ;;  %v5012_v48 = vpack.c.bf16 %v4892_v44, %v4892_v44  ;;  %v10899_v35 = vld [vmem:[%s17836_s8 + $0x340] sm:$0xf] }
 0x43e   : > { %7635 = vmatmul.bf16.gmra.mxu3 %v10804_v14  ;;  %v5011_v14 = vpack.c.bf16 %v14911_v21, %v14911_v21  ;;  %v10901_v21 = vld [vmem:[%s17836_s8 + $0x360] sm:$0xf0] }
 0x43f   : > { %5076 = vst.msk [vmem:[#allocation2 + $0x14c] sm:$0xf] %vm3129_vm3, %v5012_v48  ;;  %v10904_v38 = vor.u32 %v12148_v16, %v10901_v21  ;;  %v10965_v48 = vld [vmem:[%s17836_s8 + $0x3e0] sm:$0xf0]  ;;  %v10779_v16 = vld [vmem:[%s17836_s8 + $0x248] sm:$0xf] }
 0x440   : > { %v14909_v1 = vpop.f32.mrf.mxu0  ;;  %5075 = vst.msk [vmem:[#allocation2 + $0x148] sm:$0xf] %vm3129_vm3, %v5011_v14  ;;  %v12164_v14 = vld [vmem:[%s17836_s8 + $0x3c4] sm:$0xf]  ;;  %v12121_v21 = vld [vmem:[%s17836_s8 + $0x264] sm:$0xf0] }
 0x441   : > { %v14907_v40 = vpop.f32.mrf.mxu3  ;;  %v12342_v26 = vld [vmem:[#allocation2 + $0x150] sm:$0xff] }
 0x442   : > { %8427 = vmatpush.bf16.msra.mxu0 %v12342_v26 }
 0x447   : > { %v12341_v39 = vld [vmem:[#allocation2 + $0x148] sm:$0xff] }
 0x448   : > { %v14939_v62 = vpop.f32.mrf.mxu0  ;;  %8428 = vmatpush.bf16.msra.mxu0 %v12341_v39 }
 0x449   : > { %v14937_v13 = vpop.f32.mrf.mxu3 }
 0x44b   : > { %7809 = vmatmul.bf16.gmra.mxu0 %v10840_v36  ;;  %v10900_v36 = vor.u32 %v12152_v29, %v10899_v35  ;;  %v10963_v35 = vld [vmem:[%s17836_s8 + $0x3c0] sm:$0xf] }
 0x44c   : > { %8429 = vmatpush.bf16.msra.mxu0 %v12340_v56  ;;  %v12168_v29 = vld [vmem:[%s17836_s8 + $0x3dc] sm:$0xf0] }
 0x44d   : > { %7948 = vmatmul.bf16.gmra.mxu1 %v10652_v49  ;;  %8102 = vmatmul.bf16.gmra.mxu2 %v10560_v53  ;;  %v10716_v49 = vor.u32 %v12105_v55, %v10715_v5  ;;  %v10624_v53 = vor.u32 %v12077_v23, %v10621_v30  ;;  %v10685_v5 = vld [vmem:[%s17836_s8 + $0x1a8] sm:$0xf0]  ;;  %v10968_v23 = vor.u32 %v12164_v14, %v10965_v48 }
 0x44e   : > { %7640 = vmatmul.bf16.gmra.mxu3 %v10836_v6  ;;  %v10964_v30 = vor.u32 %v12168_v29, %v10963_v35 }
 0x450   : > { %v14952_v32 = vpop.f32.mrf.mxu0 }
 0x451   : > { %v14950_v4 = vpop.f32.mrf.mxu3 }
 0x458   : > { %v14983_v50 = vpop.f32.mrf.mxu0 }
 0x459   : > { %v14981_v41 = vpop.f32.mrf.mxu3 }
 0x45b   : > { %7814 = vmatmul.bf16.gmra.mxu0 %v10872_v15 }
 0x45d   : > { %7953 = vmatmul.bf16.gmra.mxu1 %v10684_v10  ;;  %8107 = vmatmul.bf16.gmra.mxu2 %v10592_v9  ;;  %v5502_v9 = vld [vmem:[%s17837_s9 + $0x68] sm:$0xff] }
 0x45e   : > { %7645 = vmatmul.bf16.gmra.mxu3 %v10868_v11  ;;  %v10656_v11 = vor.u32 %v12085_v25, %v10653_v7  ;;  %5620 = vperm.xlu1 %12392, %v5502_v9   ;;  %v10717_v25 = vld [vmem:[%s17836_s8 + $0x1e8] sm:$0xf0] }
 0x45f   : > { %v10720_v9 = vor.u32 %v12101_v52, %v10717_v25 }
 0x460   : > { %v14994_v60 = vpop.f32.mrf.mxu0 }
 0x461   : > { %v14989_v17 = vpop.f32.mrf.mxu3 }
 0x466   : > { %5635 = vperm.xlu1 %12392, %v5505_v20  }
 0x467   : > { %v5556_v29 = vpop.permute.xlu0 %5555 }
 0x468   : > { %v15030_v6 = vpop.f32.mrf.mxu0 }
 0x469   : > { %v15028_v61 = vpop.f32.mrf.mxu3 }
 0x46b   : > { %7819 = vmatmul.bf16.gmra.mxu0 %v10904_v38  ;;  %v10780_v38 = vor.u32 %v12121_v21, %v10779_v16  ;;  %v5503_v16 = vld [vmem:[%s17837_s9 + $0x70] sm:$0xff]  ;;  %v12180_v21 = vld [vmem:[%s17836_s8 + $0x444] sm:$0xf] }
 0x46c   : > { %5625 = vperm.xlu2 %12393, %v5503_v16  }
 0x46d   : > { %7958 = vmatmul.bf16.gmra.mxu1 %v10716_v49  ;;  %8112 = vmatmul.bf16.gmra.mxu2 %v10624_v53  ;;  %v5504_v53 = vld [vmem:[%s17837_s9 + $0x78] sm:$0xff] }
 0x46e   : > { %7650 = vmatmul.bf16.gmra.mxu3 %v10900_v36  ;;  %v10688_v36 = vor.u32 %v12093_v18, %v10685_v5  ;;  %5630 = vperm.xlu0 %12391, %v5504_v53   ;;  %v11029_v18 = vld [vmem:[%s17836_s8 + $0x460] sm:$0xf0]  ;;  %v11027_v5 = vld [vmem:[%s17836_s8 + $0x440] sm:$0xf]  ;;  %v12109_v53 = vld [vmem:[%s17836_s8 + $0x20c] sm:$0xf] }
 0x470   : > { %v15037_v24 = vpop.f32.mrf.mxu0 }
 0x471   : > { %v15035_v44 = vpop.f32.mrf.mxu3 }
 0x478   : > { %v15068_v15 = vpop.f32.mrf.mxu0 }
 0x479   : > { %v15066_v51 = vpop.f32.mrf.mxu3 }
 0x47a   : > { %v15070_v10 = vpop.f32.mrf.mxu1 }
 0x47b   : > { %7824 = vmatmul.bf16.gmra.mxu0 %v10936_v37  ;;  %v11000_v37 = vor.u32 %v12172_v63, %v10997_v59  ;;  %v10749_v63 = vld [vmem:[%s17836_s8 + $0x228] sm:$0xf0] }
 0x47d   : > { %7963 = vmatmul.bf16.gmra.mxu1 %v10748_v42  ;;  %8117 = vmatmul.bf16.gmra.mxu2 %v10656_v11  ;;  %v10812_v11 = vor.u32 %v12129_v46, %v10811_v22 }
 0x47e   : > { %7655 = vmatmul.bf16.gmra.mxu3 %v10932_v47  ;;  %v10996_v47 = vor.u32 %v12176_v2, %v10995_v34  ;;  %v11032_v34 = vor.u32 %v12180_v21, %v11029_v18 }
 0x480   : > { %v15080_v54 = vpop.f32.mrf.mxu0 }
 0x481   : > { %v15078_v31 = vpop.f32.mrf.mxu3 }
 0x482   : > { %v15082_v45 = vpop.f32.mrf.mxu1 }
 0x488   : > { %v15113_v26 = vpop.f32.mrf.mxu0 }
 0x489   : > { %v15111_v55 = vpop.f32.mrf.mxu3 }
 0x48a   : > { %v15115_v49 = vpop.f32.mrf.mxu1 }
 0x48b   : > { %7829 = vmatmul.bf16.gmra.mxu0 %v10968_v23  ;;  %v12184_v23 = vld [vmem:[%s17836_s8 + $0x45c] sm:$0xf0] }
 0x48c   : > { %v11028_v2 = vor.u32 %v12184_v23, %v11027_v5  ;;  %v5566_v5 = vpop.permute.xlu1 %5565  ;;  %v5506_v23 = vld [vmem:[%s17837_s9 + $0x88] sm:$0xff] }
 0x48d   : > { %7968 = vmatmul.bf16.gmra.mxu1 %v10780_v38  ;;  %8122 = vmatmul.bf16.gmra.mxu2 %v10688_v36  ;;  %v7587_v38 = vadd.f32 %v14833_v0, %v5556_v29  ;;  %v12137_v36 = vld [vmem:[%s17836_s8 + $0x2e4] sm:$0xf0]  ;;  %v10752_v0 = vor.u32 %v12109_v53, %v10749_v63  ;;  %v7592_v53 = vadd.f32 %v14871_v27, %v5566_v5 }
 0x48e   : > { %7660 = vmatmul.bf16.gmra.mxu3 %v10964_v30  ;;  %v10843_v30 = vld [vmem:[%s17836_s8 + $0x2c8] sm:$0xf]  ;;  %5640 = vperm.xlu2 %12393, %v5506_v23  }
 0x48f   : > { %v10844_v46 = vor.u32 %v12137_v36, %v10843_v30  ;;  %v7756_v52 = vadd.f32 %v14827_v58, %v7587_v38  ;;  %v11059_v38 = vld [vmem:[%s17836_s8 + $0x480] sm:$0xf]  ;;  %v12145_v63 = vld [vmem:[%s17836_s8 + $0x324] sm:$0xf0] }
 0x490   : > { %v15122_v39 = vpop.f32.mrf.mxu0  ;;  %v12192_v36 = vld [vmem:[%s17836_s8 + $0x49c] sm:$0xf0]  ;;  %v5510_v23 = vld [vmem:[%s17837_s9 + $0xa8] sm:$0xff] }
 0x491   : > { %v15120_v19 = vpop.f32.mrf.mxu3 }
 0x492   : > { %v15124_v56 = vpop.f32.mrf.mxu1 }
 0x498   : > { %v15152_v42 = vpop.f32.mrf.mxu0 }
 0x499   : > { %v15150_v7 = vpop.f32.mrf.mxu3 }
 0x49a   : > { %v15154_v57 = vpop.f32.mrf.mxu1 }
 0x49b   : > { %7834 = vmatmul.bf16.gmra.mxu0 %v11000_v37  ;;  %v5508_v37 = vld [vmem:[%s17837_s9 + $0x98] sm:$0xff] }
 0x49c   : > { %5650 = vperm.xlu1 %12392, %v5508_v37  }
 0x49d   : > { %7973 = vmatmul.bf16.gmra.mxu1 %v10812_v11  ;;  %8127 = vmatmul.bf16.gmra.mxu2 %v10720_v9  ;;  %v5561_v11 = vpop.permute.xlu0 %5560  ;;  %v7925_v9 = vadd.f32 %v15070_v10, %v7756_v52  ;;  %v12188_v10 = vld [vmem:[%s17836_s8 + $0x484] sm:$0xf] }
 0x49e   : > { %7665 = vmatmul.bf16.gmra.mxu3 %v10996_v47  ;;  %v5507_v47 = vld [vmem:[%s17837_s9 + $0x90] sm:$0xff]  ;;  %v7589_v20 = vadd.f32 %v14864_v8, %v5561_v11  ;;  %v11061_v8 = vld [vmem:[%s17836_s8 + $0x4a0] sm:$0xf0] }
 0x49f   : > { %5645 = vperm.xlu0 %12391, %v5507_v47   ;;  %v11060_v47 = vor.u32 %v12192_v36, %v11059_v38 }
 0x4a0   : > { %v15161_v48 = vpop.f32.mrf.mxu0  ;;  %v7758_v30 = vadd.f32 %v14835_v3, %v7589_v20  ;;  %v10875_v3 = vld [vmem:[%s17836_s8 + $0x308] sm:$0xf]  ;;  %v7761_v20 = vadd.f32 %v14866_v12, %v7592_v53  ;;  %v5576_v53 = vpop.permute.xlu2 %5575 }
 0x4a1   : > { %v15159_v14 = vpop.f32.mrf.mxu3  ;;  %v10876_v11 = vor.u32 %v12145_v63, %v10875_v3 }
 0x4a2   : > { %v15163_v35 = vpop.f32.mrf.mxu1  ;;  %v7927_v52 = vadd.f32 %v15082_v45, %v7758_v30  ;;  %v5571_v45 = vpop.permute.xlu1 %5570  ;;  %v7930_v30 = vadd.f32 %v15115_v49, %v7761_v20  ;;  %v11093_v49 = vld [vmem:[%s17836_s8 + $0x4e0] sm:$0xf0] }
 0x4a3   : > { %v7594_v12 = vadd.f32 %v14901_v33, %v5571_v45  ;;  %v11091_v33 = vld [vmem:[%s17836_s8 + $0x4c0] sm:$0xf] }
 0x4a5   : > { %v7763_v63 = vadd.f32 %v14873_v43, %v7594_v12  ;;  %v10907_v43 = vld [vmem:[%s17836_s8 + $0x348] sm:$0xf] }
 0x4a7   : > { %5660 = vperm.xlu0 %12391, %v5510_v23   ;;  %v7932_v20 = vadd.f32 %v15124_v56, %v7763_v63 }
 0x4a8   : > { %v15195_v22 = vpop.f32.mrf.mxu0  ;;  %v5581_v56 = vpop.permute.xlu2 %5580 }
 0x4a9   : > { %v15193_v59 = vpop.f32.mrf.mxu3 }
 0x4aa   : > { %v15198_v25 = vpop.f32.mrf.mxu1 }
 0x4ab   : > { %7839 = vmatmul.bf16.gmra.mxu0 %v11032_v34  ;;  %v12117_v34 = vld [vmem:[%s17836_s8 + $0x24c] sm:$0xf] }
 0x4ad   : > { %7978 = vmatmul.bf16.gmra.mxu1 %v10844_v46  ;;  %8132 = vmatmul.bf16.gmra.mxu2 %v10752_v0  ;;  %v11064_v0 = vor.u32 %v12188_v10, %v11061_v8 }
 0x4ae   : > { %7670 = vmatmul.bf16.gmra.mxu3 %v11028_v2  ;;  %v10781_v2 = vld [vmem:[%s17836_s8 + $0x268] sm:$0xf0] }
 0x4b0   : > { %v8093_v29 = vpop.f32.mrf.mxu2  ;;  %v15210_v16 = vpop.f32.mrf.mxu0 }
 0x4b1   : > { %v15207_v58 = vpop.f32.mrf.mxu3  ;;  %v15212_v21 = vadd.f32 %v8093_v29, %v7925_v9  ;;  %v10784_v9 = vor.u32 %v12117_v34, %v10781_v2  ;;  %v12196_v34 = vld [vmem:[%s17836_s8 + $0x4c4] sm:$0xf]  ;;  %v12200_v2 = vld [vmem:[%s17836_s8 + $0x4dc] sm:$0xf0] }
 0x4b2   : > { %v15214_v18 = vpop.f32.mrf.mxu1  ;;  %v11092_v45 = vor.u32 %v12200_v2, %v11091_v33 }
 0x4b8   : > { %v8095_v37 = vpop.f32.mrf.mxu2  ;;  %v15248_v27 = vpop.f32.mrf.mxu0 }
 0x4b9   : > { %v15245_v46 = vpop.f32.mrf.mxu3  ;;  %v15251_v29 = vadd.f32 %v8095_v37, %v7927_v52  ;;  %v12153_v52 = vld [vmem:[%s17836_s8 + $0x364] sm:$0xf0]  ;;  %v12125_v37 = vld [vmem:[%s17836_s8 + $0x28c] sm:$0xf] }
 0x4ba   : > { %v15253_v5 = vpop.f32.mrf.mxu1 }
 0x4bb   : > { %17841 = vst [vmem:[#allocation3_spill] sm:$0xff] %v15251_v29  ;;  %7844 = vmatmul.bf16.gmra.mxu0 %v11064_v0  ;;  %v7597_v0 = vadd.f32 %v14907_v40, %v5576_v53  ;;  %v5511_v29 = vld [vmem:[%s17837_s9 + $0xb0] sm:$0xff] }
 0x4bc   : > { %5665 = vperm.xlu1 %12392, %v5511_v29   ;;  %v5509_v29 = vld [vmem:[%s17837_s9 + $0xa0] sm:$0xff] }
 0x4bd   : > { %7983 = vmatmul.bf16.gmra.mxu1 %v10876_v11  ;;  %8137 = vmatmul.bf16.gmra.mxu2 %v10784_v9  ;;  %v11096_v9 = vor.u32 %v12196_v34, %v11093_v49 }
 0x4be   : > { %7675 = vmatmul.bf16.gmra.mxu3 %v11060_v47  ;;  %v10813_v47 = vld [vmem:[%s17836_s8 + $0x2a8] sm:$0xf0]  ;;  %5655 = vperm.xlu2 %12393, %v5509_v29  }
 0x4bf   : > { %v10816_v12 = vor.u32 %v12125_v37, %v10813_v47  ;;  %v11123_v37 = vld [vmem:[%s17836_s8 + $0x500] sm:$0xf] }
 0x4c0   : > { %v8098_v8 = vpop.f32.mrf.mxu2  ;;  %v15262_v38 = vpop.f32.mrf.mxu0  ;;  %v12208_v47 = vld [vmem:[%s17836_s8 + $0x51c] sm:$0xf0] }
 0x4c1   : > { %v15259_v10 = vpop.f32.mrf.mxu3  ;;  %v15264_v36 = vadd.f32 %v8098_v8, %v7930_v30  ;;  %v10908_v30 = vor.u32 %v12153_v52, %v10907_v43  ;;  %v7766_v8 = vadd.f32 %v14903_v28, %v7597_v0  ;;  %v7599_v28 = vadd.f32 %v14937_v13, %v5581_v56  ;;  %v5586_v0 = vpop.permute.xlu0 %5585  ;;  %v11125_v13 = vld [vmem:[%s17836_s8 + $0x520] sm:$0xf0] }
 0x4c2   : > { %v15266_v3 = vpop.f32.mrf.mxu1 }
 0x4c3   : > { %17842 = vst [vmem:[#allocation4_spill] sm:$0xff] %v15264_v36  ;;  %v7935_v63 = vadd.f32 %v15154_v57, %v7766_v8  ;;  %v7768_v52 = vadd.f32 %v14909_v1, %v7599_v28  ;;  %v12204_v57 = vld [vmem:[%s17836_s8 + $0x504] sm:$0xf]  ;;  %v10939_v1 = vld [vmem:[%s17836_s8 + $0x388] sm:$0xf] }
 0x4c5   : > { %v7937_v8 = vadd.f32 %v15163_v35, %v7768_v52  ;;  %v5513_v35 = vld [vmem:[%s17837_s9 + $0xc0] sm:$0xff]  ;;  %v5591_v52 = vpop.permute.xlu1 %5590 }
 0x4c6   : > { %5675 = vperm.xlu0 %12391, %v5513_v35  }
 0x4c8   : > { %v8100_v23 = vpop.f32.mrf.mxu2  ;;  %v15297_v40 = vpop.f32.mrf.mxu0 }
 0x4c9   : > { %v15294_v11 = vpop.f32.mrf.mxu3  ;;  %v15300_v53 = vadd.f32 %v8100_v23, %v7932_v20  ;;  %v12161_v20 = vld [vmem:[%s17836_s8 + $0x3a4] sm:$0xf0]  ;;  %v12133_v23 = vld [vmem:[%s17836_s8 + $0x2cc] sm:$0xf] }
 0x4ca   : > { %v15302_v36 = vpop.f32.mrf.mxu1  ;;  %v10940_v28 = vor.u32 %v12161_v20, %v10939_v1  ;;  %v5596_v20 = vpop.permute.xlu2 %5595 }
 0x4cb   : > { %17843 = vst [vmem:[#allocation5_spill] sm:$0xff] %v15300_v53  ;;  %7849 = vmatmul.bf16.gmra.mxu0 %v11096_v9  ;;  %v7602_v9 = vadd.f32 %v14950_v4, %v5586_v0  ;;  %v5514_v53 = vld [vmem:[%s17837_s9 + $0xc8] sm:$0xff] }
 0x4cc   : > { %5680 = vperm.xlu1 %12392, %v5514_v53   ;;  %v5512_v53 = vld [vmem:[%s17837_s9 + $0xb8] sm:$0xff] }
 0x4cd   : > { %7988 = vmatmul.bf16.gmra.mxu1 %v10908_v30  ;;  %8142 = vmatmul.bf16.gmra.mxu2 %v10816_v12  ;;  %v11128_v12 = vor.u32 %v12204_v57, %v11125_v13  ;;  %v7771_v0 = vadd.f32 %v14939_v62, %v7602_v9  ;;  %v7604_v13 = vadd.f32 %v14981_v41, %v5591_v52  ;;  %v11157_v41 = vld [vmem:[%s17836_s8 + $0x560] sm:$0xf0] }
 0x4ce   : > { %7680 = vmatmul.bf16.gmra.mxu3 %v11092_v45  ;;  %v10845_v45 = vld [vmem:[%s17836_s8 + $0x2e8] sm:$0xf0]  ;;  %5670 = vperm.xlu2 %12393, %v5512_v53  }
 0x4cf   : > { %v7940_v62 = vadd.f32 %v15198_v25, %v7771_v0  ;;  %v12212_v25 = vld [vmem:[%s17836_s8 + $0x544] sm:$0xf] }
 0x4d0   : > { %v8103_v49 = vpop.f32.mrf.mxu2  ;;  %v15311_v33 = vpop.f32.mrf.mxu0  ;;  %v11160_v0 = vor.u32 %v12212_v25, %v11157_v41 }
 0x4d1   : > { %v15308_v34 = vpop.f32.mrf.mxu3  ;;  %v15313_v2 = vadd.f32 %v8103_v49, %v7935_v63  ;;  %v11124_v63 = vor.u32 %v12208_v47, %v11123_v37  ;;  %v10848_v49 = vor.u32 %v12133_v23, %v10845_v45  ;;  %v7773_v23 = vadd.f32 %v14952_v32, %v7604_v13  ;;  %v11155_v45 = vld [vmem:[%s17836_s8 + $0x540] sm:$0xf]  ;;  %v10971_v32 = vld [vmem:[%s17836_s8 + $0x3c8] sm:$0xf] }
 0x4d2   : > { %v15315_v43 = vpop.f32.mrf.mxu1 }
 0x4d3   : > { %17844 = vst [vmem:[#allocation6_spill] sm:$0xff] %v15313_v2  ;;  %v7942_v35 = vadd.f32 %v15214_v18, %v7773_v23  ;;  %v5601_v18 = vpop.permute.xlu0 %5600 }
 0x4d8   : > { %v8105_v56 = vpop.f32.mrf.mxu2  ;;  %v15349_v4 = vpop.f32.mrf.mxu0 }
 0x4d9   : > { %v15346_v30 = vpop.f32.mrf.mxu3  ;;  %v15352_v29 = vadd.f32 %v8105_v56, %v7937_v8  ;;  %v7607_v8 = vadd.f32 %v14989_v17, %v5596_v20  ;;  %v12169_v56 = vld [vmem:[%s17836_s8 + $0x3e4] sm:$0xf0] }
 0x4da   : > { %v15354_v2 = vpop.f32.mrf.mxu1  ;;  %v10972_v13 = vor.u32 %v12169_v56, %v10971_v32  ;;  %v12220_v56 = vld [vmem:[%s17836_s8 + $0x584] sm:$0xf] }
 0x4db   : > { %17845 = vst [vmem:[#allocation7_spill] sm:$0xff] %v15352_v29  ;;  %7854 = vmatmul.bf16.gmra.mxu0 %v11128_v12  ;;  %v12216_v12 = vld [vmem:[%s17836_s8 + $0x55c] sm:$0xf0]  ;;  %v7776_v20 = vadd.f32 %v14983_v50, %v7607_v8  ;;  %v5516_v29 = vld [vmem:[%s17837_s9 + $0xd8] sm:$0xff]  ;;  %v7609_v50 = vadd.f32 %v15028_v61, %v5601_v18  ;;  %v5606_v8 = vpop.permute.xlu1 %5605 }
 0x4dc   : > { %5690 = vperm.xlu0 %12391, %v5516_v29   ;;  %v11187_v61 = vld [vmem:[%s17836_s8 + $0x580] sm:$0xf] }
 0x4dd   : > { %7993 = vmatmul.bf16.gmra.mxu1 %v10940_v28  ;;  %8147 = vmatmul.bf16.gmra.mxu2 %v10848_v49  ;;  %v10877_v28 = vld [vmem:[%s17836_s8 + $0x328] sm:$0xf0]  ;;  %v7945_v23 = vadd.f32 %v15253_v5, %v7776_v20  ;;  %v7778_v29 = vadd.f32 %v14994_v60, %v7609_v50  ;;  %v11189_v5 = vld [vmem:[%s17836_s8 + $0x5a0] sm:$0xf0]  ;;  %v11003_v60 = vld [vmem:[%s17836_s8 + $0x408] sm:$0xf] }
 0x4de   : > { %7685 = vmatmul.bf16.gmra.mxu3 %v11124_v63  ;;  %v12141_v63 = vld [vmem:[%s17836_s8 + $0x30c] sm:$0xf] }
 0x4e0   : > { %v8108_v37 = vpop.f32.mrf.mxu2  ;;  %v15366_v47 = vpop.f32.mrf.mxu0 }
 0x4e1   : > { %v15363_v57 = vpop.f32.mrf.mxu3  ;;  %v15368_v1 = vadd.f32 %v8108_v37, %v7940_v62  ;;  %v11156_v62 = vor.u32 %v12216_v12, %v11155_v45  ;;  %v10880_v37 = vor.u32 %v12141_v63, %v10877_v28  ;;  %v12224_v63 = vld [vmem:[%s17836_s8 + $0x59c] sm:$0xf0]  ;;  %v7612_v28 = vadd.f32 %v15035_v44, %v5606_v8 }
 0x4e2   : > { %v15370_v9 = vpop.f32.mrf.mxu1  ;;  %v11188_v18 = vor.u32 %v12224_v63, %v11187_v61 }
 0x4e3   : > { %17846 = vst [vmem:[#allocation8_spill] sm:$0xff] %v15368_v1 }
 0x4e8   : > { %v8110_v52 = vpop.f32.mrf.mxu2  ;;  %v15404_v17 = vpop.f32.mrf.mxu0 }
 0x4e9   : > { %v15401_v49 = vpop.f32.mrf.mxu3  ;;  %v15407_v53 = vadd.f32 %v8110_v52, %v7942_v35  ;;  %v12149_v35 = vld [vmem:[%s17836_s8 + $0x34c] sm:$0xf] }
 0x4ea   : > { %v15409_v1 = vpop.f32.mrf.mxu1  ;;  %v10909_v52 = vld [vmem:[%s17836_s8 + $0x368] sm:$0xf0] }
 0x4eb   : > { %17847 = vst [vmem:[#allocation9_spill] sm:$0xff] %v15407_v53  ;;  %7859 = vmatmul.bf16.gmra.mxu0 %v11160_v0  ;;  %v12177_v0 = vld [vmem:[%s17836_s8 + $0x424] sm:$0xf0]  ;;  %v10912_v50 = vor.u32 %v12149_v35, %v10909_v52  ;;  %v5517_v53 = vld [vmem:[%s17837_s9 + $0xe0] sm:$0xff] }
 0x4ec   : > { %5695 = vperm.xlu1 %12392, %v5517_v53   ;;  %v5515_v53 = vld [vmem:[%s17837_s9 + $0xd0] sm:$0xff]  ;;  %v11219_v35 = vld [vmem:[%s17836_s8 + $0x5c0] sm:$0xf] }
 0x4ed   : > { %7998 = vmatmul.bf16.gmra.mxu1 %v10972_v13  ;;  %8152 = vmatmul.bf16.gmra.mxu2 %v10880_v37  ;;  %v11192_v13 = vor.u32 %v12220_v56, %v11189_v5  ;;  %v7947_v37 = vadd.f32 %v15266_v3, %v7778_v29  ;;  %v5611_v3 = vpop.permute.xlu2 %5610  ;;  %v12232_v52 = vld [vmem:[%s17836_s8 + $0x5dc] sm:$0xf0] }
 0x4ee   : > { %7690 = vmatmul.bf16.gmra.mxu3 %v11156_v62  ;;  %5685 = vperm.xlu2 %12393, %v5515_v53  }
 0x4f0   : > { %v8113_v41 = vpop.f32.mrf.mxu2  ;;  %v15418_v45 = vpop.f32.mrf.mxu0 }
 0x4f1   : > { %v15415_v25 = vpop.f32.mrf.mxu3  ;;  %v15420_v12 = vadd.f32 %v8113_v41, %v7945_v23  ;;  %v11004_v23 = vor.u32 %v12177_v0, %v11003_v60  ;;  %v7781_v41 = vadd.f32 %v15030_v6, %v7612_v28  ;;  %v7614_v6 = vadd.f32 %v15066_v51, %v5611_v3  ;;  %v5616_v28 = vpop.permute.xlu0 %5615  ;;  %v11221_v51 = vld [vmem:[%s17836_s8 + $0x5e0] sm:$0xf0] }
 0x4f2   : > { %v15422_v32 = vpop.f32.mrf.mxu1 }
 0x4f3   : > { %17848 = vst [vmem:[#allocation10_spill] sm:$0xff] %v15420_v12  ;;  %v7950_v29 = vadd.f32 %v15302_v36, %v7781_v41  ;;  %v7783_v0 = vadd.f32 %v15037_v24, %v7614_v6  ;;  %v12228_v36 = vld [vmem:[%s17836_s8 + $0x5c4] sm:$0xf]  ;;  %v11035_v24 = vld [vmem:[%s17836_s8 + $0x448] sm:$0xf] }
 0x4f5   : > { %v7952_v41 = vadd.f32 %v15315_v43, %v7783_v0  ;;  %v5519_v43 = vld [vmem:[%s17837_s9 + $0xf0] sm:$0xff]  ;;  %v5621_v0 = vpop.permute.xlu1 %5620 }
 0x4f6   : > { %5705 = vperm.xlu0 %12391, %v5519_v43  }
 0x4f8   : > { %v8115_v20 = vpop.f32.mrf.mxu2  ;;  %v15453_v44 = vpop.f32.mrf.mxu0 }
 0x4f9   : > { %v15450_v62 = vpop.f32.mrf.mxu3  ;;  %v15456_v8 = vadd.f32 %v8115_v20, %v7947_v37  ;;  %v12185_v37 = vld [vmem:[%s17836_s8 + $0x464] sm:$0xf0]  ;;  %v12157_v20 = vld [vmem:[%s17836_s8 + $0x38c] sm:$0xf] }
 0x4fa   : > { %v15458_v12 = vpop.f32.mrf.mxu1  ;;  %v11036_v6 = vor.u32 %v12185_v37, %v11035_v24  ;;  %v5626_v37 = vpop.permute.xlu2 %5625 }
 0x4fb   : > { %17849 = vst [vmem:[#allocation11_spill] sm:$0xff] %v15456_v8  ;;  %7864 = vmatmul.bf16.gmra.mxu0 %v11192_v13  ;;  %v7617_v13 = vadd.f32 %v15078_v31, %v5616_v28  ;;  %v5520_v8 = vld [vmem:[%s17837_s9 + $0xf8] sm:$0xff] }
 0x4fc   : > { %5710 = vperm.xlu1 %12392, %v5520_v8   ;;  %v5518_v8 = vld [vmem:[%s17837_s9 + $0xe8] sm:$0xff] }
 0x4fd   : > { %8003 = vmatmul.bf16.gmra.mxu1 %v11004_v23  ;;  %8157 = vmatmul.bf16.gmra.mxu2 %v10912_v50  ;;  %v11224_v50 = vor.u32 %v12228_v36, %v11221_v51  ;;  %v7786_v28 = vadd.f32 %v15068_v15, %v7617_v13  ;;  %v7619_v51 = vadd.f32 %v15111_v55, %v5621_v0  ;;  %v11253_v55 = vld [vmem:[%s17836_s8 + $0x620] sm:$0xf0] }
 0x4fe   : > { %7695 = vmatmul.bf16.gmra.mxu3 %v11188_v18  ;;  %v10941_v18 = vld [vmem:[%s17836_s8 + $0x3a8] sm:$0xf0]  ;;  %5700 = vperm.xlu2 %12393, %v5518_v8  }
 0x4ff   : > { %v7955_v15 = vadd.f32 %v15354_v2, %v7786_v28  ;;  %v12236_v2 = vld [vmem:[%s17836_s8 + $0x604] sm:$0xf] }
 0x500   : > { %v8118_v5 = vpop.f32.mrf.mxu2  ;;  %v15467_v61 = vpop.f32.mrf.mxu0  ;;  %v11256_v28 = vor.u32 %v12236_v2, %v11253_v55 }
 0x501   : > { %v15464_v56 = vpop.f32.mrf.mxu3  ;;  %v15469_v63 = vadd.f32 %v8118_v5, %v7950_v29  ;;  %v11220_v29 = vor.u32 %v12232_v52, %v11219_v35  ;;  %v10944_v5 = vor.u32 %v12157_v20, %v10941_v18  ;;  %v7788_v20 = vadd.f32 %v15080_v54, %v7619_v51  ;;  %v11251_v18 = vld [vmem:[%s17836_s8 + $0x600] sm:$0xf]  ;;  %v11067_v54 = vld [vmem:[%s17836_s8 + $0x488] sm:$0xf] }
 0x502   : > { %v15471_v60 = vpop.f32.mrf.mxu1 }
 0x503   : > { %17850 = vst [vmem:[#allocation12_spill] sm:$0xff] %v15469_v63  ;;  %v7957_v43 = vadd.f32 %v15370_v9, %v7788_v20  ;;  %v5631_v9 = vpop.permute.xlu0 %5630 }
 0x508   : > { %v8120_v3 = vpop.f32.mrf.mxu2  ;;  %v15505_v31 = vpop.f32.mrf.mxu0 }
 0x509   : > { %v15502_v23 = vpop.f32.mrf.mxu3  ;;  %v15508_v53 = vadd.f32 %v8120_v3, %v7952_v41  ;;  %v7622_v41 = vadd.f32 %v15120_v19, %v5626_v37  ;;  %v12193_v3 = vld [vmem:[%s17836_s8 + $0x4a4] sm:$0xf0] }
 0x50a   : > { %v15510_v63 = vpop.f32.mrf.mxu1  ;;  %v11068_v51 = vor.u32 %v12193_v3, %v11067_v54  ;;  %v12244_v3 = vld [vmem:[%s17836_s8 + $0x644] sm:$0xf] }
 0x50b   : > { %17851 = vst [vmem:[#allocation13_spill] sm:$0xff] %v15508_v53  ;;  %7869 = vmatmul.bf16.gmra.mxu0 %v11224_v50  ;;  %v12240_v50 = vld [vmem:[%s17836_s8 + $0x61c] sm:$0xf0]  ;;  %v7791_v37 = vadd.f32 %v15113_v26, %v7622_v41  ;;  %v5522_v53 = vld [vmem:[%s17837_s9 + $0x108] sm:$0xff]  ;;  %v7624_v26 = vadd.f32 %v15150_v7, %v5631_v9  ;;  %v5636_v41 = vpop.permute.xlu1 %5635 }
 0x50c   : > { %5720 = vperm.xlu0 %12391, %v5522_v53   ;;  %v11283_v7 = vld [vmem:[%s17836_s8 + $0x640] sm:$0xf] }
 0x50d   : > { %8008 = vmatmul.bf16.gmra.mxu1 %v11036_v6  ;;  %8162 = vmatmul.bf16.gmra.mxu2 %v10944_v5  ;;  %v10973_v6 = vld [vmem:[%s17836_s8 + $0x3e8] sm:$0xf0]  ;;  %v7960_v20 = vadd.f32 %v15409_v1, %v7791_v37  ;;  %v7793_v53 = vadd.f32 %v15122_v39, %v7624_v26  ;;  %v11285_v1 = vld [vmem:[%s17836_s8 + $0x660] sm:$0xf0]  ;;  %v11099_v39 = vld [vmem:[%s17836_s8 + $0x4c8] sm:$0xf] }
 0x50e   : > { %7700 = vmatmul.bf16.gmra.mxu3 %v11220_v29  ;;  %v12165_v29 = vld [vmem:[%s17836_s8 + $0x3cc] sm:$0xf] }
 0x510   : > { %v8123_v35 = vpop.f32.mrf.mxu2  ;;  %v15522_v52 = vpop.f32.mrf.mxu0 }
 0x511   : > { %v15519_v36 = vpop.f32.mrf.mxu3  ;;  %v15524_v24 = vadd.f32 %v8123_v35, %v7955_v15  ;;  %v11252_v15 = vor.u32 %v12240_v50, %v11251_v18  ;;  %v10976_v35 = vor.u32 %v12165_v29, %v10973_v6  ;;  %v12248_v29 = vld [vmem:[%s17836_s8 + $0x65c] sm:$0xf0]  ;;  %v7627_v6 = vadd.f32 %v15159_v14, %v5636_v41 }
 0x512   : > { %v15526_v13 = vpop.f32.mrf.mxu1  ;;  %v11284_v9 = vor.u32 %v12248_v29, %v11283_v7 }
 0x513   : > { %17852 = vst [vmem:[#allocation14_spill] sm:$0xff] %v15524_v24 }
 0x518   : > { %v8125_v0 = vpop.f32.mrf.mxu2  ;;  %v15560_v19 = vpop.f32.mrf.mxu0 }
 0x519   : > { %v15557_v5 = vpop.f32.mrf.mxu3  ;;  %v15563_v8 = vadd.f32 %v8125_v0, %v7957_v43  ;;  %v12173_v43 = vld [vmem:[%s17836_s8 + $0x40c] sm:$0xf] }
 0x51a   : > { %v15565_v24 = vpop.f32.mrf.mxu1  ;;  %v11005_v0 = vld [vmem:[%s17836_s8 + $0x428] sm:$0xf0] }
 0x51b   : > { %17853 = vst [vmem:[#allocation15_spill] sm:$0xff] %v15563_v8  ;;  %7874 = vmatmul.bf16.gmra.mxu0 %v11256_v28  ;;  %v12201_v28 = vld [vmem:[%s17836_s8 + $0x4e4] sm:$0xf0]  ;;  %v11008_v26 = vor.u32 %v12173_v43, %v11005_v0  ;;  %v5523_v8 = vld [vmem:[%s17837_s9 + $0x110] sm:$0xff]  ;;  %v11315_v43 = vld [vmem:[%s17836_s8 + $0x680] sm:$0xf] }
 0x51c   : > { %5725 = vperm.xlu1 %12392, %v5523_v8   ;;  %v5521_v8 = vld [vmem:[%s17837_s9 + $0x100] sm:$0xff] }
 0x51d   : > { %8013 = vmatmul.bf16.gmra.mxu1 %v11068_v51  ;;  %8167 = vmatmul.bf16.gmra.mxu2 %v10976_v35  ;;  %v11288_v51 = vor.u32 %v12244_v3, %v11285_v1  ;;  %v7962_v35 = vadd.f32 %v15422_v32, %v7793_v53  ;;  %v5641_v32 = vpop.permute.xlu2 %5640  ;;  %v12256_v0 = vld [vmem:[%s17836_s8 + $0x69c] sm:$0xf0] }
 0x51e   : > { %7705 = vmatmul.bf16.gmra.mxu3 %v11252_v15  ;;  %5715 = vperm.xlu2 %12393, %v5521_v8  }
 0x520   : > { %v8128_v55 = vpop.f32.mrf.mxu2  ;;  %v15574_v18 = vpop.f32.mrf.mxu0 }
 0x521   : > { %v15571_v2 = vpop.f32.mrf.mxu3  ;;  %v15576_v50 = vadd.f32 %v8128_v55, %v7960_v20  ;;  %v11100_v20 = vor.u32 %v12201_v28, %v11099_v39  ;;  %v7796_v55 = vadd.f32 %v15152_v42, %v7627_v6  ;;  %v7629_v42 = vadd.f32 %v15193_v59, %v5641_v32  ;;  %v5646_v6 = vpop.permute.xlu0 %5645  ;;  %v11317_v59 = vld [vmem:[%s17836_s8 + $0x6a0] sm:$0xf0] }
 0x522   : > { %v15578_v54 = vpop.f32.mrf.mxu1 }
 0x523   : > { %17854 = vst [vmem:[#allocation16_spill] sm:$0xff] %v15576_v50  ;;  %v7965_v53 = vadd.f32 %v15458_v12, %v7796_v55  ;;  %v7798_v28 = vadd.f32 %v15161_v48, %v7629_v42  ;;  %v12252_v12 = vld [vmem:[%s17836_s8 + $0x684] sm:$0xf]  ;;  %v11131_v48 = vld [vmem:[%s17836_s8 + $0x508] sm:$0xf] }
 0x525   : > { %v7967_v55 = vadd.f32 %v15471_v60, %v7798_v28  ;;  %v5525_v60 = vld [vmem:[%s17837_s9 + $0x120] sm:$0xff]  ;;  %v5651_v28 = vpop.permute.xlu1 %5650 }
 0x526   : > { %5735 = vperm.xlu0 %12391, %v5525_v60  }
 0x528   : > { %v8130_v37 = vpop.f32.mrf.mxu2  ;;  %v15609_v14 = vpop.f32.mrf.mxu0 }
 0x529   : > { %v15606_v15 = vpop.f32.mrf.mxu3  ;;  %v15612_v41 = vadd.f32 %v8130_v37, %v7962_v35  ;;  %v12209_v35 = vld [vmem:[%s17836_s8 + $0x524] sm:$0xf0]  ;;  %v12181_v37 = vld [vmem:[%s17836_s8 + $0x44c] sm:$0xf] }
 0x52a   : > { %v15614_v50 = vpop.f32.mrf.mxu1  ;;  %v11132_v42 = vor.u32 %v12209_v35, %v11131_v48  ;;  %v5656_v35 = vpop.permute.xlu2 %5655 }
 0x52b   : > { %17855 = vst [vmem:[#allocation17_spill] sm:$0xff] %v15612_v41  ;;  %7879 = vmatmul.bf16.gmra.mxu0 %v11288_v51  ;;  %v7632_v51 = vadd.f32 %v15207_v58, %v5646_v6  ;;  %v5526_v41 = vld [vmem:[%s17837_s9 + $0x128] sm:$0xff] }
 0x52c   : > { %5740 = vperm.xlu1 %12392, %v5526_v41   ;;  %v5524_v41 = vld [vmem:[%s17837_s9 + $0x118] sm:$0xff] }
 0x52d   : > { %8018 = vmatmul.bf16.gmra.mxu1 %v11100_v20  ;;  %8172 = vmatmul.bf16.gmra.mxu2 %v11008_v26  ;;  %v11320_v26 = vor.u32 %v12252_v12, %v11317_v59  ;;  %v7801_v6 = vadd.f32 %v15195_v22, %v7632_v51  ;;  %v7634_v59 = vadd.f32 %v15245_v46, %v5651_v28  ;;  %v11349_v46 = vld [vmem:[%s17836_s8 + $0x6e0] sm:$0xf0] }
 0x52e   : > { %7710 = vmatmul.bf16.gmra.mxu3 %v11284_v9  ;;  %v11037_v9 = vld [vmem:[%s17836_s8 + $0x468] sm:$0xf0]  ;;  %5730 = vperm.xlu2 %12393, %v5524_v41  }
 0x52f   : > { %v7970_v22 = vadd.f32 %v15510_v63, %v7801_v6  ;;  %v12260_v63 = vld [vmem:[%s17836_s8 + $0x6c4] sm:$0xf] }
 0x530   : > { %v8133_v1 = vpop.f32.mrf.mxu2  ;;  %v15623_v7 = vpop.f32.mrf.mxu0  ;;  %v11352_v6 = vor.u32 %v12260_v63, %v11349_v46 }
 0x531   : > { %v15620_v3 = vpop.f32.mrf.mxu3  ;;  %v15625_v29 = vadd.f32 %v8133_v1, %v7965_v53  ;;  %v11316_v53 = vor.u32 %v12256_v0, %v11315_v43  ;;  %v11040_v1 = vor.u32 %v12181_v37, %v11037_v9  ;;  %v7803_v37 = vadd.f32 %v15210_v16, %v7634_v59  ;;  %v11347_v9 = vld [vmem:[%s17836_s8 + $0x6c0] sm:$0xf]  ;;  %v11163_v16 = vld [vmem:[%s17836_s8 + $0x548] sm:$0xf] }
 0x532   : > { %v15627_v39 = vpop.f32.mrf.mxu1 }
 0x533   : > { %17856 = vst [vmem:[#allocation18_spill] sm:$0xff] %v15625_v29  ;;  %v7972_v60 = vadd.f32 %v15526_v13, %v7803_v37  ;;  %v5661_v13 = vpop.permute.xlu0 %5660 }
 0x538   : > { %v8135_v32 = vpop.f32.mrf.mxu2  ;;  %v15661_v58 = vpop.f32.mrf.mxu0 }
 0x539   : > { %v15658_v20 = vpop.f32.mrf.mxu3  ;;  %v15664_v8 = vadd.f32 %v8135_v32, %v7967_v55  ;;  %v7637_v55 = vadd.f32 %v15259_v10, %v5656_v35  ;;  %v12217_v32 = vld [vmem:[%s17836_s8 + $0x564] sm:$0xf0] }
 0x53a   : > { %v15666_v29 = vpop.f32.mrf.mxu1  ;;  %v11164_v59 = vor.u32 %v12217_v32, %v11163_v16  ;;  %v12268_v32 = vld [vmem:[%s17836_s8 + $0x704] sm:$0xf] }
 0x53b   : > { %17857 = vst [vmem:[#allocation19_spill] sm:$0xff] %v15664_v8  ;;  %7884 = vmatmul.bf16.gmra.mxu0 %v11320_v26  ;;  %v12264_v26 = vld [vmem:[%s17836_s8 + $0x6dc] sm:$0xf0]  ;;  %v7806_v35 = vadd.f32 %v15248_v27, %v7637_v55  ;;  %v5528_v8 = vld [vmem:[%s17837_s9 + $0x138] sm:$0xff]  ;;  %v7639_v27 = vadd.f32 %v15294_v11, %v5661_v13  ;;  %v5666_v55 = vpop.permute.xlu1 %5665 }
 0x53c   : > { %5750 = vperm.xlu0 %12391, %v5528_v8   ;;  %v11379_v11 = vld [vmem:[%s17836_s8 + $0x700] sm:$0xf] }
 0x53d   : > { %8023 = vmatmul.bf16.gmra.mxu1 %v11132_v42  ;;  %8177 = vmatmul.bf16.gmra.mxu2 %v11040_v1  ;;  %v11069_v42 = vld [vmem:[%s17836_s8 + $0x4a8] sm:$0xf0]  ;;  %v7975_v37 = vadd.f32 %v15565_v24, %v7806_v35  ;;  %v7808_v8 = vadd.f32 %v15262_v38, %v7639_v27  ;;  %v11381_v24 = vld [vmem:[%s17836_s8 + $0x720] sm:$0xf0]  ;;  %v11195_v38 = vld [vmem:[%s17836_s8 + $0x588] sm:$0xf] }
 0x53e   : > { %7715 = vmatmul.bf16.gmra.mxu3 %v11316_v53  ;;  %v12189_v53 = vld [vmem:[%s17836_s8 + $0x48c] sm:$0xf] }
 0x540   : > { %v8138_v43 = vpop.f32.mrf.mxu2  ;;  %v15678_v0 = vpop.f32.mrf.mxu0 }
 0x541   : > { %v15675_v12 = vpop.f32.mrf.mxu3  ;;  %v15680_v48 = vadd.f32 %v8138_v43, %v7970_v22  ;;  %v11348_v22 = vor.u32 %v12264_v26, %v11347_v9  ;;  %v11072_v43 = vor.u32 %v12189_v53, %v11069_v42  ;;  %v12272_v53 = vld [vmem:[%s17836_s8 + $0x71c] sm:$0xf0]  ;;  %v7642_v42 = vadd.f32 %v15308_v34, %v5666_v55 }
 0x542   : > { %v15682_v51 = vpop.f32.mrf.mxu1  ;;  %v11380_v13 = vor.u32 %v12272_v53, %v11379_v11 }
 0x543   : > { %17858 = vst [vmem:[#allocation20_spill] sm:$0xff] %v15680_v48 }
 0x548   : > { %v8140_v28 = vpop.f32.mrf.mxu2  ;;  %v15716_v10 = vpop.f32.mrf.mxu0 }
 0x549   : > { %v15713_v1 = vpop.f32.mrf.mxu3  ;;  %v15719_v41 = vadd.f32 %v8140_v28, %v7972_v60  ;;  %v12197_v60 = vld [vmem:[%s17836_s8 + $0x4cc] sm:$0xf] }
 0x54a   : > { %v15721_v48 = vpop.f32.mrf.mxu1  ;;  %v11101_v28 = vld [vmem:[%s17836_s8 + $0x4e8] sm:$0xf0] }
 0x54b   : > { %17859 = vst [vmem:[#allocation21_spill] sm:$0xff] %v15719_v41  ;;  %7889 = vmatmul.bf16.gmra.mxu0 %v11352_v6  ;;  %v12225_v6 = vld [vmem:[%s17836_s8 + $0x5a4] sm:$0xf0]  ;;  %v11104_v27 = vor.u32 %v12197_v60, %v11101_v28  ;;  %v5529_v41 = vld [vmem:[%s17837_s9 + $0x140] sm:$0xff] }
 0x54c   : > { %5755 = vperm.xlu1 %12392, %v5529_v41   ;;  %v5527_v41 = vld [vmem:[%s17837_s9 + $0x130] sm:$0xff]  ;;  %v11411_v60 = vld [vmem:[%s17836_s8 + $0x740] sm:$0xf] }
 0x54d   : > { %8028 = vmatmul.bf16.gmra.mxu1 %v11164_v59  ;;  %8182 = vmatmul.bf16.gmra.mxu2 %v11072_v43  ;;  %v11384_v59 = vor.u32 %v12268_v32, %v11381_v24  ;;  %v7977_v43 = vadd.f32 %v15578_v54, %v7808_v8  ;;  %v5671_v54 = vpop.permute.xlu2 %5670  ;;  %v12280_v28 = vld [vmem:[%s17836_s8 + $0x75c] sm:$0xf0] }
 0x54e   : > { %7720 = vmatmul.bf16.gmra.mxu3 %v11348_v22  ;;  %5745 = vperm.xlu2 %12393, %v5527_v41  }
 0x550   : > { %v8143_v46 = vpop.f32.mrf.mxu2  ;;  %v15730_v9 = vpop.f32.mrf.mxu0 }
 0x551   : > { %v15727_v63 = vpop.f32.mrf.mxu3  ;;  %v15732_v26 = vadd.f32 %v8143_v46, %v7975_v37  ;;  %v11196_v37 = vor.u32 %v12225_v6, %v11195_v38  ;;  %v7811_v46 = vadd.f32 %v15297_v40, %v7642_v42  ;;  %v7644_v40 = vadd.f32 %v15346_v30, %v5671_v54  ;;  %v5676_v42 = vpop.permute.xlu0 %5675  ;;  %v11413_v30 = vld [vmem:[%s17836_s8 + $0x760] sm:$0xf0] }
 0x552   : > { %v15734_v16 = vpop.f32.mrf.mxu1 }
 0x553   : > { %17860 = vst [vmem:[#allocation22_spill] sm:$0xff] %v15732_v26  ;;  %v7980_v8 = vadd.f32 %v15614_v50, %v7811_v46  ;;  %v7813_v6 = vadd.f32 %v15311_v33, %v7644_v40  ;;  %v12276_v50 = vld [vmem:[%s17836_s8 + $0x744] sm:$0xf]  ;;  %v11227_v33 = vld [vmem:[%s17836_s8 + $0x5c8] sm:$0xf] }
 0x555   : > { %v7982_v46 = vadd.f32 %v15627_v39, %v7813_v6  ;;  %v5531_v39 = vld [vmem:[%s17837_s9 + $0x150] sm:$0xff]  ;;  %v5681_v6 = vpop.permute.xlu1 %5680 }
 0x556   : > { %5765 = vperm.xlu0 %12391, %v5531_v39  }
 0x558   : > { %v8145_v35 = vpop.f32.mrf.mxu2  ;;  %v15765_v34 = vpop.f32.mrf.mxu0 }
 0x559   : > { %v15762_v22 = vpop.f32.mrf.mxu3  ;;  %v15768_v55 = vadd.f32 %v8145_v35, %v7977_v43  ;;  %v12233_v43 = vld [vmem:[%s17836_s8 + $0x5e4] sm:$0xf0]  ;;  %v12205_v35 = vld [vmem:[%s17836_s8 + $0x50c] sm:$0xf] }
 0x55a   : > { %v15770_v26 = vpop.f32.mrf.mxu1  ;;  %v11228_v40 = vor.u32 %v12233_v43, %v11227_v33  ;;  %v5686_v43 = vpop.permute.xlu2 %5685 }
 0x55b   : > { %17861 = vst [vmem:[#allocation23_spill] sm:$0xff] %v15768_v55  ;;  %7894 = vmatmul.bf16.gmra.mxu0 %v11384_v59  ;;  %v7647_v59 = vadd.f32 %v15363_v57, %v5676_v42  ;;  %v5532_v55 = vld [vmem:[%s17837_s9 + $0x158] sm:$0xff] }
 0x55c   : > { %5770 = vperm.xlu1 %12392, %v5532_v55   ;;  %v5530_v55 = vld [vmem:[%s17837_s9 + $0x148] sm:$0xff] }
 0x55d   : > { %8033 = vmatmul.bf16.gmra.mxu1 %v11196_v37  ;;  %8187 = vmatmul.bf16.gmra.mxu2 %v11104_v27  ;;  %v11416_v27 = vor.u32 %v12276_v50, %v11413_v30  ;;  %v7816_v42 = vadd.f32 %v15349_v4, %v7647_v59  ;;  %v7649_v30 = vadd.f32 %v15401_v49, %v5681_v6  ;;  %v11445_v49 = vld [vmem:[%s17836_s8 + $0x7a0] sm:$0xf0] }
 0x55e   : > { %7725 = vmatmul.bf16.gmra.mxu3 %v11380_v13  ;;  %v11133_v13 = vld [vmem:[%s17836_s8 + $0x528] sm:$0xf0]  ;;  %5760 = vperm.xlu2 %12393, %v5530_v55  }
 0x55f   : > { %v7985_v4 = vadd.f32 %v15666_v29, %v7816_v42  ;;  %v12284_v29 = vld [vmem:[%s17836_s8 + $0x784] sm:$0xf] }
 0x560   : > { %v8148_v24 = vpop.f32.mrf.mxu2  ;;  %v15779_v11 = vpop.f32.mrf.mxu0  ;;  %v11448_v42 = vor.u32 %v12284_v29, %v11445_v49 }
 0x561   : > { %v15776_v32 = vpop.f32.mrf.mxu3  ;;  %v15781_v53 = vadd.f32 %v8148_v24, %v7980_v8  ;;  %v11412_v8 = vor.u32 %v12280_v28, %v11411_v60  ;;  %v11136_v24 = vor.u32 %v12205_v35, %v11133_v13  ;;  %v7818_v35 = vadd.f32 %v15366_v47, %v7649_v30  ;;  %v11443_v13 = vld [vmem:[%s17836_s8 + $0x780] sm:$0xf]  ;;  %v11259_v47 = vld [vmem:[%s17836_s8 + $0x608] sm:$0xf] }
 0x562   : > { %v15783_v38 = vpop.f32.mrf.mxu1 }
 0x563   : > { %17862 = vst [vmem:[#allocation24_spill] sm:$0xff] %v15781_v53  ;;  %v7987_v39 = vadd.f32 %v15682_v51, %v7818_v35  ;;  %v5691_v51 = vpop.permute.xlu0 %5690 }
 0x568   : > { %v8150_v54 = vpop.f32.mrf.mxu2  ;;  %v15817_v57 = vpop.f32.mrf.mxu0 }
 0x569   : > { %v15814_v37 = vpop.f32.mrf.mxu3  ;;  %v15820_v41 = vadd.f32 %v8150_v54, %v7982_v46  ;;  %v7652_v46 = vadd.f32 %v15415_v25, %v5686_v43  ;;  %v12241_v54 = vld [vmem:[%s17836_s8 + $0x624] sm:$0xf0] }
 0x56a   : > { %v15822_v53 = vpop.f32.mrf.mxu1  ;;  %v11260_v30 = vor.u32 %v12241_v54, %v11259_v47  ;;  %v12292_v54 = vld [vmem:[%s17836_s8 + $0x7c4] sm:$0xf] }
 0x56b   : > { %17863 = vst [vmem:[#allocation25_spill] sm:$0xff] %v15820_v41  ;;  %7899 = vmatmul.bf16.gmra.mxu0 %v11416_v27  ;;  %v12288_v27 = vld [vmem:[%s17836_s8 + $0x79c] sm:$0xf0]  ;;  %v7821_v43 = vadd.f32 %v15404_v17, %v7652_v46  ;;  %v5534_v41 = vld [vmem:[%s17837_s9 + $0x168] sm:$0xff]  ;;  %v7654_v17 = vadd.f32 %v15450_v62, %v5691_v51  ;;  %v5696_v46 = vpop.permute.xlu1 %5695 }
 0x56c   : > { %5780 = vperm.xlu0 %12391, %v5534_v41   ;;  %v11475_v62 = vld [vmem:[%s17836_s8 + $0x7c0] sm:$0xf] }
 0x56d   : > { %8038 = vmatmul.bf16.gmra.mxu1 %v11228_v40  ;;  %8192 = vmatmul.bf16.gmra.mxu2 %v11136_v24  ;;  %v11165_v40 = vld [vmem:[%s17836_s8 + $0x568] sm:$0xf0]  ;;  %v7990_v35 = vadd.f32 %v15721_v48, %v7821_v43  ;;  %v7823_v41 = vadd.f32 %v15418_v45, %v7654_v17  ;;  %v11477_v48 = vld [vmem:[%s17836_s8 + $0x7e0] sm:$0xf0]  ;;  %v11291_v45 = vld [vmem:[%s17836_s8 + $0x648] sm:$0xf] }
 0x56e   : > { %7730 = vmatmul.bf16.gmra.mxu3 %v11412_v8  ;;  %v12213_v8 = vld [vmem:[%s17836_s8 + $0x54c] sm:$0xf] }
 0x570   : > { %v8153_v60 = vpop.f32.mrf.mxu2  ;;  %v15834_v28 = vpop.f32.mrf.mxu0 }
 0x571   : > { %v15831_v50 = vpop.f32.mrf.mxu3  ;;  %v15836_v33 = vadd.f32 %v8153_v60, %v7985_v4  ;;  %v11444_v4 = vor.u32 %v12288_v27, %v11443_v13  ;;  %v11168_v60 = vor.u32 %v12213_v8, %v11165_v40  ;;  %v12296_v8 = vld [vmem:[%s17836_s8 + $0x7dc] sm:$0xf0]  ;;  %v7657_v40 = vadd.f32 %v15464_v56, %v5696_v46 }
 0x572   : > { %v15838_v59 = vpop.f32.mrf.mxu1  ;;  %v11476_v51 = vor.u32 %v12296_v8, %v11475_v62 }
 0x573   : > { %17864 = vst [vmem:[#allocation26_spill] sm:$0xff] %v15836_v33 }
 0x578   : > { %v8155_v6 = vpop.f32.mrf.mxu2  ;;  %v15872_v25 = vpop.f32.mrf.mxu0 }
 0x579   : > { %v15869_v24 = vpop.f32.mrf.mxu3  ;;  %v15875_v55 = vadd.f32 %v8155_v6, %v7987_v39  ;;  %v12221_v39 = vld [vmem:[%s17836_s8 + $0x58c] sm:$0xf] }
 0x57a   : > { %v15877_v33 = vpop.f32.mrf.mxu1  ;;  %v11197_v6 = vld [vmem:[%s17836_s8 + $0x5a8] sm:$0xf0] }
 0x57b   : > { %17865 = vst [vmem:[#allocation27_spill] sm:$0xff] %v15875_v55  ;;  %7904 = vmatmul.bf16.gmra.mxu0 %v11448_v42  ;;  %v12249_v42 = vld [vmem:[%s17836_s8 + $0x664] sm:$0xf0]  ;;  %v11200_v17 = vor.u32 %v12221_v39, %v11197_v6  ;;  %v5535_v55 = vld [vmem:[%s17837_s9 + $0x170] sm:$0xff] }
 0x57c   : > { %5785 = vperm.xlu1 %12392, %v5535_v55   ;;  %v5533_v55 = vld [vmem:[%s17837_s9 + $0x160] sm:$0xff]  ;;  %v10499_v39 = vld [vmem:[%s17836_s8 + $0x10] sm:$0xf] }
 0x57d   : > { %8043 = vmatmul.bf16.gmra.mxu1 %v11260_v30  ;;  %8197 = vmatmul.bf16.gmra.mxu2 %v11168_v60  ;;  %v11480_v30 = vor.u32 %v12292_v54, %v11477_v48  ;;  %v7992_v60 = vadd.f32 %v15734_v16, %v7823_v41  ;;  %v5701_v16 = vpop.permute.xlu2 %5700  ;;  %v12050_v6 = vld [vmem:[%s17836_s8 + $0x2c] sm:$0xf0] }
 0x57e   : > { %7735 = vmatmul.bf16.gmra.mxu3 %v11444_v4  ;;  %5775 = vperm.xlu2 %12393, %v5533_v55  }
 0x580   : > { %v8158_v49 = vpop.f32.mrf.mxu2  ;;  %v15886_v13 = vpop.f32.mrf.mxu0 }
 0x581   : > { %v15883_v29 = vpop.f32.mrf.mxu3  ;;  %v15888_v27 = vadd.f32 %v8158_v49, %v7990_v35  ;;  %v11292_v35 = vor.u32 %v12249_v42, %v11291_v45  ;;  %v7826_v49 = vadd.f32 %v15453_v44, %v7657_v40  ;;  %v7659_v44 = vadd.f32 %v15502_v23, %v5701_v16  ;;  %v5706_v40 = vpop.permute.xlu0 %5705  ;;  %v10501_v23 = vld [vmem:[%s17836_s8 + $0x30] sm:$0xf0] }
 0x582   : > { %v15890_v47 = vpop.f32.mrf.mxu1 }
 0x583   : > { %17866 = vst [vmem:[#allocation28_spill] sm:$0xff] %v15888_v27  ;;  %v7995_v41 = vadd.f32 %v15770_v26, %v7826_v49  ;;  %v7828_v42 = vadd.f32 %v15467_v61, %v7659_v44  ;;  %v12046_v26 = vld [vmem:[%s17836_s8 + $0x14] sm:$0xf]  ;;  %v11323_v61 = vld [vmem:[%s17836_s8 + $0x688] sm:$0xf] }
 0x585   : > { %v7997_v49 = vadd.f32 %v15783_v38, %v7828_v42  ;;  %v5537_v38 = vld [vmem:[%s17837_s9 + $0x180] sm:$0xff]  ;;  %v5711_v42 = vpop.permute.xlu1 %5710 }
 0x586   : > { %5795 = vperm.xlu0 %12391, %v5537_v38  }
 0x588   : > { %v8160_v43 = vpop.f32.mrf.mxu2  ;;  %v15921_v56 = vpop.f32.mrf.mxu0 }
 0x589   : > { %v15918_v4 = vpop.f32.mrf.mxu3  ;;  %v15924_v46 = vadd.f32 %v8160_v43, %v7992_v60  ;;  %v12257_v60 = vld [vmem:[%s17836_s8 + $0x6a4] sm:$0xf0]  ;;  %v12229_v43 = vld [vmem:[%s17836_s8 + $0x5cc] sm:$0xf] }
 0x58a   : > { %v15926_v27 = vpop.f32.mrf.mxu1  ;;  %v11324_v44 = vor.u32 %v12257_v60, %v11323_v61  ;;  %v5536_v60 = vld [vmem:[%s17837_s9 + $0x178] sm:$0xff] }
 0x58b   : > { %17867 = vst [vmem:[#allocation29_spill] sm:$0xff] %v15924_v46  ;;  %7909 = vmatmul.bf16.gmra.mxu0 %v11480_v30  ;;  %v7662_v30 = vadd.f32 %v15519_v36, %v5706_v40  ;;  %v5538_v46 = vld [vmem:[%s17837_s9 + $0x188] sm:$0xff]  ;;  %5790 = vperm.xlu2 %12393, %v5536_v60  }
 0x58c   : > { %5800 = vperm.xlu1 %12392, %v5538_v46  }
 0x58d   : > { %8048 = vmatmul.bf16.gmra.mxu1 %v11292_v35  ;;  %8202 = vmatmul.bf16.gmra.mxu2 %v11200_v17  ;;  %v10504_v17 = vor.u32 %v12046_v26, %v10501_v23  ;;  %v7831_v40 = vadd.f32 %v15505_v31, %v7662_v30  ;;  %v7664_v23 = vadd.f32 %v15557_v5, %v5711_v42  ;;  %v5716_v30 = vpop.permute.xlu2 %5715  ;;  %v10533_v5 = vld [vmem:[%s17836_s8 + $0x70] sm:$0xf0] }
 0x58e   : > { %7740 = vmatmul.bf16.gmra.mxu3 %v11476_v51  ;;  %v11229_v51 = vld [vmem:[%s17836_s8 + $0x5e8] sm:$0xf0] }
 0x58f   : > { %v8000_v31 = vadd.f32 %v15822_v53, %v7831_v40  ;;  %v12054_v53 = vld [vmem:[%s17836_s8 + $0x54] sm:$0xf] }
 0x590   : > { %v8163_v48 = vpop.f32.mrf.mxu2  ;;  %v15935_v62 = vpop.f32.mrf.mxu0  ;;  %v10536_v40 = vor.u32 %v12054_v53, %v10533_v5 }
 0x591   : > { %v15932_v54 = vpop.f32.mrf.mxu3  ;;  %v15937_v8 = vadd.f32 %v8163_v48, %v7995_v41  ;;  %v10500_v41 = vor.u32 %v12050_v6, %v10499_v39  ;;  %v11232_v48 = vor.u32 %v12229_v43, %v11229_v51  ;;  %v7833_v43 = vadd.f32 %v15522_v52, %v7664_v23  ;;  %v10531_v51 = vld [vmem:[%s17836_s8 + $0x50] sm:$0xf]  ;;  %v11355_v52 = vld [vmem:[%s17836_s8 + $0x6c8] sm:$0xf] }
 0x592   : > { %v15939_v45 = vpop.f32.mrf.mxu1 }
 0x593   : > { %17868 = vst [vmem:[#allocation30_spill] sm:$0xff] %v15937_v8  ;;  %v8002_v38 = vadd.f32 %v15838_v59, %v7833_v43  ;;  %v5721_v59 = vpop.permute.xlu0 %5720 }
 0x598   : > { %v8165_v16 = vpop.f32.mrf.mxu2  ;;  %v15973_v36 = vpop.f32.mrf.mxu0 }
 0x599   : > { %v15970_v35 = vpop.f32.mrf.mxu3  ;;  %v15976_v55 = vadd.f32 %v8165_v16, %v7997_v49  ;;  %v7667_v49 = vadd.f32 %v15571_v2, %v5716_v30  ;;  %v12265_v16 = vld [vmem:[%s17836_s8 + $0x6e4] sm:$0xf0] }
 0x59a   : > { %v15978_v8 = vpop.f32.mrf.mxu1  ;;  %v11356_v23 = vor.u32 %v12265_v16, %v11355_v52  ;;  %v12062_v16 = vld [vmem:[%s17836_s8 + $0x94] sm:$0xf] }
 0x59b   : > { %17869 = vst [vmem:[#allocation31_spill] sm:$0xff] %v15976_v55  ;;  %8430 = vmatmul.bf16.vlgmr.msra.gmra.mxu0 %v10504_v17  ;;  %v12058_v17 = vld [vmem:[%s17836_s8 + $0x6c] sm:$0xf0]  ;;  %v7836_v30 = vadd.f32 %v15560_v19, %v7667_v49  ;;  %v5540_v55 = vld [vmem:[%s17837_s9 + $0x198] sm:$0xff]  ;;  %v7669_v19 = vadd.f32 %v15606_v15, %v5721_v59  ;;  %v5726_v49 = vpop.permute.xlu1 %5725 }
 0x59c   : > { %5810 = vperm.xlu0 %12391, %v5540_v55   ;;  %v10563_v15 = vld [vmem:[%s17836_s8 + $0x90] sm:$0xf] }
 0x59d   : > { %8053 = vmatmul.bf16.gmra.mxu1 %v11324_v44  ;;  %8207 = vmatmul.bf16.gmra.mxu2 %v11232_v48  ;;  %v11261_v44 = vld [vmem:[%s17836_s8 + $0x628] sm:$0xf0]  ;;  %v8005_v43 = vadd.f32 %v15877_v33, %v7836_v30  ;;  %v7838_v55 = vadd.f32 %v15574_v18, %v7669_v19  ;;  %v10565_v33 = vld [vmem:[%s17836_s8 + $0xb0] sm:$0xf0]  ;;  %v11387_v18 = vld [vmem:[%s17836_s8 + $0x708] sm:$0xf] }
 0x59e   : > { %8261 = vmatmul.bf16.vlgmr.msra.gmra.mxu3 %v10500_v41  ;;  %v12237_v41 = vld [vmem:[%s17836_s8 + $0x60c] sm:$0xf] }
 0x5a0   : > { %v8168_v39 = vpop.f32.mrf.mxu2  ;;  %v15990_v6 = vpop.f32.mrf.mxu0 }
 0x5a1   : > { %v15987_v26 = vpop.f32.mrf.mxu3  ;;  %v15992_v61 = vadd.f32 %v8168_v39, %v8000_v31  ;;  %v10532_v31 = vor.u32 %v12058_v17, %v10531_v51  ;;  %v11264_v39 = vor.u32 %v12237_v41, %v11261_v44  ;;  %v12066_v41 = vld [vmem:[%s17836_s8 + $0xac] sm:$0xf0]  ;;  %v7672_v44 = vadd.f32 %v15620_v3, %v5726_v49 }
 0x5a2   : > { %v15994_v46 = vpop.f32.mrf.mxu1  ;;  %v10564_v59 = vor.u32 %v12066_v41, %v10563_v15 }
 0x5a3   : > { %17870 = vst [vmem:[#allocation32_spill] sm:$0xff] %v15992_v61 }
 0x5a8   : > { %v8170_v42 = vpop.f32.mrf.mxu2  ;;  %v16028_v2 = vpop.f32.mrf.mxu0 }
 0x5a9   : > { %v16025_v48 = vpop.f32.mrf.mxu3  ;;  %v16031_v60 = vadd.f32 %v8170_v42, %v8002_v38  ;;  %v12245_v38 = vld [vmem:[%s17836_s8 + $0x64c] sm:$0xf] }
 0x5aa   : > { %v16033_v61 = vpop.f32.mrf.mxu1  ;;  %v11293_v42 = vld [vmem:[%s17836_s8 + $0x668] sm:$0xf0] }
 0x5ab   : > { %17871 = vst [vmem:[#allocation33_spill] sm:$0xff] %v16031_v60  ;;  %8435 = vmatmul.bf16.gmra.mxu0 %v10536_v40  ;;  %v12273_v40 = vld [vmem:[%s17836_s8 + $0x724] sm:$0xf0]  ;;  %v11296_v19 = vor.u32 %v12245_v38, %v11293_v42  ;;  %v5541_v60 = vld [vmem:[%s17837_s9 + $0x1a0] sm:$0xff]  ;;  %v10595_v38 = vld [vmem:[%s17836_s8 + $0xd0] sm:$0xf] }
 0x5ac   : > { %5815 = vperm.xlu1 %12392, %v5541_v60   ;;  %v5539_v60 = vld [vmem:[%s17837_s9 + $0x190] sm:$0xff] }
 0x5ad   : > { %8058 = vmatmul.bf16.gmra.mxu1 %v11356_v23  ;;  %8212 = vmatmul.bf16.gmra.mxu2 %v11264_v39  ;;  %v10568_v23 = vor.u32 %v12062_v16, %v10565_v33  ;;  %v8007_v39 = vadd.f32 %v15890_v47, %v7838_v55  ;;  %v5731_v47 = vpop.permute.xlu2 %5730  ;;  %v12074_v42 = vld [vmem:[%s17836_s8 + $0xec] sm:$0xf0] }
 0x5ae   : > { %8266 = vmatmul.bf16.gmra.mxu3 %v10532_v31  ;;  %5805 = vperm.xlu2 %12393, %v5539_v60  }
 0x5b0   : > { %v8173_v5 = vpop.f32.mrf.mxu2  ;;  %v16042_v51 = vpop.f32.mrf.mxu0 }
 0x5b1   : > { %v16039_v53 = vpop.f32.mrf.mxu3  ;;  %v16044_v17 = vadd.f32 %v8173_v5, %v8005_v43  ;;  %v11388_v43 = vor.u32 %v12273_v40, %v11387_v18  ;;  %v7841_v5 = vadd.f32 %v15609_v14, %v7672_v44  ;;  %v7674_v14 = vadd.f32 %v15658_v20, %v5731_v47  ;;  %v5736_v44 = vpop.permute.xlu0 %5735  ;;  %v10597_v20 = vld [vmem:[%s17836_s8 + $0xf0] sm:$0xf0] }
 0x5b2   : > { %v16046_v52 = vpop.f32.mrf.mxu1 }
 0x5b3   : > { %17872 = vst [vmem:[#allocation34_spill] sm:$0xff] %v16044_v17  ;;  %v8010_v55 = vadd.f32 %v15926_v27, %v7841_v5  ;;  %v7843_v40 = vadd.f32 %v15623_v7, %v7674_v14  ;;  %v12070_v27 = vld [vmem:[%s17836_s8 + $0xd4] sm:$0xf]  ;;  %v11419_v7 = vld [vmem:[%s17836_s8 + $0x748] sm:$0xf] }
 0x5b5   : > { %v8012_v5 = vadd.f32 %v15939_v45, %v7843_v40  ;;  %v5543_v45 = vld [vmem:[%s17837_s9 + $0x1b0] sm:$0xff]  ;;  %v5741_v40 = vpop.permute.xlu1 %5740 }
 0x5b6   : > { %5825 = vperm.xlu0 %12391, %v5543_v45  }
 0x5b8   : > { %v8175_v30 = vpop.f32.mrf.mxu2  ;;  %v16077_v3 = vpop.f32.mrf.mxu0 }
 0x5b9   : > { %v16074_v31 = vpop.f32.mrf.mxu3  ;;  %v16080_v49 = vadd.f32 %v8175_v30, %v8007_v39  ;;  %v12281_v39 = vld [vmem:[%s17836_s8 + $0x764] sm:$0xf0]  ;;  %v12253_v30 = vld [vmem:[%s17836_s8 + $0x68c] sm:$0xf] }
 0x5ba   : > { %v16082_v17 = vpop.f32.mrf.mxu1  ;;  %v11420_v14 = vor.u32 %v12281_v39, %v11419_v7  ;;  %v5542_v39 = vld [vmem:[%s17837_s9 + $0x1a8] sm:$0xff] }
 0x5bb   : > { %17873 = vst [vmem:[#allocation35_spill] sm:$0xff] %v16080_v49  ;;  %8440 = vmatmul.bf16.gmra.mxu0 %v10568_v23  ;;  %v7677_v23 = vadd.f32 %v15675_v12, %v5736_v44  ;;  %v5544_v49 = vld [vmem:[%s17837_s9 + $0x1b8] sm:$0xff]  ;;  %5820 = vperm.xlu2 %12393, %v5542_v39  }
 0x5bc   : > { %5830 = vperm.xlu1 %12392, %v5544_v49  }
 0x5bd   : > { %8063 = vmatmul.bf16.gmra.mxu1 %v11388_v43  ;;  %8217 = vmatmul.bf16.gmra.mxu2 %v11296_v19  ;;  %v10600_v19 = vor.u32 %v12070_v27, %v10597_v20  ;;  %v7846_v44 = vadd.f32 %v15661_v58, %v7677_v23  ;;  %v7679_v20 = vadd.f32 %v15713_v1, %v5741_v40  ;;  %v5746_v23 = vpop.permute.xlu2 %5745  ;;  %v10629_v1 = vld [vmem:[%s17836_s8 + $0x130] sm:$0xf0] }
 0x5be   : > { %8271 = vmatmul.bf16.gmra.mxu3 %v10564_v59  ;;  %v11325_v59 = vld [vmem:[%s17836_s8 + $0x6a8] sm:$0xf0] }
 0x5bf   : > { %v8015_v58 = vadd.f32 %v15978_v8, %v7846_v44  ;;  %v12078_v8 = vld [vmem:[%s17836_s8 + $0x114] sm:$0xf] }
 0x5c0   : > { %v8178_v33 = vpop.f32.mrf.mxu2  ;;  %v16091_v15 = vpop.f32.mrf.mxu0  ;;  %v10632_v44 = vor.u32 %v12078_v8, %v10629_v1 }
 0x5c1   : > { %v16088_v16 = vpop.f32.mrf.mxu3  ;;  %v16093_v41 = vadd.f32 %v8178_v33, %v8010_v55  ;;  %v10596_v55 = vor.u32 %v12074_v42, %v10595_v38  ;;  %v11328_v33 = vor.u32 %v12253_v30, %v11325_v59  ;;  %v7848_v30 = vadd.f32 %v15678_v0, %v7679_v20  ;;  %v10627_v59 = vld [vmem:[%s17836_s8 + $0x110] sm:$0xf]  ;;  %v11451_v0 = vld [vmem:[%s17836_s8 + $0x788] sm:$0xf] }
 0x5c2   : > { %v16095_v18 = vpop.f32.mrf.mxu1 }
 0x5c3   : > { %17874 = vst [vmem:[#allocation36_spill] sm:$0xff] %v16093_v41  ;;  %v8017_v45 = vadd.f32 %v15994_v46, %v7848_v30  ;;  %v5751_v46 = vpop.permute.xlu0 %5750 }
 0x5c8   : > { %v8180_v47 = vpop.f32.mrf.mxu2  ;;  %v16129_v12 = vpop.f32.mrf.mxu0 }
 0x5c9   : > { %v16126_v43 = vpop.f32.mrf.mxu3  ;;  %v16132_v60 = vadd.f32 %v8180_v47, %v8012_v5  ;;  %v7682_v5 = vadd.f32 %v15727_v63, %v5746_v23  ;;  %v12289_v47 = vld [vmem:[%s17836_s8 + $0x7a4] sm:$0xf0] }
 0x5ca   : > { %v16134_v41 = vpop.f32.mrf.mxu1  ;;  %v11452_v20 = vor.u32 %v12289_v47, %v11451_v0  ;;  %v12086_v47 = vld [vmem:[%s17836_s8 + $0x154] sm:$0xf] }
 0x5cb   : > { %17875 = vst [vmem:[#allocation37_spill] sm:$0xff] %v16132_v60  ;;  %8445 = vmatmul.bf16.gmra.mxu0 %v10600_v19  ;;  %v12082_v19 = vld [vmem:[%s17836_s8 + $0x12c] sm:$0xf0]  ;;  %v7851_v23 = vadd.f32 %v15716_v10, %v7682_v5  ;;  %v5546_v60 = vld [vmem:[%s17837_s9 + $0x1c8] sm:$0xff]  ;;  %v7684_v10 = vadd.f32 %v15762_v22, %v5751_v46  ;;  %v5756_v5 = vpop.permute.xlu1 %5755 }
 0x5cc   : > { %5840 = vperm.xlu0 %12391, %v5546_v60   ;;  %v10659_v22 = vld [vmem:[%s17836_s8 + $0x150] sm:$0xf] }
 0x5cd   : > { %8068 = vmatmul.bf16.gmra.mxu1 %v11420_v14  ;;  %8222 = vmatmul.bf16.gmra.mxu2 %v11328_v33  ;;  %v11357_v14 = vld [vmem:[%s17836_s8 + $0x6e8] sm:$0xf0]  ;;  %v8020_v30 = vadd.f32 %v16033_v61, %v7851_v23  ;;  %v7853_v60 = vadd.f32 %v15730_v9, %v7684_v10  ;;  %v10661_v61 = vld [vmem:[%s17836_s8 + $0x170] sm:$0xf0]  ;;  %v11483_v9 = vld [vmem:[%s17836_s8 + $0x7c8] sm:$0xf] }
 0x5ce   : > { %8276 = vmatmul.bf16.gmra.mxu3 %v10596_v55  ;;  %v12261_v55 = vld [vmem:[%s17836_s8 + $0x6cc] sm:$0xf] }
 0x5d0   : > { %v8183_v38 = vpop.f32.mrf.mxu2  ;;  %v16146_v42 = vpop.f32.mrf.mxu0 }
 0x5d1   : > { %v16143_v27 = vpop.f32.mrf.mxu3  ;;  %v16148_v7 = vadd.f32 %v8183_v38, %v8015_v58  ;;  %v10628_v58 = vor.u32 %v12082_v19, %v10627_v59  ;;  %v11360_v38 = vor.u32 %v12261_v55, %v11357_v14  ;;  %v12090_v55 = vld [vmem:[%s17836_s8 + $0x16c] sm:$0xf0]  ;;  %v7687_v14 = vadd.f32 %v15776_v32, %v5756_v5 }
 0x5d2   : > { %v16150_v49 = vpop.f32.mrf.mxu1  ;;  %v10660_v46 = vor.u32 %v12090_v55, %v10659_v22 }
 0x5d3   : > { %17876 = vst [vmem:[#allocation38_spill] sm:$0xff] %v16148_v7 }
 0x5d8   : > { %v8185_v40 = vpop.f32.mrf.mxu2  ;;  %v16184_v63 = vpop.f32.mrf.mxu0 }
 0x5d9   : > { %v16181_v33 = vpop.f32.mrf.mxu3  ;;  %v16187_v39 = vadd.f32 %v8185_v40, %v8017_v45  ;;  %v12269_v45 = vld [vmem:[%s17836_s8 + $0x70c] sm:$0xf] }
 0x5da   : > { %v16189_v7 = vpop.f32.mrf.mxu1  ;;  %v11389_v40 = vld [vmem:[%s17836_s8 + $0x728] sm:$0xf0] }
 0x5db   : > { %17877 = vst [vmem:[#allocation39_spill] sm:$0xff] %v16187_v39  ;;  %8450 = vmatmul.bf16.gmra.mxu0 %v10632_v44  ;;  %v12297_v44 = vld [vmem:[%s17836_s8 + $0x7e4] sm:$0xf0]  ;;  %v11392_v10 = vor.u32 %v12269_v45, %v11389_v40  ;;  %v5547_v39 = vld [vmem:[%s17837_s9 + $0x1d0] sm:$0xff] }
 0x5dc   : > { %5845 = vperm.xlu1 %12392, %v5547_v39   ;;  %v5545_v39 = vld [vmem:[%s17837_s9 + $0x1c0] sm:$0xff]  ;;  %v10691_v45 = vld [vmem:[%s17836_s8 + $0x190] sm:$0xf] }
 0x5dd   : > { %8073 = vmatmul.bf16.gmra.mxu1 %v11452_v20  ;;  %8227 = vmatmul.bf16.gmra.mxu2 %v11360_v38  ;;  %v10664_v20 = vor.u32 %v12086_v47, %v10661_v61  ;;  %v8022_v38 = vadd.f32 %v16046_v52, %v7853_v60  ;;  %v5761_v52 = vpop.permute.xlu2 %5760  ;;  %v12098_v40 = vld [vmem:[%s17836_s8 + $0x1ac] sm:$0xf0] }
 0x5de   : > { %8281 = vmatmul.bf16.gmra.mxu3 %v10628_v58  ;;  %5835 = vperm.xlu2 %12393, %v5545_v39  }
 0x5e0   : > { %v8188_v1 = vpop.f32.mrf.mxu2  ;;  %v16198_v59 = vpop.f32.mrf.mxu0 }
 0x5e1   : > { %v16195_v8 = vpop.f32.mrf.mxu3  ;;  %v16200_v19 = vadd.f32 %v8188_v1, %v8020_v30  ;;  %v11484_v30 = vor.u32 %v12297_v44, %v11483_v9  ;;  %v7856_v1 = vadd.f32 %v15765_v34, %v7687_v14  ;;  %v7689_v34 = vadd.f32 %v15814_v37, %v5761_v52  ;;  %v5766_v14 = vpop.permute.xlu0 %5765  ;;  %v10693_v37 = vld [vmem:[%s17836_s8 + $0x1b0] sm:$0xf0] }
 0x5e2   : > { %v16202_v0 = vpop.f32.mrf.mxu1 }
 0x5e3   : > { %17878 = vst [vmem:[#allocation40_spill] sm:$0xff] %v16200_v19  ;;  %v8025_v60 = vadd.f32 %v16082_v17, %v7856_v1  ;;  %v7858_v44 = vadd.f32 %v15779_v11, %v7689_v34  ;;  %v12094_v17 = vld [vmem:[%s17836_s8 + $0x194] sm:$0xf]  ;;  %v12277_v11 = vld [vmem:[%s17836_s8 + $0x74c] sm:$0xf] }
 0x5e5   : > { %v8027_v1 = vadd.f32 %v16095_v18, %v7858_v44  ;;  %v5549_v18 = vld [vmem:[%s17837_s9 + $0x1e0] sm:$0xff]  ;;  %v5771_v44 = vpop.permute.xlu1 %5770 }
 0x5e6   : > { %5855 = vperm.xlu0 %12391, %v5549_v18  }
 0x5e8   : > { %v8190_v23 = vpop.f32.mrf.mxu2  ;;  %v16233_v32 = vpop.f32.mrf.mxu0 }
 0x5e9   : > { %v16230_v58 = vpop.f32.mrf.mxu3  ;;  %v16236_v5 = vadd.f32 %v8190_v23, %v8022_v38  ;;  %v11421_v38 = vld [vmem:[%s17836_s8 + $0x768] sm:$0xf0]  ;;  %v10507_v23 = vld [vmem:[%s17836_s8 + $0x18] sm:$0xf] }
 0x5ea   : > { %v16238_v19 = vpop.f32.mrf.mxu1  ;;  %v11424_v34 = vor.u32 %v12277_v11, %v11421_v38  ;;  %v5548_v38 = vld [vmem:[%s17837_s9 + $0x1d8] sm:$0xff] }
 0x5eb   : > { %17879 = vst [vmem:[#allocation41_spill] sm:$0xff] %v16236_v5  ;;  %8455 = vmatmul.bf16.gmra.mxu0 %v10664_v20  ;;  %v7692_v20 = vadd.f32 %v15831_v50, %v5766_v14  ;;  %v5550_v5 = vld [vmem:[%s17837_s9 + $0x1e8] sm:$0xff]  ;;  %5850 = vperm.xlu2 %12393, %v5548_v38  }
 0x5ec   : > { %5860 = vperm.xlu1 %12392, %v5550_v5  }
 0x5ed   : > { %8078 = vmatmul.bf16.gmra.mxu1 %v11484_v30  ;;  %8232 = vmatmul.bf16.gmra.mxu2 %v11392_v10  ;;  %v10696_v10 = vor.u32 %v12094_v17, %v10693_v37  ;;  %v7861_v14 = vadd.f32 %v15817_v57, %v7692_v20  ;;  %v7694_v37 = vadd.f32 %v15869_v24, %v5771_v44  ;;  %v5776_v20 = vpop.permute.xlu2 %5775  ;;  %v10725_v24 = vld [vmem:[%s17836_s8 + $0x1f0] sm:$0xf0] }
 0x5ee   : > { %8286 = vmatmul.bf16.gmra.mxu3 %v10660_v46  ;;  %v12051_v46 = vld [vmem:[%s17836_s8 + $0x34] sm:$0xf0] }
 0x5ef   : > { %v8030_v57 = vadd.f32 %v16134_v41, %v7861_v14  ;;  %v12102_v41 = vld [vmem:[%s17836_s8 + $0x1d4] sm:$0xf] }
 0x5f0   : > { %v8193_v61 = vpop.f32.mrf.mxu2  ;;  %v16247_v22 = vpop.f32.mrf.mxu0  ;;  %v10728_v14 = vor.u32 %v12102_v41, %v10725_v24 }
 0x5f1   : > { %v16244_v47 = vpop.f32.mrf.mxu3  ;;  %v16249_v55 = vadd.f32 %v8193_v61, %v8025_v60  ;;  %v10692_v60 = vor.u32 %v12098_v40, %v10691_v45  ;;  %v10508_v61 = vor.u32 %v12051_v46, %v10507_v23  ;;  %v7863_v23 = vadd.f32 %v15834_v28, %v7694_v37  ;;  %v10723_v46 = vld [vmem:[%s17836_s8 + $0x1d0] sm:$0xf]  ;;  %v12285_v28 = vld [vmem:[%s17836_s8 + $0x78c] sm:$0xf] }
 0x5f2   : > { %v16251_v9 = vpop.f32.mrf.mxu1 }
 0x5f3   : > { %17880 = vst [vmem:[#allocation42_spill] sm:$0xff] %v16249_v55  ;;  %v8032_v18 = vadd.f32 %v16150_v49, %v7863_v23  ;;  %v5781_v49 = vpop.permute.xlu0 %5780 }
 0x5f8   : > { %v8195_v52 = vpop.f32.mrf.mxu2  ;;  %v16285_v50 = vpop.f32.mrf.mxu0 }
 0x5f9   : > { %v16282_v30 = vpop.f32.mrf.mxu3  ;;  %v16288_v39 = vadd.f32 %v8195_v52, %v8027_v1  ;;  %v7697_v1 = vadd.f32 %v15883_v29, %v5776_v20  ;;  %v11453_v52 = vld [vmem:[%s17836_s8 + $0x7a8] sm:$0xf0] }
 0x5fa   : > { %v16290_v55 = vpop.f32.mrf.mxu1  ;;  %v11456_v37 = vor.u32 %v12285_v28, %v11453_v52  ;;  %v12110_v52 = vld [vmem:[%s17836_s8 + $0x214] sm:$0xf] }
 0x5fb   : > { %17881 = vst [vmem:[#allocation43_spill] sm:$0xff] %v16288_v39  ;;  %8460 = vmatmul.bf16.gmra.mxu0 %v10696_v10  ;;  %v12106_v10 = vld [vmem:[%s17836_s8 + $0x1ec] sm:$0xf0]  ;;  %v7866_v20 = vadd.f32 %v15872_v25, %v7697_v1  ;;  %v5552_v39 = vld [vmem:[%s17837_s9 + $0x1f8] sm:$0xff]  ;;  %v7699_v25 = vadd.f32 %v15918_v4, %v5781_v49  ;;  %v5786_v1 = vpop.permute.xlu1 %5785 }
 0x5fc   : > { %5870 = vperm.xlu0 %12391, %v5552_v39   ;;  %v10755_v4 = vld [vmem:[%s17836_s8 + $0x210] sm:$0xf] }
 0x5fd   : > { %8237 = vmatmul.bf16.gmra.mxu2 %v11424_v34  ;;  %8599 = vmatmul.bf16.vlgmr.msra.gmra.mxu1 %v10508_v61  ;;  %v12059_v34 = vld [vmem:[%s17836_s8 + $0x74] sm:$0xf0]  ;;  %v8035_v23 = vadd.f32 %v16189_v7, %v7866_v20  ;;  %v7868_v39 = vadd.f32 %v15886_v13, %v7699_v25  ;;  %v10757_v7 = vld [vmem:[%s17836_s8 + $0x230] sm:$0xf0]  ;;  %v12293_v13 = vld [vmem:[%s17836_s8 + $0x7cc] sm:$0xf] }
 0x5fe   : > { %8291 = vmatmul.bf16.gmra.mxu3 %v10692_v60  ;;  %v10539_v60 = vld [vmem:[%s17836_s8 + $0x58] sm:$0xf] }
 0x600   : > { %v8198_v45 = vpop.f32.mrf.mxu2  ;;  %v16302_v40 = vpop.f32.mrf.mxu0 }
 0x601   : > { %v16299_v17 = vpop.f32.mrf.mxu3  ;;  %v16304_v11 = vadd.f32 %v8198_v45, %v8030_v57  ;;  %v10724_v57 = vor.u32 %v12106_v10, %v10723_v46  ;;  %v10540_v45 = vor.u32 %v12059_v34, %v10539_v60  ;;  %v12114_v60 = vld [vmem:[%s17836_s8 + $0x22c] sm:$0xf0]  ;;  %v7702_v34 = vadd.f32 %v15932_v54, %v5786_v1 }
 0x602   : > { %v16306_v5 = vpop.f32.mrf.mxu1  ;;  %v10756_v49 = vor.u32 %v12114_v60, %v10755_v4 }
 0x603   : > { %17882 = vst [vmem:[#allocation44_spill] sm:$0xff] %v16304_v11 }
 0x608   : > { %v8200_v44 = vpop.f32.mrf.mxu2  ;;  %v16340_v29 = vpop.f32.mrf.mxu0 }
 0x609   : > { %v16337_v61 = vpop.f32.mrf.mxu3  ;;  %v16343_v38 = vadd.f32 %v8200_v44, %v8032_v18  ;;  %v10571_v18 = vld [vmem:[%s17836_s8 + $0x98] sm:$0xf] }
 0x60a   : > { %v16345_v11 = vpop.f32.mrf.mxu1  ;;  %v12067_v44 = vld [vmem:[%s17836_s8 + $0xb4] sm:$0xf0] }
 0x60b   : > { %17883 = vst [vmem:[#allocation45_spill] sm:$0xff] %v16343_v38  ;;  %8465 = vmatmul.bf16.gmra.mxu0 %v10728_v14  ;;  %v11485_v14 = vld [vmem:[%s17836_s8 + $0x7e8] sm:$0xf0]  ;;  %v10572_v25 = vor.u32 %v12067_v44, %v10571_v18  ;;  %v5791_v38 = vpop.permute.xlu2 %5790  ;;  %v5551_v18 = vld [vmem:[%s17837_s9 + $0x1f0] sm:$0xff] }
 0x60c   : > { %5865 = vperm.xlu2 %12393, %v5551_v18   ;;  %v12122_v44 = vld [vmem:[%s17836_s8 + $0x26c] sm:$0xf0] }
 0x60d   : > { %8242 = vmatmul.bf16.gmra.mxu2 %v11456_v37  ;;  %8604 = vmatmul.bf16.gmra.mxu1 %v10540_v45  ;;  %v10760_v37 = vor.u32 %v12110_v52, %v10757_v7  ;;  %v8037_v45 = vadd.f32 %v16202_v0, %v7868_v39  ;;  %v7704_v0 = vadd.f32 %v15970_v35, %v5791_v38  ;;  %v10789_v35 = vld [vmem:[%s17836_s8 + $0x270] sm:$0xf0]  ;;  %v10787_v38 = vld [vmem:[%s17836_s8 + $0x250] sm:$0xf] }
 0x60e   : > { %8296 = vmatmul.bf16.gmra.mxu3 %v10724_v57 }
 0x610   : > { %v8203_v24 = vpop.f32.mrf.mxu2  ;;  %v16354_v46 = vpop.f32.mrf.mxu0 }
 0x611   : > { %v16351_v41 = vpop.f32.mrf.mxu3  ;;  %v16356_v10 = vadd.f32 %v8203_v24, %v8035_v23  ;;  %v11488_v23 = vor.u32 %v12293_v13, %v11485_v14  ;;  %v7871_v24 = vadd.f32 %v15921_v56, %v7702_v34  ;;  %v5796_v14 = vpop.permute.xlu0 %5795 }
 0x612   : > { %v16358_v28 = vpop.f32.mrf.mxu1 }
 0x613   : > { %17884 = vst [vmem:[#allocation46_spill] sm:$0xff] %v16356_v10  ;;  %v8040_v52 = vadd.f32 %v16238_v19, %v7871_v24  ;;  %v7873_v19 = vadd.f32 %v15935_v62, %v7704_v0  ;;  %v10603_v62 = vld [vmem:[%s17836_s8 + $0xd8] sm:$0xf]  ;;  %v17887_v24 = vld [vmem:[#allocation3_spill] sm:$0xff] }
 0x618   : > { %v8205_v20 = vpop.f32.mrf.mxu2  ;;  %v8431_v54 = vpop.f32.mrf.mxu0 }
 0x619   : > { %v16386_v57 = vpop.f32.mrf.mxu3  ;;  %v16390_v1 = vadd.f32 %v8205_v20, %v8037_v45  ;;  %v12075_v45 = vld [vmem:[%s17836_s8 + $0xf4] sm:$0xf0]  ;;  %v12047_v20 = vld [vmem:[%s17836_s8 + $0x1c] sm:$0xf] }
 0x61a   : > { %v16392_v10 = vpop.f32.mrf.mxu1 }
 0x61b   : > { %17885 = vst [vmem:[#allocation47_spill] sm:$0xff] %v16390_v1  ;;  %8470 = vmatmul.bf16.gmra.mxu0 %v10760_v37  ;;  %v7707_v37 = vadd.f32 %v15987_v26, %v5796_v14  ;;  %v10788_v26 = vor.u32 %v12122_v44, %v10787_v38  ;;  %v17888_v38 = vld [vmem:[#allocation4_spill] sm:$0xff] }
 0x61d   : > { %8247 = vmatmul.bf16.gmra.mxu2 %v11488_v23  ;;  %8609 = vmatmul.bf16.gmra.mxu1 %v10572_v25  ;;  %v8042_v25 = vadd.f32 %v16251_v9, %v7873_v19  ;;  %v7876_v14 = vadd.f32 %v15973_v36, %v7707_v37 }
 0x61e   : > { %8301 = vmatmul.bf16.gmra.mxu3 %v10756_v49  ;;  %v10509_v49 = vld [vmem:[%s17836_s8 + $0x38] sm:$0xf0] }
 0x61f   : > { %v8045_v9 = vadd.f32 %v16290_v55, %v7876_v14  ;;  %v12126_v55 = vld [vmem:[%s17836_s8 + $0x294] sm:$0xf] }
 0x620   : > { %v8208_v4 = vpop.f32.mrf.mxu2  ;;  %v8433_v60 = vpop.f32.mrf.mxu0 }
 0x621   : > { %v8262_v7 = vpop.f32.mrf.mxu3  ;;  %v16397_v13 = vadd.f32 %v8208_v4, %v8040_v52  ;;  %v10512_v4 = vor.u32 %v12047_v20, %v10509_v49  ;;  %v5806_v20 = vpop.permute.xlu2 %5805 }
 0x622   : > { %v8263_v39 = vadd.f32 %v8262_v7, %v15212_v21  ;;  %v16401_v34 = vpop.f32.mrf.mxu1  ;;  %v12118_v21 = vld [vmem:[%s17836_s8 + $0x254] sm:$0xf] }
 0x623   : > { %17886 = vst [vmem:[#allocation48_spill] sm:$0xff] %v16397_v13  ;;  %v10792_v23 = vor.u32 %v12118_v21, %v10789_v35  ;;  %v5801_v21 = vpop.permute.xlu1 %5800 }
 0x624   : > { %v16399_v56 = vadd.f32 %v8431_v54, %v8263_v39  ;;  %v10604_v39 = vor.u32 %v12075_v45, %v10603_v62  ;;  %v7709_v35 = vadd.f32 %v16025_v48, %v5801_v21  ;;  %v10821_v48 = vld [vmem:[%s17836_s8 + $0x2b0] sm:$0xf0] }
 0x626   : > { %v7878_v49 = vadd.f32 %v15990_v6, %v7709_v35  ;;  %v10635_v6 = vld [vmem:[%s17836_s8 + $0x118] sm:$0xf] }
 0x628   : > { %v8210_v7 = vpop.f32.mrf.mxu2  ;;  %v8436_v0 = vpop.f32.mrf.mxu0 }
 0x629   : > { %v8264_v54 = vpop.f32.mrf.mxu3  ;;  %v16435_v18 = vadd.f32 %v8210_v7, %v8042_v25  ;;  %v7712_v25 = vadd.f32 %v16039_v53, %v5806_v20  ;;  %v10541_v7 = vld [vmem:[%s17836_s8 + $0x78] sm:$0xf0] }
 0x62a   : > { %v8265_v52 = vadd.f32 %v8264_v54, %v17887_v24  ;;  %v16439_v1 = vpop.f32.mrf.mxu1  ;;  %v10819_v54 = vld [vmem:[%s17836_s8 + $0x290] sm:$0xf]  ;;  %v12083_v24 = vld [vmem:[%s17836_s8 + $0x134] sm:$0xf0] }
 0x62b   : > { %8475 = vmatmul.bf16.gmra.mxu0 %v10792_v23  ;;  %v12130_v23 = vld [vmem:[%s17836_s8 + $0x2ac] sm:$0xf0] }
 0x62c   : > { %v16437_v13 = vadd.f32 %v8433_v60, %v8265_v52  ;;  %v12055_v52 = vld [vmem:[%s17836_s8 + $0x5c] sm:$0xf]  ;;  %v10820_v53 = vor.u32 %v12130_v23, %v10819_v54 }
 0x62d   : > { %8614 = vmatmul.bf16.gmra.mxu1 %v10604_v39  ;;  %11745 = vmatmul.msk.bf16.vlgmr.msra.gmra.mxu2 %vm2383_vm0, %v10512_v4  ;;  %v8047_v39 = vadd.f32 %v16306_v5, %v7878_v49  ;;  %v17889_v4 = vld [vmem:[#allocation5_spill] sm:$0xff]  ;;  %v10544_v35 = vor.u32 %v12055_v52, %v10541_v7  ;;  %v17890_v54 = vld [vmem:[#allocation6_spill] sm:$0xff]  ;;  %v5816_v52 = vpop.permute.xlu1 %5815 }
 0x62e   : > { %8306 = vmatmul.bf16.gmra.mxu3 %v10788_v26 }
 0x630   : > { %v8213_v36 = vpop.f32.mrf.mxu2  ;;  %v8438_v62 = vpop.f32.mrf.mxu0 }
 0x631   : > { %v8267_v19 = vpop.f32.mrf.mxu3  ;;  %v16445_v37 = vadd.f32 %v8213_v36, %v8045_v9 }
 0x632   : > { %v8268_v44 = vadd.f32 %v8267_v19, %v17888_v38  ;;  %v16449_v45 = vpop.f32.mrf.mxu1  ;;  %v10636_v19 = vor.u32 %v12083_v24, %v10635_v6  ;;  %v7881_v38 = vadd.f32 %v16028_v2, %v7712_v25 }
 0x634   : > { %v16447_v60 = vadd.f32 %v8436_v0, %v8268_v44  ;;  %v10824_v0 = vor.u32 %v12126_v55, %v10821_v48  ;;  %v5811_v55 = vpop.permute.xlu0 %5810  ;;  %v8050_v5 = vadd.f32 %v16345_v11, %v7881_v38  ;;  %v12134_v11 = vld [vmem:[%s17836_s8 + $0x2d4] sm:$0xf] }
 0x635   : > { %v7714_v48 = vadd.f32 %v16074_v31, %v5811_v55  ;;  %v10853_v31 = vld [vmem:[%s17836_s8 + $0x2f0] sm:$0xf0] }
 0x637   : > { %v7883_v7 = vadd.f32 %v16042_v51, %v7714_v48  ;;  %v10667_v51 = vld [vmem:[%s17836_s8 + $0x158] sm:$0xf] }
 0x638   : > { %v8215_v21 = vpop.f32.mrf.mxu2  ;;  %v8441_v9 = vpop.f32.mrf.mxu0 }
 0x639   : > { %v8269_v26 = vpop.f32.mrf.mxu3  ;;  %v16480_v44 = vadd.f32 %v8215_v21, %v8047_v39  ;;  %v7717_v39 = vadd.f32 %v16088_v16, %v5816_v52  ;;  %v10573_v21 = vld [vmem:[%s17836_s8 + $0xb8] sm:$0xf0] }
 0x63a   : > { %v8270_v14 = vadd.f32 %v8269_v26, %v17889_v4  ;;  %v16484_v20 = vpop.f32.mrf.mxu1  ;;  %v10851_v26 = vld [vmem:[%s17836_s8 + $0x2d0] sm:$0xf]  ;;  %v12091_v4 = vld [vmem:[%s17836_s8 + $0x174] sm:$0xf0] }
 0x63b   : > { %8480 = vmatmul.bf16.gmra.mxu0 %v10824_v0  ;;  %v12138_v0 = vld [vmem:[%s17836_s8 + $0x2ec] sm:$0xf0] }
 0x63c   : > { %v16482_v36 = vadd.f32 %v8438_v62, %v8270_v14  ;;  %v12063_v14 = vld [vmem:[%s17836_s8 + $0x9c] sm:$0xf]  ;;  %v10852_v16 = vor.u32 %v12138_v0, %v10851_v26  ;;  %v17892_v26 = vld [vmem:[#allocation8_spill] sm:$0xff] }
 0x63d   : > { %8619 = vmatmul.bf16.gmra.mxu1 %v10636_v19  ;;  %11746 = vmatmul.msk.bf16.gmra.mxu2 %vm2383_vm0, %v10544_v35  ;;  %v8052_v19 = vadd.f32 %v16358_v28, %v7883_v7  ;;  %v17891_v35 = vld [vmem:[#allocation7_spill] sm:$0xff]  ;;  %v10576_v48 = vor.u32 %v12063_v14, %v10573_v21  ;;  %v5826_v14 = vpop.permute.xlu0 %5825 }
 0x63e   : > { %8311 = vmatmul.bf16.gmra.mxu3 %v10820_v53 }
 0x640   : > { %v8218_v2 = vpop.f32.mrf.mxu2  ;;  %v8443_v6 = vpop.f32.mrf.mxu0 }
 0x641   : > { %v8272_v49 = vpop.f32.mrf.mxu3  ;;  %v16490_v25 = vadd.f32 %v8218_v2, %v8050_v5 }
 0x642   : > { %v8273_v23 = vadd.f32 %v8272_v49, %v17890_v54  ;;  %v16494_v24 = vpop.f32.mrf.mxu1  ;;  %v10668_v49 = vor.u32 %v12091_v4, %v10667_v51  ;;  %v7886_v54 = vadd.f32 %v16077_v3, %v7717_v39 }
 0x644   : > { %v16492_v62 = vadd.f32 %v8441_v9, %v8273_v23  ;;  %v10856_v9 = vor.u32 %v12134_v11, %v10853_v31  ;;  %v5821_v11 = vpop.permute.xlu2 %5820  ;;  %v8055_v28 = vadd.f32 %v16392_v10, %v7886_v54  ;;  %v12142_v10 = vld [vmem:[%s17836_s8 + $0x314] sm:$0xf] }
 0x645   : > { %v7719_v31 = vadd.f32 %v16126_v43, %v5821_v11  ;;  %v10885_v43 = vld [vmem:[%s17836_s8 + $0x330] sm:$0xf0] }
 0x647   : > { %v7888_v21 = vadd.f32 %v16091_v15, %v7719_v31  ;;  %v10699_v15 = vld [vmem:[%s17836_s8 + $0x198] sm:$0xf] }
 0x648   : > { %v8220_v55 = vpop.f32.mrf.mxu2  ;;  %v8446_v5 = vpop.f32.mrf.mxu0 }
 0x649   : > { %v8274_v53 = vpop.f32.mrf.mxu3  ;;  %v16525_v23 = vadd.f32 %v8220_v55, %v8052_v19  ;;  %v7722_v19 = vadd.f32 %v16143_v27, %v5826_v14  ;;  %v10605_v55 = vld [vmem:[%s17836_s8 + $0xf8] sm:$0xf0] }
 0x64a   : > { %v8275_v38 = vadd.f32 %v8274_v53, %v17891_v35  ;;  %v16529_v52 = vpop.f32.mrf.mxu1  ;;  %v10883_v53 = vld [vmem:[%s17836_s8 + $0x310] sm:$0xf]  ;;  %v12099_v35 = vld [vmem:[%s17836_s8 + $0x1b4] sm:$0xf0] }
 0x64b   : > { %8485 = vmatmul.bf16.gmra.mxu0 %v10856_v9  ;;  %v12146_v9 = vld [vmem:[%s17836_s8 + $0x32c] sm:$0xf0] }
 0x64c   : > { %v16527_v2 = vadd.f32 %v8443_v6, %v8275_v38  ;;  %v12071_v38 = vld [vmem:[%s17836_s8 + $0xdc] sm:$0xf]  ;;  %v10884_v27 = vor.u32 %v12146_v9, %v10883_v53 }
 0x64d   : > { %8624 = vmatmul.bf16.gmra.mxu1 %v10668_v49  ;;  %11747 = vmatmul.msk.bf16.gmra.mxu2 %vm2383_vm0, %v10576_v48  ;;  %v8057_v49 = vadd.f32 %v16401_v34, %v7888_v21  ;;  %v17893_v48 = vld [vmem:[#allocation9_spill] sm:$0xff]  ;;  %v10608_v31 = vor.u32 %v12071_v38, %v10605_v55  ;;  %v17894_v53 = vld [vmem:[#allocation10_spill] sm:$0xff]  ;;  %v5836_v38 = vpop.permute.xlu2 %5835 }
 0x64e   : > { %8316 = vmatmul.bf16.gmra.mxu3 %v10852_v16 }
 0x650   : > { %v8223_v3 = vpop.f32.mrf.mxu2  ;;  %v8448_v51 = vpop.f32.mrf.mxu0 }
 0x651   : > { %v8277_v7 = vpop.f32.mrf.mxu3  ;;  %v16535_v39 = vadd.f32 %v8223_v3, %v8055_v28 }
 0x652   : > { %v8278_v0 = vadd.f32 %v8277_v7, %v17892_v26  ;;  %v16539_v4 = vpop.f32.mrf.mxu1  ;;  %v10700_v7 = vor.u32 %v12099_v35, %v10699_v15  ;;  %v7891_v26 = vadd.f32 %v16129_v12, %v7722_v19 }
 0x654   : > { %v16537_v6 = vadd.f32 %v8446_v5, %v8278_v0  ;;  %v10888_v5 = vor.u32 %v12142_v10, %v10885_v43  ;;  %v5831_v10 = vpop.permute.xlu1 %5830  ;;  %v8060_v34 = vadd.f32 %v16439_v1, %v7891_v26  ;;  %v12150_v1 = vld [vmem:[%s17836_s8 + $0x354] sm:$0xf] }
 0x655   : > { %v7724_v43 = vadd.f32 %v16181_v33, %v5831_v10  ;;  %v10917_v33 = vld [vmem:[%s17836_s8 + $0x370] sm:$0xf0] }
 0x657   : > { %v7893_v55 = vadd.f32 %v16146_v42, %v7724_v43  ;;  %v10731_v42 = vld [vmem:[%s17836_s8 + $0x1d8] sm:$0xf] }
 0x658   : > { %v8225_v11 = vpop.f32.mrf.mxu2  ;;  %v8451_v28 = vpop.f32.mrf.mxu0 }
 0x659   : > { %v8279_v16 = vpop.f32.mrf.mxu3  ;;  %v16570_v0 = vadd.f32 %v8225_v11, %v8057_v49  ;;  %v7727_v49 = vadd.f32 %v16195_v8, %v5836_v38  ;;  %v10637_v11 = vld [vmem:[%s17836_s8 + $0x138] sm:$0xf0] }
 0x65a   : > { %v8280_v54 = vadd.f32 %v8279_v16, %v17893_v48  ;;  %v16574_v14 = vpop.f32.mrf.mxu1  ;;  %v10915_v16 = vld [vmem:[%s17836_s8 + $0x350] sm:$0xf]  ;;  %v12107_v48 = vld [vmem:[%s17836_s8 + $0x1f4] sm:$0xf0] }
 0x65b   : > { %8490 = vmatmul.bf16.gmra.mxu0 %v10888_v5  ;;  %v12154_v5 = vld [vmem:[%s17836_s8 + $0x36c] sm:$0xf0] }
 0x65c   : > { %v16572_v3 = vadd.f32 %v8448_v51, %v8280_v54  ;;  %v12079_v54 = vld [vmem:[%s17836_s8 + $0x11c] sm:$0xf]  ;;  %v10916_v8 = vor.u32 %v12154_v5, %v10915_v16  ;;  %v17896_v16 = vld [vmem:[#allocation12_spill] sm:$0xff] }
 0x65d   : > { %8629 = vmatmul.bf16.gmra.mxu1 %v10700_v7  ;;  %11748 = vmatmul.msk.bf16.gmra.mxu2 %vm2383_vm0, %v10608_v31  ;;  %v8062_v7 = vadd.f32 %v16449_v45, %v7893_v55  ;;  %v17895_v31 = vld [vmem:[#allocation11_spill] sm:$0xff]  ;;  %v10640_v43 = vor.u32 %v12079_v54, %v10637_v11  ;;  %v5846_v54 = vpop.permute.xlu1 %5845 }
 0x65e   : > { %8321 = vmatmul.bf16.gmra.mxu3 %v10884_v27 }
 0x660   : > { %v8228_v12 = vpop.f32.mrf.mxu2  ;;  %v8453_v15 = vpop.f32.mrf.mxu0 }
 0x661   : > { %v8282_v21 = vpop.f32.mrf.mxu3  ;;  %v16580_v19 = vadd.f32 %v8228_v12, %v8060_v34 }
 0x662   : > { %v8283_v9 = vadd.f32 %v8282_v21, %v17894_v53  ;;  %v16584_v35 = vpop.f32.mrf.mxu1  ;;  %v10732_v21 = vor.u32 %v12107_v48, %v10731_v42  ;;  %v7896_v53 = vadd.f32 %v16184_v63, %v7727_v49 }
 0x664   : > { %v16582_v51 = vadd.f32 %v8451_v28, %v8283_v9  ;;  %v10920_v28 = vor.u32 %v12150_v1, %v10917_v33  ;;  %v5841_v1 = vpop.permute.xlu0 %5840  ;;  %v8065_v45 = vadd.f32 %v16484_v20, %v7896_v53  ;;  %v12158_v20 = vld [vmem:[%s17836_s8 + $0x394] sm:$0xf] }
 0x665   : > { %v7729_v33 = vadd.f32 %v16230_v58, %v5841_v1  ;;  %v10949_v58 = vld [vmem:[%s17836_s8 + $0x3b0] sm:$0xf0] }
 0x667   : > { %v7898_v11 = vadd.f32 %v16198_v59, %v7729_v33  ;;  %v10763_v59 = vld [vmem:[%s17836_s8 + $0x218] sm:$0xf] }
 0x668   : > { %v8230_v10 = vpop.f32.mrf.mxu2  ;;  %v8456_v34 = vpop.f32.mrf.mxu0 }
 0x669   : > { %v8284_v27 = vpop.f32.mrf.mxu3  ;;  %v16615_v9 = vadd.f32 %v8230_v10, %v8062_v7  ;;  %v7732_v7 = vadd.f32 %v16244_v47, %v5846_v54  ;;  %v10669_v10 = vld [vmem:[%s17836_s8 + $0x178] sm:$0xf0] }
 0x66a   : > { %v8285_v26 = vadd.f32 %v8284_v27, %v17895_v31  ;;  %v16619_v38 = vpop.f32.mrf.mxu1  ;;  %v10947_v27 = vld [vmem:[%s17836_s8 + $0x390] sm:$0xf]  ;;  %v12115_v31 = vld [vmem:[%s17836_s8 + $0x234] sm:$0xf0] }
 0x66b   : > { %8495 = vmatmul.bf16.gmra.mxu0 %v10920_v28  ;;  %v12162_v28 = vld [vmem:[%s17836_s8 + $0x3ac] sm:$0xf0] }
 0x66c   : > { %v16617_v12 = vadd.f32 %v8453_v15, %v8285_v26  ;;  %v12087_v26 = vld [vmem:[%s17836_s8 + $0x15c] sm:$0xf]  ;;  %v10948_v47 = vor.u32 %v12162_v28, %v10947_v27 }
 0x66d   : > { %8634 = vmatmul.bf16.gmra.mxu1 %v10732_v21  ;;  %11749 = vmatmul.msk.bf16.gmra.mxu2 %vm2383_vm0, %v10640_v43  ;;  %v8067_v21 = vadd.f32 %v16494_v24, %v7898_v11  ;;  %v17897_v43 = vld [vmem:[#allocation13_spill] sm:$0xff]  ;;  %v10672_v33 = vor.u32 %v12087_v26, %v10669_v10  ;;  %v17898_v27 = vld [vmem:[#allocation14_spill] sm:$0xff]  ;;  %v5856_v26 = vpop.permute.xlu0 %5855 }
 0x66e   : > { %8326 = vmatmul.bf16.gmra.mxu3 %v10916_v8 }
 0x670   : > { %v8233_v63 = vpop.f32.mrf.mxu2  ;;  %v8458_v42 = vpop.f32.mrf.mxu0 }
 0x671   : > { %v8287_v55 = vpop.f32.mrf.mxu3  ;;  %v16625_v49 = vadd.f32 %v8233_v63, %v8065_v45 }
 0x672   : > { %v8288_v5 = vadd.f32 %v8287_v55, %v17896_v16  ;;  %v16629_v48 = vpop.f32.mrf.mxu1  ;;  %v10764_v55 = vor.u32 %v12115_v31, %v10763_v59  ;;  %v7901_v16 = vadd.f32 %v16233_v32, %v7732_v7 }
 0x674   : > { %v16627_v15 = vadd.f32 %v8456_v34, %v8288_v5  ;;  %v10952_v34 = vor.u32 %v12158_v20, %v10949_v58  ;;  %v5851_v20 = vpop.permute.xlu2 %5850  ;;  %v8070_v24 = vadd.f32 %v16529_v52, %v7901_v16  ;;  %v12166_v52 = vld [vmem:[%s17836_s8 + $0x3d4] sm:$0xf] }
 0x675   : > { %v7734_v58 = vadd.f32 %v16282_v30, %v5851_v20  ;;  %v10981_v30 = vld [vmem:[%s17836_s8 + $0x3f0] sm:$0xf0] }
 0x677   : > { %v7903_v10 = vadd.f32 %v16247_v22, %v7734_v58  ;;  %v10795_v22 = vld [vmem:[%s17836_s8 + $0x258] sm:$0xf] }
 0x678   : > { %v8235_v1 = vpop.f32.mrf.mxu2  ;;  %v8461_v45 = vpop.f32.mrf.mxu0 }
 0x679   : > { %v8289_v8 = vpop.f32.mrf.mxu3  ;;  %v16660_v5 = vadd.f32 %v8235_v1, %v8067_v21  ;;  %v7737_v21 = vadd.f32 %v16299_v17, %v5856_v26  ;;  %v10701_v1 = vld [vmem:[%s17836_s8 + $0x1b8] sm:$0xf0] }
 0x67a   : > { %v8290_v53 = vadd.f32 %v8289_v8, %v17897_v43  ;;  %v16664_v54 = vpop.f32.mrf.mxu1  ;;  %v10979_v8 = vld [vmem:[%s17836_s8 + $0x3d0] sm:$0xf]  ;;  %v12123_v43 = vld [vmem:[%s17836_s8 + $0x274] sm:$0xf0] }
 0x67b   : > { %8500 = vmatmul.bf16.gmra.mxu0 %v10952_v34  ;;  %v12170_v34 = vld [vmem:[%s17836_s8 + $0x3ec] sm:$0xf0] }
 0x67c   : > { %v16662_v63 = vadd.f32 %v8458_v42, %v8290_v53  ;;  %v12095_v53 = vld [vmem:[%s17836_s8 + $0x19c] sm:$0xf]  ;;  %v10980_v17 = vor.u32 %v12170_v34, %v10979_v8  ;;  %v17900_v8 = vld [vmem:[#allocation16_spill] sm:$0xff] }
 0x67d   : > { %8639 = vmatmul.bf16.gmra.mxu1 %v10764_v55  ;;  %11750 = vmatmul.msk.bf16.gmra.mxu2 %vm2383_vm0, %v10672_v33  ;;  %v8072_v55 = vadd.f32 %v16539_v4, %v7903_v10  ;;  %v17899_v33 = vld [vmem:[#allocation15_spill] sm:$0xff]  ;;  %v10704_v58 = vor.u32 %v12095_v53, %v10701_v1  ;;  %v5866_v53 = vpop.permute.xlu2 %5865 }
 0x67e   : > { %8331 = vmatmul.bf16.gmra.mxu3 %v10948_v47 }
 0x680   : > { %v8238_v32 = vpop.f32.mrf.mxu2  ;;  %v8463_v59 = vpop.f32.mrf.mxu0 }
 0x681   : > { %v8292_v11 = vpop.f32.mrf.mxu3  ;;  %v16670_v7 = vadd.f32 %v8238_v32, %v8070_v24 }
 0x682   : > { %v8293_v28 = vadd.f32 %v8292_v11, %v17898_v27  ;;  %v16674_v31 = vpop.f32.mrf.mxu1  ;;  %v10796_v11 = vor.u32 %v12123_v43, %v10795_v22  ;;  %v7906_v27 = vadd.f32 %v16285_v50, %v7737_v21 }
 0x684   : > { %v16672_v42 = vadd.f32 %v8461_v45, %v8293_v28  ;;  %v10984_v45 = vor.u32 %v12166_v52, %v10981_v30  ;;  %v5861_v52 = vpop.permute.xlu1 %5860  ;;  %v8075_v4 = vadd.f32 %v16574_v14, %v7906_v27  ;;  %v12174_v14 = vld [vmem:[%s17836_s8 + $0x414] sm:$0xf] }
 0x685   : > { %v7739_v30 = vadd.f32 %v16337_v61, %v5861_v52  ;;  %v11013_v61 = vld [vmem:[%s17836_s8 + $0x430] sm:$0xf0] }
 0x687   : > { %v7908_v1 = vadd.f32 %v16302_v40, %v7739_v30  ;;  %v10827_v40 = vld [vmem:[%s17836_s8 + $0x298] sm:$0xf] }
 0x688   : > { %v8240_v20 = vpop.f32.mrf.mxu2  ;;  %v8466_v24 = vpop.f32.mrf.mxu0 }
 0x689   : > { %v8294_v47 = vpop.f32.mrf.mxu3  ;;  %v16705_v28 = vadd.f32 %v8240_v20, %v8072_v55  ;;  %v7742_v55 = vadd.f32 %v16351_v41, %v5866_v53  ;;  %v10733_v20 = vld [vmem:[%s17836_s8 + $0x1f8] sm:$0xf0] }
 0x68a   : > { %v8295_v16 = vadd.f32 %v8294_v47, %v17899_v33  ;;  %v16709_v26 = vpop.f32.mrf.mxu1  ;;  %v11011_v47 = vld [vmem:[%s17836_s8 + $0x410] sm:$0xf]  ;;  %v12131_v33 = vld [vmem:[%s17836_s8 + $0x2b4] sm:$0xf0] }
 0x68b   : > { %8505 = vmatmul.bf16.gmra.mxu0 %v10984_v45  ;;  %v12178_v45 = vld [vmem:[%s17836_s8 + $0x42c] sm:$0xf0] }
 0x68c   : > { %v16707_v32 = vadd.f32 %v8463_v59, %v8295_v16  ;;  %v12103_v16 = vld [vmem:[%s17836_s8 + $0x1dc] sm:$0xf]  ;;  %v11012_v41 = vor.u32 %v12178_v45, %v11011_v47 }
 0x68d   : > { %8644 = vmatmul.bf16.gmra.mxu1 %v10796_v11  ;;  %11751 = vmatmul.msk.bf16.gmra.mxu2 %vm2383_vm0, %v10704_v58  ;;  %v8077_v11 = vadd.f32 %v16584_v35, %v7908_v1  ;;  %v17902_v58 = vld [vmem:[#allocation17_spill] sm:$0xff]  ;;  %v10736_v30 = vor.u32 %v12103_v16, %v10733_v20  ;;  %v17904_v47 = vld [vmem:[#allocation18_spill] sm:$0xff] }
 0x68e   : > { %8336 = vmatmul.bf16.gmra.mxu3 %v10980_v17  ;;  %v12182_v20 = vld [vmem:[%s17836_s8 + $0x454] sm:$0xf] }
 0x690   : > { %v8243_v50 = vpop.f32.mrf.mxu2  ;;  %v8468_v22 = vpop.f32.mrf.mxu0 }
 0x691   : > { %v8297_v10 = vpop.f32.mrf.mxu3  ;;  %v16715_v21 = vadd.f32 %v8243_v50, %v8075_v4 }
 0x692   : > { %v8298_v34 = vadd.f32 %v8297_v10, %v17900_v8  ;;  %v16719_v43 = vpop.f32.mrf.mxu1  ;;  %v10828_v10 = vor.u32 %v12131_v33, %v10827_v40  ;;  %v7911_v8 = vadd.f32 %v16340_v29, %v7742_v55 }
 0x693   : > { %17901 = vst [vmem:[#allocation3_spill] sm:$0xff] %v16715_v21 }
 0x694   : > { %v16717_v59 = vadd.f32 %v8466_v24, %v8298_v34  ;;  %v11016_v24 = vor.u32 %v12174_v14, %v11013_v61  ;;  %v5871_v14 = vpop.permute.xlu0 %5870  ;;  %v8080_v35 = vadd.f32 %v16619_v38, %v7911_v8  ;;  %v11043_v38 = vld [vmem:[%s17836_s8 + $0x450] sm:$0xf] }
 0x695   : > { %v7744_v61 = vadd.f32 %v16386_v57, %v5871_v14  ;;  %v11045_v57 = vld [vmem:[%s17836_s8 + $0x470] sm:$0xf0] }
 0x697   : > { %v7913_v16 = vadd.f32 %v16354_v46, %v7744_v61  ;;  %v10859_v46 = vld [vmem:[%s17836_s8 + $0x2d8] sm:$0xf] }
 0x698   : > { %v8245_v52 = vpop.f32.mrf.mxu2  ;;  %v8471_v4 = vpop.f32.mrf.mxu0 }
 0x699   : > { %v8299_v17 = vpop.f32.mrf.mxu3  ;;  %v16750_v34 = vadd.f32 %v8245_v52, %v8077_v11  ;;  %v12111_v11 = vld [vmem:[%s17836_s8 + $0x21c] sm:$0xf]  ;;  %v11048_v52 = vor.u32 %v12182_v20, %v11045_v57 }
 0x69a   : > { %v8300_v27 = vadd.f32 %v8299_v17, %v17902_v58  ;;  %v16754_v53 = vpop.f32.mrf.mxu1  ;;  %v12186_v17 = vld [vmem:[%s17836_s8 + $0x46c] sm:$0xf0]  ;;  %v10765_v58 = vld [vmem:[%s17836_s8 + $0x238] sm:$0xf0] }
 0x69b   : > { %17903 = vst [vmem:[#allocation4_spill] sm:$0xff] %v16750_v34  ;;  %8510 = vmatmul.bf16.gmra.mxu0 %v11016_v24  ;;  %v12139_v24 = vld [vmem:[%s17836_s8 + $0x2f4] sm:$0xf0]  ;;  %v11044_v8 = vor.u32 %v12186_v17, %v11043_v38  ;;  %v17908_v38 = vld [vmem:[#allocation20_spill] sm:$0xff] }
 0x69c   : > { %v16752_v50 = vadd.f32 %v8468_v22, %v8300_v27 }
 0x69d   : > { %8649 = vmatmul.bf16.gmra.mxu1 %v10828_v10  ;;  %11752 = vmatmul.msk.bf16.gmra.mxu2 %vm2383_vm0, %v10736_v30 }
 0x69e   : > { %8341 = vmatmul.bf16.gmra.mxu3 %v11012_v41  ;;  %v8082_v41 = vadd.f32 %v16629_v48, %v7913_v16  ;;  %v8601_v16 = vadd.f32 %v16664_v54, %v16399_v56  ;;  %v8994_v56 = vld [vmem:[%s16803_s13 + $0x8] sm:$0xff]  ;;  %v11075_v54 = vld [vmem:[%s17836_s8 + $0x490] sm:$0xf] }
 0x6a0   : > { %v8248_v29 = vpop.f32.mrf.mxu2  ;;  %v8473_v40 = vpop.f32.mrf.mxu0 }
 0x6a1   : > { %v8302_v1 = vpop.f32.mrf.mxu3  ;;  %v16760_v55 = vadd.f32 %v8248_v29, %v8080_v35  ;;  %v10860_v35 = vor.u32 %v12139_v24, %v10859_v46  ;;  %v8993_v29 = vld [vmem:[%s16803_s13] sm:$0xff] }
 0x6a2   : > { %v8303_v45 = vadd.f32 %v8302_v1, %v17904_v47  ;;  %v16764_v33 = vpop.f32.mrf.mxu1  ;;  %v10768_v1 = vor.u32 %v12111_v11, %v10765_v58 }
 0x6a3   : > { %17905 = vst [vmem:[#allocation5_spill] sm:$0xff] %v16760_v55 }
 0x6a4   : > { %v16762_v22 = vadd.f32 %v8471_v4, %v8303_v45  ;;  %v17906_v4 = vld [vmem:[#allocation19_spill] sm:$0xff] }
 0x6a5   : > { %v8929_v45 = vld [vmem:[%s16797_s26] sm:$0xff] }
 0x6a6   : > { %v9057_v57 = vadd.f32 %v8993_v29, %v8929_v45 }
 0x6a8   : > { %v8250_v30 = vpop.f32.mrf.mxu2  ;;  %v8476_v14 = vpop.f32.mrf.mxu0 }
 0x6a9   : > { %v8304_v27 = vpop.f32.mrf.mxu3  ;;  %v16805_v48 = vadd.f32 %v8250_v30, %v8082_v41  ;;  %v12190_v41 = vld [vmem:[%s17836_s8 + $0x494] sm:$0xf]  ;;  %v10891_v30 = vld [vmem:[%s17836_s8 + $0x318] sm:$0xf] }
 0x6aa   : > { %v8305_v10 = vadd.f32 %v8304_v27, %v17906_v4  ;;  %v16809_v47 = vpop.f32.mrf.mxu1  ;;  %v11077_v4 = vld [vmem:[%s17836_s8 + $0x4b0] sm:$0xf0] }
 0x6ab   : > { %17907 = vst [vmem:[#allocation6_spill] sm:$0xff] %v16805_v48  ;;  %8515 = vmatmul.bf16.gmra.mxu0 %v11048_v52  ;;  %v8930_v52 = vld [vmem:[%s16797_s26 + $0x8] sm:$0xff] }
 0x6ac   : > { %v16807_v61 = vadd.f32 %v8473_v40, %v8305_v10  ;;  %v12194_v10 = vld [vmem:[%s17836_s8 + $0x4ac] sm:$0xf0]  ;;  %v9058_v29 = vadd.f32 %v8994_v56, %v8930_v52  ;;  %v8606_v52 = vadd.f32 %v16709_v26, %v16447_v60  ;;  %v12198_v60 = vld [vmem:[%s17836_s8 + $0x4d4] sm:$0xf] }
 0x6ad   : > { %8654 = vmatmul.bf16.gmra.mxu1 %v10860_v35  ;;  %11753 = vmatmul.msk.bf16.gmra.mxu2 %vm2383_vm0, %v10768_v1  ;;  %v10797_v35 = vld [vmem:[%s17836_s8 + $0x278] sm:$0xf0]  ;;  %v8603_v1 = vadd.f32 %v16674_v31, %v16437_v13  ;;  %v8931_v13 = vld [vmem:[%s16797_s26 + $0x10] sm:$0xff] }
 0x6ae   : > { %8346 = vmatmul.bf16.gmra.mxu3 %v11044_v8  ;;  %v12147_v8 = vld [vmem:[%s17836_s8 + $0x334] sm:$0xf0]  ;;  %v8995_v31 = vld [vmem:[%s16803_s13 + $0x10] sm:$0xff] }
 0x6af   : > { %v9059_v56 = vadd.f32 %v8995_v31, %v8931_v13  ;;  %v11109_v26 = vld [vmem:[%s17836_s8 + $0x4f0] sm:$0xf0] }
 0x6b0   : > { %v8769_v17 = vpop.f32.mrf.mxu2  ;;  %v8478_v46 = vpop.f32.mrf.mxu0 }
 0x6b1   : > { %v8307_v20 = vpop.f32.mrf.mxu3  ;;  %v8770_v24 = vadd.f32 %v8769_v17, %v8601_v16  ;;  %v11080_v16 = vor.u32 %v12190_v41, %v11077_v4 }
 0x6b2   : > { %v8308_v40 = vadd.f32 %v8307_v20, %v17908_v38  ;;  %v16825_v58 = vpop.f32.mrf.mxu1  ;;  %v17909_v20 = vld [vmem:[#allocation21_spill] sm:$0xff] }
 0x6b3   : > { %v9121_v27 = vsub.f32 %v8770_v24, %v9057_v57 }
 0x6b4   : > { %v16817_v11 = vadd.f32 %v8476_v14, %v8308_v40  ;;  %v12119_v14 = vld [vmem:[%s17836_s8 + $0x25c] sm:$0xf]  ;;  %v11076_v40 = vor.u32 %v12194_v10, %v11075_v54 }
 0x6b5   : > { %9185 = vst.msk [vmem:[%s16823_s16] sm:$0xff] %vm4713_vm5, %v9121_v27  ;;  %v10892_v27 = vor.u32 %v12147_v8, %v10891_v30  ;;  %v10800_v48 = vor.u32 %v12119_v14, %v10797_v35  ;;  %v17910_v54 = vld [vmem:[#allocation22_spill] sm:$0xff] }
 0x6b8   : > { %v8771_v38 = vpop.f32.mrf.mxu2  ;;  %v8481_v17 = vpop.f32.mrf.mxu0 }
 0x6b9   : > { %v8309_v45 = vpop.f32.mrf.mxu3  ;;  %v8772_v24 = vadd.f32 %v8771_v38, %v8603_v1  ;;  %v8996_v1 = vld [vmem:[%s16803_s13 + $0x18] sm:$0xff]  ;;  %v8608_v38 = vadd.f32 %v16719_v43, %v16482_v36  ;;  %v8933_v36 = vld [vmem:[%s16797_s26 + $0x20] sm:$0xff] }
 0x6ba   : > { %v8310_v57 = vadd.f32 %v8309_v45, %v17909_v20  ;;  %v16860_v34 = vpop.f32.mrf.mxu1  ;;  %v12202_v45 = vld [vmem:[%s17836_s8 + $0x4ec] sm:$0xf0]  ;;  %v12127_v20 = vld [vmem:[%s17836_s8 + $0x29c] sm:$0xf]  ;;  %v8997_v43 = vld [vmem:[%s16803_s13 + $0x20] sm:$0xff] }
 0x6bb   : > { %v9122_v21 = vsub.f32 %v8772_v24, %v9058_v29  ;;  %8520 = vmatmul.bf16.gmra.mxu0 %v11080_v16  ;;  %v10923_v29 = vld [vmem:[%s17836_s8 + $0x358] sm:$0xf]  ;;  %v11112_v24 = vor.u32 %v12198_v60, %v11109_v26 }
 0x6bc   : > { %v16858_v55 = vadd.f32 %v8478_v46, %v8310_v57  ;;  %v12155_v16 = vld [vmem:[%s17836_s8 + $0x374] sm:$0xf0]  ;;  %v10829_v57 = vld [vmem:[%s17836_s8 + $0x2b8] sm:$0xf0] }
 0x6bd   : > { %9186 = vst.msk [vmem:[%s16823_s16 + $0x8] sm:$0xff] %vm4713_vm5, %v9122_v21  ;;  %8659 = vmatmul.bf16.gmra.mxu1 %v10892_v27  ;;  %11754 = vmatmul.msk.bf16.gmra.mxu2 %vm2383_vm0, %v10800_v48  ;;  %v8932_v21 = vld [vmem:[%s16797_s26 + $0x18] sm:$0xff]  ;;  %v11107_v48 = vld [vmem:[%s17836_s8 + $0x4d0] sm:$0xf]  ;;  %v17911_v27 = vld [vmem:[#allocation23_spill] sm:$0xff] }
 0x6be   : > { %8351 = vmatmul.bf16.gmra.mxu3 %v11076_v40 }
 0x6c0   : > { %v8774_v4 = vpop.f32.mrf.mxu2  ;;  %v8483_v10 = vpop.f32.mrf.mxu0 }
 0x6c1   : > { %v8312_v46 = vpop.f32.mrf.mxu3  ;;  %v8775_v30 = vadd.f32 %v8774_v4, %v8606_v52  ;;  %v11108_v52 = vor.u32 %v12202_v45, %v11107_v48  ;;  %v17912_v48 = vld [vmem:[#allocation24_spill] sm:$0xff] }
 0x6c2   : > { %v8313_v41 = vadd.f32 %v8312_v46, %v17910_v54  ;;  %v16872_v14 = vpop.f32.mrf.mxu1  ;;  %v10924_v54 = vor.u32 %v12155_v16, %v10923_v29 }
 0x6c3   : > { %v9123_v35 = vsub.f32 %v8775_v30, %v9059_v56 }
 0x6c4   : > { %v16870_v8 = vadd.f32 %v8481_v17, %v8313_v41  ;;  %v9060_v17 = vadd.f32 %v8996_v1, %v8932_v21  ;;  %v10832_v41 = vor.u32 %v12127_v20, %v10829_v57  ;;  %v8611_v21 = vadd.f32 %v16754_v53, %v16492_v62  ;;  %v12206_v62 = vld [vmem:[%s17836_s8 + $0x514] sm:$0xf] }
 0x6c5   : > { %9187 = vst.msk [vmem:[%s16823_s16 + $0x10] sm:$0xff] %vm4713_vm5, %v9123_v35  ;;  %v9061_v1 = vadd.f32 %v8997_v43, %v8933_v36  ;;  %v11141_v53 = vld [vmem:[%s17836_s8 + $0x530] sm:$0xf0] }
 0x6c8   : > { %v8776_v31 = vpop.f32.mrf.mxu2  ;;  %v8486_v46 = vpop.f32.mrf.mxu0 }
 0x6c9   : > { %v8314_v40 = vpop.f32.mrf.mxu3  ;;  %v8777_v56 = vadd.f32 %v8776_v31, %v8608_v38  ;;  %v8934_v38 = vld [vmem:[%s16797_s26 + $0x28] sm:$0xff]  ;;  %v12135_v31 = vld [vmem:[%s17836_s8 + $0x2dc] sm:$0xf] }
 0x6ca   : > { %v8315_v13 = vadd.f32 %v8314_v40, %v17911_v27  ;;  %v16907_v30 = vpop.f32.mrf.mxu1  ;;  %v8998_v40 = vld [vmem:[%s16803_s13 + $0x28] sm:$0xff]  ;;  %v10955_v27 = vld [vmem:[%s17836_s8 + $0x398] sm:$0xf] }
 0x6cb   : > { %v9124_v35 = vsub.f32 %v8777_v56, %v9060_v17  ;;  %8525 = vmatmul.bf16.gmra.mxu0 %v11112_v24  ;;  %v11139_v17 = vld [vmem:[%s17836_s8 + $0x510] sm:$0xf] }
 0x6cc   : > { %v16905_v4 = vadd.f32 %v8483_v10, %v8315_v13  ;;  %v12210_v24 = vld [vmem:[%s17836_s8 + $0x52c] sm:$0xf0]  ;;  %v12163_v13 = vld [vmem:[%s17836_s8 + $0x3b4] sm:$0xf0] }
 0x6cd   : > { %9188 = vst.msk [vmem:[%s16823_s16 + $0x18] sm:$0xff] %vm4713_vm5, %v9124_v35  ;;  %8664 = vmatmul.bf16.gmra.mxu1 %v10924_v54  ;;  %11755 = vmatmul.msk.bf16.gmra.mxu2 %vm2383_vm0, %v10832_v41  ;;  %v9062_v54 = vadd.f32 %v8998_v40, %v8934_v38  ;;  %v11144_v41 = vor.u32 %v12206_v62, %v11141_v53  ;;  %v17913_v35 = vld [vmem:[#allocation25_spill] sm:$0xff] }
 0x6ce   : > { %8356 = vmatmul.bf16.gmra.mxu3 %v11108_v52  ;;  %v10861_v52 = vld [vmem:[%s17836_s8 + $0x2f8] sm:$0xf0]  ;;  %v8616_v38 = vadd.f32 %v16809_v47, %v16537_v6  ;;  %v12214_v6 = vld [vmem:[%s17836_s8 + $0x554] sm:$0xf] }
 0x6cf   : > { %v11173_v47 = vld [vmem:[%s17836_s8 + $0x570] sm:$0xf0] }
 0x6d0   : > { %v8779_v26 = vpop.f32.mrf.mxu2  ;;  %v8488_v45 = vpop.f32.mrf.mxu0 }
 0x6d1   : > { %v8317_v10 = vpop.f32.mrf.mxu3  ;;  %v8780_v29 = vadd.f32 %v8779_v26, %v8611_v21  ;;  %v11140_v21 = vor.u32 %v12210_v24, %v11139_v17  ;;  %v17914_v17 = vld [vmem:[#allocation26_spill] sm:$0xff] }
 0x6d2   : > { %v8318_v60 = vadd.f32 %v8317_v10, %v17912_v48  ;;  %v16919_v20 = vpop.f32.mrf.mxu1  ;;  %v10956_v48 = vor.u32 %v12163_v13, %v10955_v27 }
 0x6d3   : > { %v9125_v57 = vsub.f32 %v8780_v29, %v9061_v1 }
 0x6d4   : > { %v16917_v16 = vadd.f32 %v8486_v46, %v8318_v60  ;;  %v8613_v46 = vadd.f32 %v16764_v33, %v16527_v2  ;;  %v10864_v60 = vor.u32 %v12135_v31, %v10861_v52  ;;  %v8935_v2 = vld [vmem:[%s16797_s26 + $0x30] sm:$0xff] }
 0x6d5   : > { %9189 = vst.msk [vmem:[%s16823_s16 + $0x20] sm:$0xff] %vm4713_vm5, %v9125_v57  ;;  %v8999_v33 = vld [vmem:[%s16803_s13 + $0x30] sm:$0xff] }
 0x6d6   : > { %v9063_v40 = vadd.f32 %v8999_v33, %v8935_v2 }
 0x6d8   : > { %v8781_v43 = vpop.f32.mrf.mxu2  ;;  %v8491_v10 = vpop.f32.mrf.mxu0 }
 0x6d9   : > { %v8319_v56 = vpop.f32.mrf.mxu3  ;;  %v8782_v1 = vadd.f32 %v8781_v43, %v8613_v46  ;;  %v8936_v46 = vld [vmem:[%s16797_s26 + $0x38] sm:$0xff] }
 0x6da   : > { %v8320_v36 = vadd.f32 %v8319_v56, %v17913_v35  ;;  %v16954_v29 = vpop.f32.mrf.mxu1  ;;  %v9000_v56 = vld [vmem:[%s16803_s13 + $0x38] sm:$0xff] }
 0x6db   : > { %v9126_v57 = vsub.f32 %v8782_v1, %v9062_v54  ;;  %8530 = vmatmul.bf16.gmra.mxu0 %v11144_v41  ;;  %v11171_v54 = vld [vmem:[%s17836_s8 + $0x550] sm:$0xf]  ;;  %v10987_v35 = vld [vmem:[%s17836_s8 + $0x3d8] sm:$0xf]  ;;  %v12143_v43 = vld [vmem:[%s17836_s8 + $0x31c] sm:$0xf] }
 0x6dc   : > { %v16952_v26 = vadd.f32 %v8488_v45, %v8320_v36  ;;  %v12218_v41 = vld [vmem:[%s17836_s8 + $0x56c] sm:$0xf0]  ;;  %v12171_v36 = vld [vmem:[%s17836_s8 + $0x3f4] sm:$0xf0] }
 0x6dd   : > { %9190 = vst.msk [vmem:[%s16823_s16 + $0x28] sm:$0xff] %vm4713_vm5, %v9126_v57  ;;  %8669 = vmatmul.bf16.gmra.mxu1 %v10956_v48  ;;  %11756 = vmatmul.msk.bf16.gmra.mxu2 %vm2383_vm0, %v10864_v60  ;;  %v9064_v48 = vadd.f32 %v9000_v56, %v8936_v46  ;;  %v11176_v60 = vor.u32 %v12214_v6, %v11173_v47  ;;  %v17915_v57 = vld [vmem:[#allocation27_spill] sm:$0xff] }
 0x6de   : > { %8361 = vmatmul.bf16.gmra.mxu3 %v11140_v21  ;;  %v10893_v21 = vld [vmem:[%s17836_s8 + $0x338] sm:$0xf0]  ;;  %v8621_v46 = vadd.f32 %v16860_v34, %v16582_v51  ;;  %v12222_v51 = vld [vmem:[%s17836_s8 + $0x594] sm:$0xf] }
 0x6df   : > { %v11205_v34 = vld [vmem:[%s17836_s8 + $0x5b0] sm:$0xf0] }
 0x6e0   : > { %v8784_v53 = vpop.f32.mrf.mxu2  ;;  %v8493_v24 = vpop.f32.mrf.mxu0 }
 0x6e1   : > { %v8322_v45 = vpop.f32.mrf.mxu3  ;;  %v8785_v27 = vadd.f32 %v8784_v53, %v8616_v38  ;;  %v11172_v38 = vor.u32 %v12218_v41, %v11171_v54  ;;  %v17916_v54 = vld [vmem:[#allocation28_spill] sm:$0xff] }
 0x6e2   : > { %v8323_v62 = vadd.f32 %v8322_v45, %v17914_v17  ;;  %v16966_v31 = vpop.f32.mrf.mxu1  ;;  %v10988_v17 = vor.u32 %v12171_v36, %v10987_v35 }
 0x6e3   : > { %v9127_v52 = vsub.f32 %v8785_v27, %v9063_v40 }
 0x6e4   : > { %v16964_v13 = vadd.f32 %v8491_v10, %v8323_v62  ;;  %v8618_v10 = vadd.f32 %v16825_v58, %v16572_v3  ;;  %v10896_v62 = vor.u32 %v12143_v43, %v10893_v21  ;;  %v8937_v3 = vld [vmem:[%s16797_s26 + $0x40] sm:$0xff] }
 0x6e5   : > { %9191 = vst.msk [vmem:[%s16823_s16 + $0x30] sm:$0xff] %vm4713_vm5, %v9127_v52  ;;  %v9001_v58 = vld [vmem:[%s16803_s13 + $0x40] sm:$0xff] }
 0x6e6   : > { %v9065_v56 = vadd.f32 %v9001_v58, %v8937_v3 }
 0x6e8   : > { %v8786_v33 = vpop.f32.mrf.mxu2  ;;  %v8496_v45 = vpop.f32.mrf.mxu0 }
 0x6e9   : > { %v8324_v1 = vpop.f32.mrf.mxu3  ;;  %v8787_v40 = vadd.f32 %v8786_v33, %v8618_v10  ;;  %v8938_v10 = vld [vmem:[%s16797_s26 + $0x48] sm:$0xff]  ;;  %v12151_v33 = vld [vmem:[%s17836_s8 + $0x35c] sm:$0xf] }
 0x6ea   : > { %v8325_v2 = vadd.f32 %v8324_v1, %v17915_v57  ;;  %v17001_v27 = vpop.f32.mrf.mxu1  ;;  %v9002_v1 = vld [vmem:[%s16803_s13 + $0x48] sm:$0xff]  ;;  %v11019_v57 = vld [vmem:[%s17836_s8 + $0x418] sm:$0xf] }
 0x6eb   : > { %v9128_v52 = vsub.f32 %v8787_v40, %v9064_v48  ;;  %8535 = vmatmul.bf16.gmra.mxu0 %v11176_v60  ;;  %v11203_v48 = vld [vmem:[%s17836_s8 + $0x590] sm:$0xf] }
 0x6ec   : > { %v16999_v53 = vadd.f32 %v8493_v24, %v8325_v2  ;;  %v12226_v60 = vld [vmem:[%s17836_s8 + $0x5ac] sm:$0xf0]  ;;  %v12179_v2 = vld [vmem:[%s17836_s8 + $0x434] sm:$0xf0] }
 0x6ed   : > { %9192 = vst.msk [vmem:[%s16823_s16 + $0x38] sm:$0xff] %vm4713_vm5, %v9128_v52  ;;  %8674 = vmatmul.bf16.gmra.mxu1 %v10988_v17  ;;  %11757 = vmatmul.msk.bf16.gmra.mxu2 %vm2383_vm0, %v10896_v62  ;;  %v9066_v17 = vadd.f32 %v9002_v1, %v8938_v10  ;;  %v11208_v62 = vor.u32 %v12222_v51, %v11205_v34  ;;  %v17917_v52 = vld [vmem:[#allocation29_spill] sm:$0xff] }
 0x6ee   : > { %8366 = vmatmul.bf16.gmra.mxu3 %v11172_v38  ;;  %v10925_v38 = vld [vmem:[%s17836_s8 + $0x378] sm:$0xf0]  ;;  %v8626_v10 = vadd.f32 %v16907_v30, %v16627_v15  ;;  %v12230_v15 = vld [vmem:[%s17836_s8 + $0x5d4] sm:$0xf] }
 0x6ef   : > { %v11237_v30 = vld [vmem:[%s17836_s8 + $0x5f0] sm:$0xf0] }
 0x6f0   : > { %v8789_v47 = vpop.f32.mrf.mxu2  ;;  %v8498_v41 = vpop.f32.mrf.mxu0 }
 0x6f1   : > { %v8327_v24 = vpop.f32.mrf.mxu3  ;;  %v8790_v35 = vadd.f32 %v8789_v47, %v8621_v46  ;;  %v11204_v46 = vor.u32 %v12226_v60, %v11203_v48  ;;  %v17918_v48 = vld [vmem:[#allocation30_spill] sm:$0xff] }
 0x6f2   : > { %v8328_v6 = vadd.f32 %v8327_v24, %v17916_v54  ;;  %v17013_v43 = vpop.f32.mrf.mxu1  ;;  %v11020_v54 = vor.u32 %v12179_v2, %v11019_v57 }
 0x6f3   : > { %v9129_v21 = vsub.f32 %v8790_v35, %v9065_v56 }
 0x6f4   : > { %v17011_v36 = vadd.f32 %v8496_v45, %v8328_v6  ;;  %v8623_v45 = vadd.f32 %v16872_v14, %v16617_v12  ;;  %v10928_v6 = vor.u32 %v12151_v33, %v10925_v38  ;;  %v8939_v12 = vld [vmem:[%s16797_s26 + $0x50] sm:$0xff] }
 0x6f5   : > { %9193 = vst.msk [vmem:[%s16823_s16 + $0x40] sm:$0xff] %vm4713_vm5, %v9129_v21  ;;  %v9003_v14 = vld [vmem:[%s16803_s13 + $0x50] sm:$0xff] }
 0x6f6   : > { %v9067_v1 = vadd.f32 %v9003_v14, %v8939_v12 }
 0x6f8   : > { %v8791_v58 = vpop.f32.mrf.mxu2  ;;  %v8501_v24 = vpop.f32.mrf.mxu0 }
 0x6f9   : > { %v8329_v40 = vpop.f32.mrf.mxu3  ;;  %v8792_v56 = vadd.f32 %v8791_v58, %v8623_v45  ;;  %v8940_v45 = vld [vmem:[%s16797_s26 + $0x58] sm:$0xff] }
 0x6fa   : > { %v8330_v3 = vadd.f32 %v8329_v40, %v17917_v52  ;;  %v17048_v35 = vpop.f32.mrf.mxu1  ;;  %v9004_v40 = vld [vmem:[%s16803_s13 + $0x58] sm:$0xff] }
 0x6fb   : > { %v9130_v21 = vsub.f32 %v8792_v56, %v9066_v17  ;;  %8540 = vmatmul.bf16.gmra.mxu0 %v11208_v62  ;;  %v11235_v17 = vld [vmem:[%s17836_s8 + $0x5d0] sm:$0xf]  ;;  %v11051_v52 = vld [vmem:[%s17836_s8 + $0x458] sm:$0xf]  ;;  %v12159_v58 = vld [vmem:[%s17836_s8 + $0x39c] sm:$0xf] }
 0x6fc   : > { %v17046_v47 = vadd.f32 %v8498_v41, %v8330_v3  ;;  %v12234_v62 = vld [vmem:[%s17836_s8 + $0x5ec] sm:$0xf0]  ;;  %v12187_v3 = vld [vmem:[%s17836_s8 + $0x474] sm:$0xf0] }
 0x6fd   : > { %9194 = vst.msk [vmem:[%s16823_s16 + $0x48] sm:$0xff] %vm4713_vm5, %v9130_v21  ;;  %8679 = vmatmul.bf16.gmra.mxu1 %v11020_v54  ;;  %11758 = vmatmul.msk.bf16.gmra.mxu2 %vm2383_vm0, %v10928_v6  ;;  %v9068_v54 = vadd.f32 %v9004_v40, %v8940_v45  ;;  %v11240_v6 = vor.u32 %v12230_v15, %v11237_v30  ;;  %v17919_v21 = vld [vmem:[#allocation31_spill] sm:$0xff] }
 0x6fe   : > { %8371 = vmatmul.bf16.gmra.mxu3 %v11204_v46  ;;  %v10957_v46 = vld [vmem:[%s17836_s8 + $0x3b8] sm:$0xf0]  ;;  %v8631_v45 = vadd.f32 %v16954_v29, %v16672_v42  ;;  %v12238_v42 = vld [vmem:[%s17836_s8 + $0x614] sm:$0xf] }
 0x6ff   : > { %v11269_v29 = vld [vmem:[%s17836_s8 + $0x630] sm:$0xf0] }
 0x700   : > { %v8794_v34 = vpop.f32.mrf.mxu2  ;;  %v8503_v60 = vpop.f32.mrf.mxu0 }
 0x701   : > { %v8332_v41 = vpop.f32.mrf.mxu3  ;;  %v8795_v57 = vadd.f32 %v8794_v34, %v8626_v10  ;;  %v11236_v10 = vor.u32 %v12234_v62, %v11235_v17  ;;  %v17920_v17 = vld [vmem:[#allocation32_spill] sm:$0xff] }
 0x702   : > { %v8333_v51 = vadd.f32 %v8332_v41, %v17918_v48  ;;  %v17060_v33 = vpop.f32.mrf.mxu1  ;;  %v11052_v48 = vor.u32 %v12187_v3, %v11051_v52 }
 0x703   : > { %v9131_v38 = vsub.f32 %v8795_v57, %v9067_v1 }
 0x704   : > { %v17058_v2 = vadd.f32 %v8501_v24, %v8333_v51  ;;  %v8628_v24 = vadd.f32 %v16919_v20, %v16662_v63  ;;  %v10960_v51 = vor.u32 %v12159_v58, %v10957_v46  ;;  %v8941_v63 = vld [vmem:[%s16797_s26 + $0x60] sm:$0xff] }
 0x705   : > { %9195 = vst.msk [vmem:[%s16823_s16 + $0x50] sm:$0xff] %vm4713_vm5, %v9131_v38  ;;  %v9005_v20 = vld [vmem:[%s16803_s13 + $0x60] sm:$0xff] }
 0x706   : > { %v9069_v40 = vadd.f32 %v9005_v20, %v8941_v63 }
 0x708   : > { %v8796_v14 = vpop.f32.mrf.mxu2  ;;  %v8506_v41 = vpop.f32.mrf.mxu0 }
 0x709   : > { %v8334_v56 = vpop.f32.mrf.mxu3  ;;  %v8797_v1 = vadd.f32 %v8796_v14, %v8628_v24  ;;  %v8942_v24 = vld [vmem:[%s16797_s26 + $0x68] sm:$0xff]  ;;  %v12167_v14 = vld [vmem:[%s17836_s8 + $0x3dc] sm:$0xf] }
 0x70a   : > { %v8335_v12 = vadd.f32 %v8334_v56, %v17919_v21  ;;  %v17095_v57 = vpop.f32.mrf.mxu1  ;;  %v9006_v56 = vld [vmem:[%s16803_s13 + $0x68] sm:$0xff]  ;;  %v11083_v21 = vld [vmem:[%s17836_s8 + $0x498] sm:$0xf] }
 0x70b   : > { %v9132_v38 = vsub.f32 %v8797_v1, %v9068_v54  ;;  %8545 = vmatmul.bf16.gmra.mxu0 %v11240_v6  ;;  %v11267_v54 = vld [vmem:[%s17836_s8 + $0x610] sm:$0xf] }
 0x70c   : > { %v17093_v34 = vadd.f32 %v8503_v60, %v8335_v12  ;;  %v12242_v6 = vld [vmem:[%s17836_s8 + $0x62c] sm:$0xf0]  ;;  %v12195_v12 = vld [vmem:[%s17836_s8 + $0x4b4] sm:$0xf0] }
 0x70d   : > { %9196 = vst.msk [vmem:[%s16823_s16 + $0x58] sm:$0xff] %vm4713_vm5, %v9132_v38  ;;  %8684 = vmatmul.bf16.gmra.mxu1 %v11052_v48  ;;  %11759 = vmatmul.msk.bf16.gmra.mxu2 %vm2383_vm0, %v10960_v51  ;;  %v9070_v48 = vadd.f32 %v9006_v56, %v8942_v24  ;;  %v11272_v51 = vor.u32 %v12238_v42, %v11269_v29  ;;  %v17921_v38 = vld [vmem:[#allocation33_spill] sm:$0xff] }
 0x70e   : > { %8376 = vmatmul.bf16.gmra.mxu3 %v11236_v10  ;;  %v10989_v10 = vld [vmem:[%s17836_s8 + $0x3f8] sm:$0xf0]  ;;  %v8636_v24 = vadd.f32 %v17001_v27, %v16717_v59  ;;  %v12246_v59 = vld [vmem:[%s17836_s8 + $0x654] sm:$0xf] }
 0x70f   : > { %v11301_v27 = vld [vmem:[%s17836_s8 + $0x670] sm:$0xf0] }
 0x710   : > { %v8799_v30 = vpop.f32.mrf.mxu2  ;;  %v8508_v62 = vpop.f32.mrf.mxu0 }
 0x711   : > { %v8337_v60 = vpop.f32.mrf.mxu3  ;;  %v8800_v52 = vadd.f32 %v8799_v30, %v8631_v45  ;;  %v11268_v45 = vor.u32 %v12242_v6, %v11267_v54  ;;  %v17922_v54 = vld [vmem:[#allocation34_spill] sm:$0xff] }
 0x712   : > { %v8338_v15 = vadd.f32 %v8337_v60, %v17920_v17  ;;  %v17107_v58 = vpop.f32.mrf.mxu1  ;;  %v11084_v17 = vor.u32 %v12195_v12, %v11083_v21 }
 0x713   : > { %v9133_v46 = vsub.f32 %v8800_v52, %v9069_v40 }
 0x714   : > { %v17105_v3 = vadd.f32 %v8506_v41, %v8338_v15  ;;  %v8633_v41 = vadd.f32 %v16966_v31, %v16707_v32  ;;  %v10992_v15 = vor.u32 %v12167_v14, %v10989_v10  ;;  %v8943_v32 = vld [vmem:[%s16797_s26 + $0x70] sm:$0xff] }
 0x715   : > { %9197 = vst.msk [vmem:[%s16823_s16 + $0x60] sm:$0xff] %vm4713_vm5, %v9133_v46  ;;  %v9007_v31 = vld [vmem:[%s16803_s13 + $0x70] sm:$0xff] }
 0x716   : > { %v9071_v56 = vadd.f32 %v9007_v31, %v8943_v32 }
 0x718   : > { %v8801_v20 = vpop.f32.mrf.mxu2  ;;  %v8511_v60 = vpop.f32.mrf.mxu0 }
 0x719   : > { %v8339_v1 = vpop.f32.mrf.mxu3  ;;  %v8802_v40 = vadd.f32 %v8801_v20, %v8633_v41  ;;  %v8944_v41 = vld [vmem:[%s16797_s26 + $0x78] sm:$0xff] }
 0x71a   : > { %v8340_v63 = vadd.f32 %v8339_v1, %v17921_v38  ;;  %v17142_v52 = vpop.f32.mrf.mxu1  ;;  %v9008_v1 = vld [vmem:[%s16803_s13 + $0x78] sm:$0xff] }
 0x71b   : > { %v9134_v46 = vsub.f32 %v8802_v40, %v9070_v48  ;;  %8550 = vmatmul.bf16.gmra.mxu0 %v11272_v51  ;;  %v11299_v48 = vld [vmem:[%s17836_s8 + $0x650] sm:$0xf]  ;;  %v11115_v38 = vld [vmem:[%s17836_s8 + $0x4d8] sm:$0xf]  ;;  %v12175_v20 = vld [vmem:[%s17836_s8 + $0x41c] sm:$0xf] }
 0x71c   : > { %v17140_v30 = vadd.f32 %v8508_v62, %v8340_v63  ;;  %v12250_v51 = vld [vmem:[%s17836_s8 + $0x66c] sm:$0xf0]  ;;  %v12203_v63 = vld [vmem:[%s17836_s8 + $0x4f4] sm:$0xf0] }
 0x71d   : > { %9198 = vst.msk [vmem:[%s16823_s16 + $0x68] sm:$0xff] %vm4713_vm5, %v9134_v46  ;;  %8689 = vmatmul.bf16.gmra.mxu1 %v11084_v17  ;;  %11760 = vmatmul.msk.bf16.gmra.mxu2 %vm2383_vm0, %v10992_v15  ;;  %v9072_v17 = vadd.f32 %v9008_v1, %v8944_v41  ;;  %v11304_v15 = vor.u32 %v12246_v59, %v11301_v27  ;;  %v17923_v46 = vld [vmem:[#allocation35_spill] sm:$0xff] }
 0x71e   : > { %8381 = vmatmul.bf16.gmra.mxu3 %v11268_v45  ;;  %v11021_v45 = vld [vmem:[%s17836_s8 + $0x438] sm:$0xf0]  ;;  %v8641_v41 = vadd.f32 %v17048_v35, %v16762_v22  ;;  %v12254_v22 = vld [vmem:[%s17836_s8 + $0x694] sm:$0xf] }
 0x71f   : > { %v11333_v35 = vld [vmem:[%s17836_s8 + $0x6b0] sm:$0xf0] }
 0x720   : > { %v8804_v29 = vpop.f32.mrf.mxu2  ;;  %v8513_v6 = vpop.f32.mrf.mxu0 }
 0x721   : > { %v8342_v62 = vpop.f32.mrf.mxu3  ;;  %v8805_v21 = vadd.f32 %v8804_v29, %v8636_v24  ;;  %v11300_v24 = vor.u32 %v12250_v51, %v11299_v48  ;;  %v17924_v48 = vld [vmem:[#allocation36_spill] sm:$0xff] }
 0x722   : > { %v8343_v42 = vadd.f32 %v8342_v62, %v17922_v54  ;;  %v17154_v14 = vpop.f32.mrf.mxu1  ;;  %v11116_v54 = vor.u32 %v12203_v63, %v11115_v38 }
 0x723   : > { %v9135_v10 = vsub.f32 %v8805_v21, %v9071_v56 }
 0x724   : > { %v17152_v12 = vadd.f32 %v8511_v60, %v8343_v42  ;;  %v8638_v60 = vadd.f32 %v17013_v43, %v16752_v50  ;;  %v11024_v42 = vor.u32 %v12175_v20, %v11021_v45  ;;  %v8945_v50 = vld [vmem:[%s16797_s26 + $0x80] sm:$0xff] }
 0x725   : > { %9199 = vst.msk [vmem:[%s16823_s16 + $0x70] sm:$0xff] %vm4713_vm5, %v9135_v10  ;;  %v9009_v43 = vld [vmem:[%s16803_s13 + $0x80] sm:$0xff] }
 0x726   : > { %v9073_v1 = vadd.f32 %v9009_v43, %v8945_v50 }
 0x728   : > { %v8806_v31 = vpop.f32.mrf.mxu2  ;;  %v8516_v62 = vpop.f32.mrf.mxu0 }
 0x729   : > { %v8344_v40 = vpop.f32.mrf.mxu3  ;;  %v8807_v56 = vadd.f32 %v8806_v31, %v8638_v60  ;;  %v8946_v60 = vld [vmem:[%s16797_s26 + $0x88] sm:$0xff]  ;;  %v12183_v31 = vld [vmem:[%s17836_s8 + $0x45c] sm:$0xf] }
 0x72a   : > { %v8345_v32 = vadd.f32 %v8344_v40, %v17923_v46  ;;  %v17189_v21 = vpop.f32.mrf.mxu1  ;;  %v9010_v40 = vld [vmem:[%s16803_s13 + $0x88] sm:$0xff]  ;;  %v11147_v46 = vld [vmem:[%s17836_s8 + $0x518] sm:$0xf] }
 0x72b   : > { %v9136_v10 = vsub.f32 %v8807_v56, %v9072_v17  ;;  %8555 = vmatmul.bf16.gmra.mxu0 %v11304_v15  ;;  %v11331_v17 = vld [vmem:[%s17836_s8 + $0x690] sm:$0xf] }
 0x72c   : > { %v17187_v29 = vadd.f32 %v8513_v6, %v8345_v32  ;;  %v12258_v15 = vld [vmem:[%s17836_s8 + $0x6ac] sm:$0xf0]  ;;  %v12211_v32 = vld [vmem:[%s17836_s8 + $0x534] sm:$0xf0] }
 0x72d   : > { %9200 = vst.msk [vmem:[%s16823_s16 + $0x78] sm:$0xff] %vm4713_vm5, %v9136_v10  ;;  %8694 = vmatmul.bf16.gmra.mxu1 %v11116_v54  ;;  %11761 = vmatmul.msk.bf16.gmra.mxu2 %vm2383_vm0, %v11024_v42  ;;  %v9074_v54 = vadd.f32 %v9010_v40, %v8946_v60  ;;  %v11336_v42 = vor.u32 %v12254_v22, %v11333_v35  ;;  %v17925_v10 = vld [vmem:[#allocation37_spill] sm:$0xff] }
 0x72e   : > { %8386 = vmatmul.bf16.gmra.mxu3 %v11300_v24  ;;  %v11053_v24 = vld [vmem:[%s17836_s8 + $0x478] sm:$0xf0]  ;;  %v8646_v60 = vadd.f32 %v17095_v57, %v16817_v11  ;;  %v12262_v11 = vld [vmem:[%s17836_s8 + $0x6d4] sm:$0xf] }
 0x72f   : > { %v11365_v57 = vld [vmem:[%s17836_s8 + $0x6f0] sm:$0xf0] }
 0x730   : > { %v8809_v27 = vpop.f32.mrf.mxu2  ;;  %v8518_v51 = vpop.f32.mrf.mxu0 }
 0x731   : > { %v8347_v6 = vpop.f32.mrf.mxu3  ;;  %v8810_v38 = vadd.f32 %v8809_v27, %v8641_v41  ;;  %v11332_v41 = vor.u32 %v12258_v15, %v11331_v17  ;;  %v17926_v17 = vld [vmem:[#allocation38_spill] sm:$0xff] }
 0x732   : > { %v8348_v59 = vadd.f32 %v8347_v6, %v17924_v48  ;;  %v17201_v20 = vpop.f32.mrf.mxu1  ;;  %v11056_v48 = vor.u32 %v12183_v31, %v11053_v24 }
 0x733   : > { %v9137_v45 = vsub.f32 %v8810_v38, %v9073_v1  ;;  %v11148_v1 = vor.u32 %v12211_v32, %v11147_v46 }
 0x734   : > { %v17199_v63 = vadd.f32 %v8516_v62, %v8348_v59  ;;  %v8643_v62 = vadd.f32 %v17060_v33, %v16807_v61  ;;  %v8947_v61 = vld [vmem:[%s16797_s26 + $0x90] sm:$0xff] }
 0x735   : > { %9201 = vst.msk [vmem:[%s16823_s16 + $0x80] sm:$0xff] %vm4713_vm5, %v9137_v45  ;;  %v9011_v33 = vld [vmem:[%s16803_s13 + $0x90] sm:$0xff] }
 0x736   : > { %v9075_v40 = vadd.f32 %v9011_v33, %v8947_v61 }
 0x738   : > { %v8811_v43 = vpop.f32.mrf.mxu2  ;;  %v8521_v59 = vpop.f32.mrf.mxu0 }
 0x739   : > { %v8349_v56 = vpop.f32.mrf.mxu3  ;;  %v8812_v6 = vadd.f32 %v8811_v43, %v8643_v62  ;;  %v8948_v62 = vld [vmem:[%s16797_s26 + $0x98] sm:$0xff] }
 0x73a   : > { %v8350_v50 = vadd.f32 %v8349_v56, %v17925_v10  ;;  %v17236_v38 = vpop.f32.mrf.mxu1  ;;  %v9012_v56 = vld [vmem:[%s16803_s13 + $0x98] sm:$0xff] }
 0x73b   : > { %v9138_v45 = vsub.f32 %v8812_v6, %v9074_v54  ;;  %8560 = vmatmul.bf16.gmra.mxu0 %v11336_v42  ;;  %v11363_v54 = vld [vmem:[%s17836_s8 + $0x6d0] sm:$0xf]  ;;  %v11179_v10 = vld [vmem:[%s17836_s8 + $0x558] sm:$0xf]  ;;  %v12191_v43 = vld [vmem:[%s17836_s8 + $0x49c] sm:$0xf]  ;;  %v8648_v6 = vadd.f32 %v17107_v58, %v16858_v55 }
 0x73c   : > { %v17234_v27 = vadd.f32 %v8518_v51, %v8350_v50  ;;  %v12266_v42 = vld [vmem:[%s17836_s8 + $0x6ec] sm:$0xf0]  ;;  %v12219_v50 = vld [vmem:[%s17836_s8 + $0x574] sm:$0xf0]  ;;  %v8949_v55 = vld [vmem:[%s16797_s26 + $0xa0] sm:$0xff] }
 0x73d   : > { %9202 = vst.msk [vmem:[%s16823_s16 + $0x88] sm:$0xff] %vm4713_vm5, %v9138_v45  ;;  %8699 = vmatmul.bf16.gmra.mxu1 %v11148_v1  ;;  %11762 = vmatmul.msk.bf16.gmra.mxu2 %vm2383_vm0, %v11056_v48  ;;  %v9076_v48 = vadd.f32 %v9012_v56, %v8948_v62  ;;  %v17927_v45 = vld [vmem:[#allocation39_spill] sm:$0xff] }
 0x73e   : > { %8391 = vmatmul.bf16.gmra.mxu3 %v11332_v41  ;;  %v11085_v41 = vld [vmem:[%s17836_s8 + $0x4b8] sm:$0xf0]  ;;  %v9013_v58 = vld [vmem:[%s16803_s13 + $0xa0] sm:$0xff] }
 0x73f   : > { %v9077_v56 = vadd.f32 %v9013_v58, %v8949_v55  ;;  %v17929_v55 = vld [vmem:[#allocation41_spill] sm:$0xff] }
 0x740   : > { %v8814_v35 = vpop.f32.mrf.mxu2  ;;  %v8523_v24 = vpop.f32.mrf.mxu0 }
 0x741   : > { %v8352_v51 = vpop.f32.mrf.mxu3  ;;  %v8815_v15 = vadd.f32 %v8814_v35, %v8646_v60  ;;  %v11364_v60 = vor.u32 %v12266_v42, %v11363_v54  ;;  %v17928_v54 = vld [vmem:[#allocation40_spill] sm:$0xff] }
 0x742   : > { %v8353_v22 = vadd.f32 %v8352_v51, %v17926_v17  ;;  %v17248_v32 = vpop.f32.mrf.mxu1  ;;  %v11088_v17 = vor.u32 %v12191_v43, %v11085_v41  ;;  %v8950_v41 = vld [vmem:[%s16797_s26 + $0xa8] sm:$0xff] }
 0x743   : > { %v9139_v31 = vsub.f32 %v8815_v15, %v9075_v40  ;;  %v11180_v40 = vor.u32 %v12219_v50, %v11179_v10 }
 0x744   : > { %v17246_v46 = vadd.f32 %v8521_v59, %v8353_v22  ;;  %v11368_v59 = vor.u32 %v12262_v11, %v11365_v57 }
 0x745   : > { %9203 = vst.msk [vmem:[%s16823_s16 + $0x90] sm:$0xff] %vm4713_vm5, %v9139_v31 }
 0x748   : > { %v8816_v33 = vpop.f32.mrf.mxu2  ;;  %v8526_v31 = vpop.f32.mrf.mxu0 }
 0x749   : > { %v8354_v1 = vpop.f32.mrf.mxu3  ;;  %v8817_v51 = vadd.f32 %v8816_v33, %v8648_v6  ;;  %v9014_v6 = vld [vmem:[%s16803_s13 + $0xa8] sm:$0xff]  ;;  %v11117_v33 = vld [vmem:[%s17836_s8 + $0x4f8] sm:$0xf0] }
 0x74a   : > { %v8355_v61 = vadd.f32 %v8354_v1, %v17927_v45  ;;  %v17283_v35 = vpop.f32.mrf.mxu1  ;;  %v11395_v1 = vld [vmem:[%s17836_s8 + $0x710] sm:$0xf]  ;;  %v12227_v45 = vld [vmem:[%s17836_s8 + $0x5b4] sm:$0xf0] }
 0x74b   : > { %v9140_v15 = vsub.f32 %v8817_v51, %v9076_v48  ;;  %8565 = vmatmul.bf16.gmra.mxu0 %v11368_v59  ;;  %v12274_v48 = vld [vmem:[%s17836_s8 + $0x72c] sm:$0xf0]  ;;  %v11211_v59 = vld [vmem:[%s17836_s8 + $0x598] sm:$0xf] }
 0x74c   : > { %v17281_v22 = vadd.f32 %v8523_v24, %v8355_v61  ;;  %v8651_v24 = vadd.f32 %v17142_v52, %v16870_v8  ;;  %v12270_v8 = vld [vmem:[%s17836_s8 + $0x714] sm:$0xf]  ;;  %v12199_v61 = vld [vmem:[%s17836_s8 + $0x4dc] sm:$0xf] }
 0x74d   : > { %9204 = vst.msk [vmem:[%s16823_s16 + $0x98] sm:$0xff] %vm4713_vm5, %v9140_v15  ;;  %8704 = vmatmul.bf16.gmra.mxu1 %v11180_v40  ;;  %11763 = vmatmul.msk.bf16.gmra.mxu2 %vm2383_vm0, %v11088_v17  ;;  %v11397_v52 = vld [vmem:[%s17836_s8 + $0x730] sm:$0xf0]  ;;  %v9078_v17 = vadd.f32 %v9014_v6, %v8950_v41 }
 0x74e   : > { %8396 = vmatmul.bf16.gmra.mxu3 %v11364_v60  ;;  %v8653_v60 = vadd.f32 %v17154_v14, %v16905_v4  ;;  %v11400_v15 = vor.u32 %v12270_v8, %v11397_v52  ;;  %v8951_v14 = vld [vmem:[%s16797_s26 + $0xb0] sm:$0xff] }
 0x750   : > { %v8819_v57 = vpop.f32.mrf.mxu2  ;;  %v8528_v40 = vpop.f32.mrf.mxu0 }
 0x751   : > { %v8357_v62 = vpop.f32.mrf.mxu3  ;;  %v8820_v42 = vadd.f32 %v8819_v57, %v8651_v24  ;;  %v11396_v24 = vor.u32 %v12274_v48, %v11395_v1  ;;  %v8952_v48 = vld [vmem:[%s16797_s26 + $0xb8] sm:$0xff] }
 0x752   : > { %v8358_v11 = vadd.f32 %v8357_v62, %v17928_v54  ;;  %v17295_v50 = vpop.f32.mrf.mxu1  ;;  %v11120_v54 = vor.u32 %v12199_v61, %v11117_v33  ;;  %v12278_v61 = vld [vmem:[%s17836_s8 + $0x754] sm:$0xf]  ;;  %v11243_v33 = vld [vmem:[%s17836_s8 + $0x5d8] sm:$0xf] }
 0x753   : > { %v9141_v43 = vsub.f32 %v8820_v42, %v9077_v56  ;;  %v11212_v56 = vor.u32 %v12227_v45, %v11211_v59  ;;  %v9015_v42 = vld [vmem:[%s16803_s13 + $0xb0] sm:$0xff]  ;;  %v9016_v59 = vld [vmem:[%s16803_s13 + $0xb8] sm:$0xff] }
 0x754   : > { %v17293_v10 = vadd.f32 %v8526_v31, %v8358_v11  ;;  %v9079_v41 = vadd.f32 %v9015_v42, %v8951_v14  ;;  %v11427_v45 = vld [vmem:[%s17836_s8 + $0x750] sm:$0xf]  ;;  %v8953_v14 = vld [vmem:[%s16797_s26 + $0xc0] sm:$0xff] }
 0x755   : > { %9205 = vst.msk [vmem:[%s16823_s16 + $0xa0] sm:$0xff] %vm4713_vm5, %v9141_v43  ;;  %v8656_v43 = vadd.f32 %v17189_v21, %v16917_v16  ;;  %v11429_v16 = vld [vmem:[%s17836_s8 + $0x770] sm:$0xf0]  ;;  %v12282_v21 = vld [vmem:[%s17836_s8 + $0x76c] sm:$0xf0]  ;;  %v9017_v42 = vld [vmem:[%s16803_s13 + $0xc0] sm:$0xff] }
 0x758   : > { %v8821_v31 = vpop.f32.mrf.mxu2 }
 0x759   : > { %v8359_v51 = vpop.f32.mrf.mxu3  ;;  %v8822_v62 = vadd.f32 %v8821_v31, %v8653_v60  ;;  %v12235_v60 = vld [vmem:[%s17836_s8 + $0x5f4] sm:$0xf0]  ;;  %v11428_v31 = vor.u32 %v12282_v21, %v11427_v45  ;;  %v12286_v45 = vld [vmem:[%s17836_s8 + $0x794] sm:$0xf]  ;;  %v12215_v21 = vld [vmem:[%s17836_s8 + $0x55c] sm:$0xf] }
 0x75a   : > { %v8360_v58 = vadd.f32 %v8359_v51, %v17929_v55  ;;  %v17330_v57 = vpop.f32.mrf.mxu1  ;;  %v12207_v51 = vld [vmem:[%s17836_s8 + $0x51c] sm:$0xf]  ;;  %v11432_v55 = vor.u32 %v12278_v61, %v11429_v16  ;;  %v11275_v61 = vld [vmem:[%s17836_s8 + $0x618] sm:$0xf] }
 0x75b   : > { %v9142_v4 = vsub.f32 %v8822_v62, %v9078_v17  ;;  %8570 = vmatmul.bf16.gmra.mxu0 %v11400_v15  ;;  %v8658_v17 = vadd.f32 %v17201_v20, %v16952_v26  ;;  %v9080_v15 = vadd.f32 %v9016_v59, %v8952_v48  ;;  %v11244_v62 = vor.u32 %v12235_v60, %v11243_v33  ;;  %v9018_v48 = vld [vmem:[%s16803_s13 + $0xc8] sm:$0xff]  ;;  %v11459_v59 = vld [vmem:[%s17836_s8 + $0x790] sm:$0xf]  ;;  %v12243_v16 = vld [vmem:[%s17836_s8 + $0x634] sm:$0xf0] }
 0x75c   : > { %v17328_v11 = vadd.f32 %v8528_v40, %v8360_v58  ;;  %v11149_v40 = vld [vmem:[%s17836_s8 + $0x538] sm:$0xf0]  ;;  %v8661_v26 = vadd.f32 %v17236_v38, %v16964_v13  ;;  %v9081_v20 = vadd.f32 %v9017_v42, %v8953_v14  ;;  %v11461_v13 = vld [vmem:[%s17836_s8 + $0x7b0] sm:$0xf0]  ;;  %v12290_v38 = vld [vmem:[%s17836_s8 + $0x7ac] sm:$0xf0]  ;;  %v8663_v60 = vadd.f32 %v17248_v32, %v16999_v53 }
 0x75d   : > { %9206 = vst.msk [vmem:[%s16823_s16 + $0xa8] sm:$0xff] %vm4713_vm5, %v9142_v4  ;;  %8709 = vmatmul.bf16.gmra.mxu1 %v11212_v56  ;;  %11764 = vmatmul.msk.bf16.gmra.mxu2 %vm2383_vm0, %v11120_v54  ;;  %v11152_v56 = vor.u32 %v12207_v51, %v11149_v40  ;;  %v11181_v33 = vld [vmem:[%s17836_s8 + $0x578] sm:$0xf0]  ;;  %v11464_v40 = vor.u32 %v12286_v45, %v11461_v13 }
 0x75e   : > { %8401 = vmatmul.bf16.gmra.mxu3 %v11396_v24  ;;  %v8666_v53 = vadd.f32 %v17283_v35, %v17011_v36  ;;  %v11493_v36 = vld [vmem:[%s17836_s8 + $0x7f0] sm:$0xf0]  ;;  %v12298_v35 = vld [vmem:[%s17836_s8 + $0x7ec] sm:$0xf0]  ;;  %v12223_v45 = vld [vmem:[%s17836_s8 + $0x59c] sm:$0xf] }
 0x75f   : > { %v11213_v13 = vld [vmem:[%s17836_s8 + $0x5b8] sm:$0xf0] }
 0x760   : > { %v8824_v6 = vpop.f32.mrf.mxu2 }
 0x761   : > { %v8825_v1 = vadd.f32 %v8824_v6, %v8656_v43 }
 0x762   : > { %v17339_v8 = vpop.f32.mrf.mxu1 }
 0x763   : > { %v9143_v52 = vsub.f32 %v8825_v1, %v9079_v41 }
 0x765   : > { %9207 = vst.msk [vmem:[%s16823_s16 + $0xb0] sm:$0xff] %vm4713_vm5, %v9143_v52  ;;  %v8954_v52 = vld [vmem:[%s16797_s26 + $0xc8] sm:$0xff] }
 0x766   : > { %v9082_v51 = vadd.f32 %v9018_v48, %v8954_v52  ;;  %v12294_v52 = vld [vmem:[%s17836_s8 + $0x7d4] sm:$0xf]  ;;  %v11307_v48 = vld [vmem:[%s17836_s8 + $0x658] sm:$0xf] }
 0x768   : > { %v8826_v58 = vpop.f32.mrf.mxu2 }
 0x769   : > { %v8827_v24 = vadd.f32 %v8826_v58, %v8658_v17  ;;  %v11276_v58 = vor.u32 %v12243_v16, %v11275_v61  ;;  %v11496_v16 = vor.u32 %v12294_v52, %v11493_v36 }
 0x76a   : > { %v17371_v54 = vpop.f32.mrf.mxu1 }
 0x76b   : > { %v9144_v4 = vsub.f32 %v8827_v24, %v9080_v15  ;;  %8575 = vmatmul.bf16.gmra.mxu0 %v11432_v55  ;;  %v11460_v15 = vor.u32 %v12290_v38, %v11459_v59  ;;  %v12251_v59 = vld [vmem:[%s17836_s8 + $0x674] sm:$0xf0]  ;;  %v8668_v38 = vadd.f32 %v17295_v50, %v17046_v47  ;;  %v8671_v47 = vadd.f32 %v17330_v57, %v17058_v2  ;;  %v12231_v57 = vld [vmem:[%s17836_s8 + $0x5dc] sm:$0xf] }
 0x76c   : > { %v12259_v2 = vld [vmem:[%s17836_s8 + $0x6b4] sm:$0xf0] }
 0x76d   : > { %9208 = vst.msk [vmem:[%s16823_s16 + $0xb8] sm:$0xff] %vm4713_vm5, %v9144_v4  ;;  %8714 = vmatmul.bf16.gmra.mxu1 %v11244_v62  ;;  %11765 = vmatmul.msk.bf16.gmra.mxu2 %vm2383_vm0, %v11152_v56  ;;  %v8955_v56 = vld [vmem:[%s16797_s26 + $0xd0] sm:$0xff] }
 0x76e   : > { %8406 = vmatmul.bf16.gmra.mxu3 %v11428_v31  ;;  %v11184_v31 = vor.u32 %v12215_v21, %v11181_v33  ;;  %v9019_v4 = vld [vmem:[%s16803_s13 + $0xd0] sm:$0xff] }
 0x76f   : > { %v9083_v32 = vadd.f32 %v9019_v4, %v8955_v56 }
 0x770   : > { %v8829_v43 = vpop.f32.mrf.mxu2 }
 0x771   : > { %v8830_v41 = vadd.f32 %v8829_v43, %v8661_v26  ;;  %v8956_v43 = vld [vmem:[%s16797_s26 + $0xd8] sm:$0xff] }
 0x772   : > { %v17380_v6 = vpop.f32.mrf.mxu1 }
 0x773   : > { %v9145_v1 = vsub.f32 %v8830_v41, %v9081_v20  ;;  %v9020_v41 = vld [vmem:[%s16803_s13 + $0xd8] sm:$0xff] }
 0x774   : > { %v9084_v61 = vadd.f32 %v9020_v41, %v8956_v43 }
 0x775   : > { %9209 = vst.msk [vmem:[%s16823_s16 + $0xc0] sm:$0xff] %vm4713_vm5, %v9145_v1  ;;  %v11491_v1 = vld [vmem:[%s17836_s8 + $0x7d0] sm:$0xf] }
 0x776   : > { %v11492_v33 = vor.u32 %v12298_v35, %v11491_v1 }
 0x778   : > { %v8831_v17 = vpop.f32.mrf.mxu2 }
 0x779   : > { %v8832_v55 = vadd.f32 %v8831_v17, %v8663_v60 }
 0x77a   : > { %v17412_v24 = vpop.f32.mrf.mxu1 }
 0x77b   : > { %v9146_v62 = vsub.f32 %v8832_v55, %v9082_v51  ;;  %8580 = vmatmul.bf16.gmra.mxu0 %v11464_v40  ;;  %v11308_v51 = vor.u32 %v12251_v59, %v11307_v48  ;;  %v11216_v40 = vor.u32 %v12223_v45, %v11213_v13  ;;  %v8957_v55 = vld [vmem:[%s16797_s26 + $0xe0] sm:$0xff]  ;;  %v8959_v59 = vld [vmem:[%s16797_s26 + $0xf0] sm:$0xff] }
 0x77c   : > { %v9023_v45 = vld [vmem:[%s16803_s13 + $0xf0] sm:$0xff] }
 0x77d   : > { %9210 = vst.msk [vmem:[%s16823_s16 + $0xc8] sm:$0xff] %vm4713_vm5, %v9146_v62  ;;  %8719 = vmatmul.bf16.gmra.mxu1 %v11276_v58  ;;  %11766 = vmatmul.msk.bf16.gmra.mxu2 %vm2383_vm0, %v11184_v31  ;;  %v9021_v58 = vld [vmem:[%s16803_s13 + $0xe0] sm:$0xff] }
 0x77e   : > { %8411 = vmatmul.bf16.gmra.mxu3 %v11460_v15  ;;  %v9085_v50 = vadd.f32 %v9021_v58, %v8957_v55 }
 0x780   : > { %v8834_v14 = vpop.f32.mrf.mxu2 }
 0x781   : > { %v8835_v42 = vadd.f32 %v8834_v14, %v8666_v53  ;;  %v8958_v53 = vld [vmem:[%s16797_s26 + $0xe8] sm:$0xff]  ;;  %v11339_v14 = vld [vmem:[%s17836_s8 + $0x698] sm:$0xf] }
 0x782   : > { %v17421_v26 = vpop.f32.mrf.mxu1  ;;  %v11340_v52 = vor.u32 %v12259_v2, %v11339_v14 }
 0x783   : > { %v9147_v20 = vsub.f32 %v8835_v42, %v9083_v32  ;;  %v9022_v32 = vld [vmem:[%s16803_s13 + $0xe8] sm:$0xff]  ;;  %v11245_v42 = vld [vmem:[%s17836_s8 + $0x5f8] sm:$0xf0] }
 0x784   : > { %v9086_v43 = vadd.f32 %v9022_v32, %v8958_v53  ;;  %v11248_v36 = vor.u32 %v12231_v57, %v11245_v42  ;;  %v9025_v53 = vld [vmem:[%s16803_s13 + $0x100] sm:$0xff]  ;;  %v8962_v42 = vld [vmem:[%s16797_s26 + $0x108] sm:$0xff] }
 0x785   : > { %9211 = vst.msk [vmem:[%s16823_s16 + $0xd0] sm:$0xff] %vm4713_vm5, %v9147_v20  ;;  %v8673_v20 = vadd.f32 %v17339_v8, %v17093_v34  ;;  %v8676_v34 = vadd.f32 %v17371_v54, %v17105_v3  ;;  %v9087_v8 = vadd.f32 %v9023_v45, %v8959_v59  ;;  %v12267_v3 = vld [vmem:[%s17836_s8 + $0x6f4] sm:$0xf0]  ;;  %v12239_v54 = vld [vmem:[%s17836_s8 + $0x61c] sm:$0xf] }
 0x788   : > { %v8836_v21 = vpop.f32.mrf.mxu2 }
 0x789   : > { %v8837_v60 = vadd.f32 %v8836_v21, %v8668_v38  ;;  %v8960_v21 = vld [vmem:[%s16797_s26 + $0xf8] sm:$0xff] }
 0x78a   : > { %v17453_v17 = vpop.f32.mrf.mxu1 }
 0x78b   : > { %v9148_v15 = vsub.f32 %v8837_v60, %v9084_v61  ;;  %8585 = vmatmul.bf16.gmra.mxu0 %v11496_v16  ;;  %v11371_v60 = vld [vmem:[%s17836_s8 + $0x6d8] sm:$0xf] }
 0x78d   : > { %9212 = vst.msk [vmem:[%s16823_s16 + $0xd8] sm:$0xff] %vm4713_vm5, %v9148_v15  ;;  %8724 = vmatmul.bf16.gmra.mxu1 %v11308_v51  ;;  %11767 = vmatmul.msk.bf16.gmra.mxu2 %vm2383_vm0, %v11216_v40  ;;  %v11277_v51 = vld [vmem:[%s17836_s8 + $0x638] sm:$0xf0]  ;;  %v8678_v40 = vadd.f32 %v17380_v6, %v17140_v30  ;;  %v8681_v30 = vadd.f32 %v17412_v24, %v17152_v12  ;;  %v12275_v12 = vld [vmem:[%s17836_s8 + $0x734] sm:$0xf0] }
 0x78e   : > { %8416 = vmatmul.bf16.gmra.mxu3 %v11492_v33  ;;  %v9024_v33 = vld [vmem:[%s16803_s13 + $0xf8] sm:$0xff] }
 0x78f   : > { %v9088_v15 = vadd.f32 %v9024_v33, %v8960_v21  ;;  %v12247_v24 = vld [vmem:[%s17836_s8 + $0x65c] sm:$0xf] }
 0x790   : > { %v8839_v31 = vpop.f32.mrf.mxu2 }
 0x791   : > { %v8840_v62 = vadd.f32 %v8839_v31, %v8671_v47  ;;  %v11372_v47 = vor.u32 %v12267_v3, %v11371_v60 }
 0x792   : > { %v17462_v56 = vpop.f32.mrf.mxu1 }
 0x793   : > { %v9149_v4 = vsub.f32 %v8840_v62, %v9085_v50  ;;  %v11280_v50 = vor.u32 %v12239_v54, %v11277_v51  ;;  %v8964_v51 = vld [vmem:[%s16797_s26 + $0x118] sm:$0xff] }
 0x795   : > { %9213 = vst.msk [vmem:[%s16823_s16 + $0xe0] sm:$0xff] %vm4713_vm5, %v9149_v4  ;;  %v8961_v4 = vld [vmem:[%s16797_s26 + $0x100] sm:$0xff] }
 0x796   : > { %v9089_v6 = vadd.f32 %v9025_v53, %v8961_v4 }
 0x798   : > { %v8841_v41 = vpop.f32.mrf.mxu2 }
 0x799   : > { %v8842_v1 = vadd.f32 %v8841_v41, %v8673_v20  ;;  %v9026_v20 = vld [vmem:[%s16803_s13 + $0x108] sm:$0xff]  ;;  %v11309_v41 = vld [vmem:[%s17836_s8 + $0x678] sm:$0xf0] }
 0x79a   : > { %v17482_v35 = vpop.f32.mrf.mxu1 }
 0x79b   : > { %v9150_v48 = vsub.f32 %v8842_v1, %v9086_v43  ;;  %v11403_v43 = vld [vmem:[%s17836_s8 + $0x718] sm:$0xf]  ;;  %v8683_v1 = vadd.f32 %v17421_v26, %v17187_v29  ;;  %v8686_v26 = vadd.f32 %v17453_v17, %v17199_v63  ;;  %v12255_v17 = vld [vmem:[%s17836_s8 + $0x69c] sm:$0xf] }
 0x79c   : > { %v11404_v45 = vor.u32 %v12275_v12, %v11403_v43  ;;  %v12283_v63 = vld [vmem:[%s17836_s8 + $0x774] sm:$0xf0] }
 0x79d   : > { %9214 = vst.msk [vmem:[%s16823_s16 + $0xe8] sm:$0xff] %vm4713_vm5, %v9150_v48  ;;  %8729 = vmatmul.bf16.gmra.mxu1 %v11340_v52  ;;  %11768 = vmatmul.msk.bf16.gmra.mxu2 %vm2383_vm0, %v11248_v36  ;;  %v9090_v52 = vadd.f32 %v9026_v20, %v8962_v42  ;;  %v17540_v36 = vpop.f32.mrf.mxu3  ;;  %v9029_v42 = vld [vmem:[%s16803_s13 + $0x120] sm:$0xff] }
 0x7a0   : > { %v8844_v13 = vpop.f32.mrf.mxu2 }
 0x7a1   : > { %v8845_v38 = vadd.f32 %v8844_v13, %v8676_v34  ;;  %v11312_v34 = vor.u32 %v12247_v24, %v11309_v41  ;;  %v17542_v13 = vpop.f32.mrf.mxu0 }
 0x7a2   : > { %v17491_v61 = vpop.f32.mrf.mxu1 }
 0x7a3   : > { %v9151_v16 = vsub.f32 %v8845_v38, %v9087_v8  ;;  %v8963_v38 = vld [vmem:[%s16797_s26 + $0x110] sm:$0xff] }
 0x7a5   : > { %9215 = vst.msk [vmem:[%s16823_s16 + $0xf0] sm:$0xff] %vm4713_vm5, %v9151_v16  ;;  %v9027_v16 = vld [vmem:[%s16803_s13 + $0x110] sm:$0xff]  ;;  %v17553_v3 = vpop.f32.mrf.mxu3 }
 0x7a6   : > { %v9091_v21 = vadd.f32 %v9027_v16, %v8963_v38 }
 0x7a8   : > { %v8846_v55 = vpop.f32.mrf.mxu2 }
 0x7a9   : > { %v8847_v58 = vadd.f32 %v8846_v55, %v8678_v40  ;;  %v9028_v40 = vld [vmem:[%s16803_s13 + $0x118] sm:$0xff]  ;;  %v17562_v55 = vpop.f32.mrf.mxu0 }
 0x7aa   : > { %v17511_v31 = vpop.f32.mrf.mxu1 }
 0x7ab   : > { %v9152_v62 = vsub.f32 %v8847_v58, %v9088_v15  ;;  %v11435_v15 = vld [vmem:[%s17836_s8 + $0x758] sm:$0xf]  ;;  %v11341_v58 = vld [vmem:[%s17836_s8 + $0x6b8] sm:$0xf0] }
 0x7ad   : > { %9216 = vst.msk [vmem:[%s16823_s16 + $0xf8] sm:$0xff] %vm4713_vm5, %v9152_v62  ;;  %8734 = vmatmul.bf16.gmra.mxu1 %v11372_v47  ;;  %11769 = vmatmul.msk.bf16.gmra.mxu2 %vm2383_vm0, %v11280_v50  ;;  %v8688_v47 = vadd.f32 %v17462_v56, %v17234_v27  ;;  %v9092_v50 = vadd.f32 %v9028_v40, %v8964_v51  ;;  %v8967_v51 = vld [vmem:[%s16797_s26 + $0x130] sm:$0xff] }
 0x7ae   : > { %v8691_v27 = vadd.f32 %v17482_v35, %v17246_v46  ;;  %v12291_v35 = vld [vmem:[%s17836_s8 + $0x7b4] sm:$0xf0]  ;;  %v9031_v40 = vld [vmem:[%s16803_s13 + $0x130] sm:$0xff] }
 0x7b0   : > { %v8849_v32 = vpop.f32.mrf.mxu2 }
 0x7b1   : > { %v8850_v14 = vadd.f32 %v8849_v32, %v8681_v30  ;;  %v11436_v30 = vor.u32 %v12283_v63, %v11435_v15  ;;  %v17586_v20 = vpop.f32.mrf.mxu0 }
 0x7b2   : > { %v17520_v57 = vpop.f32.mrf.mxu1 }
 0x7b3   : > { %v9153_v2 = vsub.f32 %v8850_v14, %v9089_v6  ;;  %v11344_v6 = vor.u32 %v12255_v17, %v11341_v58  ;;  %v17577_v14 = vpop.f32.mrf.mxu3 }
 0x7b5   : > { %9217 = vst.msk [vmem:[%s16823_s16 + $0x100] sm:$0xff] %vm4713_vm5, %v9153_v2  ;;  %v8965_v2 = vld [vmem:[%s16797_s26 + $0x120] sm:$0xff] }
 0x7b6   : > { %v9093_v56 = vadd.f32 %v9029_v42, %v8965_v2 }
 0x7b8   : > { %v8851_v48 = vpop.f32.mrf.mxu2 }
 0x7b9   : > { %v8852_v59 = vadd.f32 %v8851_v48, %v8683_v1  ;;  %v8966_v1 = vld [vmem:[%s16797_s26 + $0x128] sm:$0xff]  ;;  %v11467_v48 = vld [vmem:[%s17836_s8 + $0x798] sm:$0xf] }
 0x7ba   : > { %v17549_v29 = vpop.f32.mrf.mxu1 }
 0x7bb   : > { %v9154_v8 = vsub.f32 %v8852_v59, %v9090_v52  ;;  %v9030_v52 = vld [vmem:[%s16803_s13 + $0x128] sm:$0xff]  ;;  %v17597_v46 = vpop.f32.mrf.mxu3  ;;  %v12263_v59 = vld [vmem:[%s17836_s8 + $0x6dc] sm:$0xf] }
 0x7bd   : > { %9218 = vst.msk [vmem:[%s16823_s16 + $0x108] sm:$0xff] %vm4713_vm5, %v9154_v8  ;;  %8739 = vmatmul.bf16.gmra.mxu1 %v11404_v45  ;;  %11770 = vmatmul.msk.bf16.gmra.mxu2 %vm2383_vm0, %v11312_v34  ;;  %v11373_v45 = vld [vmem:[%s17836_s8 + $0x6f8] sm:$0xf0]  ;;  %v8693_v34 = vadd.f32 %v17491_v61, %v17281_v22  ;;  %v9094_v8 = vadd.f32 %v9030_v52, %v8966_v1 }
 0x7be   : > { %v8696_v22 = vadd.f32 %v17511_v31, %v17293_v10  ;;  %v9095_v61 = vadd.f32 %v9031_v40, %v8967_v51  ;;  %v12299_v10 = vld [vmem:[%s17836_s8 + $0x7f4] sm:$0xf0]  ;;  %v12271_v31 = vld [vmem:[%s17836_s8 + $0x71c] sm:$0xf] }
 0x7c0   : > { %v8854_v33 = vpop.f32.mrf.mxu2 }
 0x7c1   : > { %v8855_v60 = vadd.f32 %v8854_v33, %v8686_v26  ;;  %v11468_v26 = vor.u32 %v12291_v35, %v11467_v48  ;;  %v17610_v33 = vpop.f32.mrf.mxu0  ;;  %v8969_v48 = vld [vmem:[%s16797_s26 + $0x140] sm:$0xff] }
 0x7c2   : > { %v17575_v62 = vpop.f32.mrf.mxu1  ;;  %v9033_v35 = vld [vmem:[%s16803_s13 + $0x140] sm:$0xff] }
 0x7c3   : > { %v9155_v54 = vsub.f32 %v8855_v60, %v9091_v21  ;;  %v11376_v21 = vor.u32 %v12263_v59, %v11373_v45  ;;  %v17621_v15 = vpop.f32.mrf.mxu3 }
 0x7c5   : > { %9219 = vst.msk [vmem:[%s16823_s16 + $0x110] sm:$0xff] %vm4713_vm5, %v9155_v54 }
 0x7c8   : > { %v8856_v4 = vpop.f32.mrf.mxu2 }
 0x7c9   : > { %v8857_v53 = vadd.f32 %v8856_v4, %v8688_v47  ;;  %v17623_v47 = vpop.f32.mrf.mxu0  ;;  %v9032_v4 = vld [vmem:[%s16803_s13 + $0x138] sm:$0xff] }
 0x7ca   : > { %v17588_v24 = vpop.f32.mrf.mxu1 }
 0x7cb   : > { %v9156_v32 = vsub.f32 %v8857_v53, %v9092_v50  ;;  %v8968_v50 = vld [vmem:[%s16797_s26 + $0x138] sm:$0xff]  ;;  %v17647_v1 = vpop.f32.mrf.mxu3 }
 0x7cc   : > { %v11499_v53 = vld [vmem:[%s17836_s8 + $0x7d8] sm:$0xf]  ;;  %v9096_v2 = vadd.f32 %v9032_v4, %v8968_v50 }
 0x7cd   : > { %9220 = vst.msk [vmem:[%s16823_s16 + $0x118] sm:$0xff] %vm4713_vm5, %v9156_v32  ;;  %8744 = vmatmul.bf16.gmra.mxu1 %v11436_v30  ;;  %11771 = vmatmul.msk.bf16.gmra.mxu2 %vm2383_vm0, %v11344_v6  ;;  %v11405_v6 = vld [vmem:[%s17836_s8 + $0x738] sm:$0xf0]  ;;  %v8698_v32 = vadd.f32 %v17520_v57, %v17328_v11 }
 0x7d0   : > { %v8859_v43 = vpop.f32.mrf.mxu2 }
 0x7d1   : > { %v8860_v12 = vadd.f32 %v8859_v43, %v8691_v27  ;;  %v17930_v27 = vld [vmem:[#allocation42_spill] sm:$0xff]  ;;  %v17655_v11 = vpop.f32.mrf.mxu0 }
 0x7d2   : > { %v17612_v54 = vpop.f32.mrf.mxu1 }
 0x7d3   : > { %v9157_v41 = vsub.f32 %v8860_v12, %v9093_v56  ;;  %v8363_v56 = vadd.f32 %v17540_v36, %v17930_v27  ;;  %v11500_v12 = vor.u32 %v12299_v10, %v11499_v53  ;;  %v9097_v36 = vadd.f32 %v9033_v35, %v8969_v48  ;;  %v8971_v10 = vld [vmem:[%s16797_s26 + $0x150] sm:$0xff] }
 0x7d5   : > { %9221 = vst.msk [vmem:[%s16823_s16 + $0x120] sm:$0xff] %vm4713_vm5, %v9157_v41  ;;  %v11408_v41 = vor.u32 %v12271_v31, %v11405_v6  ;;  %v8532_v59 = vadd.f32 %v17542_v13, %v8363_v56  ;;  %v17662_v13 = vpop.f32.mrf.mxu3  ;;  %v9035_v31 = vld [vmem:[%s16803_s13 + $0x150] sm:$0xff] }
 0x7d7   : > { %v8701_v57 = vadd.f32 %v17549_v29, %v8532_v59  ;;  %v12279_v29 = vld [vmem:[%s17836_s8 + $0x75c] sm:$0xf] }
 0x7d8   : > { %v8861_v38 = vpop.f32.mrf.mxu2 }
 0x7d9   : > { %v8862_v16 = vadd.f32 %v8861_v38, %v8693_v34 }
 0x7da   : > { %v17632_v30 = vpop.f32.mrf.mxu1 }
 0x7db   : > { %v9158_v60 = vsub.f32 %v8862_v16, %v9094_v8  ;;  %v17931_v8 = vld [vmem:[#allocation43_spill] sm:$0xff] }
 0x7dc   : > { %v8365_v38 = vadd.f32 %v17553_v3, %v17931_v8  ;;  %v11437_v3 = vld [vmem:[%s17836_s8 + $0x778] sm:$0xf0] }
 0x7dd   : > { %9222 = vst.msk [vmem:[%s16823_s16 + $0x128] sm:$0xff] %vm4713_vm5, %v9158_v60  ;;  %8749 = vmatmul.bf16.gmra.mxu1 %v11468_v26  ;;  %11772 = vmatmul.msk.bf16.gmra.mxu2 %vm2383_vm0, %v11376_v21  ;;  %v8970_v21 = vld [vmem:[%s16797_s26 + $0x148] sm:$0xff]  ;;  %v11440_v50 = vor.u32 %v12279_v29, %v11437_v3 }
 0x7de   : > { %v9034_v60 = vld [vmem:[%s16803_s13 + $0x148] sm:$0xff]  ;;  %v8534_v51 = vadd.f32 %v17562_v55, %v8365_v38 }
 0x7e0   : > { %v8864_v63 = vpop.f32.mrf.mxu2  ;;  %v8703_v40 = vadd.f32 %v17575_v62, %v8534_v51  ;;  %v8379_v62 = vpop.f32.mrf.mxu3 }
 0x7e1   : > { %v8865_v17 = vadd.f32 %v8864_v63, %v8696_v22  ;;  %v9098_v22 = vadd.f32 %v9034_v60, %v8970_v21  ;;  %v8973_v21 = vld [vmem:[%s16797_s26 + $0x160] sm:$0xff] }
 0x7e2   : > { %v17658_v45 = vpop.f32.mrf.mxu1  ;;  %v9037_v60 = vld [vmem:[%s16803_s13 + $0x160] sm:$0xff] }
 0x7e3   : > { %v9159_v58 = vsub.f32 %v8865_v17, %v9095_v61  ;;  %v17676_v61 = vpop.f32.mrf.mxu0  ;;  %v17932_v17 = vld [vmem:[#allocation44_spill] sm:$0xff]  ;;  %v9101_v3 = vadd.f32 %v9037_v60, %v8973_v21 }
 0x7e4   : > { %v8368_v55 = vadd.f32 %v17577_v14, %v17932_v17  ;;  %v9099_v14 = vadd.f32 %v9035_v31, %v8971_v10 }
 0x7e5   : > { %9223 = vst.msk [vmem:[%s16823_s16 + $0x130] sm:$0xff] %vm4713_vm5, %v9159_v58 }
 0x7e6   : > { %v8537_v6 = vadd.f32 %v17586_v20, %v8368_v55  ;;  %v9036_v20 = vld [vmem:[%s16803_s13 + $0x158] sm:$0xff] }
 0x7e8   : > { %v8866_v42 = vpop.f32.mrf.mxu2 }
 0x7e9   : > { %v8867_v43 = vadd.f32 %v8866_v42, %v8698_v32  ;;  %v8706_v32 = vadd.f32 %v17588_v24, %v8537_v6  ;;  %v17933_v42 = vld [vmem:[#allocation45_spill] sm:$0xff]  ;;  %v12287_v24 = vld [vmem:[%s17836_s8 + $0x79c] sm:$0xf] }
 0x7ea   : > { %v17680_v4 = vpop.f32.mrf.mxu1  ;;  %v8370_v27 = vadd.f32 %v17597_v46, %v17933_v42  ;;  %v11469_v46 = vld [vmem:[%s17836_s8 + $0x7b8] sm:$0xf0] }
 0x7eb   : > { %v9160_v52 = vsub.f32 %v8867_v43, %v9096_v2  ;;  %v8548_v43 = vpop.f32.mrf.mxu0  ;;  %v11472_v38 = vor.u32 %v12287_v24, %v11469_v46  ;;  %v8380_v46 = vadd.f32 %v8379_v62, %v16435_v18 }
 0x7ec   : > { %v8539_v48 = vadd.f32 %v17610_v33, %v8370_v27 }
 0x7ed   : > { %9224 = vst.msk [vmem:[%s16823_s16 + $0x138] sm:$0xff] %vm4713_vm5, %v9160_v52  ;;  %8754 = vmatmul.bf16.gmra.mxu1 %v11500_v12  ;;  %11773 = vmatmul.msk.bf16.gmra.mxu2 %vm2383_vm0, %v11408_v41  ;;  %v8972_v52 = vld [vmem:[%s16797_s26 + $0x158] sm:$0xff] }
 0x7ee   : > { %v8708_v35 = vadd.f32 %v17612_v54, %v8539_v48  ;;  %v9100_v59 = vadd.f32 %v9036_v20, %v8972_v52  ;;  %v9039_v52 = vld [vmem:[%s16803_s13 + $0x170] sm:$0xff] }
 0x7f0   : > { %v8869_v34 = vpop.f32.mrf.mxu2 }
 0x7f1   : > { %v8870_v16 = vadd.f32 %v8869_v34, %v8701_v57  ;;  %v8382_v57 = vpop.f32.mrf.mxu3  ;;  %v17934_v34 = vld [vmem:[#allocation46_spill] sm:$0xff] }
 0x7f2   : > { %v17691_v41 = vpop.f32.mrf.mxu1  ;;  %v8373_v8 = vadd.f32 %v17621_v15, %v17934_v34  ;;  %v8976_v34 = vld [vmem:[%s16797_s26 + $0x178] sm:$0xff]  ;;  %v8383_v21 = vadd.f32 %v8382_v57, %v16445_v37 }
 0x7f3   : > { %v9161_v26 = vsub.f32 %v8870_v16, %v9097_v36 }
 0x7f4   : > { %v8542_v51 = vadd.f32 %v17623_v47, %v8373_v8  ;;  %v9040_v8 = vld [vmem:[%s16803_s13 + $0x178] sm:$0xff] }
 0x7f5   : > { %9225 = vst.msk [vmem:[%s16823_s16 + $0x140] sm:$0xff] %vm4713_vm5, %v9161_v26  ;;  %v8551_v26 = vpop.f32.mrf.mxu0 }
 0x7f6   : > { %v8711_v29 = vadd.f32 %v17632_v30, %v8542_v51  ;;  %v12295_v30 = vld [vmem:[%s17836_s8 + $0x7dc] sm:$0xf] }
 0x7f8   : > { %v8871_v63 = vpop.f32.mrf.mxu2 }
 0x7f9   : > { %v8872_v58 = vadd.f32 %v8871_v63, %v8703_v40  ;;  %v17935_v40 = vld [vmem:[#allocation47_spill] sm:$0xff]  ;;  %v8384_v17 = vpop.f32.mrf.mxu3 }
 0x7fa   : > { %v8720_v54 = vpop.f32.mrf.mxu1 }
 0x7fb   : > { %v9162_v53 = vsub.f32 %v8872_v58, %v9098_v22  ;;  %v8375_v22 = vadd.f32 %v17647_v1, %v17935_v40  ;;  %v8974_v58 = vld [vmem:[%s16797_s26 + $0x168] sm:$0xff]  ;;  %v11501_v1 = vld [vmem:[%s17836_s8 + $0x7f8] sm:$0xf0] }
 0x7fc   : > { %v11504_v42 = vor.u32 %v12295_v30, %v11501_v1 }
 0x7fd   : > { %9226 = vst.msk [vmem:[%s16823_s16 + $0x148] sm:$0xff] %vm4713_vm5, %v9162_v53  ;;  %11774 = vmatmul.msk.bf16.gmra.mxu2 %vm2383_vm0, %v11440_v50  ;;  %v9038_v50 = vld [vmem:[%s16803_s13 + $0x168] sm:$0xff]  ;;  %v8544_v47 = vadd.f32 %v17655_v11, %v8375_v22  ;;  %v8553_v53 = vpop.f32.mrf.mxu0 }
 0x7fe   : > { %v9102_v31 = vadd.f32 %v9038_v50, %v8974_v58  ;;  %v8978_v58 = vld [vmem:[%s16797_s26 + $0x188] sm:$0xff] }
 0x7ff   : > { %v8713_v10 = vadd.f32 %v17658_v45, %v8544_v47  ;;  %v9042_v50 = vld [vmem:[%s16803_s13 + $0x188] sm:$0xff] }
 0x800   : > { %v8874_v2 = vpop.f32.mrf.mxu2  ;;  %v9106_v1 = vadd.f32 %v9042_v50, %v8978_v58  ;;  %v9047_v58 = vld [vmem:[%s16803_s13 + $0x1b0] sm:$0xff] }
 0x801   : > { %v8875_v56 = vadd.f32 %v8874_v2, %v8706_v32 }
 0x802   : > { %v8722_v6 = vpop.f32.mrf.mxu1 }
 0x803   : > { %v9163_v12 = vsub.f32 %v8875_v56, %v9099_v14  ;;  %v17936_v14 = vld [vmem:[#allocation48_spill] sm:$0xff]  ;;  %v8387_v56 = vpop.f32.mrf.mxu3 }
 0x804   : > { %v8378_v11 = vadd.f32 %v17662_v13, %v17936_v14  ;;  %v9043_v14 = vld [vmem:[%s16803_s13 + $0x190] sm:$0xff] }
 0x805   : > { %9227 = vst.msk [vmem:[%s16823_s16 + $0x150] sm:$0xff] %vm4713_vm5, %v9163_v12  ;;  %v8975_v12 = vld [vmem:[%s16797_s26 + $0x170] sm:$0xff]  ;;  %v8556_v24 = vpop.f32.mrf.mxu0 }
 0x806   : > { %v8547_v20 = vadd.f32 %v17676_v61, %v8378_v11  ;;  %v9103_v48 = vadd.f32 %v9039_v52, %v8975_v12  ;;  %v8549_v61 = vadd.f32 %v8548_v43, %v8380_v46 }
 0x808   : > { %v8876_v36 = vpop.f32.mrf.mxu2  ;;  %v8716_v45 = vadd.f32 %v17680_v4, %v8547_v20  ;;  %v9104_v4 = vadd.f32 %v9040_v8, %v8976_v34  ;;  %v8980_v20 = vld [vmem:[%s16797_s26 + $0x198] sm:$0xff]  ;;  %v8981_v8 = vld [vmem:[%s16797_s26 + $0x1a0] sm:$0xff] }
 0x809   : > { %v8877_v33 = vadd.f32 %v8876_v36, %v8708_v35 }
 0x80b   : > { %v9164_v16 = vsub.f32 %v8877_v33, %v9100_v59  ;;  %v8725_v59 = vpop.f32.mrf.mxu1  ;;  %v8389_v33 = vpop.f32.mrf.mxu3 }
 0x80c   : > { %v8390_v12 = vadd.f32 %v8389_v33, %v16525_v23 }
 0x80d   : > { %9228 = vst.msk [vmem:[%s16823_s16 + $0x158] sm:$0xff] %vm4713_vm5, %v9164_v16  ;;  %11775 = vmatmul.msk.bf16.gmra.mxu2 %vm2383_vm0, %v11472_v38  ;;  %v8718_v38 = vadd.f32 %v17691_v41, %v8549_v61  ;;  %v8558_v18 = vpop.f32.mrf.mxu0  ;;  %v9045_v61 = vld [vmem:[%s16803_s13 + $0x1a0] sm:$0xff] }
 0x810   : > { %v8879_v15 = vpop.f32.mrf.mxu2 }
 0x811   : > { %v8880_v63 = vadd.f32 %v8879_v15, %v8711_v29  ;;  %v8977_v29 = vld [vmem:[%s16797_s26 + $0x180] sm:$0xff]  ;;  %v8552_v15 = vadd.f32 %v8551_v26, %v8383_v21 }
 0x813   : > { %v9165_v55 = vsub.f32 %v8880_v63, %v9101_v3  ;;  %v8727_v51 = vpop.f32.mrf.mxu1  ;;  %v9041_v3 = vld [vmem:[%s16803_s13 + $0x180] sm:$0xff]  ;;  %v8721_v43 = vadd.f32 %v8720_v54, %v8552_v15  ;;  %v8392_v22 = vpop.f32.mrf.mxu3  ;;  %v8385_v63 = vadd.f32 %v8384_v17, %v16480_v44 }
 0x814   : > { %v9105_v40 = vadd.f32 %v9041_v3, %v8977_v29  ;;  %v8982_v29 = vld [vmem:[%s16797_s26 + $0x1a8] sm:$0xff] }
 0x815   : > { %9229 = vst.msk [vmem:[%s16823_s16 + $0x160] sm:$0xff] %vm4713_vm5, %v9165_v55  ;;  %v8561_v55 = vpop.f32.mrf.mxu0  ;;  %v8554_v47 = vadd.f32 %v8553_v53, %v8385_v63  ;;  %v9046_v3 = vld [vmem:[%s16803_s13 + $0x1a8] sm:$0xff] }
 0x817   : > { %v8723_v30 = vadd.f32 %v8722_v6, %v8554_v47 }
 0x818   : > { %v8881_v32 = vpop.f32.mrf.mxu2 }
 0x819   : > { %v8882_v2 = vadd.f32 %v8881_v32, %v8713_v10  ;;  %v8388_v10 = vadd.f32 %v8387_v56, %v16490_v25  ;;  %v8979_v32 = vld [vmem:[%s16797_s26 + $0x190] sm:$0xff] }
 0x81b   : > { %v9166_v27 = vsub.f32 %v8882_v2, %v9102_v31  ;;  %v8730_v26 = vpop.f32.mrf.mxu1  ;;  %v8394_v44 = vpop.f32.mrf.mxu3  ;;  %v8557_v11 = vadd.f32 %v8556_v24, %v8388_v10 }
 0x81d   : > { %9230 = vst.msk [vmem:[%s16823_s16 + $0x168] sm:$0xff] %vm4713_vm5, %v9166_v27  ;;  %11776 = vmatmul.msk.bf16.gmra.mxu2 %vm2383_vm0, %v11504_v42  ;;  %v8563_v53 = vpop.f32.mrf.mxu0  ;;  %v8726_v2 = vadd.f32 %v8725_v59, %v8557_v11  ;;  %v9107_v42 = vadd.f32 %v9043_v14, %v8979_v32  ;;  %v8393_v59 = vadd.f32 %v8392_v22, %v16535_v39 }
 0x81f   : > { %v8562_v33 = vadd.f32 %v8561_v55, %v8393_v59  ;;  %v8983_v55 = vld [vmem:[%s16797_s26 + $0x1b0] sm:$0xff]  ;;  %v8986_v59 = vld [vmem:[%s16797_s26 + $0x1c8] sm:$0xff] }
 0x820   : > { %v8884_v13 = vpop.f32.mrf.mxu2 }
 0x821   : > { %v8885_v35 = vadd.f32 %v8884_v13, %v8716_v45  ;;  %v9044_v45 = vld [vmem:[%s16803_s13 + $0x198] sm:$0xff] }
 0x822   : > { %v9108_v13 = vadd.f32 %v9044_v45, %v8980_v20 }
 0x823   : > { %v9167_v36 = vsub.f32 %v8885_v35, %v9103_v48  ;;  %v8732_v27 = vpop.f32.mrf.mxu1  ;;  %v8397_v52 = vpop.f32.mrf.mxu3  ;;  %v8559_v48 = vadd.f32 %v8558_v18, %v8390_v12 }
 0x824   : > { %v8398_v63 = vadd.f32 %v8397_v52, %v16580_v19 }
 0x825   : > { %9231 = vst.msk [vmem:[%s16823_s16 + $0x170] sm:$0xff] %vm4713_vm5, %v9167_v36  ;;  %v8728_v24 = vadd.f32 %v8727_v51, %v8559_v48  ;;  %v8566_v46 = vpop.f32.mrf.mxu0 }
 0x826   : > { %v8567_v50 = vadd.f32 %v8566_v46, %v8398_v63 }
 0x828   : > { %v8886_v16 = vpop.f32.mrf.mxu2 }
 0x829   : > { %v8887_v60 = vadd.f32 %v8886_v16, %v8718_v38  ;;  %v9109_v16 = vadd.f32 %v9045_v61, %v8981_v8 }
 0x82b   : > { %v9168_v62 = vsub.f32 %v8887_v60, %v9104_v4  ;;  %v8735_v23 = vpop.f32.mrf.mxu1  ;;  %v8399_v38 = vpop.f32.mrf.mxu3  ;;  %v8731_v4 = vadd.f32 %v8730_v26, %v8562_v33  ;;  %v8395_v60 = vadd.f32 %v8394_v44, %v16570_v0  ;;  %v8984_v44 = vld [vmem:[%s16797_s26 + $0x1b8] sm:$0xff] }
 0x82c   : > { %v8736_v26 = vadd.f32 %v8735_v23, %v8567_v50 }
 0x82d   : > { %9232 = vst.msk [vmem:[%s16823_s16 + $0x178] sm:$0xff] %vm4713_vm5, %v9168_v62  ;;  %v8568_v39 = vpop.f32.mrf.mxu0  ;;  %v8564_v15 = vadd.f32 %v8563_v53, %v8395_v60  ;;  %v8987_v60 = vld [vmem:[%s16797_s26 + $0x1d0] sm:$0xff] }
 0x830   : > { %v8889_v41 = vpop.f32.mrf.mxu2 }
 0x831   : > { %v8890_v37 = vadd.f32 %v8889_v41, %v8721_v43  ;;  %v8733_v43 = vadd.f32 %v8732_v27, %v8564_v15 }
 0x833   : > { %v9169_v57 = vsub.f32 %v8890_v37, %v9105_v40  ;;  %v8737_v51 = vpop.f32.mrf.mxu1  ;;  %v9110_v40 = vadd.f32 %v9046_v3, %v8982_v29  ;;  %v8402_v22 = vpop.f32.mrf.mxu3 }
 0x834   : > { %v8403_v27 = vadd.f32 %v8402_v22, %v16625_v49  ;;  %v8988_v22 = vld [vmem:[%s16797_s26 + $0x1d8] sm:$0xff] }
 0x835   : > { %9233 = vst.msk [vmem:[%s16823_s16 + $0x180] sm:$0xff] %vm4713_vm5, %v9169_v57  ;;  %v8571_v57 = vpop.f32.mrf.mxu0 }
 0x836   : > { %v8572_v52 = vadd.f32 %v8571_v57, %v8403_v27  ;;  %v9054_v27 = vld [vmem:[%s16803_s13 + $0x1e8] sm:$0xff] }
 0x838   : > { %v8891_v54 = vpop.f32.mrf.mxu2 }
 0x839   : > { %v8892_v31 = vadd.f32 %v8891_v54, %v8723_v30  ;;  %v9111_v30 = vadd.f32 %v9047_v58, %v8983_v55  ;;  %v8400_v54 = vadd.f32 %v8399_v38, %v16615_v9  ;;  %v17937_v58 = vld [vmem:[#allocation3_spill] sm:$0xff] }
 0x83b   : > { %v9170_v17 = vsub.f32 %v8892_v31, %v9106_v1  ;;  %v8740_v47 = vpop.f32.mrf.mxu1  ;;  %v8404_v19 = vpop.f32.mrf.mxu3  ;;  %v8569_v32 = vadd.f32 %v8568_v39, %v8400_v54 }
 0x83c   : > { %v8741_v20 = vadd.f32 %v8740_v47, %v8572_v52  ;;  %v17939_v52 = vld [vmem:[#allocation5_spill] sm:$0xff] }
 0x83d   : > { %9234 = vst.msk [vmem:[%s16823_s16 + $0x188] sm:$0xff] %vm4713_vm5, %v9170_v17  ;;  %v9048_v17 = vld [vmem:[%s16803_s13 + $0x1b8] sm:$0xff]  ;;  %v8573_v14 = vpop.f32.mrf.mxu0  ;;  %v8738_v11 = vadd.f32 %v8737_v51, %v8569_v32  ;;  %v17938_v32 = vld [vmem:[#allocation4_spill] sm:$0xff] }
 0x83e   : > { %v9112_v53 = vadd.f32 %v9048_v17, %v8984_v44 }
 0x840   : > { %v8894_v6 = vpop.f32.mrf.mxu2 }
 0x841   : > { %v8895_v25 = vadd.f32 %v8894_v6, %v8726_v2 }
 0x843   : > { %v9171_v56 = vsub.f32 %v8895_v25, %v9107_v42  ;;  %v8742_v2 = vpop.f32.mrf.mxu1  ;;  %v8407_v12 = vpop.f32.mrf.mxu3  ;;  %v8985_v25 = vld [vmem:[%s16797_s26 + $0x1c0] sm:$0xff] }
 0x844   : > { %v8408_v38 = vadd.f32 %v8407_v12, %v16670_v7 }
 0x845   : > { %9235 = vst.msk [vmem:[%s16823_s16 + $0x190] sm:$0xff] %vm4713_vm5, %v9171_v56  ;;  %v9049_v56 = vld [vmem:[%s16803_s13 + $0x1c0] sm:$0xff]  ;;  %v8576_v48 = vpop.f32.mrf.mxu0 }
 0x846   : > { %v9113_v45 = vadd.f32 %v9049_v56, %v8985_v25  ;;  %v8577_v39 = vadd.f32 %v8576_v48, %v8408_v38 }
 0x848   : > { %v8896_v35 = vpop.f32.mrf.mxu2 }
 0x849   : > { %v8897_v36 = vadd.f32 %v8896_v35, %v8728_v24 }
 0x84b   : > { %v9172_v34 = vsub.f32 %v8897_v36, %v9108_v13  ;;  %v8405_v13 = vadd.f32 %v8404_v19, %v16660_v5  ;;  %v8745_v49 = vpop.f32.mrf.mxu1  ;;  %v9050_v36 = vld [vmem:[%s16803_s13 + $0x1c8] sm:$0xff] }
 0x84c   : > { %v9114_v61 = vadd.f32 %v9050_v36, %v8986_v59 }
 0x84d   : > { %9236 = vst.msk [vmem:[%s16823_s16 + $0x198] sm:$0xff] %vm4713_vm5, %v9172_v34  ;;  %v8574_v23 = vadd.f32 %v8573_v14, %v8405_v13  ;;  %v8409_v34 = vpop.f32.mrf.mxu3  ;;  %v8578_v5 = vpop.f32.mrf.mxu0  ;;  %v8991_v13 = vld [vmem:[%s16797_s26 + $0x1f0] sm:$0xff] }
 0x84e   : > { %v8410_v15 = vadd.f32 %v8409_v34, %v16705_v28  ;;  %v17940_v34 = vld [vmem:[#allocation6_spill] sm:$0xff] }
 0x84f   : > { %v8743_v8 = vadd.f32 %v8742_v2, %v8574_v23 }
 0x850   : > { %v8899_v21 = vpop.f32.mrf.mxu2  ;;  %v8579_v63 = vadd.f32 %v8578_v5, %v8410_v15  ;;  %v8992_v5 = vld [vmem:[%s16797_s26 + $0x1f8] sm:$0xff] }
 0x851   : > { %v8900_v18 = vadd.f32 %v8899_v21, %v8731_v4 }
 0x853   : > { %v9173_v62 = vsub.f32 %v8900_v18, %v9109_v16  ;;  %v8747_v21 = vpop.f32.mrf.mxu1  ;;  %v9051_v18 = vld [vmem:[%s16803_s13 + $0x1d0] sm:$0xff] }
 0x854   : > { %v9115_v51 = vadd.f32 %v9051_v18, %v8987_v60 }
 0x855   : > { %9237 = vst.msk [vmem:[%s16823_s16 + $0x1a0] sm:$0xff] %vm4713_vm5, %v9173_v62  ;;  %v8746_v62 = vadd.f32 %v8745_v49, %v8577_v39  ;;  %v8412_v29 = vpop.f32.mrf.mxu3 }
 0x856   : > { %v8413_v50 = vadd.f32 %v8412_v29, %v17937_v58 }
 0x858   : > { %v8901_v41 = vpop.f32.mrf.mxu2 }
 0x859   : > { %v8902_v0 = vadd.f32 %v8901_v41, %v8733_v43  ;;  %v9052_v41 = vld [vmem:[%s16803_s13 + $0x1d8] sm:$0xff] }
 0x85a   : > { %v9116_v57 = vadd.f32 %v9052_v41, %v8988_v22 }
 0x85b   : > { %v9174_v37 = vsub.f32 %v8902_v0, %v9110_v40  ;;  %v8581_v40 = vpop.f32.mrf.mxu0  ;;  %v8750_v0 = vpop.f32.mrf.mxu1 }
 0x85c   : > { %v8582_v54 = vadd.f32 %v8581_v40, %v8413_v50 }
 0x85d   : > { %9238 = vst.msk [vmem:[%s16823_s16 + $0x1a8] sm:$0xff] %vm4713_vm5, %v9174_v37  ;;  %v8748_v37 = vadd.f32 %v8747_v21, %v8579_v63  ;;  %v8414_v28 = vpop.f32.mrf.mxu3 }
 0x85e   : > { %v8751_v19 = vadd.f32 %v8750_v0, %v8582_v54  ;;  %v8415_v14 = vadd.f32 %v8414_v28, %v17938_v32 }
 0x860   : > { %v8904_v1 = vpop.f32.mrf.mxu2 }
 0x861   : > { %v8905_v10 = vadd.f32 %v8904_v1, %v8736_v26  ;;  %v9053_v1 = vld [vmem:[%s16803_s13 + $0x1e0] sm:$0xff] }
 0x863   : > { %v9175_v31 = vsub.f32 %v8905_v10, %v9111_v30  ;;  %v8989_v30 = vld [vmem:[%s16797_s26 + $0x1e0] sm:$0xff]  ;;  %v8583_v10 = vpop.f32.mrf.mxu0  ;;  %v8752_v44 = vpop.f32.mrf.mxu1 }
 0x865   : > { %9239 = vst.msk [vmem:[%s16823_s16 + $0x1b0] sm:$0xff] %vm4713_vm5, %v9175_v31  ;;  %v9117_v31 = vadd.f32 %v9053_v1, %v8989_v30  ;;  %v8417_v2 = vpop.f32.mrf.mxu3 }
 0x868   : > { %v8906_v42 = vpop.f32.mrf.mxu2 }
 0x869   : > { %v8907_v9 = vadd.f32 %v8906_v42, %v8738_v11  ;;  %v8990_v42 = vld [vmem:[%s16797_s26 + $0x1e8] sm:$0xff] }
 0x86a   : > { %v9118_v12 = vadd.f32 %v9054_v27, %v8990_v42 }
 0x86b   : > { %v9176_v6 = vsub.f32 %v8907_v9, %v9112_v53  ;;  %v8584_v9 = vadd.f32 %v8583_v10, %v8415_v14  ;;  %v8586_v25 = vpop.f32.mrf.mxu0  ;;  %v8755_v48 = vpop.f32.mrf.mxu1 }
 0x86d   : > { %9240 = vst.msk [vmem:[%s16823_s16 + $0x1b8] sm:$0xff] %vm4713_vm5, %v9176_v6  ;;  %v8753_v6 = vadd.f32 %v8752_v44, %v8584_v9 }
 0x870   : > { %v8909_v24 = vpop.f32.mrf.mxu2 }
 0x871   : > { %v8910_v46 = vadd.f32 %v8909_v24, %v8741_v20  ;;  %v8418_v20 = vadd.f32 %v8417_v2, %v17939_v52 }
 0x873   : > { %v9177_v35 = vsub.f32 %v8910_v46, %v9113_v45  ;;  %v9055_v46 = vld [vmem:[%s16803_s13 + $0x1f0] sm:$0xff]  ;;  %v8587_v49 = vadd.f32 %v8586_v25, %v8418_v20 }
 0x874   : > { %v9119_v36 = vadd.f32 %v9055_v46, %v8991_v13 }
 0x875   : > { %9241 = vst.msk [vmem:[%s16823_s16 + $0x1c0] sm:$0xff] %vm4713_vm5, %v9177_v35  ;;  %v8419_v35 = vpop.f32.mrf.mxu3  ;;  %v8756_v59 = vadd.f32 %v8755_v48, %v8587_v49 }
 0x878   : > { %v8911_v33 = vpop.f32.mrf.mxu2 }
 0x879   : > { %v8912_v4 = vadd.f32 %v8911_v33, %v8743_v8  ;;  %v8420_v8 = vadd.f32 %v8419_v35, %v17940_v34  ;;  %v8588_v33 = vpop.f32.mrf.mxu0 }
 0x87b   : > { %v9178_v16 = vsub.f32 %v8912_v4, %v9114_v61  ;;  %v8757_v4 = vpop.f32.mrf.mxu1  ;;  %v8589_v21 = vadd.f32 %v8588_v33, %v8420_v8 }
 0x87d   : > { %9242 = vst.msk [vmem:[%s16823_s16 + $0x1c8] sm:$0xff] %vm4713_vm5, %v9178_v16  ;;  %v9056_v16 = vld [vmem:[%s16803_s13 + $0x1f8] sm:$0xff]  ;;  %v8758_v60 = vadd.f32 %v8757_v4, %v8589_v21 }
 0x87e   : > { %v9120_v18 = vadd.f32 %v9056_v16, %v8992_v5 }
 0x880   : > { %v8914_v3 = vpop.f32.mrf.mxu2 }
 0x881   : > { %v8915_v7 = vadd.f32 %v8914_v3, %v8746_v62 }
 0x883   : > { %v9179_v43 = vsub.f32 %v8915_v7, %v9115_v51 }
 0x885   : > { %9243 = vst.msk [vmem:[%s16823_s16 + $0x1d0] sm:$0xff] %vm4713_vm5, %v9179_v43 }
 0x888   : > { %v8916_v55 = vpop.f32.mrf.mxu2 }
 0x889   : > { %v8917_v47 = vadd.f32 %v8916_v55, %v8748_v37 }
 0x88b   : > { %v9180_v26 = vsub.f32 %v8917_v47, %v9116_v57 }
 0x88d   : > { %9244 = vst.msk [vmem:[%s16823_s16 + $0x1d8] sm:$0xff] %vm4713_vm5, %v9180_v26 }
 0x890   : > { %v8919_v17 = vpop.f32.mrf.mxu2 }
 0x891   : > { %v8920_v11 = vadd.f32 %v8919_v17, %v8751_v19 }
 0x893   : > { %v9181_v53 = vsub.f32 %v8920_v11, %v9117_v31 }
 0x895   : > { %9245 = vst.msk [vmem:[%s16823_s16 + $0x1e0] sm:$0xff] %vm4713_vm5, %v9181_v53 }
 0x898   : > { %v8921_v56 = vpop.f32.mrf.mxu2 }
 0x899   : > { %v8922_v45 = vadd.f32 %v8921_v56, %v8753_v6 }
 0x89b   : > { %v9182_v24 = vsub.f32 %v8922_v45, %v9118_v12 }
 0x89d   : > { %9246 = vst.msk [vmem:[%s16823_s16 + $0x1e8] sm:$0xff] %vm4713_vm5, %v9182_v24 }
 0x8a0   : > { %v8924_v23 = vpop.f32.mrf.mxu2 }
 0x8a1   : > { %v8925_v61 = vadd.f32 %v8924_v23, %v8756_v59 }
 0x8a3   : > { %v9183_v38 = vsub.f32 %v8925_v61, %v9119_v36 }
 0x8a5   : > { %9247 = vst.msk [vmem:[%s16823_s16 + $0x1f0] sm:$0xff] %vm4713_vm5, %v9183_v38 }
 0x8a8   : > { %v8926_v39 = vpop.f32.mrf.mxu2 }
 0x8a9   : > { %v8927_v62 = vadd.f32 %v8926_v39, %v8758_v60 }
 0x8ab   : > { %v9184_v51 = vsub.f32 %v8927_v62, %v9120_v18 }
 0x8ad   : > { %9248 = vst.msk [vmem:[%s16823_s16 + $0x1f8] sm:$0xff] %vm4713_vm5, %v9184_v51 }
 0x8ae PF: > { %s22_s21 = sadd.s32 1, %s12400_s21  }
 0x8af   : > { %p19_p4 = scmp.ge.s32.totalorder %s22_s21, 4  }
 0x8b1   :  { %21 = sbr.rel (!%p19_p4) target bundleno = 1 (0x1), region = 113 }

</bundles_post_ra>
